<compile_context>
chip_gen: v5e
topology: v5e:2x2
jax: 0.10.0
libtpu: 0.0.40
codegen_flags: <defaults>
</compile_context>

<pallas_src>
import functools

import jax
import jax.numpy as jnp
from jax.experimental import pallas as pl
from jax.experimental.pallas import tpu as pltpu


def _silu(x):
    # x * sigmoid(x); sigmoid via tanh (single EUP op, no exp overflow).
    return x * (0.5 * (jnp.tanh(0.5 * x) + 1.0))


def _fused_decode_kernel(x_smem, w1_ref, b1_ref, w2_smem, b2_smem, w3_smem,
                         b3_smem, o_ref, pad_ref, *, E, S, KH, KW, C1, OC,
                         Ho, Wo):
    b = pl.program_id(0)

    # ---------------- Stage 1: Linear(E -> S*S) + SiLU -----------------
    # plane[r, c] = b1[r, c] + sum_e x[e] * W1[e, r, c]
    plane = b1_ref[...]                                  # (S, S) f32
    for e in range(E):
        plane = plane + x_smem[b, e] * w1_ref[e]
    plane = _silu(plane)

    # ------------- Stage 2: Conv2d(1 -> C1, valid) + SiLU ---------------
    H2 = S - KH + 1
    W2 = S - KW + 1
    acc2 = [jnp.zeros((H2, W2), jnp.float32) for _ in range(C1)]
    for j in range(KW):                                  # KW lane shifts total
        col = plane[:, j:j + W2]                         # (S, W2)
        for i in range(KH):                              # cheap sublane shifts
            tap = col[i:i + H2, :]                       # (H2, W2), reused over oc
            for oc in range(C1):
                acc2[oc] = acc2[oc] + w2_smem[oc * KH * KW + i * KW + j] * tap
    act2 = [_silu(acc2[oc] + b2_smem[oc]) for oc in range(C1)]

    # ------- Zero-padded activations in VMEM (no HBM pad / round trip) -------
    pad_ref[...] = jnp.zeros_like(pad_ref)
    for ic in range(C1):
        pad_ref[ic, KH - 1:KH - 1 + H2, KW - 1:KW - 1 + W2] = act2[ic]

    # --------- Stage 3: ConvTranspose2d(C1 -> OC, 3x3, stride 1) -----------
    # == valid correlation of padded input with spatially flipped kernel.
    acc3 = [jnp.zeros((Ho, Wo), jnp.float32) + b3_smem[oc] for oc in range(OC)]
    for ic in range(C1):
        x_ic = pad_ref[ic]                               # (Hp, Wp)
        for j in range(KW):                              # KW lane shifts / channel
            col = x_ic[:, j:j + Wo]
            for i in range(KH):
                tap = col[i:i + Ho, :]                   # reused over all oc
                for oc in range(OC):
                    widx = ((ic * OC + oc) * KH + (KH - 1 - i)) * KW + (KW - 1 - j)
                    acc3[oc] = acc3[oc] + w3_smem[widx] * tap

    # -------- Lane-dense output slab: (1, Ho, OC*Wo); NCHW restored outside.
    for oc in range(OC):
        o_ref[0, :, oc * Wo:(oc + 1) * Wo] = acc3[oc]


def simple_conv_decode(params, embed_data, output_shape):
    wl, bl, w2, b2, w3, b3 = params
    B, E = embed_data.shape
    hidden = wl.shape[1]
    S = 32
    # Mirrors the hard-coded reshape in the PyTorch module; fail loudly otherwise.
    assert wl.shape[0] == E and hidden == S * S, "Linear must produce 1024 = 32*32"
    C1, in_c, KH, KW = w2.shape                     # Conv2d weight (OC, IC=1, KH, KW)
    assert in_c == 1, "Conv2d stage expects a single input channel"
    ic3, OC, kh3, kw3 = w3.shape                    # ConvTranspose2d weight (IC, OC, KH, KW)
    assert ic3 == C1 and kh3 == KH and kw3 == KW
    H2, W2 = S - KH + 1, S - KW + 1
    Ho, Wo = output_shape
    assert Ho == H2 + KH - 1 and Wo == W2 + KW - 1, \
        "output_size must match stride-1 transpose conv"
    Hp, Wp = H2 + 2 * (KH - 1), W2 + 2 * (KW - 1)

    # Host-side layout plumbing only (no extra device passes of note).
    w1_planes = wl.reshape(E, S, S).astype(jnp.float32)       # (E, 32, 32)
    b1_plane = bl.reshape(S, S).astype(jnp.float32)           # (32, 32)

    kern = functools.partial(_fused_decode_kernel, E=E, S=S, KH=KH, KW=KW,
                             C1=C1, OC=OC, Ho=Ho, Wo=Wo)

    flops = B * (2 * E * S * S
                 + 2 * C1 * KH * KW * H2 * W2
                 + 2 * C1 * OC * KH * KW * Ho * Wo)
    transcendentals = B * (S * S + C1 * H2 * W2)
    bytes_accessed = 4 * (embed_data.size + w1_planes.size + b1_plane.size
                          + w2.size + b2.size + w3.size + b3.size
                          + B * OC * Ho * Wo)

    out_slab = pl.pallas_call(
        kern,
        out_shape=jax.ShapeDtypeStruct((B, Ho, OC * Wo), jnp.float32),
        grid=(B,),
        in_specs=[
            pl.BlockSpec(memory_space=pltpu.MemorySpace.SMEM),      # embed (B, E)
            pl.BlockSpec((E, S, S), lambda bb: (0, 0, 0)),          # Linear W planes
            pl.BlockSpec((S, S), lambda bb: (0, 0)),                # Linear bias plane
            pl.BlockSpec(memory_space=pltpu.MemorySpace.SMEM),      # conv W (flat)
            pl.BlockSpec(memory_space=pltpu.MemorySpace.SMEM),      # conv bias
            pl.BlockSpec(memory_space=pltpu.MemorySpace.SMEM),      # convT W (flat)
            pl.BlockSpec(memory_space=pltpu.MemorySpace.SMEM),      # convT bias
        ],
        out_specs=pl.BlockSpec((1, Ho, OC * Wo), lambda bb: (bb, 0, 0)),
        scratch_shapes=[pltpu.VMEM((C1, Hp, Wp), jnp.float32)],     # padded acts
        compiler_params=pltpu.CompilerParams(dimension_semantics=("parallel",)),
        cost_estimate=pl.CostEstimate(flops=flops,
                                      transcendentals=transcendentals,
                                      bytes_accessed=bytes_accessed),
    )(embed_data.astype(jnp.float32),
      w1_planes, b1_plane,
      w2.reshape(-1).astype(jnp.float32), b2.astype(jnp.float32),
      w3.reshape(-1).astype(jnp.float32), b3.astype(jnp.float32))

    # (B, Ho, OC*Wo) slab -> NCHW (B, OC, Ho, Wo)
    return out_slab.reshape(B, Ho, OC, Wo).transpose(0, 2, 1, 3)


if __name__ == "__main__":
    key = jax.random.PRNGKey(0)
    B, E, OC = 2, 32, 4
    ks = jax.random.split(key, 7)

    embed_data = jax.random.normal(ks[0], (B, E), jnp.float32)
    # Linear(embed_dim, 1024): torch weight is (1024, E); store its transpose (E, 1024).
    wl = jax.random.normal(ks[1], (E, 1024), jnp.float32) * 0.05
    bl = jax.random.normal(ks[2], (1024,), jnp.float32) * 0.05
    # Conv2d(1, 3, 3x3): weight (OC=3, IC=1, 3, 3)
    w2 = jax.random.normal(ks[3], (3, 1, 3, 3), jnp.float32) * 0.2
    b2 = jax.random.normal(ks[4], (3,), jnp.float32) * 0.2
    # ConvTranspose2d(3, OC, 3x3): weight (IC=3, OC, 3, 3)
    w3 = jax.random.normal(ks[5], (3, OC, 3, 3), jnp.float32) * 0.2
    b3 = jax.random.normal(ks[6], (OC,), jnp.float32) * 0.2

    out = simple_conv_decode((wl, bl, w2, b2, w3, b3), embed_data, (32, 32))
    out = jax.block_until_ready(out)

    # Pure-JAX reference for correctness.
    y1 = embed_data @ wl + bl
    y1 = y1 * jax.nn.sigmoid(y1)
    y1 = y1.reshape(B, 1, 32, 32)
    y2 = jax.lax.conv_general_dilated(y1, w2, (1, 1), "VALID",
                                      dimension_numbers=("NCHW", "OIHW", "NCHW"))
    y2 = y2 + b2[None, :, None, None]
    y2 = y2 * jax.nn.sigmoid(y2)
    y2p = jnp.pad(y2, ((0, 0), (0, 0), (2, 2), (2, 2)))
    w3f = jnp.flip(w3, axis=(2, 3)).transpose(1, 0, 2, 3)  # (OC, IC, 3, 3)
    ref = jax.lax.conv_general_dilated(y2p, w3f, (1, 1), "VALID",
                                       dimension_numbers=("NCHW", "OIHW", "NCHW"))
    ref = ref + b3[None, :, None, None]

    assert out.shape == (B, OC, 32, 32), out.shape
    assert jnp.allclose(out, ref, rtol=1e-4, atol=1e-4)
    print("KERNEL_OK")
</pallas_src>

<mosaic_0001>
module attributes {stable_mosaic.version = 11 : i64} {
  func.func @_fused_decode_kernel(%arg0: i32, %arg1: memref<2x32xf32, #tpu.memory_space<smem>>, %arg2: memref<32x32x32xf32, #tpu.memory_space<vmem>>, %arg3: memref<32x32xf32, #tpu.memory_space<vmem>>, %arg4: memref<27xf32, #tpu.memory_space<smem>>, %arg5: memref<3xf32, #tpu.memory_space<smem>>, %arg6: memref<108xf32, #tpu.memory_space<smem>>, %arg7: memref<4xf32, #tpu.memory_space<smem>>, %arg8: memref<1x32x128xf32, #tpu.memory_space<vmem>>, %arg9: memref<3x34x34xf32, #tpu.memory_space<vmem>>) attributes {dimension_semantics = [#tpu.dimension_semantics<parallel>], iteration_bounds = array<i64: 2>, scalar_prefetch = 0 : i64, scratch_operands = 1 : i64, tpu.core_type = #tpu.core_type<tc>, window_params = [{transform_indices = @transform_0, window_bounds = array<i64: 2, 32>}, {pipeline_mode = #tpu.pipeline_mode<synchronous>, transform_indices = @transform_1, window_bounds = array<i64: 32, 32, 32>}, {pipeline_mode = #tpu.pipeline_mode<synchronous>, transform_indices = @transform_2, window_bounds = array<i64: 32, 32>}, {transform_indices = @transform_3, window_bounds = array<i64: 27>}, {transform_indices = @transform_4, window_bounds = array<i64: 3>}, {transform_indices = @transform_5, window_bounds = array<i64: 108>}, {transform_indices = @transform_6, window_bounds = array<i64: 4>}, {transform_indices = @transform_7, window_bounds = array<i64: 1, 32, 128>}]} {
    %c0 = arith.constant 0 : index
    %c0_0 = arith.constant 0 : index
    %0 = vector.load %arg3[%c0, %c0_0] : memref<32x32xf32, #tpu.memory_space<vmem>>, vector<32x32xf32>
    %1 = arith.index_cast %arg0 : i32 to index
    %c0_1 = arith.constant 0 : index
    %2 = memref.load %arg1[%1, %c0_1] : memref<2x32xf32, #tpu.memory_space<smem>>
    %c0_2 = arith.constant 0 : index
    %c0_3 = arith.constant 0 : index
    %c0_4 = arith.constant 0 : index
    %3 = vector.load %arg2[%c0_2, %c0_3, %c0_4] : memref<32x32x32xf32, #tpu.memory_space<vmem>>, vector<1x32x32xf32>
    %4 = vector.shape_cast %3 : vector<1x32x32xf32> to vector<32x32xf32>
    %5 = vector.broadcast %2 : f32 to vector<32x32xf32>
    %6 = arith.mulf %5, %4 : vector<32x32xf32>
    %7 = arith.addf %0, %6 : vector<32x32xf32>
    %8 = arith.index_cast %arg0 : i32 to index
    %c1 = arith.constant 1 : index
    %9 = memref.load %arg1[%8, %c1] : memref<2x32xf32, #tpu.memory_space<smem>>
    %c1_5 = arith.constant 1 : index
    %c0_6 = arith.constant 0 : index
    %c0_7 = arith.constant 0 : index
    %10 = vector.load %arg2[%c1_5, %c0_6, %c0_7] : memref<32x32x32xf32, #tpu.memory_space<vmem>>, vector<1x32x32xf32>
    %11 = vector.shape_cast %10 : vector<1x32x32xf32> to vector<32x32xf32>
    %12 = vector.broadcast %9 : f32 to vector<32x32xf32>
    %13 = arith.mulf %12, %11 : vector<32x32xf32>
    %14 = arith.addf %7, %13 : vector<32x32xf32>
    %15 = arith.index_cast %arg0 : i32 to index
    %c2 = arith.constant 2 : index
    %16 = memref.load %arg1[%15, %c2] : memref<2x32xf32, #tpu.memory_space<smem>>
    %c2_8 = arith.constant 2 : index
    %c0_9 = arith.constant 0 : index
    %c0_10 = arith.constant 0 : index
    %17 = vector.load %arg2[%c2_8, %c0_9, %c0_10] : memref<32x32x32xf32, #tpu.memory_space<vmem>>, vector<1x32x32xf32>
    %18 = vector.shape_cast %17 : vector<1x32x32xf32> to vector<32x32xf32>
    %19 = vector.broadcast %16 : f32 to vector<32x32xf32>
    %20 = arith.mulf %19, %18 : vector<32x32xf32>
    %21 = arith.addf %14, %20 : vector<32x32xf32>
    %22 = arith.index_cast %arg0 : i32 to index
    %c3 = arith.constant 3 : index
    %23 = memref.load %arg1[%22, %c3] : memref<2x32xf32, #tpu.memory_space<smem>>
    %c3_11 = arith.constant 3 : index
    %c0_12 = arith.constant 0 : index
    %c0_13 = arith.constant 0 : index
    %24 = vector.load %arg2[%c3_11, %c0_12, %c0_13] : memref<32x32x32xf32, #tpu.memory_space<vmem>>, vector<1x32x32xf32>
    %25 = vector.shape_cast %24 : vector<1x32x32xf32> to vector<32x32xf32>
    %26 = vector.broadcast %23 : f32 to vector<32x32xf32>
    %27 = arith.mulf %26, %25 : vector<32x32xf32>
    %28 = arith.addf %21, %27 : vector<32x32xf32>
    %29 = arith.index_cast %arg0 : i32 to index
    %c4 = arith.constant 4 : index
    %30 = memref.load %arg1[%29, %c4] : memref<2x32xf32, #tpu.memory_space<smem>>
    %c4_14 = arith.constant 4 : index
    %c0_15 = arith.constant 0 : index
    %c0_16 = arith.constant 0 : index
    %31 = vector.load %arg2[%c4_14, %c0_15, %c0_16] : memref<32x32x32xf32, #tpu.memory_space<vmem>>, vector<1x32x32xf32>
    %32 = vector.shape_cast %31 : vector<1x32x32xf32> to vector<32x32xf32>
    %33 = vector.broadcast %30 : f32 to vector<32x32xf32>
    %34 = arith.mulf %33, %32 : vector<32x32xf32>
    %35 = arith.addf %28, %34 : vector<32x32xf32>
    %36 = arith.index_cast %arg0 : i32 to index
    %c5 = arith.constant 5 : index
    %37 = memref.load %arg1[%36, %c5] : memref<2x32xf32, #tpu.memory_space<smem>>
    %c5_17 = arith.constant 5 : index
    %c0_18 = arith.constant 0 : index
    %c0_19 = arith.constant 0 : index
    %38 = vector.load %arg2[%c5_17, %c0_18, %c0_19] : memref<32x32x32xf32, #tpu.memory_space<vmem>>, vector<1x32x32xf32>
    %39 = vector.shape_cast %38 : vector<1x32x32xf32> to vector<32x32xf32>
    %40 = vector.broadcast %37 : f32 to vector<32x32xf32>
    %41 = arith.mulf %40, %39 : vector<32x32xf32>
    %42 = arith.addf %35, %41 : vector<32x32xf32>
    %43 = arith.index_cast %arg0 : i32 to index
    %c6 = arith.constant 6 : index
    %44 = memref.load %arg1[%43, %c6] : memref<2x32xf32, #tpu.memory_space<smem>>
    %c6_20 = arith.constant 6 : index
    %c0_21 = arith.constant 0 : index
    %c0_22 = arith.constant 0 : index
    %45 = vector.load %arg2[%c6_20, %c0_21, %c0_22] : memref<32x32x32xf32, #tpu.memory_space<vmem>>, vector<1x32x32xf32>
    %46 = vector.shape_cast %45 : vector<1x32x32xf32> to vector<32x32xf32>
    %47 = vector.broadcast %44 : f32 to vector<32x32xf32>
    %48 = arith.mulf %47, %46 : vector<32x32xf32>
    %49 = arith.addf %42, %48 : vector<32x32xf32>
    %50 = arith.index_cast %arg0 : i32 to index
    %c7 = arith.constant 7 : index
    %51 = memref.load %arg1[%50, %c7] : memref<2x32xf32, #tpu.memory_space<smem>>
    %c7_23 = arith.constant 7 : index
    %c0_24 = arith.constant 0 : index
    %c0_25 = arith.constant 0 : index
    %52 = vector.load %arg2[%c7_23, %c0_24, %c0_25] : memref<32x32x32xf32, #tpu.memory_space<vmem>>, vector<1x32x32xf32>
    %53 = vector.shape_cast %52 : vector<1x32x32xf32> to vector<32x32xf32>
    %54 = vector.broadcast %51 : f32 to vector<32x32xf32>
    %55 = arith.mulf %54, %53 : vector<32x32xf32>
    %56 = arith.addf %49, %55 : vector<32x32xf32>
    %57 = arith.index_cast %arg0 : i32 to index
    %c8 = arith.constant 8 : index
    %58 = memref.load %arg1[%57, %c8] : memref<2x32xf32, #tpu.memory_space<smem>>
    %c8_26 = arith.constant 8 : index
    %c0_27 = arith.constant 0 : index
    %c0_28 = arith.constant 0 : index
    %59 = vector.load %arg2[%c8_26, %c0_27, %c0_28] : memref<32x32x32xf32, #tpu.memory_space<vmem>>, vector<1x32x32xf32>
    %60 = vector.shape_cast %59 : vector<1x32x32xf32> to vector<32x32xf32>
    %61 = vector.broadcast %58 : f32 to vector<32x32xf32>
    %62 = arith.mulf %61, %60 : vector<32x32xf32>
    %63 = arith.addf %56, %62 : vector<32x32xf32>
    %64 = arith.index_cast %arg0 : i32 to index
    %c9 = arith.constant 9 : index
    %65 = memref.load %arg1[%64, %c9] : memref<2x32xf32, #tpu.memory_space<smem>>
    %c9_29 = arith.constant 9 : index
    %c0_30 = arith.constant 0 : index
    %c0_31 = arith.constant 0 : index
    %66 = vector.load %arg2[%c9_29, %c0_30, %c0_31] : memref<32x32x32xf32, #tpu.memory_space<vmem>>, vector<1x32x32xf32>
    %67 = vector.shape_cast %66 : vector<1x32x32xf32> to vector<32x32xf32>
    %68 = vector.broadcast %65 : f32 to vector<32x32xf32>
    %69 = arith.mulf %68, %67 : vector<32x32xf32>
    %70 = arith.addf %63, %69 : vector<32x32xf32>
    %71 = arith.index_cast %arg0 : i32 to index
    %c10 = arith.constant 10 : index
    %72 = memref.load %arg1[%71, %c10] : memref<2x32xf32, #tpu.memory_space<smem>>
    %c10_32 = arith.constant 10 : index
    %c0_33 = arith.constant 0 : index
    %c0_34 = arith.constant 0 : index
    %73 = vector.load %arg2[%c10_32, %c0_33, %c0_34] : memref<32x32x32xf32, #tpu.memory_space<vmem>>, vector<1x32x32xf32>
    %74 = vector.shape_cast %73 : vector<1x32x32xf32> to vector<32x32xf32>
    %75 = vector.broadcast %72 : f32 to vector<32x32xf32>
    %76 = arith.mulf %75, %74 : vector<32x32xf32>
    %77 = arith.addf %70, %76 : vector<32x32xf32>
    %78 = arith.index_cast %arg0 : i32 to index
    %c11 = arith.constant 11 : index
    %79 = memref.load %arg1[%78, %c11] : memref<2x32xf32, #tpu.memory_space<smem>>
    %c11_35 = arith.constant 11 : index
    %c0_36 = arith.constant 0 : index
    %c0_37 = arith.constant 0 : index
    %80 = vector.load %arg2[%c11_35, %c0_36, %c0_37] : memref<32x32x32xf32, #tpu.memory_space<vmem>>, vector<1x32x32xf32>
    %81 = vector.shape_cast %80 : vector<1x32x32xf32> to vector<32x32xf32>
    %82 = vector.broadcast %79 : f32 to vector<32x32xf32>
    %83 = arith.mulf %82, %81 : vector<32x32xf32>
    %84 = arith.addf %77, %83 : vector<32x32xf32>
    %85 = arith.index_cast %arg0 : i32 to index
    %c12 = arith.constant 12 : index
    %86 = memref.load %arg1[%85, %c12] : memref<2x32xf32, #tpu.memory_space<smem>>
    %c12_38 = arith.constant 12 : index
    %c0_39 = arith.constant 0 : index
    %c0_40 = arith.constant 0 : index
    %87 = vector.load %arg2[%c12_38, %c0_39, %c0_40] : memref<32x32x32xf32, #tpu.memory_space<vmem>>, vector<1x32x32xf32>
    %88 = vector.shape_cast %87 : vector<1x32x32xf32> to vector<32x32xf32>
    %89 = vector.broadcast %86 : f32 to vector<32x32xf32>
    %90 = arith.mulf %89, %88 : vector<32x32xf32>
    %91 = arith.addf %84, %90 : vector<32x32xf32>
    %92 = arith.index_cast %arg0 : i32 to index
    %c13 = arith.constant 13 : index
    %93 = memref.load %arg1[%92, %c13] : memref<2x32xf32, #tpu.memory_space<smem>>
    %c13_41 = arith.constant 13 : index
    %c0_42 = arith.constant 0 : index
    %c0_43 = arith.constant 0 : index
    %94 = vector.load %arg2[%c13_41, %c0_42, %c0_43] : memref<32x32x32xf32, #tpu.memory_space<vmem>>, vector<1x32x32xf32>
    %95 = vector.shape_cast %94 : vector<1x32x32xf32> to vector<32x32xf32>
    %96 = vector.broadcast %93 : f32 to vector<32x32xf32>
    %97 = arith.mulf %96, %95 : vector<32x32xf32>
    %98 = arith.addf %91, %97 : vector<32x32xf32>
    %99 = arith.index_cast %arg0 : i32 to index
    %c14 = arith.constant 14 : index
    %100 = memref.load %arg1[%99, %c14] : memref<2x32xf32, #tpu.memory_space<smem>>
    %c14_44 = arith.constant 14 : index
    %c0_45 = arith.constant 0 : index
    %c0_46 = arith.constant 0 : index
    %101 = vector.load %arg2[%c14_44, %c0_45, %c0_46] : memref<32x32x32xf32, #tpu.memory_space<vmem>>, vector<1x32x32xf32>
    %102 = vector.shape_cast %101 : vector<1x32x32xf32> to vector<32x32xf32>
    %103 = vector.broadcast %100 : f32 to vector<32x32xf32>
    %104 = arith.mulf %103, %102 : vector<32x32xf32>
    %105 = arith.addf %98, %104 : vector<32x32xf32>
    %106 = arith.index_cast %arg0 : i32 to index
    %c15 = arith.constant 15 : index
    %107 = memref.load %arg1[%106, %c15] : memref<2x32xf32, #tpu.memory_space<smem>>
    %c15_47 = arith.constant 15 : index
    %c0_48 = arith.constant 0 : index
    %c0_49 = arith.constant 0 : index
    %108 = vector.load %arg2[%c15_47, %c0_48, %c0_49] : memref<32x32x32xf32, #tpu.memory_space<vmem>>, vector<1x32x32xf32>
    %109 = vector.shape_cast %108 : vector<1x32x32xf32> to vector<32x32xf32>
    %110 = vector.broadcast %107 : f32 to vector<32x32xf32>
    %111 = arith.mulf %110, %109 : vector<32x32xf32>
    %112 = arith.addf %105, %111 : vector<32x32xf32>
    %113 = arith.index_cast %arg0 : i32 to index
    %c16 = arith.constant 16 : index
    %114 = memref.load %arg1[%113, %c16] : memref<2x32xf32, #tpu.memory_space<smem>>
    %c16_50 = arith.constant 16 : index
    %c0_51 = arith.constant 0 : index
    %c0_52 = arith.constant 0 : index
    %115 = vector.load %arg2[%c16_50, %c0_51, %c0_52] : memref<32x32x32xf32, #tpu.memory_space<vmem>>, vector<1x32x32xf32>
    %116 = vector.shape_cast %115 : vector<1x32x32xf32> to vector<32x32xf32>
    %117 = vector.broadcast %114 : f32 to vector<32x32xf32>
    %118 = arith.mulf %117, %116 : vector<32x32xf32>
    %119 = arith.addf %112, %118 : vector<32x32xf32>
    %120 = arith.index_cast %arg0 : i32 to index
    %c17 = arith.constant 17 : index
    %121 = memref.load %arg1[%120, %c17] : memref<2x32xf32, #tpu.memory_space<smem>>
    %c17_53 = arith.constant 17 : index
    %c0_54 = arith.constant 0 : index
    %c0_55 = arith.constant 0 : index
    %122 = vector.load %arg2[%c17_53, %c0_54, %c0_55] : memref<32x32x32xf32, #tpu.memory_space<vmem>>, vector<1x32x32xf32>
    %123 = vector.shape_cast %122 : vector<1x32x32xf32> to vector<32x32xf32>
    %124 = vector.broadcast %121 : f32 to vector<32x32xf32>
    %125 = arith.mulf %124, %123 : vector<32x32xf32>
    %126 = arith.addf %119, %125 : vector<32x32xf32>
    %127 = arith.index_cast %arg0 : i32 to index
    %c18 = arith.constant 18 : index
    %128 = memref.load %arg1[%127, %c18] : memref<2x32xf32, #tpu.memory_space<smem>>
    %c18_56 = arith.constant 18 : index
    %c0_57 = arith.constant 0 : index
    %c0_58 = arith.constant 0 : index
    %129 = vector.load %arg2[%c18_56, %c0_57, %c0_58] : memref<32x32x32xf32, #tpu.memory_space<vmem>>, vector<1x32x32xf32>
    %130 = vector.shape_cast %129 : vector<1x32x32xf32> to vector<32x32xf32>
    %131 = vector.broadcast %128 : f32 to vector<32x32xf32>
    %132 = arith.mulf %131, %130 : vector<32x32xf32>
    %133 = arith.addf %126, %132 : vector<32x32xf32>
    %134 = arith.index_cast %arg0 : i32 to index
    %c19 = arith.constant 19 : index
    %135 = memref.load %arg1[%134, %c19] : memref<2x32xf32, #tpu.memory_space<smem>>
    %c19_59 = arith.constant 19 : index
    %c0_60 = arith.constant 0 : index
    %c0_61 = arith.constant 0 : index
    %136 = vector.load %arg2[%c19_59, %c0_60, %c0_61] : memref<32x32x32xf32, #tpu.memory_space<vmem>>, vector<1x32x32xf32>
    %137 = vector.shape_cast %136 : vector<1x32x32xf32> to vector<32x32xf32>
    %138 = vector.broadcast %135 : f32 to vector<32x32xf32>
    %139 = arith.mulf %138, %137 : vector<32x32xf32>
    %140 = arith.addf %133, %139 : vector<32x32xf32>
    %141 = arith.index_cast %arg0 : i32 to index
    %c20 = arith.constant 20 : index
    %142 = memref.load %arg1[%141, %c20] : memref<2x32xf32, #tpu.memory_space<smem>>
    %c20_62 = arith.constant 20 : index
    %c0_63 = arith.constant 0 : index
    %c0_64 = arith.constant 0 : index
    %143 = vector.load %arg2[%c20_62, %c0_63, %c0_64] : memref<32x32x32xf32, #tpu.memory_space<vmem>>, vector<1x32x32xf32>
    %144 = vector.shape_cast %143 : vector<1x32x32xf32> to vector<32x32xf32>
    %145 = vector.broadcast %142 : f32 to vector<32x32xf32>
    %146 = arith.mulf %145, %144 : vector<32x32xf32>
    %147 = arith.addf %140, %146 : vector<32x32xf32>
    %148 = arith.index_cast %arg0 : i32 to index
    %c21 = arith.constant 21 : index
    %149 = memref.load %arg1[%148, %c21] : memref<2x32xf32, #tpu.memory_space<smem>>
    %c21_65 = arith.constant 21 : index
    %c0_66 = arith.constant 0 : index
    %c0_67 = arith.constant 0 : index
    %150 = vector.load %arg2[%c21_65, %c0_66, %c0_67] : memref<32x32x32xf32, #tpu.memory_space<vmem>>, vector<1x32x32xf32>
    %151 = vector.shape_cast %150 : vector<1x32x32xf32> to vector<32x32xf32>
    %152 = vector.broadcast %149 : f32 to vector<32x32xf32>
    %153 = arith.mulf %152, %151 : vector<32x32xf32>
    %154 = arith.addf %147, %153 : vector<32x32xf32>
    %155 = arith.index_cast %arg0 : i32 to index
    %c22 = arith.constant 22 : index
    %156 = memref.load %arg1[%155, %c22] : memref<2x32xf32, #tpu.memory_space<smem>>
    %c22_68 = arith.constant 22 : index
    %c0_69 = arith.constant 0 : index
    %c0_70 = arith.constant 0 : index
    %157 = vector.load %arg2[%c22_68, %c0_69, %c0_70] : memref<32x32x32xf32, #tpu.memory_space<vmem>>, vector<1x32x32xf32>
    %158 = vector.shape_cast %157 : vector<1x32x32xf32> to vector<32x32xf32>
    %159 = vector.broadcast %156 : f32 to vector<32x32xf32>
    %160 = arith.mulf %159, %158 : vector<32x32xf32>
    %161 = arith.addf %154, %160 : vector<32x32xf32>
    %162 = arith.index_cast %arg0 : i32 to index
    %c23 = arith.constant 23 : index
    %163 = memref.load %arg1[%162, %c23] : memref<2x32xf32, #tpu.memory_space<smem>>
    %c23_71 = arith.constant 23 : index
    %c0_72 = arith.constant 0 : index
    %c0_73 = arith.constant 0 : index
    %164 = vector.load %arg2[%c23_71, %c0_72, %c0_73] : memref<32x32x32xf32, #tpu.memory_space<vmem>>, vector<1x32x32xf32>
    %165 = vector.shape_cast %164 : vector<1x32x32xf32> to vector<32x32xf32>
    %166 = vector.broadcast %163 : f32 to vector<32x32xf32>
    %167 = arith.mulf %166, %165 : vector<32x32xf32>
    %168 = arith.addf %161, %167 : vector<32x32xf32>
    %169 = arith.index_cast %arg0 : i32 to index
    %c24 = arith.constant 24 : index
    %170 = memref.load %arg1[%169, %c24] : memref<2x32xf32, #tpu.memory_space<smem>>
    %c24_74 = arith.constant 24 : index
    %c0_75 = arith.constant 0 : index
    %c0_76 = arith.constant 0 : index
    %171 = vector.load %arg2[%c24_74, %c0_75, %c0_76] : memref<32x32x32xf32, #tpu.memory_space<vmem>>, vector<1x32x32xf32>
    %172 = vector.shape_cast %171 : vector<1x32x32xf32> to vector<32x32xf32>
    %173 = vector.broadcast %170 : f32 to vector<32x32xf32>
    %174 = arith.mulf %173, %172 : vector<32x32xf32>
    %175 = arith.addf %168, %174 : vector<32x32xf32>
    %176 = arith.index_cast %arg0 : i32 to index
    %c25 = arith.constant 25 : index
    %177 = memref.load %arg1[%176, %c25] : memref<2x32xf32, #tpu.memory_space<smem>>
    %c25_77 = arith.constant 25 : index
    %c0_78 = arith.constant 0 : index
    %c0_79 = arith.constant 0 : index
    %178 = vector.load %arg2[%c25_77, %c0_78, %c0_79] : memref<32x32x32xf32, #tpu.memory_space<vmem>>, vector<1x32x32xf32>
    %179 = vector.shape_cast %178 : vector<1x32x32xf32> to vector<32x32xf32>
    %180 = vector.broadcast %177 : f32 to vector<32x32xf32>
    %181 = arith.mulf %180, %179 : vector<32x32xf32>
    %182 = arith.addf %175, %181 : vector<32x32xf32>
    %183 = arith.index_cast %arg0 : i32 to index
    %c26 = arith.constant 26 : index
    %184 = memref.load %arg1[%183, %c26] : memref<2x32xf32, #tpu.memory_space<smem>>
    %c26_80 = arith.constant 26 : index
    %c0_81 = arith.constant 0 : index
    %c0_82 = arith.constant 0 : index
    %185 = vector.load %arg2[%c26_80, %c0_81, %c0_82] : memref<32x32x32xf32, #tpu.memory_space<vmem>>, vector<1x32x32xf32>
    %186 = vector.shape_cast %185 : vector<1x32x32xf32> to vector<32x32xf32>
    %187 = vector.broadcast %184 : f32 to vector<32x32xf32>
    %188 = arith.mulf %187, %186 : vector<32x32xf32>
    %189 = arith.addf %182, %188 : vector<32x32xf32>
    %190 = arith.index_cast %arg0 : i32 to index
    %c27 = arith.constant 27 : index
    %191 = memref.load %arg1[%190, %c27] : memref<2x32xf32, #tpu.memory_space<smem>>
    %c27_83 = arith.constant 27 : index
    %c0_84 = arith.constant 0 : index
    %c0_85 = arith.constant 0 : index
    %192 = vector.load %arg2[%c27_83, %c0_84, %c0_85] : memref<32x32x32xf32, #tpu.memory_space<vmem>>, vector<1x32x32xf32>
    %193 = vector.shape_cast %192 : vector<1x32x32xf32> to vector<32x32xf32>
    %194 = vector.broadcast %191 : f32 to vector<32x32xf32>
    %195 = arith.mulf %194, %193 : vector<32x32xf32>
    %196 = arith.addf %189, %195 : vector<32x32xf32>
    %197 = arith.index_cast %arg0 : i32 to index
    %c28 = arith.constant 28 : index
    %198 = memref.load %arg1[%197, %c28] : memref<2x32xf32, #tpu.memory_space<smem>>
    %c28_86 = arith.constant 28 : index
    %c0_87 = arith.constant 0 : index
    %c0_88 = arith.constant 0 : index
    %199 = vector.load %arg2[%c28_86, %c0_87, %c0_88] : memref<32x32x32xf32, #tpu.memory_space<vmem>>, vector<1x32x32xf32>
    %200 = vector.shape_cast %199 : vector<1x32x32xf32> to vector<32x32xf32>
    %201 = vector.broadcast %198 : f32 to vector<32x32xf32>
    %202 = arith.mulf %201, %200 : vector<32x32xf32>
    %203 = arith.addf %196, %202 : vector<32x32xf32>
    %204 = arith.index_cast %arg0 : i32 to index
    %c29 = arith.constant 29 : index
    %205 = memref.load %arg1[%204, %c29] : memref<2x32xf32, #tpu.memory_space<smem>>
    %c29_89 = arith.constant 29 : index
    %c0_90 = arith.constant 0 : index
    %c0_91 = arith.constant 0 : index
    %206 = vector.load %arg2[%c29_89, %c0_90, %c0_91] : memref<32x32x32xf32, #tpu.memory_space<vmem>>, vector<1x32x32xf32>
    %207 = vector.shape_cast %206 : vector<1x32x32xf32> to vector<32x32xf32>
    %208 = vector.broadcast %205 : f32 to vector<32x32xf32>
    %209 = arith.mulf %208, %207 : vector<32x32xf32>
    %210 = arith.addf %203, %209 : vector<32x32xf32>
    %211 = arith.index_cast %arg0 : i32 to index
    %c30 = arith.constant 30 : index
    %212 = memref.load %arg1[%211, %c30] : memref<2x32xf32, #tpu.memory_space<smem>>
    %c30_92 = arith.constant 30 : index
    %c0_93 = arith.constant 0 : index
    %c0_94 = arith.constant 0 : index
    %213 = vector.load %arg2[%c30_92, %c0_93, %c0_94] : memref<32x32x32xf32, #tpu.memory_space<vmem>>, vector<1x32x32xf32>
    %214 = vector.shape_cast %213 : vector<1x32x32xf32> to vector<32x32xf32>
    %215 = vector.broadcast %212 : f32 to vector<32x32xf32>
    %216 = arith.mulf %215, %214 : vector<32x32xf32>
    %217 = arith.addf %210, %216 : vector<32x32xf32>
    %218 = arith.index_cast %arg0 : i32 to index
    %c31 = arith.constant 31 : index
    %219 = memref.load %arg1[%218, %c31] : memref<2x32xf32, #tpu.memory_space<smem>>
    %c31_95 = arith.constant 31 : index
    %c0_96 = arith.constant 0 : index
    %c0_97 = arith.constant 0 : index
    %220 = vector.load %arg2[%c31_95, %c0_96, %c0_97] : memref<32x32x32xf32, #tpu.memory_space<vmem>>, vector<1x32x32xf32>
    %221 = vector.shape_cast %220 : vector<1x32x32xf32> to vector<32x32xf32>
    %222 = vector.broadcast %219 : f32 to vector<32x32xf32>
    %223 = arith.mulf %222, %221 : vector<32x32xf32>
    %224 = arith.addf %217, %223 : vector<32x32xf32>
    %cst = arith.constant 5.000000e-01 : f32
    %225 = vector.broadcast %cst : f32 to vector<32x32xf32>
    %226 = arith.mulf %225, %224 : vector<32x32xf32>
    %227 = math.tanh %226 : vector<32x32xf32>
    %cst_98 = arith.constant 1.000000e+00 : f32
    %228 = vector.broadcast %cst_98 : f32 to vector<32x32xf32>
    %229 = arith.addf %227, %228 : vector<32x32xf32>
    %cst_99 = arith.constant 5.000000e-01 : f32
    %230 = vector.broadcast %cst_99 : f32 to vector<32x32xf32>
    %231 = arith.mulf %230, %229 : vector<32x32xf32>
    %232 = arith.mulf %224, %231 : vector<32x32xf32>
    %cst_100 = arith.constant 0.000000e+00 : f32
    %233 = vector.broadcast %cst_100 : f32 to vector<30x30xf32>
    %cst_101 = arith.constant 0.000000e+00 : f32
    %234 = vector.broadcast %cst_101 : f32 to vector<30x30xf32>
    %cst_102 = arith.constant 0.000000e+00 : f32
    %235 = vector.broadcast %cst_102 : f32 to vector<30x30xf32>
    %236 = vector.extract_strided_slice %232 {offsets = [0, 0], sizes = [32, 30], strides = [1, 1]} : vector<32x32xf32> to vector<32x30xf32>
    %237 = vector.extract_strided_slice %236 {offsets = [0, 0], sizes = [30, 30], strides = [1, 1]} : vector<32x30xf32> to vector<30x30xf32>
    %c0_103 = arith.constant 0 : index
    %238 = memref.load %arg4[%c0_103] : memref<27xf32, #tpu.memory_space<smem>>
    %239 = vector.broadcast %238 : f32 to vector<30x30xf32>
    %240 = arith.mulf %239, %237 : vector<30x30xf32>
    %241 = arith.addf %233, %240 : vector<30x30xf32>
    %c9_104 = arith.constant 9 : index
    %242 = memref.load %arg4[%c9_104] : memref<27xf32, #tpu.memory_space<smem>>
    %243 = vector.broadcast %242 : f32 to vector<30x30xf32>
    %244 = arith.mulf %243, %237 : vector<30x30xf32>
    %245 = arith.addf %234, %244 : vector<30x30xf32>
    %c18_105 = arith.constant 18 : index
    %246 = memref.load %arg4[%c18_105] : memref<27xf32, #tpu.memory_space<smem>>
    %247 = vector.broadcast %246 : f32 to vector<30x30xf32>
    %248 = arith.mulf %247, %237 : vector<30x30xf32>
    %249 = arith.addf %235, %248 : vector<30x30xf32>
    %250 = vector.extract_strided_slice %236 {offsets = [1, 0], sizes = [30, 30], strides = [1, 1]} : vector<32x30xf32> to vector<30x30xf32>
    %c3_106 = arith.constant 3 : index
    %251 = memref.load %arg4[%c3_106] : memref<27xf32, #tpu.memory_space<smem>>
    %252 = vector.broadcast %251 : f32 to vector<30x30xf32>
    %253 = arith.mulf %252, %250 : vector<30x30xf32>
    %254 = arith.addf %241, %253 : vector<30x30xf32>
    %c12_107 = arith.constant 12 : index
    %255 = memref.load %arg4[%c12_107] : memref<27xf32, #tpu.memory_space<smem>>
    %256 = vector.broadcast %255 : f32 to vector<30x30xf32>
    %257 = arith.mulf %256, %250 : vector<30x30xf32>
    %258 = arith.addf %245, %257 : vector<30x30xf32>
    %c21_108 = arith.constant 21 : index
    %259 = memref.load %arg4[%c21_108] : memref<27xf32, #tpu.memory_space<smem>>
    %260 = vector.broadcast %259 : f32 to vector<30x30xf32>
    %261 = arith.mulf %260, %250 : vector<30x30xf32>
    %262 = arith.addf %249, %261 : vector<30x30xf32>
    %263 = vector.extract_strided_slice %236 {offsets = [2, 0], sizes = [30, 30], strides = [1, 1]} : vector<32x30xf32> to vector<30x30xf32>
    %c6_109 = arith.constant 6 : index
    %264 = memref.load %arg4[%c6_109] : memref<27xf32, #tpu.memory_space<smem>>
    %265 = vector.broadcast %264 : f32 to vector<30x30xf32>
    %266 = arith.mulf %265, %263 : vector<30x30xf32>
    %267 = arith.addf %254, %266 : vector<30x30xf32>
    %c15_110 = arith.constant 15 : index
    %268 = memref.load %arg4[%c15_110] : memref<27xf32, #tpu.memory_space<smem>>
    %269 = vector.broadcast %268 : f32 to vector<30x30xf32>
    %270 = arith.mulf %269, %263 : vector<30x30xf32>
    %271 = arith.addf %258, %270 : vector<30x30xf32>
    %c24_111 = arith.constant 24 : index
    %272 = memref.load %arg4[%c24_111] : memref<27xf32, #tpu.memory_space<smem>>
    %273 = vector.broadcast %272 : f32 to vector<30x30xf32>
    %274 = arith.mulf %273, %263 : vector<30x30xf32>
    %275 = arith.addf %262, %274 : vector<30x30xf32>
    %276 = vector.extract_strided_slice %232 {offsets = [0, 1], sizes = [32, 30], strides = [1, 1]} : vector<32x32xf32> to vector<32x30xf32>
    %277 = vector.extract_strided_slice %276 {offsets = [0, 0], sizes = [30, 30], strides = [1, 1]} : vector<32x30xf32> to vector<30x30xf32>
    %c1_112 = arith.constant 1 : index
    %278 = memref.load %arg4[%c1_112] : memref<27xf32, #tpu.memory_space<smem>>
    %279 = vector.broadcast %278 : f32 to vector<30x30xf32>
    %280 = arith.mulf %279, %277 : vector<30x30xf32>
    %281 = arith.addf %267, %280 : vector<30x30xf32>
    %c10_113 = arith.constant 10 : index
    %282 = memref.load %arg4[%c10_113] : memref<27xf32, #tpu.memory_space<smem>>
    %283 = vector.broadcast %282 : f32 to vector<30x30xf32>
    %284 = arith.mulf %283, %277 : vector<30x30xf32>
    %285 = arith.addf %271, %284 : vector<30x30xf32>
    %c19_114 = arith.constant 19 : index
    %286 = memref.load %arg4[%c19_114] : memref<27xf32, #tpu.memory_space<smem>>
    %287 = vector.broadcast %286 : f32 to vector<30x30xf32>
    %288 = arith.mulf %287, %277 : vector<30x30xf32>
    %289 = arith.addf %275, %288 : vector<30x30xf32>
    %290 = vector.extract_strided_slice %276 {offsets = [1, 0], sizes = [30, 30], strides = [1, 1]} : vector<32x30xf32> to vector<30x30xf32>
    %c4_115 = arith.constant 4 : index
    %291 = memref.load %arg4[%c4_115] : memref<27xf32, #tpu.memory_space<smem>>
    %292 = vector.broadcast %291 : f32 to vector<30x30xf32>
    %293 = arith.mulf %292, %290 : vector<30x30xf32>
    %294 = arith.addf %281, %293 : vector<30x30xf32>
    %c13_116 = arith.constant 13 : index
    %295 = memref.load %arg4[%c13_116] : memref<27xf32, #tpu.memory_space<smem>>
    %296 = vector.broadcast %295 : f32 to vector<30x30xf32>
    %297 = arith.mulf %296, %290 : vector<30x30xf32>
    %298 = arith.addf %285, %297 : vector<30x30xf32>
    %c22_117 = arith.constant 22 : index
    %299 = memref.load %arg4[%c22_117] : memref<27xf32, #tpu.memory_space<smem>>
    %300 = vector.broadcast %299 : f32 to vector<30x30xf32>
    %301 = arith.mulf %300, %290 : vector<30x30xf32>
    %302 = arith.addf %289, %301 : vector<30x30xf32>
    %303 = vector.extract_strided_slice %276 {offsets = [2, 0], sizes = [30, 30], strides = [1, 1]} : vector<32x30xf32> to vector<30x30xf32>
    %c7_118 = arith.constant 7 : index
    %304 = memref.load %arg4[%c7_118] : memref<27xf32, #tpu.memory_space<smem>>
    %305 = vector.broadcast %304 : f32 to vector<30x30xf32>
    %306 = arith.mulf %305, %303 : vector<30x30xf32>
    %307 = arith.addf %294, %306 : vector<30x30xf32>
    %c16_119 = arith.constant 16 : index
    %308 = memref.load %arg4[%c16_119] : memref<27xf32, #tpu.memory_space<smem>>
    %309 = vector.broadcast %308 : f32 to vector<30x30xf32>
    %310 = arith.mulf %309, %303 : vector<30x30xf32>
    %311 = arith.addf %298, %310 : vector<30x30xf32>
    %c25_120 = arith.constant 25 : index
    %312 = memref.load %arg4[%c25_120] : memref<27xf32, #tpu.memory_space<smem>>
    %313 = vector.broadcast %312 : f32 to vector<30x30xf32>
    %314 = arith.mulf %313, %303 : vector<30x30xf32>
    %315 = arith.addf %302, %314 : vector<30x30xf32>
    %316 = vector.extract_strided_slice %232 {offsets = [0, 2], sizes = [32, 30], strides = [1, 1]} : vector<32x32xf32> to vector<32x30xf32>
    %317 = vector.extract_strided_slice %316 {offsets = [0, 0], sizes = [30, 30], strides = [1, 1]} : vector<32x30xf32> to vector<30x30xf32>
    %c2_121 = arith.constant 2 : index
    %318 = memref.load %arg4[%c2_121] : memref<27xf32, #tpu.memory_space<smem>>
    %319 = vector.broadcast %318 : f32 to vector<30x30xf32>
    %320 = arith.mulf %319, %317 : vector<30x30xf32>
    %321 = arith.addf %307, %320 : vector<30x30xf32>
    %c11_122 = arith.constant 11 : index
    %322 = memref.load %arg4[%c11_122] : memref<27xf32, #tpu.memory_space<smem>>
    %323 = vector.broadcast %322 : f32 to vector<30x30xf32>
    %324 = arith.mulf %323, %317 : vector<30x30xf32>
    %325 = arith.addf %311, %324 : vector<30x30xf32>
    %c20_123 = arith.constant 20 : index
    %326 = memref.load %arg4[%c20_123] : memref<27xf32, #tpu.memory_space<smem>>
    %327 = vector.broadcast %326 : f32 to vector<30x30xf32>
    %328 = arith.mulf %327, %317 : vector<30x30xf32>
    %329 = arith.addf %315, %328 : vector<30x30xf32>
    %330 = vector.extract_strided_slice %316 {offsets = [1, 0], sizes = [30, 30], strides = [1, 1]} : vector<32x30xf32> to vector<30x30xf32>
    %c5_124 = arith.constant 5 : index
    %331 = memref.load %arg4[%c5_124] : memref<27xf32, #tpu.memory_space<smem>>
    %332 = vector.broadcast %331 : f32 to vector<30x30xf32>
    %333 = arith.mulf %332, %330 : vector<30x30xf32>
    %334 = arith.addf %321, %333 : vector<30x30xf32>
    %c14_125 = arith.constant 14 : index
    %335 = memref.load %arg4[%c14_125] : memref<27xf32, #tpu.memory_space<smem>>
    %336 = vector.broadcast %335 : f32 to vector<30x30xf32>
    %337 = arith.mulf %336, %330 : vector<30x30xf32>
    %338 = arith.addf %325, %337 : vector<30x30xf32>
    %c23_126 = arith.constant 23 : index
    %339 = memref.load %arg4[%c23_126] : memref<27xf32, #tpu.memory_space<smem>>
    %340 = vector.broadcast %339 : f32 to vector<30x30xf32>
    %341 = arith.mulf %340, %330 : vector<30x30xf32>
    %342 = arith.addf %329, %341 : vector<30x30xf32>
    %343 = vector.extract_strided_slice %316 {offsets = [2, 0], sizes = [30, 30], strides = [1, 1]} : vector<32x30xf32> to vector<30x30xf32>
    %c8_127 = arith.constant 8 : index
    %344 = memref.load %arg4[%c8_127] : memref<27xf32, #tpu.memory_space<smem>>
    %345 = vector.broadcast %344 : f32 to vector<30x30xf32>
    %346 = arith.mulf %345, %343 : vector<30x30xf32>
    %347 = arith.addf %334, %346 : vector<30x30xf32>
    %c17_128 = arith.constant 17 : index
    %348 = memref.load %arg4[%c17_128] : memref<27xf32, #tpu.memory_space<smem>>
    %349 = vector.broadcast %348 : f32 to vector<30x30xf32>
    %350 = arith.mulf %349, %343 : vector<30x30xf32>
    %351 = arith.addf %338, %350 : vector<30x30xf32>
    %c26_129 = arith.constant 26 : index
    %352 = memref.load %arg4[%c26_129] : memref<27xf32, #tpu.memory_space<smem>>
    %353 = vector.broadcast %352 : f32 to vector<30x30xf32>
    %354 = arith.mulf %353, %343 : vector<30x30xf32>
    %355 = arith.addf %342, %354 : vector<30x30xf32>
    %c0_130 = arith.constant 0 : index
    %356 = memref.load %arg5[%c0_130] : memref<3xf32, #tpu.memory_space<smem>>
    %357 = vector.broadcast %356 : f32 to vector<30x30xf32>
    %358 = arith.addf %347, %357 : vector<30x30xf32>
    %cst_131 = arith.constant 5.000000e-01 : f32
    %359 = vector.broadcast %cst_131 : f32 to vector<30x30xf32>
    %360 = arith.mulf %359, %358 : vector<30x30xf32>
    %361 = math.tanh %360 : vector<30x30xf32>
    %cst_132 = arith.constant 1.000000e+00 : f32
    %362 = vector.broadcast %cst_132 : f32 to vector<30x30xf32>
    %363 = arith.addf %361, %362 : vector<30x30xf32>
    %cst_133 = arith.constant 5.000000e-01 : f32
    %364 = vector.broadcast %cst_133 : f32 to vector<30x30xf32>
    %365 = arith.mulf %364, %363 : vector<30x30xf32>
    %366 = arith.mulf %358, %365 : vector<30x30xf32>
    %c1_134 = arith.constant 1 : index
    %367 = memref.load %arg5[%c1_134] : memref<3xf32, #tpu.memory_space<smem>>
    %368 = vector.broadcast %367 : f32 to vector<30x30xf32>
    %369 = arith.addf %351, %368 : vector<30x30xf32>
    %cst_135 = arith.constant 5.000000e-01 : f32
    %370 = vector.broadcast %cst_135 : f32 to vector<30x30xf32>
    %371 = arith.mulf %370, %369 : vector<30x30xf32>
    %372 = math.tanh %371 : vector<30x30xf32>
    %cst_136 = arith.constant 1.000000e+00 : f32
    %373 = vector.broadcast %cst_136 : f32 to vector<30x30xf32>
    %374 = arith.addf %372, %373 : vector<30x30xf32>
    %cst_137 = arith.constant 5.000000e-01 : f32
    %375 = vector.broadcast %cst_137 : f32 to vector<30x30xf32>
    %376 = arith.mulf %375, %374 : vector<30x30xf32>
    %377 = arith.mulf %369, %376 : vector<30x30xf32>
    %c2_138 = arith.constant 2 : index
    %378 = memref.load %arg5[%c2_138] : memref<3xf32, #tpu.memory_space<smem>>
    %379 = vector.broadcast %378 : f32 to vector<30x30xf32>
    %380 = arith.addf %355, %379 : vector<30x30xf32>
    %cst_139 = arith.constant 5.000000e-01 : f32
    %381 = vector.broadcast %cst_139 : f32 to vector<30x30xf32>
    %382 = arith.mulf %381, %380 : vector<30x30xf32>
    %383 = math.tanh %382 : vector<30x30xf32>
    %cst_140 = arith.constant 1.000000e+00 : f32
    %384 = vector.broadcast %cst_140 : f32 to vector<30x30xf32>
    %385 = arith.addf %383, %384 : vector<30x30xf32>
    %cst_141 = arith.constant 5.000000e-01 : f32
    %386 = vector.broadcast %cst_141 : f32 to vector<30x30xf32>
    %387 = arith.mulf %386, %385 : vector<30x30xf32>
    %388 = arith.mulf %380, %387 : vector<30x30xf32>
    %cst_142 = arith.constant 0.000000e+00 : f32
    %389 = vector.broadcast %cst_142 : f32 to vector<3x34x34xf32>
    %c0_143 = arith.constant 0 : index
    %c0_144 = arith.constant 0 : index
    %c0_145 = arith.constant 0 : index
    %390 = vector.load %arg9[%c0_143, %c0_144, %c0_145] : memref<3x34x34xf32, #tpu.memory_space<vmem>>, vector<3x34x34xf32>
    tpu.vector_store %arg9[%c0_143, %c0_144, %c0_145], %389 {strides = array<i32>} : memref<3x34x34xf32, #tpu.memory_space<vmem>>, vector<3x34x34xf32>,
    %c0_146 = arith.constant 0 : index
    %c2_147 = arith.constant 2 : index
    %c2_148 = arith.constant 2 : index
    %391 = vector.load %arg9[%c0_146, %c2_147, %c2_148] : memref<3x34x34xf32, #tpu.memory_space<vmem>>, vector<1x30x30xf32>
    %392 = vector.shape_cast %391 : vector<1x30x30xf32> to vector<30x30xf32>
    %393 = vector.shape_cast %366 : vector<30x30xf32> to vector<1x30x30xf32>
    tpu.vector_store %arg9[%c0_146, %c2_147, %c2_148], %393 {strides = array<i32>} : memref<3x34x34xf32, #tpu.memory_space<vmem>>, vector<1x30x30xf32>,
    %c1_149 = arith.constant 1 : index
    %c2_150 = arith.constant 2 : index
    %c2_151 = arith.constant 2 : index
    %394 = vector.load %arg9[%c1_149, %c2_150, %c2_151] : memref<3x34x34xf32, #tpu.memory_space<vmem>>, vector<1x30x30xf32>
    %395 = vector.shape_cast %394 : vector<1x30x30xf32> to vector<30x30xf32>
    %396 = vector.shape_cast %377 : vector<30x30xf32> to vector<1x30x30xf32>
    tpu.vector_store %arg9[%c1_149, %c2_150, %c2_151], %396 {strides = array<i32>} : memref<3x34x34xf32, #tpu.memory_space<vmem>>, vector<1x30x30xf32>,
    %c2_152 = arith.constant 2 : index
    %c2_153 = arith.constant 2 : index
    %c2_154 = arith.constant 2 : index
    %397 = vector.load %arg9[%c2_152, %c2_153, %c2_154] : memref<3x34x34xf32, #tpu.memory_space<vmem>>, vector<1x30x30xf32>
    %398 = vector.shape_cast %397 : vector<1x30x30xf32> to vector<30x30xf32>
    %399 = vector.shape_cast %388 : vector<30x30xf32> to vector<1x30x30xf32>
    tpu.vector_store %arg9[%c2_152, %c2_153, %c2_154], %399 {strides = array<i32>} : memref<3x34x34xf32, #tpu.memory_space<vmem>>, vector<1x30x30xf32>,
    %cst_155 = arith.constant 0.000000e+00 : f32
    %400 = vector.broadcast %cst_155 : f32 to vector<32x32xf32>
    %c0_156 = arith.constant 0 : index
    %401 = memref.load %arg7[%c0_156] : memref<4xf32, #tpu.memory_space<smem>>
    %402 = vector.broadcast %401 : f32 to vector<32x32xf32>
    %403 = arith.addf %400, %402 : vector<32x32xf32>
    %cst_157 = arith.constant 0.000000e+00 : f32
    %404 = vector.broadcast %cst_157 : f32 to vector<32x32xf32>
    %c1_158 = arith.constant 1 : index
    %405 = memref.load %arg7[%c1_158] : memref<4xf32, #tpu.memory_space<smem>>
    %406 = vector.broadcast %405 : f32 to vector<32x32xf32>
    %407 = arith.addf %404, %406 : vector<32x32xf32>
    %cst_159 = arith.constant 0.000000e+00 : f32
    %408 = vector.broadcast %cst_159 : f32 to vector<32x32xf32>
    %c2_160 = arith.constant 2 : index
    %409 = memref.load %arg7[%c2_160] : memref<4xf32, #tpu.memory_space<smem>>
    %410 = vector.broadcast %409 : f32 to vector<32x32xf32>
    %411 = arith.addf %408, %410 : vector<32x32xf32>
    %cst_161 = arith.constant 0.000000e+00 : f32
    %412 = vector.broadcast %cst_161 : f32 to vector<32x32xf32>
    %c3_162 = arith.constant 3 : index
    %413 = memref.load %arg7[%c3_162] : memref<4xf32, #tpu.memory_space<smem>>
    %414 = vector.broadcast %413 : f32 to vector<32x32xf32>
    %415 = arith.addf %412, %414 : vector<32x32xf32>
    %c0_163 = arith.constant 0 : index
    %c0_164 = arith.constant 0 : index
    %c0_165 = arith.constant 0 : index
    %416 = vector.load %arg9[%c0_163, %c0_164, %c0_165] : memref<3x34x34xf32, #tpu.memory_space<vmem>>, vector<1x34x34xf32>
    %417 = vector.shape_cast %416 : vector<1x34x34xf32> to vector<34x34xf32>
    %418 = vector.extract_strided_slice %417 {offsets = [0, 0], sizes = [34, 32], strides = [1, 1]} : vector<34x34xf32> to vector<34x32xf32>
    %419 = vector.extract_strided_slice %418 {offsets = [0, 0], sizes = [32, 32], strides = [1, 1]} : vector<34x32xf32> to vector<32x32xf32>
    %c8_166 = arith.constant 8 : index
    %420 = memref.load %arg6[%c8_166] : memref<108xf32, #tpu.memory_space<smem>>
    %421 = vector.broadcast %420 : f32 to vector<32x32xf32>
    %422 = arith.mulf %421, %419 : vector<32x32xf32>
    %423 = arith.addf %403, %422 : vector<32x32xf32>
    %c17_167 = arith.constant 17 : index
    %424 = memref.load %arg6[%c17_167] : memref<108xf32, #tpu.memory_space<smem>>
    %425 = vector.broadcast %424 : f32 to vector<32x32xf32>
    %426 = arith.mulf %425, %419 : vector<32x32xf32>
    %427 = arith.addf %407, %426 : vector<32x32xf32>
    %c26_168 = arith.constant 26 : index
    %428 = memref.load %arg6[%c26_168] : memref<108xf32, #tpu.memory_space<smem>>
    %429 = vector.broadcast %428 : f32 to vector<32x32xf32>
    %430 = arith.mulf %429, %419 : vector<32x32xf32>
    %431 = arith.addf %411, %430 : vector<32x32xf32>
    %c35 = arith.constant 35 : index
    %432 = memref.load %arg6[%c35] : memref<108xf32, #tpu.memory_space<smem>>
    %433 = vector.broadcast %432 : f32 to vector<32x32xf32>
    %434 = arith.mulf %433, %419 : vector<32x32xf32>
    %435 = arith.addf %415, %434 : vector<32x32xf32>
    %436 = vector.extract_strided_slice %418 {offsets = [1, 0], sizes = [32, 32], strides = [1, 1]} : vector<34x32xf32> to vector<32x32xf32>
    %c5_169 = arith.constant 5 : index
    %437 = memref.load %arg6[%c5_169] : memref<108xf32, #tpu.memory_space<smem>>
    %438 = vector.broadcast %437 : f32 to vector<32x32xf32>
    %439 = arith.mulf %438, %436 : vector<32x32xf32>
    %440 = arith.addf %423, %439 : vector<32x32xf32>
    %c14_170 = arith.constant 14 : index
    %441 = memref.load %arg6[%c14_170] : memref<108xf32, #tpu.memory_space<smem>>
    %442 = vector.broadcast %441 : f32 to vector<32x32xf32>
    %443 = arith.mulf %442, %436 : vector<32x32xf32>
    %444 = arith.addf %427, %443 : vector<32x32xf32>
    %c23_171 = arith.constant 23 : index
    %445 = memref.load %arg6[%c23_171] : memref<108xf32, #tpu.memory_space<smem>>
    %446 = vector.broadcast %445 : f32 to vector<32x32xf32>
    %447 = arith.mulf %446, %436 : vector<32x32xf32>
    %448 = arith.addf %431, %447 : vector<32x32xf32>
    %c32 = arith.constant 32 : index
    %449 = memref.load %arg6[%c32] : memref<108xf32, #tpu.memory_space<smem>>
    %450 = vector.broadcast %449 : f32 to vector<32x32xf32>
    %451 = arith.mulf %450, %436 : vector<32x32xf32>
    %452 = arith.addf %435, %451 : vector<32x32xf32>
    %453 = vector.extract_strided_slice %418 {offsets = [2, 0], sizes = [32, 32], strides = [1, 1]} : vector<34x32xf32> to vector<32x32xf32>
    %c2_172 = arith.constant 2 : index
    %454 = memref.load %arg6[%c2_172] : memref<108xf32, #tpu.memory_space<smem>>
    %455 = vector.broadcast %454 : f32 to vector<32x32xf32>
    %456 = arith.mulf %455, %453 : vector<32x32xf32>
    %457 = arith.addf %440, %456 : vector<32x32xf32>
    %c11_173 = arith.constant 11 : index
    %458 = memref.load %arg6[%c11_173] : memref<108xf32, #tpu.memory_space<smem>>
    %459 = vector.broadcast %458 : f32 to vector<32x32xf32>
    %460 = arith.mulf %459, %453 : vector<32x32xf32>
    %461 = arith.addf %444, %460 : vector<32x32xf32>
    %c20_174 = arith.constant 20 : index
    %462 = memref.load %arg6[%c20_174] : memref<108xf32, #tpu.memory_space<smem>>
    %463 = vector.broadcast %462 : f32 to vector<32x32xf32>
    %464 = arith.mulf %463, %453 : vector<32x32xf32>
    %465 = arith.addf %448, %464 : vector<32x32xf32>
    %c29_175 = arith.constant 29 : index
    %466 = memref.load %arg6[%c29_175] : memref<108xf32, #tpu.memory_space<smem>>
    %467 = vector.broadcast %466 : f32 to vector<32x32xf32>
    %468 = arith.mulf %467, %453 : vector<32x32xf32>
    %469 = arith.addf %452, %468 : vector<32x32xf32>
    %470 = vector.extract_strided_slice %417 {offsets = [0, 1], sizes = [34, 32], strides = [1, 1]} : vector<34x34xf32> to vector<34x32xf32>
    %471 = vector.extract_strided_slice %470 {offsets = [0, 0], sizes = [32, 32], strides = [1, 1]} : vector<34x32xf32> to vector<32x32xf32>
    %c7_176 = arith.constant 7 : index
    %472 = memref.load %arg6[%c7_176] : memref<108xf32, #tpu.memory_space<smem>>
    %473 = vector.broadcast %472 : f32 to vector<32x32xf32>
    %474 = arith.mulf %473, %471 : vector<32x32xf32>
    %475 = arith.addf %457, %474 : vector<32x32xf32>
    %c16_177 = arith.constant 16 : index
    %476 = memref.load %arg6[%c16_177] : memref<108xf32, #tpu.memory_space<smem>>
    %477 = vector.broadcast %476 : f32 to vector<32x32xf32>
    %478 = arith.mulf %477, %471 : vector<32x32xf32>
    %479 = arith.addf %461, %478 : vector<32x32xf32>
    %c25_178 = arith.constant 25 : index
    %480 = memref.load %arg6[%c25_178] : memref<108xf32, #tpu.memory_space<smem>>
    %481 = vector.broadcast %480 : f32 to vector<32x32xf32>
    %482 = arith.mulf %481, %471 : vector<32x32xf32>
    %483 = arith.addf %465, %482 : vector<32x32xf32>
    %c34 = arith.constant 34 : index
    %484 = memref.load %arg6[%c34] : memref<108xf32, #tpu.memory_space<smem>>
    %485 = vector.broadcast %484 : f32 to vector<32x32xf32>
    %486 = arith.mulf %485, %471 : vector<32x32xf32>
    %487 = arith.addf %469, %486 : vector<32x32xf32>
    %488 = vector.extract_strided_slice %470 {offsets = [1, 0], sizes = [32, 32], strides = [1, 1]} : vector<34x32xf32> to vector<32x32xf32>
    %c4_179 = arith.constant 4 : index
    %489 = memref.load %arg6[%c4_179] : memref<108xf32, #tpu.memory_space<smem>>
    %490 = vector.broadcast %489 : f32 to vector<32x32xf32>
    %491 = arith.mulf %490, %488 : vector<32x32xf32>
    %492 = arith.addf %475, %491 : vector<32x32xf32>
    %c13_180 = arith.constant 13 : index
    %493 = memref.load %arg6[%c13_180] : memref<108xf32, #tpu.memory_space<smem>>
    %494 = vector.broadcast %493 : f32 to vector<32x32xf32>
    %495 = arith.mulf %494, %488 : vector<32x32xf32>
    %496 = arith.addf %479, %495 : vector<32x32xf32>
    %c22_181 = arith.constant 22 : index
    %497 = memref.load %arg6[%c22_181] : memref<108xf32, #tpu.memory_space<smem>>
    %498 = vector.broadcast %497 : f32 to vector<32x32xf32>
    %499 = arith.mulf %498, %488 : vector<32x32xf32>
    %500 = arith.addf %483, %499 : vector<32x32xf32>
    %c31_182 = arith.constant 31 : index
    %501 = memref.load %arg6[%c31_182] : memref<108xf32, #tpu.memory_space<smem>>
    %502 = vector.broadcast %501 : f32 to vector<32x32xf32>
    %503 = arith.mulf %502, %488 : vector<32x32xf32>
    %504 = arith.addf %487, %503 : vector<32x32xf32>
    %505 = vector.extract_strided_slice %470 {offsets = [2, 0], sizes = [32, 32], strides = [1, 1]} : vector<34x32xf32> to vector<32x32xf32>
    %c1_183 = arith.constant 1 : index
    %506 = memref.load %arg6[%c1_183] : memref<108xf32, #tpu.memory_space<smem>>
    %507 = vector.broadcast %506 : f32 to vector<32x32xf32>
    %508 = arith.mulf %507, %505 : vector<32x32xf32>
    %509 = arith.addf %492, %508 : vector<32x32xf32>
    %c10_184 = arith.constant 10 : index
    %510 = memref.load %arg6[%c10_184] : memref<108xf32, #tpu.memory_space<smem>>
    %511 = vector.broadcast %510 : f32 to vector<32x32xf32>
    %512 = arith.mulf %511, %505 : vector<32x32xf32>
    %513 = arith.addf %496, %512 : vector<32x32xf32>
    %c19_185 = arith.constant 19 : index
    %514 = memref.load %arg6[%c19_185] : memref<108xf32, #tpu.memory_space<smem>>
    %515 = vector.broadcast %514 : f32 to vector<32x32xf32>
    %516 = arith.mulf %515, %505 : vector<32x32xf32>
    %517 = arith.addf %500, %516 : vector<32x32xf32>
    %c28_186 = arith.constant 28 : index
    %518 = memref.load %arg6[%c28_186] : memref<108xf32, #tpu.memory_space<smem>>
    %519 = vector.broadcast %518 : f32 to vector<32x32xf32>
    %520 = arith.mulf %519, %505 : vector<32x32xf32>
    %521 = arith.addf %504, %520 : vector<32x32xf32>
    %522 = vector.extract_strided_slice %417 {offsets = [0, 2], sizes = [34, 32], strides = [1, 1]} : vector<34x34xf32> to vector<34x32xf32>
    %523 = vector.extract_strided_slice %522 {offsets = [0, 0], sizes = [32, 32], strides = [1, 1]} : vector<34x32xf32> to vector<32x32xf32>
    %c6_187 = arith.constant 6 : index
    %524 = memref.load %arg6[%c6_187] : memref<108xf32, #tpu.memory_space<smem>>
    %525 = vector.broadcast %524 : f32 to vector<32x32xf32>
    %526 = arith.mulf %525, %523 : vector<32x32xf32>
    %527 = arith.addf %509, %526 : vector<32x32xf32>
    %c15_188 = arith.constant 15 : index
    %528 = memref.load %arg6[%c15_188] : memref<108xf32, #tpu.memory_space<smem>>
    %529 = vector.broadcast %528 : f32 to vector<32x32xf32>
    %530 = arith.mulf %529, %523 : vector<32x32xf32>
    %531 = arith.addf %513, %530 : vector<32x32xf32>
    %c24_189 = arith.constant 24 : index
    %532 = memref.load %arg6[%c24_189] : memref<108xf32, #tpu.memory_space<smem>>
    %533 = vector.broadcast %532 : f32 to vector<32x32xf32>
    %534 = arith.mulf %533, %523 : vector<32x32xf32>
    %535 = arith.addf %517, %534 : vector<32x32xf32>
    %c33 = arith.constant 33 : index
    %536 = memref.load %arg6[%c33] : memref<108xf32, #tpu.memory_space<smem>>
    %537 = vector.broadcast %536 : f32 to vector<32x32xf32>
    %538 = arith.mulf %537, %523 : vector<32x32xf32>
    %539 = arith.addf %521, %538 : vector<32x32xf32>
    %540 = vector.extract_strided_slice %522 {offsets = [1, 0], sizes = [32, 32], strides = [1, 1]} : vector<34x32xf32> to vector<32x32xf32>
    %c3_190 = arith.constant 3 : index
    %541 = memref.load %arg6[%c3_190] : memref<108xf32, #tpu.memory_space<smem>>
    %542 = vector.broadcast %541 : f32 to vector<32x32xf32>
    %543 = arith.mulf %542, %540 : vector<32x32xf32>
    %544 = arith.addf %527, %543 : vector<32x32xf32>
    %c12_191 = arith.constant 12 : index
    %545 = memref.load %arg6[%c12_191] : memref<108xf32, #tpu.memory_space<smem>>
    %546 = vector.broadcast %545 : f32 to vector<32x32xf32>
    %547 = arith.mulf %546, %540 : vector<32x32xf32>
    %548 = arith.addf %531, %547 : vector<32x32xf32>
    %c21_192 = arith.constant 21 : index
    %549 = memref.load %arg6[%c21_192] : memref<108xf32, #tpu.memory_space<smem>>
    %550 = vector.broadcast %549 : f32 to vector<32x32xf32>
    %551 = arith.mulf %550, %540 : vector<32x32xf32>
    %552 = arith.addf %535, %551 : vector<32x32xf32>
    %c30_193 = arith.constant 30 : index
    %553 = memref.load %arg6[%c30_193] : memref<108xf32, #tpu.memory_space<smem>>
    %554 = vector.broadcast %553 : f32 to vector<32x32xf32>
    %555 = arith.mulf %554, %540 : vector<32x32xf32>
    %556 = arith.addf %539, %555 : vector<32x32xf32>
    %557 = vector.extract_strided_slice %522 {offsets = [2, 0], sizes = [32, 32], strides = [1, 1]} : vector<34x32xf32> to vector<32x32xf32>
    %c0_194 = arith.constant 0 : index
    %558 = memref.load %arg6[%c0_194] : memref<108xf32, #tpu.memory_space<smem>>
    %559 = vector.broadcast %558 : f32 to vector<32x32xf32>
    %560 = arith.mulf %559, %557 : vector<32x32xf32>
    %561 = arith.addf %544, %560 : vector<32x32xf32>
    %c9_195 = arith.constant 9 : index
    %562 = memref.load %arg6[%c9_195] : memref<108xf32, #tpu.memory_space<smem>>
    %563 = vector.broadcast %562 : f32 to vector<32x32xf32>
    %564 = arith.mulf %563, %557 : vector<32x32xf32>
    %565 = arith.addf %548, %564 : vector<32x32xf32>
    %c18_196 = arith.constant 18 : index
    %566 = memref.load %arg6[%c18_196] : memref<108xf32, #tpu.memory_space<smem>>
    %567 = vector.broadcast %566 : f32 to vector<32x32xf32>
    %568 = arith.mulf %567, %557 : vector<32x32xf32>
    %569 = arith.addf %552, %568 : vector<32x32xf32>
    %c27_197 = arith.constant 27 : index
    %570 = memref.load %arg6[%c27_197] : memref<108xf32, #tpu.memory_space<smem>>
    %571 = vector.broadcast %570 : f32 to vector<32x32xf32>
    %572 = arith.mulf %571, %557 : vector<32x32xf32>
    %573 = arith.addf %556, %572 : vector<32x32xf32>
    %c1_198 = arith.constant 1 : index
    %c0_199 = arith.constant 0 : index
    %c0_200 = arith.constant 0 : index
    %574 = vector.load %arg9[%c1_198, %c0_199, %c0_200] : memref<3x34x34xf32, #tpu.memory_space<vmem>>, vector<1x34x34xf32>
    %575 = vector.shape_cast %574 : vector<1x34x34xf32> to vector<34x34xf32>
    %576 = vector.extract_strided_slice %575 {offsets = [0, 0], sizes = [34, 32], strides = [1, 1]} : vector<34x34xf32> to vector<34x32xf32>
    %577 = vector.extract_strided_slice %576 {offsets = [0, 0], sizes = [32, 32], strides = [1, 1]} : vector<34x32xf32> to vector<32x32xf32>
    %c44 = arith.constant 44 : index
    %578 = memref.load %arg6[%c44] : memref<108xf32, #tpu.memory_space<smem>>
    %579 = vector.broadcast %578 : f32 to vector<32x32xf32>
    %580 = arith.mulf %579, %577 : vector<32x32xf32>
    %581 = arith.addf %561, %580 : vector<32x32xf32>
    %c53 = arith.constant 53 : index
    %582 = memref.load %arg6[%c53] : memref<108xf32, #tpu.memory_space<smem>>
    %583 = vector.broadcast %582 : f32 to vector<32x32xf32>
    %584 = arith.mulf %583, %577 : vector<32x32xf32>
    %585 = arith.addf %565, %584 : vector<32x32xf32>
    %c62 = arith.constant 62 : index
    %586 = memref.load %arg6[%c62] : memref<108xf32, #tpu.memory_space<smem>>
    %587 = vector.broadcast %586 : f32 to vector<32x32xf32>
    %588 = arith.mulf %587, %577 : vector<32x32xf32>
    %589 = arith.addf %569, %588 : vector<32x32xf32>
    %c71 = arith.constant 71 : index
    %590 = memref.load %arg6[%c71] : memref<108xf32, #tpu.memory_space<smem>>
    %591 = vector.broadcast %590 : f32 to vector<32x32xf32>
    %592 = arith.mulf %591, %577 : vector<32x32xf32>
    %593 = arith.addf %573, %592 : vector<32x32xf32>
    %594 = vector.extract_strided_slice %576 {offsets = [1, 0], sizes = [32, 32], strides = [1, 1]} : vector<34x32xf32> to vector<32x32xf32>
    %c41 = arith.constant 41 : index
    %595 = memref.load %arg6[%c41] : memref<108xf32, #tpu.memory_space<smem>>
    %596 = vector.broadcast %595 : f32 to vector<32x32xf32>
    %597 = arith.mulf %596, %594 : vector<32x32xf32>
    %598 = arith.addf %581, %597 : vector<32x32xf32>
    %c50 = arith.constant 50 : index
    %599 = memref.load %arg6[%c50] : memref<108xf32, #tpu.memory_space<smem>>
    %600 = vector.broadcast %599 : f32 to vector<32x32xf32>
    %601 = arith.mulf %600, %594 : vector<32x32xf32>
    %602 = arith.addf %585, %601 : vector<32x32xf32>
    %c59 = arith.constant 59 : index
    %603 = memref.load %arg6[%c59] : memref<108xf32, #tpu.memory_space<smem>>
    %604 = vector.broadcast %603 : f32 to vector<32x32xf32>
    %605 = arith.mulf %604, %594 : vector<32x32xf32>
    %606 = arith.addf %589, %605 : vector<32x32xf32>
    %c68 = arith.constant 68 : index
    %607 = memref.load %arg6[%c68] : memref<108xf32, #tpu.memory_space<smem>>
    %608 = vector.broadcast %607 : f32 to vector<32x32xf32>
    %609 = arith.mulf %608, %594 : vector<32x32xf32>
    %610 = arith.addf %593, %609 : vector<32x32xf32>
    %611 = vector.extract_strided_slice %576 {offsets = [2, 0], sizes = [32, 32], strides = [1, 1]} : vector<34x32xf32> to vector<32x32xf32>
    %c38 = arith.constant 38 : index
    %612 = memref.load %arg6[%c38] : memref<108xf32, #tpu.memory_space<smem>>
    %613 = vector.broadcast %612 : f32 to vector<32x32xf32>
    %614 = arith.mulf %613, %611 : vector<32x32xf32>
    %615 = arith.addf %598, %614 : vector<32x32xf32>
    %c47 = arith.constant 47 : index
    %616 = memref.load %arg6[%c47] : memref<108xf32, #tpu.memory_space<smem>>
    %617 = vector.broadcast %616 : f32 to vector<32x32xf32>
    %618 = arith.mulf %617, %611 : vector<32x32xf32>
    %619 = arith.addf %602, %618 : vector<32x32xf32>
    %c56 = arith.constant 56 : index
    %620 = memref.load %arg6[%c56] : memref<108xf32, #tpu.memory_space<smem>>
    %621 = vector.broadcast %620 : f32 to vector<32x32xf32>
    %622 = arith.mulf %621, %611 : vector<32x32xf32>
    %623 = arith.addf %606, %622 : vector<32x32xf32>
    %c65 = arith.constant 65 : index
    %624 = memref.load %arg6[%c65] : memref<108xf32, #tpu.memory_space<smem>>
    %625 = vector.broadcast %624 : f32 to vector<32x32xf32>
    %626 = arith.mulf %625, %611 : vector<32x32xf32>
    %627 = arith.addf %610, %626 : vector<32x32xf32>
    %628 = vector.extract_strided_slice %575 {offsets = [0, 1], sizes = [34, 32], strides = [1, 1]} : vector<34x34xf32> to vector<34x32xf32>
    %629 = vector.extract_strided_slice %628 {offsets = [0, 0], sizes = [32, 32], strides = [1, 1]} : vector<34x32xf32> to vector<32x32xf32>
    %c43 = arith.constant 43 : index
    %630 = memref.load %arg6[%c43] : memref<108xf32, #tpu.memory_space<smem>>
    %631 = vector.broadcast %630 : f32 to vector<32x32xf32>
    %632 = arith.mulf %631, %629 : vector<32x32xf32>
    %633 = arith.addf %615, %632 : vector<32x32xf32>
    %c52 = arith.constant 52 : index
    %634 = memref.load %arg6[%c52] : memref<108xf32, #tpu.memory_space<smem>>
    %635 = vector.broadcast %634 : f32 to vector<32x32xf32>
    %636 = arith.mulf %635, %629 : vector<32x32xf32>
    %637 = arith.addf %619, %636 : vector<32x32xf32>
    %c61 = arith.constant 61 : index
    %638 = memref.load %arg6[%c61] : memref<108xf32, #tpu.memory_space<smem>>
    %639 = vector.broadcast %638 : f32 to vector<32x32xf32>
    %640 = arith.mulf %639, %629 : vector<32x32xf32>
    %641 = arith.addf %623, %640 : vector<32x32xf32>
    %c70 = arith.constant 70 : index
    %642 = memref.load %arg6[%c70] : memref<108xf32, #tpu.memory_space<smem>>
    %643 = vector.broadcast %642 : f32 to vector<32x32xf32>
    %644 = arith.mulf %643, %629 : vector<32x32xf32>
    %645 = arith.addf %627, %644 : vector<32x32xf32>
    %646 = vector.extract_strided_slice %628 {offsets = [1, 0], sizes = [32, 32], strides = [1, 1]} : vector<34x32xf32> to vector<32x32xf32>
    %c40 = arith.constant 40 : index
    %647 = memref.load %arg6[%c40] : memref<108xf32, #tpu.memory_space<smem>>
    %648 = vector.broadcast %647 : f32 to vector<32x32xf32>
    %649 = arith.mulf %648, %646 : vector<32x32xf32>
    %650 = arith.addf %633, %649 : vector<32x32xf32>
    %c49 = arith.constant 49 : index
    %651 = memref.load %arg6[%c49] : memref<108xf32, #tpu.memory_space<smem>>
    %652 = vector.broadcast %651 : f32 to vector<32x32xf32>
    %653 = arith.mulf %652, %646 : vector<32x32xf32>
    %654 = arith.addf %637, %653 : vector<32x32xf32>
    %c58 = arith.constant 58 : index
    %655 = memref.load %arg6[%c58] : memref<108xf32, #tpu.memory_space<smem>>
    %656 = vector.broadcast %655 : f32 to vector<32x32xf32>
    %657 = arith.mulf %656, %646 : vector<32x32xf32>
    %658 = arith.addf %641, %657 : vector<32x32xf32>
    %c67 = arith.constant 67 : index
    %659 = memref.load %arg6[%c67] : memref<108xf32, #tpu.memory_space<smem>>
    %660 = vector.broadcast %659 : f32 to vector<32x32xf32>
    %661 = arith.mulf %660, %646 : vector<32x32xf32>
    %662 = arith.addf %645, %661 : vector<32x32xf32>
    %663 = vector.extract_strided_slice %628 {offsets = [2, 0], sizes = [32, 32], strides = [1, 1]} : vector<34x32xf32> to vector<32x32xf32>
    %c37 = arith.constant 37 : index
    %664 = memref.load %arg6[%c37] : memref<108xf32, #tpu.memory_space<smem>>
    %665 = vector.broadcast %664 : f32 to vector<32x32xf32>
    %666 = arith.mulf %665, %663 : vector<32x32xf32>
    %667 = arith.addf %650, %666 : vector<32x32xf32>
    %c46 = arith.constant 46 : index
    %668 = memref.load %arg6[%c46] : memref<108xf32, #tpu.memory_space<smem>>
    %669 = vector.broadcast %668 : f32 to vector<32x32xf32>
    %670 = arith.mulf %669, %663 : vector<32x32xf32>
    %671 = arith.addf %654, %670 : vector<32x32xf32>
    %c55 = arith.constant 55 : index
    %672 = memref.load %arg6[%c55] : memref<108xf32, #tpu.memory_space<smem>>
    %673 = vector.broadcast %672 : f32 to vector<32x32xf32>
    %674 = arith.mulf %673, %663 : vector<32x32xf32>
    %675 = arith.addf %658, %674 : vector<32x32xf32>
    %c64 = arith.constant 64 : index
    %676 = memref.load %arg6[%c64] : memref<108xf32, #tpu.memory_space<smem>>
    %677 = vector.broadcast %676 : f32 to vector<32x32xf32>
    %678 = arith.mulf %677, %663 : vector<32x32xf32>
    %679 = arith.addf %662, %678 : vector<32x32xf32>
    %680 = vector.extract_strided_slice %575 {offsets = [0, 2], sizes = [34, 32], strides = [1, 1]} : vector<34x34xf32> to vector<34x32xf32>
    %681 = vector.extract_strided_slice %680 {offsets = [0, 0], sizes = [32, 32], strides = [1, 1]} : vector<34x32xf32> to vector<32x32xf32>
    %c42 = arith.constant 42 : index
    %682 = memref.load %arg6[%c42] : memref<108xf32, #tpu.memory_space<smem>>
    %683 = vector.broadcast %682 : f32 to vector<32x32xf32>
    %684 = arith.mulf %683, %681 : vector<32x32xf32>
    %685 = arith.addf %667, %684 : vector<32x32xf32>
    %c51 = arith.constant 51 : index
    %686 = memref.load %arg6[%c51] : memref<108xf32, #tpu.memory_space<smem>>
    %687 = vector.broadcast %686 : f32 to vector<32x32xf32>
    %688 = arith.mulf %687, %681 : vector<32x32xf32>
    %689 = arith.addf %671, %688 : vector<32x32xf32>
    %c60 = arith.constant 60 : index
    %690 = memref.load %arg6[%c60] : memref<108xf32, #tpu.memory_space<smem>>
    %691 = vector.broadcast %690 : f32 to vector<32x32xf32>
    %692 = arith.mulf %691, %681 : vector<32x32xf32>
    %693 = arith.addf %675, %692 : vector<32x32xf32>
    %c69 = arith.constant 69 : index
    %694 = memref.load %arg6[%c69] : memref<108xf32, #tpu.memory_space<smem>>
    %695 = vector.broadcast %694 : f32 to vector<32x32xf32>
    %696 = arith.mulf %695, %681 : vector<32x32xf32>
    %697 = arith.addf %679, %696 : vector<32x32xf32>
    %698 = vector.extract_strided_slice %680 {offsets = [1, 0], sizes = [32, 32], strides = [1, 1]} : vector<34x32xf32> to vector<32x32xf32>
    %c39 = arith.constant 39 : index
    %699 = memref.load %arg6[%c39] : memref<108xf32, #tpu.memory_space<smem>>
    %700 = vector.broadcast %699 : f32 to vector<32x32xf32>
    %701 = arith.mulf %700, %698 : vector<32x32xf32>
    %702 = arith.addf %685, %701 : vector<32x32xf32>
    %c48 = arith.constant 48 : index
    %703 = memref.load %arg6[%c48] : memref<108xf32, #tpu.memory_space<smem>>
    %704 = vector.broadcast %703 : f32 to vector<32x32xf32>
    %705 = arith.mulf %704, %698 : vector<32x32xf32>
    %706 = arith.addf %689, %705 : vector<32x32xf32>
    %c57 = arith.constant 57 : index
    %707 = memref.load %arg6[%c57] : memref<108xf32, #tpu.memory_space<smem>>
    %708 = vector.broadcast %707 : f32 to vector<32x32xf32>
    %709 = arith.mulf %708, %698 : vector<32x32xf32>
    %710 = arith.addf %693, %709 : vector<32x32xf32>
    %c66 = arith.constant 66 : index
    %711 = memref.load %arg6[%c66] : memref<108xf32, #tpu.memory_space<smem>>
    %712 = vector.broadcast %711 : f32 to vector<32x32xf32>
    %713 = arith.mulf %712, %698 : vector<32x32xf32>
    %714 = arith.addf %697, %713 : vector<32x32xf32>
    %715 = vector.extract_strided_slice %680 {offsets = [2, 0], sizes = [32, 32], strides = [1, 1]} : vector<34x32xf32> to vector<32x32xf32>
    %c36 = arith.constant 36 : index
    %716 = memref.load %arg6[%c36] : memref<108xf32, #tpu.memory_space<smem>>
    %717 = vector.broadcast %716 : f32 to vector<32x32xf32>
    %718 = arith.mulf %717, %715 : vector<32x32xf32>
    %719 = arith.addf %702, %718 : vector<32x32xf32>
    %c45 = arith.constant 45 : index
    %720 = memref.load %arg6[%c45] : memref<108xf32, #tpu.memory_space<smem>>
    %721 = vector.broadcast %720 : f32 to vector<32x32xf32>
    %722 = arith.mulf %721, %715 : vector<32x32xf32>
    %723 = arith.addf %706, %722 : vector<32x32xf32>
    %c54 = arith.constant 54 : index
    %724 = memref.load %arg6[%c54] : memref<108xf32, #tpu.memory_space<smem>>
    %725 = vector.broadcast %724 : f32 to vector<32x32xf32>
    %726 = arith.mulf %725, %715 : vector<32x32xf32>
    %727 = arith.addf %710, %726 : vector<32x32xf32>
    %c63 = arith.constant 63 : index
    %728 = memref.load %arg6[%c63] : memref<108xf32, #tpu.memory_space<smem>>
    %729 = vector.broadcast %728 : f32 to vector<32x32xf32>
    %730 = arith.mulf %729, %715 : vector<32x32xf32>
    %731 = arith.addf %714, %730 : vector<32x32xf32>
    %c2_201 = arith.constant 2 : index
    %c0_202 = arith.constant 0 : index
    %c0_203 = arith.constant 0 : index
    %732 = vector.load %arg9[%c2_201, %c0_202, %c0_203] : memref<3x34x34xf32, #tpu.memory_space<vmem>>, vector<1x34x34xf32>
    %733 = vector.shape_cast %732 : vector<1x34x34xf32> to vector<34x34xf32>
    %734 = vector.extract_strided_slice %733 {offsets = [0, 0], sizes = [34, 32], strides = [1, 1]} : vector<34x34xf32> to vector<34x32xf32>
    %735 = vector.extract_strided_slice %734 {offsets = [0, 0], sizes = [32, 32], strides = [1, 1]} : vector<34x32xf32> to vector<32x32xf32>
    %c80 = arith.constant 80 : index
    %736 = memref.load %arg6[%c80] : memref<108xf32, #tpu.memory_space<smem>>
    %737 = vector.broadcast %736 : f32 to vector<32x32xf32>
    %738 = arith.mulf %737, %735 : vector<32x32xf32>
    %739 = arith.addf %719, %738 : vector<32x32xf32>
    %c89 = arith.constant 89 : index
    %740 = memref.load %arg6[%c89] : memref<108xf32, #tpu.memory_space<smem>>
    %741 = vector.broadcast %740 : f32 to vector<32x32xf32>
    %742 = arith.mulf %741, %735 : vector<32x32xf32>
    %743 = arith.addf %723, %742 : vector<32x32xf32>
    %c98 = arith.constant 98 : index
    %744 = memref.load %arg6[%c98] : memref<108xf32, #tpu.memory_space<smem>>
    %745 = vector.broadcast %744 : f32 to vector<32x32xf32>
    %746 = arith.mulf %745, %735 : vector<32x32xf32>
    %747 = arith.addf %727, %746 : vector<32x32xf32>
    %c107 = arith.constant 107 : index
    %748 = memref.load %arg6[%c107] : memref<108xf32, #tpu.memory_space<smem>>
    %749 = vector.broadcast %748 : f32 to vector<32x32xf32>
    %750 = arith.mulf %749, %735 : vector<32x32xf32>
    %751 = arith.addf %731, %750 : vector<32x32xf32>
    %752 = vector.extract_strided_slice %734 {offsets = [1, 0], sizes = [32, 32], strides = [1, 1]} : vector<34x32xf32> to vector<32x32xf32>
    %c77 = arith.constant 77 : index
    %753 = memref.load %arg6[%c77] : memref<108xf32, #tpu.memory_space<smem>>
    %754 = vector.broadcast %753 : f32 to vector<32x32xf32>
    %755 = arith.mulf %754, %752 : vector<32x32xf32>
    %756 = arith.addf %739, %755 : vector<32x32xf32>
    %c86 = arith.constant 86 : index
    %757 = memref.load %arg6[%c86] : memref<108xf32, #tpu.memory_space<smem>>
    %758 = vector.broadcast %757 : f32 to vector<32x32xf32>
    %759 = arith.mulf %758, %752 : vector<32x32xf32>
    %760 = arith.addf %743, %759 : vector<32x32xf32>
    %c95 = arith.constant 95 : index
    %761 = memref.load %arg6[%c95] : memref<108xf32, #tpu.memory_space<smem>>
    %762 = vector.broadcast %761 : f32 to vector<32x32xf32>
    %763 = arith.mulf %762, %752 : vector<32x32xf32>
    %764 = arith.addf %747, %763 : vector<32x32xf32>
    %c104 = arith.constant 104 : index
    %765 = memref.load %arg6[%c104] : memref<108xf32, #tpu.memory_space<smem>>
    %766 = vector.broadcast %765 : f32 to vector<32x32xf32>
    %767 = arith.mulf %766, %752 : vector<32x32xf32>
    %768 = arith.addf %751, %767 : vector<32x32xf32>
    %769 = vector.extract_strided_slice %734 {offsets = [2, 0], sizes = [32, 32], strides = [1, 1]} : vector<34x32xf32> to vector<32x32xf32>
    %c74 = arith.constant 74 : index
    %770 = memref.load %arg6[%c74] : memref<108xf32, #tpu.memory_space<smem>>
    %771 = vector.broadcast %770 : f32 to vector<32x32xf32>
    %772 = arith.mulf %771, %769 : vector<32x32xf32>
    %773 = arith.addf %756, %772 : vector<32x32xf32>
    %c83 = arith.constant 83 : index
    %774 = memref.load %arg6[%c83] : memref<108xf32, #tpu.memory_space<smem>>
    %775 = vector.broadcast %774 : f32 to vector<32x32xf32>
    %776 = arith.mulf %775, %769 : vector<32x32xf32>
    %777 = arith.addf %760, %776 : vector<32x32xf32>
    %c92 = arith.constant 92 : index
    %778 = memref.load %arg6[%c92] : memref<108xf32, #tpu.memory_space<smem>>
    %779 = vector.broadcast %778 : f32 to vector<32x32xf32>
    %780 = arith.mulf %779, %769 : vector<32x32xf32>
    %781 = arith.addf %764, %780 : vector<32x32xf32>
    %c101 = arith.constant 101 : index
    %782 = memref.load %arg6[%c101] : memref<108xf32, #tpu.memory_space<smem>>
    %783 = vector.broadcast %782 : f32 to vector<32x32xf32>
    %784 = arith.mulf %783, %769 : vector<32x32xf32>
    %785 = arith.addf %768, %784 : vector<32x32xf32>
    %786 = vector.extract_strided_slice %733 {offsets = [0, 1], sizes = [34, 32], strides = [1, 1]} : vector<34x34xf32> to vector<34x32xf32>
    %787 = vector.extract_strided_slice %786 {offsets = [0, 0], sizes = [32, 32], strides = [1, 1]} : vector<34x32xf32> to vector<32x32xf32>
    %c79 = arith.constant 79 : index
    %788 = memref.load %arg6[%c79] : memref<108xf32, #tpu.memory_space<smem>>
    %789 = vector.broadcast %788 : f32 to vector<32x32xf32>
    %790 = arith.mulf %789, %787 : vector<32x32xf32>
    %791 = arith.addf %773, %790 : vector<32x32xf32>
    %c88 = arith.constant 88 : index
    %792 = memref.load %arg6[%c88] : memref<108xf32, #tpu.memory_space<smem>>
    %793 = vector.broadcast %792 : f32 to vector<32x32xf32>
    %794 = arith.mulf %793, %787 : vector<32x32xf32>
    %795 = arith.addf %777, %794 : vector<32x32xf32>
    %c97 = arith.constant 97 : index
    %796 = memref.load %arg6[%c97] : memref<108xf32, #tpu.memory_space<smem>>
    %797 = vector.broadcast %796 : f32 to vector<32x32xf32>
    %798 = arith.mulf %797, %787 : vector<32x32xf32>
    %799 = arith.addf %781, %798 : vector<32x32xf32>
    %c106 = arith.constant 106 : index
    %800 = memref.load %arg6[%c106] : memref<108xf32, #tpu.memory_space<smem>>
    %801 = vector.broadcast %800 : f32 to vector<32x32xf32>
    %802 = arith.mulf %801, %787 : vector<32x32xf32>
    %803 = arith.addf %785, %802 : vector<32x32xf32>
    %804 = vector.extract_strided_slice %786 {offsets = [1, 0], sizes = [32, 32], strides = [1, 1]} : vector<34x32xf32> to vector<32x32xf32>
    %c76 = arith.constant 76 : index
    %805 = memref.load %arg6[%c76] : memref<108xf32, #tpu.memory_space<smem>>
    %806 = vector.broadcast %805 : f32 to vector<32x32xf32>
    %807 = arith.mulf %806, %804 : vector<32x32xf32>
    %808 = arith.addf %791, %807 : vector<32x32xf32>
    %c85 = arith.constant 85 : index
    %809 = memref.load %arg6[%c85] : memref<108xf32, #tpu.memory_space<smem>>
    %810 = vector.broadcast %809 : f32 to vector<32x32xf32>
    %811 = arith.mulf %810, %804 : vector<32x32xf32>
    %812 = arith.addf %795, %811 : vector<32x32xf32>
    %c94 = arith.constant 94 : index
    %813 = memref.load %arg6[%c94] : memref<108xf32, #tpu.memory_space<smem>>
    %814 = vector.broadcast %813 : f32 to vector<32x32xf32>
    %815 = arith.mulf %814, %804 : vector<32x32xf32>
    %816 = arith.addf %799, %815 : vector<32x32xf32>
    %c103 = arith.constant 103 : index
    %817 = memref.load %arg6[%c103] : memref<108xf32, #tpu.memory_space<smem>>
    %818 = vector.broadcast %817 : f32 to vector<32x32xf32>
    %819 = arith.mulf %818, %804 : vector<32x32xf32>
    %820 = arith.addf %803, %819 : vector<32x32xf32>
    %821 = vector.extract_strided_slice %786 {offsets = [2, 0], sizes = [32, 32], strides = [1, 1]} : vector<34x32xf32> to vector<32x32xf32>
    %c73 = arith.constant 73 : index
    %822 = memref.load %arg6[%c73] : memref<108xf32, #tpu.memory_space<smem>>
    %823 = vector.broadcast %822 : f32 to vector<32x32xf32>
    %824 = arith.mulf %823, %821 : vector<32x32xf32>
    %825 = arith.addf %808, %824 : vector<32x32xf32>
    %c82 = arith.constant 82 : index
    %826 = memref.load %arg6[%c82] : memref<108xf32, #tpu.memory_space<smem>>
    %827 = vector.broadcast %826 : f32 to vector<32x32xf32>
    %828 = arith.mulf %827, %821 : vector<32x32xf32>
    %829 = arith.addf %812, %828 : vector<32x32xf32>
    %c91 = arith.constant 91 : index
    %830 = memref.load %arg6[%c91] : memref<108xf32, #tpu.memory_space<smem>>
    %831 = vector.broadcast %830 : f32 to vector<32x32xf32>
    %832 = arith.mulf %831, %821 : vector<32x32xf32>
    %833 = arith.addf %816, %832 : vector<32x32xf32>
    %c100 = arith.constant 100 : index
    %834 = memref.load %arg6[%c100] : memref<108xf32, #tpu.memory_space<smem>>
    %835 = vector.broadcast %834 : f32 to vector<32x32xf32>
    %836 = arith.mulf %835, %821 : vector<32x32xf32>
    %837 = arith.addf %820, %836 : vector<32x32xf32>
    %838 = vector.extract_strided_slice %733 {offsets = [0, 2], sizes = [34, 32], strides = [1, 1]} : vector<34x34xf32> to vector<34x32xf32>
    %839 = vector.extract_strided_slice %838 {offsets = [0, 0], sizes = [32, 32], strides = [1, 1]} : vector<34x32xf32> to vector<32x32xf32>
    %c78 = arith.constant 78 : index
    %840 = memref.load %arg6[%c78] : memref<108xf32, #tpu.memory_space<smem>>
    %841 = vector.broadcast %840 : f32 to vector<32x32xf32>
    %842 = arith.mulf %841, %839 : vector<32x32xf32>
    %843 = arith.addf %825, %842 : vector<32x32xf32>
    %c87 = arith.constant 87 : index
    %844 = memref.load %arg6[%c87] : memref<108xf32, #tpu.memory_space<smem>>
    %845 = vector.broadcast %844 : f32 to vector<32x32xf32>
    %846 = arith.mulf %845, %839 : vector<32x32xf32>
    %847 = arith.addf %829, %846 : vector<32x32xf32>
    %c96 = arith.constant 96 : index
    %848 = memref.load %arg6[%c96] : memref<108xf32, #tpu.memory_space<smem>>
    %849 = vector.broadcast %848 : f32 to vector<32x32xf32>
    %850 = arith.mulf %849, %839 : vector<32x32xf32>
    %851 = arith.addf %833, %850 : vector<32x32xf32>
    %c105 = arith.constant 105 : index
    %852 = memref.load %arg6[%c105] : memref<108xf32, #tpu.memory_space<smem>>
    %853 = vector.broadcast %852 : f32 to vector<32x32xf32>
    %854 = arith.mulf %853, %839 : vector<32x32xf32>
    %855 = arith.addf %837, %854 : vector<32x32xf32>
    %856 = vector.extract_strided_slice %838 {offsets = [1, 0], sizes = [32, 32], strides = [1, 1]} : vector<34x32xf32> to vector<32x32xf32>
    %c75 = arith.constant 75 : index
    %857 = memref.load %arg6[%c75] : memref<108xf32, #tpu.memory_space<smem>>
    %858 = vector.broadcast %857 : f32 to vector<32x32xf32>
    %859 = arith.mulf %858, %856 : vector<32x32xf32>
    %860 = arith.addf %843, %859 : vector<32x32xf32>
    %c84 = arith.constant 84 : index
    %861 = memref.load %arg6[%c84] : memref<108xf32, #tpu.memory_space<smem>>
    %862 = vector.broadcast %861 : f32 to vector<32x32xf32>
    %863 = arith.mulf %862, %856 : vector<32x32xf32>
    %864 = arith.addf %847, %863 : vector<32x32xf32>
    %c93 = arith.constant 93 : index
    %865 = memref.load %arg6[%c93] : memref<108xf32, #tpu.memory_space<smem>>
    %866 = vector.broadcast %865 : f32 to vector<32x32xf32>
    %867 = arith.mulf %866, %856 : vector<32x32xf32>
    %868 = arith.addf %851, %867 : vector<32x32xf32>
    %c102 = arith.constant 102 : index
    %869 = memref.load %arg6[%c102] : memref<108xf32, #tpu.memory_space<smem>>
    %870 = vector.broadcast %869 : f32 to vector<32x32xf32>
    %871 = arith.mulf %870, %856 : vector<32x32xf32>
    %872 = arith.addf %855, %871 : vector<32x32xf32>
    %873 = vector.extract_strided_slice %838 {offsets = [2, 0], sizes = [32, 32], strides = [1, 1]} : vector<34x32xf32> to vector<32x32xf32>
    %c72 = arith.constant 72 : index
    %874 = memref.load %arg6[%c72] : memref<108xf32, #tpu.memory_space<smem>>
    %875 = vector.broadcast %874 : f32 to vector<32x32xf32>
    %876 = arith.mulf %875, %873 : vector<32x32xf32>
    %877 = arith.addf %860, %876 : vector<32x32xf32>
    %c81 = arith.constant 81 : index
    %878 = memref.load %arg6[%c81] : memref<108xf32, #tpu.memory_space<smem>>
    %879 = vector.broadcast %878 : f32 to vector<32x32xf32>
    %880 = arith.mulf %879, %873 : vector<32x32xf32>
    %881 = arith.addf %864, %880 : vector<32x32xf32>
    %c90 = arith.constant 90 : index
    %882 = memref.load %arg6[%c90] : memref<108xf32, #tpu.memory_space<smem>>
    %883 = vector.broadcast %882 : f32 to vector<32x32xf32>
    %884 = arith.mulf %883, %873 : vector<32x32xf32>
    %885 = arith.addf %868, %884 : vector<32x32xf32>
    %c99 = arith.constant 99 : index
    %886 = memref.load %arg6[%c99] : memref<108xf32, #tpu.memory_space<smem>>
    %887 = vector.broadcast %886 : f32 to vector<32x32xf32>
    %888 = arith.mulf %887, %873 : vector<32x32xf32>
    %889 = arith.addf %872, %888 : vector<32x32xf32>
    %c0_204 = arith.constant 0 : index
    %c0_205 = arith.constant 0 : index
    %c0_206 = arith.constant 0 : index
    %890 = vector.load %arg8[%c0_204, %c0_205, %c0_206] : memref<1x32x128xf32, #tpu.memory_space<vmem>>, vector<1x32x32xf32>
    %891 = vector.shape_cast %890 : vector<1x32x32xf32> to vector<32x32xf32>
    %892 = vector.shape_cast %877 : vector<32x32xf32> to vector<1x32x32xf32>
    tpu.vector_store %arg8[%c0_204, %c0_205, %c0_206], %892 {strides = array<i32>} : memref<1x32x128xf32, #tpu.memory_space<vmem>>, vector<1x32x32xf32>,
    %c0_207 = arith.constant 0 : index
    %c0_208 = arith.constant 0 : index
    %c32_209 = arith.constant 32 : index
    %893 = vector.load %arg8[%c0_207, %c0_208, %c32_209] : memref<1x32x128xf32, #tpu.memory_space<vmem>>, vector<1x32x32xf32>
    %894 = vector.shape_cast %893 : vector<1x32x32xf32> to vector<32x32xf32>
    %895 = vector.shape_cast %881 : vector<32x32xf32> to vector<1x32x32xf32>
    tpu.vector_store %arg8[%c0_207, %c0_208, %c32_209], %895 {strides = array<i32>} : memref<1x32x128xf32, #tpu.memory_space<vmem>>, vector<1x32x32xf32>,
    %c0_210 = arith.constant 0 : index
    %c0_211 = arith.constant 0 : index
    %c64_212 = arith.constant 64 : index
    %896 = vector.load %arg8[%c0_210, %c0_211, %c64_212] : memref<1x32x128xf32, #tpu.memory_space<vmem>>, vector<1x32x32xf32>
    %897 = vector.shape_cast %896 : vector<1x32x32xf32> to vector<32x32xf32>
    %898 = vector.shape_cast %885 : vector<32x32xf32> to vector<1x32x32xf32>
    tpu.vector_store %arg8[%c0_210, %c0_211, %c64_212], %898 {strides = array<i32>} : memref<1x32x128xf32, #tpu.memory_space<vmem>>, vector<1x32x32xf32>,
    %c0_213 = arith.constant 0 : index
    %c0_214 = arith.constant 0 : index
    %c96_215 = arith.constant 96 : index
    %899 = vector.load %arg8[%c0_213, %c0_214, %c96_215] : memref<1x32x128xf32, #tpu.memory_space<vmem>>, vector<1x32x32xf32>
    %900 = vector.shape_cast %899 : vector<1x32x32xf32> to vector<32x32xf32>
    %901 = vector.shape_cast %889 : vector<32x32xf32> to vector<1x32x32xf32>
    tpu.vector_store %arg8[%c0_213, %c0_214, %c96_215], %901 {strides = array<i32>} : memref<1x32x128xf32, #tpu.memory_space<vmem>>, vector<1x32x32xf32>,
    return
  }
  func.func @transform_0(%arg0: i32) -> (i32, i32) {
    %c0_i32 = arith.constant 0 : i32
    %c0_i32_0 = arith.constant 0 : i32
    %c0_i32_1 = arith.constant 0 : i32
    return %c0_i32, %c0_i32_0 : i32, i32
  }
  func.func @transform_1(%arg0: i32) -> (i32, i32, i32) {
    %c0_i32 = arith.constant 0 : i32
    %c0_i32_0 = arith.constant 0 : i32
    %c0_i32_1 = arith.constant 0 : i32
    %c0_i32_2 = arith.constant 0 : i32
    return %c0_i32, %c0_i32_0, %c0_i32_1 : i32, i32, i32
  }
  func.func @transform_2(%arg0: i32) -> (i32, i32) {
    %c0_i32 = arith.constant 0 : i32
    %c0_i32_0 = arith.constant 0 : i32
    %c0_i32_1 = arith.constant 0 : i32
    return %c0_i32, %c0_i32_0 : i32, i32
  }
  func.func @transform_3(%arg0: i32) -> i32 {
    %c0_i32 = arith.constant 0 : i32
    %c0_i32_0 = arith.constant 0 : i32
    return %c0_i32 : i32
  }
  func.func @transform_4(%arg0: i32) -> i32 {
    %c0_i32 = arith.constant 0 : i32
    %c0_i32_0 = arith.constant 0 : i32
    return %c0_i32 : i32
  }
  func.func @transform_5(%arg0: i32) -> i32 {
    %c0_i32 = arith.constant 0 : i32
    %c0_i32_0 = arith.constant 0 : i32
    return %c0_i32 : i32
  }
  func.func @transform_6(%arg0: i32) -> i32 {
    %c0_i32 = arith.constant 0 : i32
    %c0_i32_0 = arith.constant 0 : i32
    return %c0_i32 : i32
  }
  func.func @transform_7(%arg0: i32) -> (i32, i32, i32) {
    %c0_i32 = arith.constant 0 : i32
    %c0_i32_0 = arith.constant 0 : i32
    %c0_i32_1 = arith.constant 0 : i32
    return %arg0, %c0_i32, %c0_i32_0 : i32, i32, i32
  }
}

</mosaic_0001>

<bundles_post_ra>
// kernel: tpu_custom_call.1
= control target key start
LH: loop header
LB: loop body
LE: loop exit
PB: predicated region body
PF: predicated region fallthrough
CT: control target
= control target key end

     0   :  { %s10177_s0 = inlined_call_operand.hbm [shape: f32[2,32], index: 0, kind: input, shape index: {}]   ;;  %s10178_s1 = inlined_call_operand.hbm [shape: f32[32,32,32], index: 1, kind: input, shape index: {}]   ;;  %s10179_s2 = inlined_call_operand.hbm [shape: f32[32,32], index: 2, kind: input, shape index: {}]   ;;  %s10180_s3 = inlined_call_operand.vmem [shape: f32[27], index: 3, kind: input, shape index: {}]   ;;  %s10181_s4 = inlined_call_operand.vmem [shape: f32[3], index: 4, kind: input, shape index: {}]   ;;  %s10182_s5 = inlined_call_operand.vmem [shape: f32[108], index: 5, kind: input, shape index: {}]   ;;  %s10183_s6 = inlined_call_operand.vmem [shape: f32[4], index: 6, kind: input, shape index: {}]   ;;  %s10184_s7 = inlined_call_operand.hbm [shape: f32[2,32,128], index: 7, kind: output, shape index: {}]  }
   0x1   :  { %10235 = sst [smem:[#allocation176_spill]] %s10177_s0 }
   0x2   :  { %10236 = sst [smem:[#allocation177_spill]] %s10178_s1 }
   0x3   :  { %12 = vsyncpa [#allocation6], 0 }
   0x4   :  { %13 = vsyncpa [#allocation4], 0 }
   0x5   :  { %14 = vsyncpa [#allocation10], 0 }
   0x6   :  { %15 = vsyncpa [#allocation7], 0 }
   0x7   :  { %16 = vsyncpa [#allocation13], 0 }
   0x8   :  { %17 = vsyncpa [#allocation16], 0 }
   0x9   :  { %18 = vsyncpa [#allocation5], 0 }
   0xa   :  { %20 = vsyncpa [#allocation5 + $0x1], 0  ;;  %s5852_s24 = smov 0   ;;  %s5854_s25 = smov 0  }
   0xb   :  { %s5856_s26 = smov 0   ;;  %s5858_s27 = smov 0  }
   0xc LB: > { %s5873_s28 = sadd.s32 4294967295, %s5792_s27   ;;  %s5236_s29 = sadd.s32 4294967294, %s5792_s27   ;;  %s5792_s27 = sphi %s5858_s27, %s10821_s27   ;;  %s5788_s26 = sphi %s5856_s26, %s10820_s26   ;;  %s5784_s25 = sphi %s5854_s25, %s10819_s25   ;;  %s5780_s24 = sphi %s5852_s24, %s10818_s24  }
   0xd   : > { %s5877_s30 = sadd.s32 1, %s5792_s27   ;;  %s180_s8 = sadd.s32 1, %s5788_s26 }
   0xe   : > { %s177_s9 = ssub.s32 %s5792_s27, %s5877_s30  ;;  %p190_p0 = scmp.ne.s32.totalorder %s5788_s26, %s5784_s25 }
   0xf   : > { %p178_p1 = scmp.eq.s32.totalorder %s177_s9, 0  ;;  %p191_p2 = scmp.eq.s32.totalorder %s5873_s28, 1 }
  0x10   : > { %p196_p3 = scmp.ne.s32.totalorder %s5784_s25, %s5780_s24  ;;  %p197_p4 = scmp.eq.s32.totalorder %s5236_s29, 1 }
  0x11   : > { %s5888_s10 = scalar_select %p178_p1, %s5788_s26, %s180_s8  }
  0x12   : > { %p5890_p5 = por %p191_p2, %p190_p0  ;;  %p5894_p6 = por %p197_p4, %p196_p3 }
  0x13   : > { %p5237_p7 = scmp.ge.s32.totalorder %s5792_s27, 1  ;;  %p204_p8 = scmp.lt.s32.totalorder %s5792_s27, 3 }
  0x14   : > { %p5455_p9 = scmp.eq.s32.totalorder %s5873_s28, 0  ;;  %s264_s16 = sshll.u32 %s10181_s4, 4  ;;  %s265_s16 = int_to_ptr.vmem [resolvable:$true] %s264_s16 }
  0x15   : > { %p5901_p10 = pnand %p5237_p7, %p204_p8  ;;  %s10240_s0 = sld [smem:[#allocation176_spill]] }
  0x16   : > { %s10242_s1 = sld [smem:[#allocation177_spill]]  ;;  %s5794_s29 = smov [#allocation8]  }
  0x17   : > { %p5429_p11 = pneg %p5901_p10  ;;  %s227_s8 = sshll.u32 %s5794_s29, 4  ;;  %s228_s8 = int_to_ptr.vmem [resolvable:$true] %s227_s8 }
  0x18   : > { %s5795_s9 = smov [#allocation12]   ;;  %s5796_s14 = smov [#allocation3]  }
  0x19   : > { %p5915_p12 = pnand %p5455_p9, %p5429_p11  ;;  %s239_s18 = sshll.u32 %s10179_s2, 4  ;;  %s240_s18 = int_to_ptr.hbm [resolvable:$true] %s239_s18 }
  0x1a   : > { %s5797_s21 = smov 128   ;;  %s5798_s22 = smov 8  }
  0x1b   : > { %s216_s19 = sshll.u32 %s10240_s0, 4  ;;  %s5799_s29 = smov [#allocation9]   ;;  %s217_s19 = int_to_ptr.hbm [resolvable:$true] %s216_s19 }
  0x1c   : > { %s225_s23 = sshll.u32 %s10242_s1, 4  ;;  %s241_s0 = sshll.u32 %s5799_s29, 4  ;;  %s226_s23 = int_to_ptr.hbm [resolvable:$true] %s225_s23  ;;  %s242_s0 = int_to_ptr.vmem [resolvable:$true] %s241_s0 }
  0x1d   : > { %5444 = dma.vmem_to_smem (!%p5915_p12), %s265_s16, 16, %s5795_s9, [#allocation13]  }
  0x1e   : > { %5432 = dma.hbm_to_smem (!%p5915_p12), %s217_s19, 32, %s5796_s14, [#allocation6]  }
  0x1f   : > { %5435 = dma.hbm_to_vmem [thread:$0]  (!%p5915_p12), %s226_s23, 16384, %s228_s8, [#allocation4], %s5797_s21, %s5797_s21, %s5798_s22  }
  0x20   : > { %s254_s9 = sshll.u32 %s10180_s3, 4  ;;  %s274_s15 = sshll.u32 %s10182_s5, 4  ;;  %s255_s9 = int_to_ptr.vmem [resolvable:$true] %s254_s9  ;;  %s275_s15 = int_to_ptr.vmem [resolvable:$true] %s274_s15 }
  0x21   : > { %5438 = dma.hbm_to_vmem [thread:$0]  (!%p5915_p12), %s240_s18, 512, %s242_s0, [#allocation10], %s5797_s21, %s5797_s21, %s5798_s22  }
  0x22   : > { %s5800_s17 = smov [#allocation11]   ;;  %s5801_s23 = smov [#allocation14]  }
  0x23   : > { %5441 = dma.vmem_to_smem (!%p5915_p12), %s255_s9, 16, %s5800_s17, [#allocation7]  }
  0x24   : > { %5447 = dma.vmem_to_smem (!%p5915_p12), %s275_s15, 16, %s5801_s23, [#allocation13]  }
  0x25   : > { %s284_s1 = sshll.u32 %s10183_s6, 4  ;;  %s5802_s16 = smov [#allocation15]   ;;  %s285_s1 = int_to_ptr.vmem [resolvable:$true] %s284_s1 }
  0x26   : > { %5450 = dma.vmem_to_smem (!%p5915_p12), %s285_s1, 16, %s5802_s16, [#allocation16]  }
  0x27   : > { %297 = sbr.rel (%p5901_p10) target bundleno = 1609 (0x649), region = 48 }
  0x2c   : > { %5751 = dma.done.wait (%p5455_p9), [#allocation6], 32  }
  0x2d   : > { %5753 = vsyncadd (%p5455_p9), [#allocation6], 4294967264 }
  0x2e   : > { %5755 = dma.done.wait (%p5455_p9), [#allocation4], 16384  }
  0x2f   : > { %5757 = vsyncadd (%p5455_p9), [#allocation4], 4294950912 }
  0x30   : > { %5759 = dma.done.wait (%p5455_p9), [#allocation10], 512  }
  0x31   : > { %5761 = vsyncadd (%p5455_p9), [#allocation10], 4294966784 }
  0x32   : > { %5763 = dma.done.wait (%p5455_p9), [#allocation7], 16  }
  0x33   : > { %5765 = vsyncadd (%p5455_p9), [#allocation7], 4294967280 }
  0x34   : > { %5767 = dma.done.wait (%p5455_p9), [#allocation13], 32  }
  0x35   : > { %5769 = vsyncadd (%p5455_p9), [#allocation13], 4294967264 }
  0x36   : > { %5771 = dma.done.wait (%p5455_p9), [#allocation16], 16  }
  0x37   : > { %5773 = vsyncadd (%p5455_p9), [#allocation16], 4294967280 }
  0x38   : > { %334 = sfence }
  0x39   : > { %s5975_s0 = sshll.u32 %s5873_s28, 7  ;;  %v364_v0 = vld [vmem:[#allocation8 + $0x10] sm:$0xff]  ;;  %v362_v2 = vld [vmem:[#allocation8] sm:$0xff]  ;;  %vm931_vm0 = vcmask 1046528   ;;  %vm1007_vm1 = vcmask 1045504   ;;  %vm1703_vm2 = vcmask 277504  }
  0x3a   : > { %s361_s13 = sld [smem:[#allocation3 + %s5975_s0]]  ;;  %s375_s20 = sadd.s32 1, %s5975_s0  ;;  %v380_v1 = vld [vmem:[#allocation8 + $0x30] sm:$0xff]  ;;  %v378_v3 = vld [vmem:[#allocation8 + $0x20] sm:$0xff]  ;;  %vm1740_vm3 = vcmask 259088   ;;  %vm1708_vm4 = vcmask 271360  }
  0x3b   : > { %s376_s18 = sld [smem:[#allocation3 + %s375_s20]]  ;;  %s391_s21 = sadd.s32 2, %s5975_s0  ;;  %v358_v4 = vld [vmem:[#allocation9 + $0x10] sm:$0xff]  ;;  %v356_v7 = vld [vmem:[#allocation9] sm:$0xff]  ;;  %vm1736_vm5 = vcmask 261136   ;;  %vm5027_vm6 = vcmask 261120  }
  0x3c   : > { %s392_s22 = sld [smem:[#allocation3 + %s391_s21]]  ;;  %s407_s9 = sadd.s32 3, %s5975_s0  ;;  %v396_v6 = vld [vmem:[#allocation8 + $0x50] sm:$0xff]  ;;  %v394_v12 = vld [vmem:[#allocation8 + $0x40] sm:$0xff]  ;;  %vm5048_vm7 = vcmask 523520   ;;  %vm5069_vm8 = vcmask 785920  }
  0x3d   : > { %s408_s19 = sld [smem:[#allocation3 + %s407_s9]]  ;;  %s423_s14 = sadd.s32 4, %s5975_s0  ;;  %v412_v10 = vld [vmem:[#allocation8 + $0x70] sm:$0xff]  ;;  %v410_v16 = vld [vmem:[#allocation8 + $0x60] sm:$0xff]  ;;  %vm5090_vm9 = vcmask 1048320  }
  0x3e   : > { %s5982_s15 = sld [smem:[#allocation3 + %s423_s14]]  ;;  %s439_s17 = sadd.s32 5, %s5975_s0  ;;  %v428_v20 = vld [vmem:[#allocation8 + $0x90] sm:$0xff]  ;;  %v426_v25 = vld [vmem:[#allocation8 + $0x80] sm:$0xff] }
  0x3f   : > { %s5985_s23 = sld [smem:[#allocation3 + %s439_s17]]  ;;  %s455_s8 = sadd.s32 6, %s5975_s0  ;;  %v444_v27 = vld [vmem:[#allocation8 + $0xb0] sm:$0xff]  ;;  %v442_v32 = vld [vmem:[#allocation8 + $0xa0] sm:$0xff] }
  0x40   : > { %v5988_v5 = vstv %s361_s13  ;;  %s5990_s29 = sld [smem:[#allocation3 + %s455_s8]]  ;;  %s471_s1 = sadd.s32 7, %s5975_s0  ;;  %v460_v34 = vld [vmem:[#allocation8 + $0xd0] sm:$0xff]  ;;  %v458_v39 = vld [vmem:[#allocation8 + $0xc0] sm:$0xff] }
  0x41   : > { %v369_v8 = vmul.f32 %v5988_v5, %v364_v0  ;;  %v5994_v9 = vstv %s376_s18  ;;  %s5996_s16 = sld [smem:[#allocation3 + %s471_s1]]  ;;  %s487_s20 = sadd.s32 8, %s5975_s0  ;;  %v367_v11 = vmul.f32 %v5988_v5, %v362_v2  ;;  %v476_v41 = vld [vmem:[#allocation8 + $0xf0] sm:$0xff]  ;;  %v474_v46 = vld [vmem:[#allocation8 + $0xe0] sm:$0xff] }
  0x42   : > { %v385_v13 = vmul.f32 %v5994_v9, %v380_v1  ;;  %v6001_v14 = vstv %s392_s22  ;;  %s503_s13 = sadd.s32 9, %s5975_s0  ;;  %v383_v15 = vmul.f32 %v5994_v9, %v378_v3  ;;  %s6008_s18 = sld [smem:[#allocation3 + %s487_s20]]  ;;  %v492_v48 = vld [vmem:[#allocation8 + $0x110] sm:$0xff]  ;;  %v490_v53 = vld [vmem:[#allocation8 + $0x100] sm:$0xff] }
  0x43   : > { %v373_v17 = vadd.f32 %v369_v8, %v358_v4  ;;  %v401_v18 = vmul.f32 %v6001_v14, %v396_v6  ;;  %v6006_v19 = vstv %s408_s19  ;;  %v371_v21 = vadd.f32 %v367_v11, %v356_v7  ;;  %s519_s21 = sadd.s32 10, %s5975_s0  ;;  %s6019_s22 = sld [smem:[#allocation3 + %s503_s13]]  ;;  %v508_v55 = vld [vmem:[#allocation8 + $0x130] sm:$0xff]  ;;  %v506_v60 = vld [vmem:[#allocation8 + $0x120] sm:$0xff] }
  0x44   : > { %v417_v22 = vmul.f32 %v6006_v19, %v412_v10  ;;  %v6012_v23 = vstv %s5982_s15  ;;  %v399_v24 = vmul.f32 %v6001_v14, %v394_v12  ;;  %v415_v30 = vmul.f32 %v6006_v19, %v410_v16  ;;  %s535_s9 = sadd.s32 11, %s5975_s0  ;;  %s6027_s19 = sld [smem:[#allocation3 + %s519_s21]]  ;;  %v524_v62 = vld [vmem:[#allocation8 + $0x150] sm:$0xff]  ;;  %v522_v3 = vld [vmem:[#allocation8 + $0x140] sm:$0xff] }
  0x45   : > { %v389_v26 = vadd.f32 %v385_v13, %v373_v17  ;;  %v6017_v28 = vstv %s5985_s23  ;;  %v387_v29 = vadd.f32 %v383_v15, %v371_v21  ;;  %v433_v31 = vmul.f32 %v6012_v23, %v428_v20  ;;  %s551_s14 = sadd.s32 12, %s5975_s0  ;;  %s6035_s15 = sld [smem:[#allocation3 + %s535_s9]]  ;;  %v540_v6 = vld [vmem:[#allocation8 + $0x170] sm:$0xff]  ;;  %v538_v12 = vld [vmem:[#allocation8 + $0x160] sm:$0xff] }
  0x46   : > { %v6025_v35 = vstv %s5990_s29  ;;  %v431_v37 = vmul.f32 %v6012_v23, %v426_v25  ;;  %v449_v38 = vmul.f32 %v6017_v28, %v444_v27  ;;  %v447_v44 = vmul.f32 %v6017_v28, %v442_v32  ;;  %s567_s17 = sadd.s32 13, %s5975_s0  ;;  %s6043_s23 = sld [smem:[#allocation3 + %s551_s14]]  ;;  %v556_v15 = vld [vmem:[#allocation8 + $0x190] sm:$0xff]  ;;  %v554_v21 = vld [vmem:[#allocation8 + $0x180] sm:$0xff] }
  0x47   : > { %v405_v33 = vadd.f32 %v401_v18, %v389_v26  ;;  %v403_v36 = vadd.f32 %v399_v24, %v387_v29  ;;  %v6033_v42 = vstv %s5996_s16  ;;  %v465_v45 = vmul.f32 %v6025_v35, %v460_v34  ;;  %s583_s8 = sadd.s32 14, %s5975_s0  ;;  %s6051_s29 = sld [smem:[#allocation3 + %s567_s17]]  ;;  %v572_v24 = vld [vmem:[#allocation8 + $0x1b0] sm:$0xff] }
  0x48   : > { %v6041_v49 = vstv %s6008_s18  ;;  %v463_v51 = vmul.f32 %v6025_v35, %v458_v39  ;;  %v481_v52 = vmul.f32 %v6033_v42, %v476_v41  ;;  %v479_v58 = vmul.f32 %v6033_v42, %v474_v46  ;;  %s599_s1 = sadd.s32 15, %s5975_s0  ;;  %s6059_s16 = sld [smem:[#allocation3 + %s583_s8]]  ;;  %v588_v32 = vld [vmem:[#allocation8 + $0x1d0] sm:$0xff] }
  0x49   : > { %v421_v40 = vadd.f32 %v417_v22, %v405_v33  ;;  %v419_v43 = vadd.f32 %v415_v30, %v403_v36  ;;  %v6049_v56 = vstv %s6019_s22  ;;  %v497_v59 = vmul.f32 %v6041_v49, %v492_v48  ;;  %s615_s20 = sadd.s32 16, %s5975_s0  ;;  %s631_s13 = sadd.s32 17, %s5975_s0  ;;  %v570_v30 = vld [vmem:[#allocation8 + $0x1a0] sm:$0xff] }
  0x4a   : > { %v6057_v63 = vstv %s6027_s19  ;;  %v495_v1 = vmul.f32 %v6041_v49, %v490_v53  ;;  %v513_v2 = vmul.f32 %v6049_v56, %v508_v55  ;;  %s6068_s18 = sld [smem:[#allocation3 + %s599_s1]]  ;;  %s647_s21 = sadd.s32 18, %s5975_s0  ;;  %v511_v10 = vmul.f32 %v6049_v56, %v506_v60  ;;  %v618_v55 = vld [vmem:[#allocation8 + $0x200] sm:$0xff] }
  0x4b   : > { %v437_v47 = vadd.f32 %v433_v31, %v421_v40  ;;  %v435_v50 = vadd.f32 %v431_v37, %v419_v43  ;;  %v6066_v7 = vstv %s6035_s15  ;;  %v529_v11 = vmul.f32 %v6057_v63, %v524_v62  ;;  %s6073_s22 = sld [smem:[#allocation3 + %s615_s20]]  ;;  %s663_s9 = sadd.s32 19, %s5975_s0  ;;  %v604_v40 = vld [vmem:[#allocation8 + $0x1f0] sm:$0xff] }
  0x4c   : > { %v6077_v16 = vstv %s6043_s23  ;;  %s6079_s19 = sld [smem:[#allocation3 + %s631_s13]]  ;;  %s679_s14 = sadd.s32 20, %s5975_s0  ;;  %v527_v18 = vmul.f32 %v6057_v63, %v522_v3  ;;  %v545_v20 = vmul.f32 %v6066_v7, %v540_v6  ;;  %v543_v27 = vmul.f32 %v6066_v7, %v538_v12  ;;  %v650_v3 = vld [vmem:[#allocation8 + $0x240] sm:$0xff] }
  0x4d   : > { %v453_v54 = vadd.f32 %v449_v38, %v437_v47  ;;  %v451_v57 = vadd.f32 %v447_v44, %v435_v50  ;;  %s6084_s15 = sld [smem:[#allocation3 + %s647_s21]]  ;;  %s695_s17 = sadd.s32 21, %s5975_s0  ;;  %v6088_v25 = vstv %s6051_s29  ;;  %v561_v29 = vmul.f32 %v6077_v16, %v556_v15  ;;  %v586_v38 = vld [vmem:[#allocation8 + $0x1c0] sm:$0xff]  ;;  %v620_v47 = vld [vmem:[#allocation8 + $0x210] sm:$0xff]  ;;  %v381_v15 = vld [vmem:[#allocation8 + $0x38] sm:$0xff] }
  0x4e   : > { %s6090_s23 = sld [smem:[#allocation3 + %s663_s9]]  ;;  %v6097_v33 = vstv %s6059_s16  ;;  %s711_s29 = sadd.s32 22, %s5975_s0  ;;  %v559_v36 = vmul.f32 %v6077_v16, %v554_v21  ;;  %v577_v37 = vmul.f32 %v6088_v25, %v572_v24  ;;  %v575_v44 = vmul.f32 %v6088_v25, %v570_v30  ;;  %v666_v12 = vld [vmem:[#allocation8 + $0x260] sm:$0xff]  ;;  %v700_v21 = vld [vmem:[#allocation8 + $0x2b0] sm:$0xff] }
  0x4f   : > { %v469_v61 = vadd.f32 %v465_v45, %v453_v54  ;;  %v467_v0 = vadd.f32 %v463_v51, %v451_v57  ;;  %s6094_s8 = sld [smem:[#allocation3 + %s679_s14]]  ;;  %s727_s20 = sadd.s32 23, %s5975_s0  ;;  %v602_v45 = vld [vmem:[#allocation8 + $0x1e0] sm:$0xff]  ;;  %v593_v46 = vmul.f32 %v6097_v33, %v588_v32  ;;  %v636_v51 = vld [vmem:[#allocation8 + $0x230] sm:$0xff]  ;;  %v591_v54 = vmul.f32 %v6097_v33, %v586_v38 }
  0x50   : > { %s6099_s1 = sld [smem:[#allocation3 + %s695_s17]]  ;;  %v6106_v41 = vstv %s6068_s18  ;;  %s743_s13 = sadd.s32 24, %s5975_s0  ;;  %v634_v57 = vld [vmem:[#allocation8 + $0x220] sm:$0xff] }
  0x51   : > { %v485_v4 = vadd.f32 %v481_v52, %v469_v61  ;;  %v483_v8 = vadd.f32 %v479_v58, %v467_v0  ;;  %v6112_v48 = vstv %s6073_s22  ;;  %s6114_s16 = sld [smem:[#allocation3 + %s711_s29]]  ;;  %s759_s21 = sadd.s32 25, %s5975_s0  ;;  %v609_v58 = vmul.f32 %v6106_v41, %v604_v40  ;;  %v668_v0 = vld [vmem:[#allocation8 + $0x270] sm:$0xff]  ;;  %v698_v38 = vld [vmem:[#allocation8 + $0x2a0] sm:$0xff]  ;;  %v413_v40 = vld [vmem:[#allocation8 + $0x78] sm:$0xff] }
  0x52   : > { %v6118_v52 = vstv %s6079_s19  ;;  %s6120_s18 = sld [smem:[#allocation3 + %s727_s20]]  ;;  %v607_v60 = vmul.f32 %v6106_v41, %v602_v45  ;;  %v625_v6 = vmul.f32 %v6112_v48, %v620_v47  ;;  %s775_s19 = sadd.s32 26, %s5975_s0 }
  0x53   : > { %v501_v13 = vadd.f32 %v497_v59, %v485_v4  ;;  %v499_v17 = vadd.f32 %v495_v1, %v483_v8  ;;  %v652_v59 = vld [vmem:[#allocation8 + $0x250] sm:$0xff]  ;;  %s6124_s22 = sld [smem:[#allocation3 + %s743_s13]]  ;;  %v6128_v62 = vstv %s6084_s15  ;;  %v365_v4 = vld [vmem:[#allocation8 + $0x18] sm:$0xff]  ;;  %v641_v8 = vmul.f32 %v6118_v52, %v636_v51  ;;  %s791_s14 = sadd.s32 27, %s5975_s0 }
  0x54   : > { %v6131_v1 = vstv %s6090_s23  ;;  %s6133_s9 = sld [smem:[#allocation3 + %s759_s21]]  ;;  %v655_v30 = vmul.f32 %v6128_v62, %v650_v3  ;;  %s807_s23 = sadd.s32 28, %s5975_s0 }
  0x55   : > { %v517_v22 = vadd.f32 %v513_v2, %v501_v13  ;;  %v515_v26 = vadd.f32 %v511_v10, %v499_v17  ;;  %v623_v10 = vmul.f32 %v6112_v48, %v618_v55  ;;  %v359_v13 = vld [vmem:[#allocation9 + $0x18] sm:$0xff]  ;;  %s6151_s15 = sld [smem:[#allocation3 + %s775_s19]]  ;;  %s839_s20 = sadd.s32 30, %s5975_s0 }
  0x56   : > { %s6159_s17 = sld [smem:[#allocation3 + %s791_s14]]  ;;  %s855_s13 = sadd.s32 31, %s5975_s0 }
  0x57   : > { %v533_v31 = vadd.f32 %v529_v11, %v517_v22  ;;  %v531_v34 = vadd.f32 %v527_v18, %v515_v26  ;;  %v639_v11 = vmul.f32 %v6118_v52, %v634_v57  ;;  %v684_v18 = vld [vmem:[#allocation8 + $0x290] sm:$0xff]  ;;  %v6144_v22 = vstv %s6099_s1  ;;  %v397_v26 = vld [vmem:[#allocation8 + $0x58] sm:$0xff]  ;;  %s6184_s1 = sld [smem:[#allocation3 + %s807_s23]] }
  0x58   : > { %v6163_v51 = vstv %s6114_s16  ;;  %v429_v57 = vld [vmem:[#allocation8 + $0x98] sm:$0xff]  ;;  %s6218_s16 = sld [smem:[#allocation3 + %s839_s20]]  ;;  %s5804_s20 = smov 126  }
  0x59   : > { %v549_v39 = vadd.f32 %v545_v20, %v533_v31  ;;  %v547_v43 = vadd.f32 %v543_v27, %v531_v34  ;;  %v6141_v20 = vstv %s6094_s8  ;;  %v657_v27 = vmul.f32 %v6128_v62, %v652_v59  ;;  %s823_s8 = sadd.s32 29, %s5975_s0  ;;  %s6228_s0 = sld [smem:[#allocation3 + %s855_s13]] }
  0x5a   : > { %v370_v31 = vmul.f32 %v5988_v5, %v365_v4  ;;  %v703_v59 = vmul.f32 %v6144_v22, %v698_v38  ;;  %v748_v4 = vld [vmem:[#allocation8 + $0x310] sm:$0xff]  ;;  %s6194_s29 = sld [smem:[#allocation3 + %s823_s8]] }
  0x5b   : > { %v565_v50 = vadd.f32 %v561_v29, %v549_v39  ;;  %v563_v53 = vadd.f32 %v559_v36, %v547_v43  ;;  %v673_v29 = vmul.f32 %v6131_v1, %v668_v0  ;;  %v671_v36 = vmul.f32 %v6131_v1, %v666_v12  ;;  %v764_v12 = vld [vmem:[#allocation8 + $0x330] sm:$0xff]  ;;  %s6276_s21 = sld [smem:[#allocation11 + $0x1]] }
  0x5c   : > { %v386_v39 = vmul.f32 %v5994_v9, %v381_v15  ;;  %v689_v43 = vmul.f32 %v6141_v20, %v684_v18  ;;  %v374_v45 = vadd.f32 %v370_v31, %v359_v13  ;;  %v6176_v13 = vstv %s6133_s9  ;;  %v445_v15 = vld [vmem:[#allocation8 + $0xb8] sm:$0xff]  ;;  %v379_v31 = vld [vmem:[#allocation8 + $0x28] sm:$0xff]  ;;  %s5265_s9 = sld [smem:[#allocation11 + $0x13]] }
  0x5d   : > { %v581_v61 = vadd.f32 %v577_v37, %v565_v50  ;;  %v579_v2 = vadd.f32 %v575_v44, %v563_v53  ;;  %v682_v37 = vld [vmem:[#allocation8 + $0x280] sm:$0xff]  ;;  %v6157_v44 = vmul.f32 %v6144_v22, %v700_v21  ;;  %v716_v50 = vld [vmem:[#allocation8 + $0x2d0] sm:$0xff]  ;;  %s5267_s19 = sld [smem:[#allocation11 + $0xd]] }
  0x5e   : > { %v732_v53 = vld [vmem:[#allocation8 + $0x2f0] sm:$0xff]  ;;  %v390_v0 = vadd.f32 %v386_v39, %v374_v45  ;;  %v6192_v39 = vmul.f32 %v6176_v13, %v764_v12  ;;  %v357_v45 = vld [vmem:[#allocation9 + $0x8] sm:$0xff]  ;;  %s5268_s14 = sld [smem:[#allocation11 + $0x16]] }
  0x5f   : > { %v597_v17 = vadd.f32 %v593_v46, %v581_v61  ;;  %v595_v24 = vadd.f32 %v591_v54, %v579_v2  ;;  %v402_v46 = vmul.f32 %v6001_v14, %v397_v26  ;;  %v6166_v54 = vstv %s6120_s18  ;;  %v730_v61 = vld [vmem:[#allocation8 + $0x2e0] sm:$0xff]  ;;  %v363_v26 = vld [vmem:[#allocation8 + $0x8] sm:$0xff]  ;;  %s6279_s18 = sld [smem:[#allocation11 + $0xa]] }
  0x60   : > { %v418_v2 = vmul.f32 %v6006_v19, %v413_v40  ;;  %v6181_v18 = vmul.f32 %v6166_v54, %v732_v53  ;;  %v762_v53 = vld [vmem:[#allocation8 + $0x320] sm:$0xff]  ;;  %s5271_s23 = sld [smem:[#allocation11 + $0x19]] }
  0x61   : > { %v613_v32 = vadd.f32 %v609_v58, %v597_v17  ;;  %v611_v34 = vadd.f32 %v607_v60, %v595_v24  ;;  %v687_v58 = vmul.f32 %v6141_v20, %v682_v37  ;;  %v714_v60 = vld [vmem:[#allocation8 + $0x2c0] sm:$0xff]  ;;  %v721_v17 = vmul.f32 %v6163_v51, %v716_v50  ;;  %s5269_s8 = sld [smem:[#allocation11 + $0x7]] }
  0x62   : > { %v406_v21 = vadd.f32 %v402_v46, %v390_v0  ;;  %v434_v24 = vmul.f32 %v6012_v23, %v429_v57  ;;  %v735_v37 = vmul.f32 %v6166_v54, %v730_v61  ;;  %v746_v50 = vld [vmem:[#allocation8 + $0x300] sm:$0xff]  ;;  %v368_v57 = vmul.f32 %v5988_v5, %v363_v26  ;;  %s5274_s13 = sld [smem:[#allocation11 + $0x14]] }
  0x63   : > { %v629_v47 = vadd.f32 %v625_v6, %v613_v32  ;;  %v627_v55 = vadd.f32 %v623_v10, %v611_v34  ;;  %v6173_v6 = vstv %s6124_s22  ;;  %v719_v34 = vmul.f32 %v6163_v51, %v714_v60  ;;  %s5803_s22 = smov 127  }
  0x64   : > { %v6189_v38 = vmul.f32 %v6173_v6, %v748_v4  ;;  %v422_v40 = vadd.f32 %v418_v2, %v406_v21  ;;  %v384_v60 = vmul.f32 %v5994_v9, %v379_v31  ;;  %v6200_v61 = vstv %s6151_s15  ;;  %v411_v4 = vld [vmem:[#allocation8 + $0x68] sm:$0xff]  ;;  %s5270_s15 = sld [smem:[#allocation11 + $0x10]] }
  0x65   : > { %v645_v3 = vadd.f32 %v641_v8, %v629_v47  ;;  %v643_v10 = vadd.f32 %v639_v11, %v627_v55  ;;  %v461_v11 = vld [vmem:[#allocation8 + $0xd8] sm:$0xff]  ;;  %v6203_v0 = vstv %s6159_s17  ;;  %v372_v21 = vadd.f32 %v368_v57, %v357_v45  ;;  %s5266_s17 = sld [smem:[#allocation11 + $0x4]] }
  0x66   : > { %v477_v55 = vld [vmem:[#allocation8 + $0xf8] sm:$0xff]  ;;  %v466_v2 = vmul.f32 %v6025_v35, %v461_v11  ;;  %v751_v9 = vmul.f32 %v6173_v6, %v746_v50  ;;  %v767_v26 = vmul.f32 %v6176_v13, %v762_v53  ;;  %v794_v50 = vld [vmem:[#allocation8 + $0x360] sm:$0xff] }
  0x67   : > { %v661_v8 = vadd.f32 %v657_v27, %v645_v3  ;;  %v659_v32 = vadd.f32 %v655_v30, %v643_v10  ;;  %v450_v27 = vmul.f32 %v6017_v28, %v445_v15  ;;  %v395_v30 = vld [vmem:[#allocation8 + $0x48] sm:$0xff]  ;;  %v438_v3 = vadd.f32 %v434_v24, %v422_v40  ;;  %v780_v10 = vld [vmem:[#allocation8 + $0x350] sm:$0xff]  ;;  %v493_v15 = vld [vmem:[#allocation8 + $0x118] sm:$0xff] }
  0x68   : > { %v400_v5 = vmul.f32 %v6001_v14, %v395_v30  ;;  %v482_v24 = vmul.f32 %v6033_v42, %v477_v55  ;;  %v509_v11 = vld [vmem:[#allocation8 + $0x138] sm:$0xff]  ;;  %v388_v40 = vadd.f32 %v384_v60, %v372_v21  ;;  %v785_v14 = vmul.f32 %v6200_v61, %v780_v10 }
  0x69   : > { %v677_v46 = vadd.f32 %v673_v29, %v661_v8  ;;  %v675_v47 = vadd.f32 %v671_v36, %v659_v32  ;;  %v796_v29 = vld [vmem:[#allocation8 + $0x370] sm:$0xff]  ;;  %v454_v31 = vadd.f32 %v450_v27, %v438_v3  ;;  %v427_v8 = vld [vmem:[#allocation8 + $0x88] sm:$0xff]  ;;  %v498_v30 = vmul.f32 %v6041_v49, %v493_v15  ;;  %v525_v53 = vld [vmem:[#allocation8 + $0x158] sm:$0xff] }
  0x6a   : > { %v6216_v45 = vmul.f32 %v6203_v0, %v796_v29  ;;  %v404_v55 = vadd.f32 %v400_v5, %v388_v40  ;;  %v432_v57 = vmul.f32 %v6012_v23, %v427_v8  ;;  %v6226_v60 = vstv %s6194_s29  ;;  %v541_v29 = vld [vmem:[#allocation8 + $0x178] sm:$0xff]  ;;  %s5273_s29 = sld [smem:[#allocation11 + $0xb]] }
  0x6b   : > { %v693_v12 = vadd.f32 %v689_v43, %v677_v46  ;;  %v691_v36 = vadd.f32 %v687_v58, %v675_v47  ;;  %v416_v58 = vmul.f32 %v6006_v19, %v411_v4  ;;  %v470_v27 = vadd.f32 %v466_v2, %v454_v31  ;;  %v443_v46 = vld [vmem:[#allocation8 + $0xa8] sm:$0xff] }
  0x6c   : > { %v6223_v19 = vstv %s6184_s1  ;;  %v514_v2 = vmul.f32 %v6049_v56, %v509_v11  ;;  %v459_v4 = vld [vmem:[#allocation8 + $0xc8] sm:$0xff]  ;;  %v448_v15 = vmul.f32 %v6017_v28, %v443_v46  ;;  %v799_v21 = vmul.f32 %v6203_v0, %v794_v50  ;;  %s5272_s1 = sld [smem:[#allocation11 + $0x2]] }
  0x6d   : > { %v709_v32 = vadd.f32 %v6157_v44, %v693_v12  ;;  %v707_v43 = vadd.f32 %v703_v59, %v691_v36  ;;  %v778_v59 = vld [vmem:[#allocation8 + $0x340] sm:$0xff]  ;;  %v486_v3 = vadd.f32 %v482_v24, %v470_v27  ;;  %v420_v36 = vadd.f32 %v416_v58, %v404_v55  ;;  %v475_v24 = vld [vmem:[#allocation8 + $0xe8] sm:$0xff] }
  0x6e   : > { %v783_v23 = vmul.f32 %v6200_v61, %v778_v59  ;;  %v530_v31 = vmul.f32 %v6057_v63, %v525_v53  ;;  %v546_v27 = vmul.f32 %v6066_v7, %v541_v29  ;;  %v480_v59 = vmul.f32 %v6033_v42, %v475_v24  ;;  %v605_v24 = vld [vmem:[#allocation8 + $0x1f8] sm:$0xff] }
  0x6f   : > { %v725_v44 = vadd.f32 %v721_v17, %v709_v32  ;;  %v723_v47 = vadd.f32 %v719_v34, %v707_v43  ;;  %v812_v17 = vld [vmem:[#allocation8 + $0x390] sm:$0xff]  ;;  %v502_v5 = vadd.f32 %v498_v30, %v486_v3  ;;  %v557_v43 = vld [vmem:[#allocation8 + $0x198] sm:$0xff]  ;;  %v436_v11 = vadd.f32 %v432_v57, %v420_v36  ;;  %v491_v30 = vld [vmem:[#allocation8 + $0x108] sm:$0xff] }
  0x70   : > { %v828_v34 = vld [vmem:[#allocation8 + $0x3b0] sm:$0xff]  ;;  %v817_v40 = vmul.f32 %v6223_v19, %v812_v17  ;;  %v6244_v50 = vstv %s6218_s16  ;;  %v562_v55 = vmul.f32 %v6077_v16, %v557_v43  ;;  %v507_v57 = vld [vmem:[#allocation8 + $0x128] sm:$0xff]  ;;  %v496_v17 = vmul.f32 %v6041_v49, %v491_v30  ;;  %s5275_s16 = sld [smem:[#allocation11 + $0x5]] }
  0x71   : > { %v741_v12 = vadd.f32 %v6181_v18, %v725_v44  ;;  %v739_v10 = vadd.f32 %v735_v37, %v723_v47  ;;  %v810_v18 = vld [vmem:[#allocation8 + $0x380] sm:$0xff]  ;;  %v464_v37 = vmul.f32 %v6025_v35, %v459_v4  ;;  %v833_v28 = vmul.f32 %v6226_v60, %v828_v34  ;;  %v523_v36 = vld [vmem:[#allocation8 + $0x148] sm:$0xff] }
  0x72   : > { %v518_v58 = vadd.f32 %v514_v2, %v502_v5  ;;  %v826_v47 = vld [vmem:[#allocation8 + $0x3a0] sm:$0xff]  ;;  %v815_v35 = vmul.f32 %v6223_v19, %v810_v18  ;;  %v844_v2 = vld [vmem:[#allocation8 + $0x3d0] sm:$0xff]  ;;  %v6250_v34 = vstv %s6228_s0  ;;  %s5276_s0 = sld [smem:[#allocation11 + $0xe]] }
  0x73   : > { %v757_v8 = vadd.f32 %v6189_v38, %v741_v12  ;;  %v755_v32 = vadd.f32 %v751_v9, %v739_v10  ;;  %v573_v38 = vld [vmem:[#allocation8 + $0x1b8] sm:$0xff]  ;;  %v452_v9 = vadd.f32 %v448_v15, %v436_v11  ;;  %v842_v12 = vld [vmem:[#allocation8 + $0x3c0] sm:$0xff]  ;;  %v831_v42 = vmul.f32 %v6226_v60, %v826_v47  ;;  %v860_v5 = vld [vmem:[#allocation8 + $0x3f0] sm:$0xff] }
  0x74   : > { %v534_v53 = vadd.f32 %v530_v31, %v518_v58  ;;  %v578_v29 = vmul.f32 %v6088_v25, %v573_v38  ;;  %v847_v49 = vmul.f32 %v6244_v50, %v842_v12  ;;  %v539_v11 = vld [vmem:[#allocation8 + $0x168] sm:$0xff] }
  0x75   : > { %v773_v46 = vadd.f32 %v6192_v39, %v757_v8  ;;  %v771_v44 = vadd.f32 %v767_v26, %v755_v32  ;;  %v589_v39 = vld [vmem:[#allocation8 + $0x1d8] sm:$0xff]  ;;  %v468_v26 = vadd.f32 %v464_v37, %v452_v9  ;;  %v512_v8 = vmul.f32 %v6049_v56, %v507_v57  ;;  %v555_v47 = vld [vmem:[#allocation8 + $0x188] sm:$0xff] }
  0x76   : > { %v550_v10 = vadd.f32 %v546_v27, %v534_v53  ;;  %v849_v32 = vmul.f32 %v6244_v50, %v844_v2  ;;  %v594_v43 = vmul.f32 %v6097_v33, %v589_v39  ;;  %v621_v27 = vld [vmem:[#allocation8 + $0x218] sm:$0xff]  ;;  %v610_v56 = vmul.f32 %v6106_v41, %v605_v24  ;;  %v571_v57 = vld [vmem:[#allocation8 + $0x1a8] sm:$0xff] }
  0x77   : > { %v789_v3 = vadd.f32 %v785_v14, %v773_v46  ;;  %v787_v4 = vadd.f32 %v783_v23, %v771_v44  ;;  %v858_v14 = vld [vmem:[#allocation8 + $0x3e0] sm:$0xff]  ;;  %v484_v23 = vadd.f32 %v480_v59, %v468_v26  ;;  %v637_v59 = vld [vmem:[#allocation8 + $0x238] sm:$0xff]  ;;  %v560_v12 = vmul.f32 %v6077_v16, %v555_v47 }
  0x78   : > { %v566_v18 = vadd.f32 %v562_v55, %v550_v10  ;;  %v863_v46 = vmul.f32 %v6250_v34, %v858_v14  ;;  %v544_v55 = vmul.f32 %v6066_v7, %v539_v11  ;;  %v653_v2 = vld [vmem:[#allocation8 + $0x258] sm:$0xff]  ;;  %v642_v26 = vmul.f32 %v6118_v52, %v637_v59 }
  0x79   : > { %v805_v15 = vadd.f32 %v6216_v45, %v789_v3  ;;  %v803_v31 = vadd.f32 %v799_v21, %v787_v4  ;;  %v500_v30 = vadd.f32 %v496_v17, %v484_v23  ;;  %v528_v45 = vmul.f32 %v6057_v63, %v523_v36  ;;  %v587_v17 = vld [vmem:[#allocation8 + $0x1c8] sm:$0xff]  ;;  %v669_v10 = vld [vmem:[#allocation8 + $0x278] sm:$0xff] }
  0x7a   : > { %v865_v21 = vmul.f32 %v6250_v34, %v860_v5  ;;  %v582_v44 = vadd.f32 %v578_v29, %v566_v18  ;;  %v576_v7 = vmul.f32 %v6088_v25, %v571_v57  ;;  %v603_v5 = vld [vmem:[#allocation8 + $0x1e8] sm:$0xff]  ;;  %v685_v24 = vld [vmem:[#allocation8 + $0x298] sm:$0xff]  ;;  %v592_v23 = vmul.f32 %v6097_v33, %v587_v17 }
  0x7b   : > { %v821_v37 = vadd.f32 %v817_v40, %v805_v15  ;;  %v819_v58 = vadd.f32 %v815_v35, %v803_v31  ;;  %v516_v53 = vadd.f32 %v512_v8, %v500_v30  ;;  %v626_v35 = vmul.f32 %v6112_v48, %v621_v27  ;;  %v701_v18 = vld [vmem:[#allocation8 + $0x2b8] sm:$0xff] }
  0x7c   : > { %v598_v40 = vadd.f32 %v594_v43, %v582_v44  ;;  %v658_v15 = vmul.f32 %v6128_v62, %v653_v2  ;;  %v608_v25 = vmul.f32 %v6106_v41, %v603_v5  ;;  %v717_v27 = vld [vmem:[#allocation8 + $0x2d8] sm:$0xff] }
  0x7d   : > { %v837_v38 = vadd.f32 %v833_v28, %v821_v37  ;;  %v835_v9 = vadd.f32 %v831_v42, %v819_v58  ;;  %v532_v4 = vadd.f32 %v528_v45, %v516_v53  ;;  %v690_v37 = vmul.f32 %v6141_v20, %v685_v24  ;;  %v635_v58 = vld [vmem:[#allocation8 + $0x228] sm:$0xff]  ;;  %v733_v44 = vld [vmem:[#allocation8 + $0x2f8] sm:$0xff] }
  0x7e   : > { %v614_v39 = vadd.f32 %v610_v56, %v598_v40  ;;  %v640_v41 = vmul.f32 %v6118_v52, %v635_v58  ;;  %v749_v53 = vld [vmem:[#allocation8 + $0x318] sm:$0xff] }
  0x7f   : > { %v853_v3 = vadd.f32 %v849_v32, %v837_v38  ;;  %v851_v63 = vadd.f32 %v847_v49, %v835_v9  ;;  %v548_v29 = vadd.f32 %v544_v55, %v532_v4  ;;  %v674_v32 = vmul.f32 %v6131_v1, %v669_v10  ;;  %v619_v49 = vld [vmem:[#allocation8 + $0x208] sm:$0xff]  ;;  %v765_v4 = vld [vmem:[#allocation8 + $0x338] sm:$0xff] }
  0x80   : > { %v630_v36 = vadd.f32 %v626_v35, %v614_v39  ;;  %v624_v33 = vmul.f32 %v6112_v48, %v619_v49  ;;  %v722_v38 = vmul.f32 %v6163_v51, %v717_v27  ;;  %v667_v9 = vld [vmem:[#allocation8 + $0x268] sm:$0xff]  ;;  %v754_v17 = vmul.f32 %v6173_v6, %v749_v53 }
  0x81   : > { %v869_v28 = vadd.f32 %v865_v21, %v853_v3  ;;  %v6267_v42 = vadd.f32 %v863_v46, %v851_v63  ;;  %v564_v16 = vadd.f32 %v560_v12, %v548_v29  ;;  %v706_v21 = vmul.f32 %v6144_v22, %v701_v18  ;;  %v651_v46 = vld [vmem:[#allocation8 + $0x248] sm:$0xff] }
  0x82   : > { %v646_v8 = vadd.f32 %v642_v26, %v630_v36  ;;  %v656_v48 = vmul.f32 %v6128_v62, %v651_v46  ;;  %v738_v3 = vmul.f32 %v6166_v54, %v733_v44  ;;  %v683_v63 = vld [vmem:[#allocation8 + $0x288] sm:$0xff]  ;;  %v672_v12 = vmul.f32 %v6131_v1, %v667_v9 }
  0x83   : > { %v873_v31 = vmul.f32 0.5, %v869_v28  ;;  %v871_v14 = vmul.f32 0.5, %v6267_v42  ;;  %v580_v43 = vadd.f32 %v576_v7, %v564_v16  ;;  %v699_v10 = vld [vmem:[#allocation8 + $0x2a8] sm:$0xff]  ;;  %v6289_v29 = vstv %s6276_s21  ;;  %v781_v7 = vld [vmem:[#allocation8 + $0x358] sm:$0xff]  ;;  %s5277_s21 = sld [smem:[#allocation11 + $0x17]] }
  0x84   : > { %v662_v11 = vadd.f32 %v658_v15, %v646_v8  ;;  %v688_v15 = vmul.f32 %v6141_v20, %v683_v63  ;;  %v770_v24 = vmul.f32 %v6176_v13, %v765_v4  ;;  %v715_v1 = vld [vmem:[#allocation8 + $0x2c8] sm:$0xff]  ;;  %v786_v20 = vmul.f32 %v6200_v61, %v781_v7 }
  0x85   : > { %5520 = vtanh.f32 %v873_v31  ;;  %v596_v30 = vadd.f32 %v592_v23, %v580_v43  ;;  %v6295_v31 = vstv %s6279_s18  ;;  %v797_v23 = vld [vmem:[#allocation8 + $0x378] sm:$0xff]  ;;  %v747_v27 = vld [vmem:[#allocation8 + $0x308] sm:$0xff]  ;;  %s5278_s18 = sld [smem:[#allocation11 + $0x8]] }
  0x86   : > { %5522 = vtanh.f32 %v871_v14  ;;  %v678_v45 = vadd.f32 %v674_v32, %v662_v11  ;;  %v704_v32 = vmul.f32 %v6144_v22, %v699_v10  ;;  %v813_v11 = vld [vmem:[#allocation8 + $0x398] sm:$0xff]  ;;  %v802_v58 = vmul.f32 %v6203_v0, %v797_v23  ;;  %v763_v44 = vld [vmem:[#allocation8 + $0x328] sm:$0xff] }
  0x87   : > { %v612_v56 = vadd.f32 %v608_v25, %v596_v30  ;;  %v829_v30 = vld [vmem:[#allocation8 + $0x3b8] sm:$0xff]  ;;  %v818_v46 = vmul.f32 %v6223_v19, %v813_v11  ;;  %v779_v9 = vld [vmem:[#allocation8 + $0x348] sm:$0xff]  ;;  %v1126_v11 = vstv %s5265_s9  ;;  %s5279_s9 = sld [smem:[#allocation11 + $0x11]] }
  0x88   : > { %v694_v47 = vadd.f32 %v690_v37, %v678_v45  ;;  %v720_v37 = vmul.f32 %v6163_v51, %v715_v1  ;;  %v845_v51 = vld [vmem:[#allocation8 + $0x3d8] sm:$0xff] }
  0x89   : > { %v628_v55 = vadd.f32 %v624_v33, %v612_v56 }
  0x8a   : > { %v710_v57 = vadd.f32 %v706_v21, %v694_v47 }
  0x8b   : > { %v5521_v59 = vpop.eup %5520  ;;  %v644_v52 = vadd.f32 %v640_v41, %v628_v55  ;;  %v752_v41 = vmul.f32 %v6173_v6, %v747_v27  ;;  %v768_v55 = vmul.f32 %v6176_v13, %v763_v44 }
  0x8c   : > { %v5523_v40 = vpop.eup %5522  ;;  %v881_v35 = vadd.f32 1.0, %v5521_v59  ;;  %v726_v26 = vadd.f32 %v722_v38, %v710_v57  ;;  %v834_v38 = vmul.f32 %v6226_v60, %v829_v30  ;;  %v861_v59 = vld [vmem:[#allocation8 + $0x3f8] sm:$0xff]  ;;  %v784_v57 = vmul.f32 %v6200_v61, %v779_v9 }
  0x8d   : > { %v879_v2 = vadd.f32 1.0, %v5523_v40  ;;  %v660_v36 = vadd.f32 %v656_v48, %v644_v52  ;;  %v850_v40 = vmul.f32 %v6244_v50, %v845_v51  ;;  %v866_v63 = vmul.f32 %v6250_v34, %v861_v59 }
  0x8e   : > { %v885_v39 = vmul.f32 0.5, %v881_v35  ;;  %v742_v14 = vadd.f32 %v738_v3, %v726_v26 }
  0x8f   : > { %v883_v62 = vmul.f32 0.5, %v879_v2  ;;  %v676_v8 = vadd.f32 %v672_v12, %v660_v36  ;;  %v811_v2 = vld [vmem:[#allocation8 + $0x388] sm:$0xff] }
  0x90   : > { %v6292_v5 = vmul.f32 %v885_v39, %v869_v28  ;;  %v758_v18 = vadd.f32 %v754_v17, %v742_v14  ;;  %v731_v28 = vld [vmem:[#allocation8 + $0x2e8] sm:$0xff]  ;;  %v816_v26 = vmul.f32 %v6223_v19, %v811_v2 }
  0x91   : > { %v6299_v16 = vmul.f32 %v883_v62, %v6267_v42  ;;  %v692_v42 = vadd.f32 %v688_v15, %v676_v8  ;;  %v736_v45 = vmul.f32 %v6166_v54, %v731_v28  ;;  %v795_v54 = vld [vmem:[#allocation8 + $0x368] sm:$0xff] }
  0x92   : > { %v1077_v49 = vmul.f32 %v6289_v29, %v6292_v5  ;;  %v774_v22 = vadd.f32 %v770_v24, %v758_v18  ;;  %v800_v4 = vmul.f32 %v6203_v0, %v795_v54  ;;  %v827_v12 = vld [vmem:[#allocation8 + $0x3a8] sm:$0xff] }
  0x93   : > { %v1101_v43 = vmul.f32 %v6295_v31, %v6299_v16  ;;  %v1075_v25 = vmul.f32 %v6289_v29, %v6299_v16  ;;  %v708_v33 = vadd.f32 %v704_v32, %v692_v42  ;;  %v843_v17 = vld [vmem:[#allocation8 + $0x3c8] sm:$0xff]  ;;  %v832_v62 = vmul.f32 %v6226_v60, %v827_v12 }
  0x94   : > { %1087 = vrot.lane.b32.xlu1 %v1077_v49, %s5803_s22  ;;  %v790_v21 = vadd.f32 %v786_v20, %v774_v22  ;;  %v859_v36 = vld [vmem:[#allocation8 + $0x3e8] sm:$0xff]  ;;  %v848_v15 = vmul.f32 %v6244_v50, %v843_v17  ;;  %v1129_v42 = vmul.f32 %v1126_v11, %v6292_v5  ;;  %v1103_v22 = vmul.f32 %v6295_v31, %v6292_v5 }
  0x95   : > { %1109 = vrot.lane.b32.xlu2 %v1101_v43, %s5803_s22  ;;  %1083 = vrot.lane.b32.xlu0 %v1075_v25, %s5803_s22  ;;  %v724_v56 = vadd.f32 %v720_v37, %v708_v33  ;;  %v864_v24 = vmul.f32 %v6250_v34, %v859_v36  ;;  %v1127_v37 = vmul.f32 %v1126_v11, %v6299_v16 }
  0x96   : > { %v806_v47 = vadd.f32 %v802_v58, %v790_v21  ;;  %v1185_v58 = vstv %s5267_s19  ;;  %v6353_v21 = vstv %s5270_s15  ;;  %s5280_s19 = sld [smem:[#allocation11 + $0x1a]] }
  0x97   : > { %v740_v53 = vadd.f32 %v736_v45, %v724_v56  ;;  %v1218_v45 = vstv %s5268_s14  ;;  %s5258_s14 = sld [smem:[#allocation11 + $0xc]] }
  0x98   : > { %v822_v48 = vadd.f32 %v818_v46, %v806_v47  ;;  %s5261_s15 = sld [smem:[#allocation11 + $0xf]] }
  0x99   : > { %v756_v35 = vadd.f32 %v752_v41, %v740_v53  ;;  %v1251_v53 = vstv %s5269_s8  ;;  %s5260_s8 = sld [smem:[#allocation11 + $0x6]] }
  0x9a   : > { %v838_v3 = vadd.f32 %v834_v38, %v822_v48  ;;  %v6365_v38 = vstv %s5271_s23  ;;  %s5255_s23 = sld [smem:[#allocation11 + $0x9]] }
  0x9b   : > { %v772_v6 = vadd.f32 %v768_v55, %v756_v35 }
  0x9c   : > { %v854_v52 = vadd.f32 %v850_v40, %v838_v3 }
  0x9d   : > { %v788_v39 = vadd.f32 %v784_v57, %v772_v6 }
  0x9e   : > { %v870_v13 = vadd.f32 %v866_v63, %v854_v52  ;;  %v1186_v63 = vmul.f32 %v1185_v58, %v6299_v16 }
  0x9f   : > { %v804_v10 = vadd.f32 %v800_v4, %v788_v39 }
  0xa0   : > { %v874_v7 = vmul.f32 0.5, %v870_v13  ;;  %v1194_v4 = vrot.slane %v1186_v63, 1 }
  0xa1   : > { %v820_v61 = vadd.f32 %v816_v26, %v804_v10  ;;  %v1221_v26 = vmul.f32 %v1218_v45, %v6292_v5  ;;  %v1188_v10 = vmul.f32 %v1185_v58, %v6292_v5 }
  0xa2   : > { %5524 = vtanh.f32 %v874_v7 }
  0xa3   : > { %v836_v14 = vadd.f32 %v832_v62, %v820_v61  ;;  %v1230_v62 = vrot.slane %v1221_v26, 1  ;;  %v1197_v7 = vrot.slane %v1188_v10, 1 }
  0xa5   : > { %v852_v0 = vadd.f32 %v848_v15, %v836_v14  ;;  %v1254_v15 = vmul.f32 %v1251_v53, %v6292_v5 }
  0xa7   : > { %v868_v1 = vadd.f32 %v864_v24, %v852_v0  ;;  %v1219_v0 = vmul.f32 %v1218_v45, %v6299_v16 }
  0xa8   : > { %v5525_v23 = vpop.eup %5524 }
  0xa9   : > { %v882_v8 = vadd.f32 1.0, %v5525_v23  ;;  %v872_v32 = vmul.f32 0.5, %v868_v1 }
  0xab   : > { %v886_v19 = vmul.f32 0.5, %v882_v8  ;;  %5526 = vtanh.f32 %v872_v32  ;;  %v1263_v8 = vrot.slane %v1254_v15, 2  ;;  %v1227_v32 = vrot.slane %v1219_v0, 1 }
  0xad   : > { %v6327_v49 = vmul.f32 %v886_v19, %v870_v13 }
  0xaf   : > { %v1078_v60 = vmul.f32 %v6289_v29, %v6327_v49  ;;  %v1104_v34 = vmul.f32 %v6295_v31, %v6327_v49  ;;  %v1130_v30 = vmul.f32 %v1126_v11, %v6327_v49  ;;  %v1222_v46 = vmul.f32 %v1218_v45, %v6327_v49 }
  0xb0   : > { %v6359_v44 = vmul.f32 %v6353_v21, %v6327_v49  ;;  %v6374_v55 = vmul.f32 %v6365_v38, %v6327_v49  ;;  %v1255_v48 = vmul.f32 %v1251_v53, %v6327_v49 }
  0xb1   : > { %v5527_v18 = vpop.eup %5526  ;;  %1089 = vrot.lane.b32.xlu1 %v1078_v60, %s5803_s22  ;;  %v1232_v56 = vrot.slane %v1222_v46, 1 }
  0xb2   : > { %v880_v50 = vadd.f32 1.0, %v5527_v18  ;;  %v1298_v41 = vrot.slane %v6359_v44, 2  ;;  %v1331_v35 = vrot.slane %v6374_v55, 2  ;;  %v1265_v57 = vrot.slane %v1255_v48, 2 }
  0xb3   : > { %v1233_v36 = vsel %vm931_vm0, %v1230_v62, %v1232_v56  ;;  %v1285_v18 = vmul.f32 %v6353_v21, %v6299_v16 }
  0xb4   : > { %v884_v20 = vmul.f32 0.5, %v880_v50 }
  0xb6   : > { %v6334_v28 = vmul.f32 %v884_v20, %v868_v1 }
  0xb8   : > { %v1102_v43 = vmul.f32 %v6295_v31, %v6334_v28  ;;  %v1076_v25 = vmul.f32 %v6289_v29, %v6334_v28  ;;  %v1189_v29 = vmul.f32 %v1185_v58, %v6327_v49  ;;  %v1128_v33 = vmul.f32 %v1126_v11, %v6334_v28 }
  0xb9   : > { %1115 = vrot.lane.b32.xlu1 %v1104_v34, %s5803_s22  ;;  %v1152_v31 = vstv %s5266_s17  ;;  %v1187_v2 = vmul.f32 %v1185_v58, %v6334_v28  ;;  %v1253_v61 = vmul.f32 %v1251_v53, %v6334_v28  ;;  %v1220_v1 = vmul.f32 %v1218_v45, %v6334_v28  ;;  %s5257_s17 = sld [smem:[#allocation11 + $0x3]] }
  0xba   : > { %1111 = vrot.lane.b32.xlu2 %v1102_v43, %s5803_s22  ;;  %1085 = vrot.lane.b32.xlu0 %v1076_v25, %s5803_s22  ;;  %v1199_v27 = vrot.slane %v1189_v29, 1  ;;  %v1156_v51 = vmul.f32 %v1152_v31, %v6327_v49  ;;  %v1154_v9 = vmul.f32 %v1152_v31, %v6334_v28  ;;  %v1155_v59 = vmul.f32 %v1152_v31, %v6292_v5 }
  0xbb   : > { %v1153_v6 = vmul.f32 %v1152_v31, %v6299_v16  ;;  %v1195_v52 = vrot.slane %v1187_v2, 1  ;;  %v1261_v23 = vrot.slane %v1253_v61, 2  ;;  %v1228_v19 = vrot.slane %v1220_v1, 1 }
  0xbc   : > { %v1166_v47 = vrot.slane %v1156_v51, 1  ;;  %v1162_v40 = vrot.slane %v1154_v9, 1  ;;  %v1164_v54 = vrot.slane %v1155_v59, 1  ;;  %v1200_v24 = vsel %vm931_vm0, %v1197_v7, %v1199_v27 }
  0xbd   : > { %v1161_v12 = vrot.slane %v1153_v6, 1  ;;  %v1196_v39 = vsel %vm931_vm0, %v1194_v4, %v1195_v52  ;;  %v1198_v14 = vsel %vm931_vm0, %v1195_v52, %v1197_v7  ;;  %v1264_v60 = vsel %vm1007_vm1, %v1261_v23, %v1263_v8 }
  0xbe   : > { %v1165_v3 = vsel %vm931_vm0, %v1162_v40, %v1164_v54  ;;  %v1167_v13 = vsel %vm931_vm0, %v1164_v54, %v1166_v47  ;;  %v1286_v50 = vmul.f32 %v6353_v21, %v6334_v28  ;;  %v1229_v20 = vsel %vm931_vm0, %v1227_v32, %v1228_v19 }
  0xbf   : > { %v1163_v17 = vsel %vm931_vm0, %v1161_v12, %v1162_v40  ;;  %v1231_v34 = vsel %vm931_vm0, %v1228_v19, %v1230_v62  ;;  %v1252_v43 = vmul.f32 %v1251_v53, %v6299_v16  ;;  %v1293_v25 = vrot.slane %v1285_v18, 2 }
  0xc0   : > { %v1294_v11 = vrot.slane %v1286_v50, 2  ;;  %v1266_v58 = vsel %vm1007_vm1, %v1263_v8, %v1265_v57  ;;  %v1319_v51 = vmul.f32 %v6365_v38, %v6334_v28  ;;  %v1376_v53 = vstv %s5273_s29  ;;  %s5259_s29 = sld [smem:[#allocation11 + $0x15]] }
  0xc1   : > { %1139 = vrot.lane.b32.xlu1 %v1129_v42, %s5803_s22  ;;  %v1260_v42 = vrot.slane %v1252_v43, 2  ;;  %v1377_v55 = vmul.f32 %v1376_v53, %v6299_v16  ;;  %v1402_v2 = vstv %s5274_s13  ;;  %v1428_v6 = vstv %s5275_s16  ;;  %s5256_s13 = sld [smem:[#allocation11 + $0x12]] }
  0xc2   : > { %1135 = vrot.lane.b32.xlu2 %v1127_v37, %s5803_s22  ;;  %1113 = vrot.lane.b32.xlu0 %v1103_v22, %s5803_s22  ;;  %v1295_v37 = vsel %vm1007_vm1, %v1293_v25, %v1294_v11  ;;  %v1320_v22 = vmul.f32 %v6365_v38, %v6292_v5  ;;  %v1327_v9 = vrot.slane %v1319_v51, 2  ;;  %v1405_v52 = vmul.f32 %v1402_v2, %v6292_v5  ;;  %s6656_s16 = sld [smem:[#allocation11 + $0x18]] }
  0xc3   : > { %v1262_v29 = vsel %vm1007_vm1, %v1260_v42, %v1261_v23  ;;  %v1403_v12 = vmul.f32 %v1402_v2, %v6299_v16  ;;  %v1430_v26 = vmul.f32 %v1428_v6, %v6334_v28  ;;  %v1406_v15 = vmul.f32 %v1402_v2, %v6327_v49 }
  0xc4   : > { %v1432_v23 = vmul.f32 %v1428_v6, %v6327_v49  ;;  %v1429_v8 = vmul.f32 %v1428_v6, %v6299_v16 }
  0xc5   : > { %v1438_v10 = vrot.slane %v1430_v26, 1 }
  0xc6   : > { %v1437_v18 = vrot.slane %v1429_v8, 1 }
  0xc9   : > { %1207 = vrot.lane.b32.xlu1 %v1199_v27, %s5803_s22  ;;  %v1287_v27 = vmul.f32 %v6353_v21, %v6292_v5  ;;  %v1318_v21 = vmul.f32 %v6365_v38, %v6299_v16 }
  0xca   : > { %1141 = vrot.lane.b32.xlu2 %v1130_v30, %s5803_s22  ;;  %1137 = vrot.lane.b32.xlu0 %v1128_v33, %s5803_s22  ;;  %v1329_v30 = vrot.slane %v1320_v22, 2 }
  0xcb   : > { %v1296_v33 = vrot.slane %v1287_v27, 2 }
  0xcc   : > { %v1332_v45 = vsel %vm1007_vm1, %v1329_v30, %v1331_v35  ;;  %v1330_v59 = vsel %vm1007_vm1, %v1327_v9, %v1329_v30  ;;  %v1494_v30 = vstv %s5277_s21  ;;  %s6813_s21 = sld [smem:[#allocation12 + $0x1]] }
  0xcd   : > { %v1297_v31 = vsel %vm1007_vm1, %v1294_v11, %v1296_v33  ;;  %v1299_v46 = vsel %vm1007_vm1, %v1296_v33, %v1298_v41  ;;  %v1439_v11 = vsel %vm931_vm0, %v1437_v18, %v1438_v10  ;;  %v1496_v51 = vmul.f32 %v1494_v30, %v6334_v28 }
  0xd1   : > { %1306 = vrot.lane.b32.xlu1 %v1298_v41, %s5803_s22 }
  0xd2   : > { %1240 = vrot.lane.b32.xlu2 %v1232_v56, %s5803_s22  ;;  %1174 = vrot.lane.b32.xlu0 %v1166_v47, %s5803_s22  ;;  %v1350_v56 = vstv %s5272_s1  ;;  %v1326_v47 = vrot.slane %v1318_v21, 2  ;;  %v1495_v21 = vmul.f32 %v1494_v30, %v6299_v16  ;;  %s6632_s1 = sld [smem:[#allocation11]] }
  0xd3   : > { %v1352_v44 = vmul.f32 %v1350_v56, %v6334_v28  ;;  %v1353_v48 = vmul.f32 %v1350_v56, %v6292_v5  ;;  %v1351_v40 = vmul.f32 %v1350_v56, %v6299_v16 }
  0xd4   : > { %v1328_v41 = vsel %vm1007_vm1, %v1326_v47, %v1327_v9  ;;  %v1503_v9 = vrot.slane %v1495_v21, 1 }
  0xd9   : > { %1170 = vrot.lane.b32.xlu1 %v1165_v3, %s5803_s22  ;;  %v1354_v3 = vmul.f32 %v1350_v56, %v6327_v49 }
  0xda   : > { %1339 = vrot.lane.b32.xlu2 %v1331_v35, %s5803_s22  ;;  %1273 = vrot.lane.b32.xlu0 %v1265_v57, %s5803_s22  ;;  %v1380_v35 = vmul.f32 %v1376_v53, %v6327_v49  ;;  %v1378_v57 = vmul.f32 %v1376_v53, %v6334_v28 }
  0xe1   : > { %1201 = vrot.lane.b32.xlu1 %v1196_v39, %s5803_s22  ;;  %v1379_v39 = vmul.f32 %v1376_v53, %v6292_v5 }
  0xe2   : > { %1172 = vrot.lane.b32.xlu2 %v1167_v13, %s5803_s22  ;;  %1168 = vrot.lane.b32.xlu0 %v1163_v17, %s5803_s22  ;;  %v1431_v13 = vmul.f32 %v1428_v6, %v6292_v5 }
  0xe4   : > { %v1440_v62 = vrot.slane %v1431_v13, 1 }
  0xe9   : > { %1238 = vrot.lane.b32.xlu1 %v1233_v36, %s5803_s22  ;;  %v1461_v36 = vstv %s5276_s0  ;;  %s6796_s0 = sld [smem:[#allocation12]] }
  0xea   : > { %1203 = vrot.lane.b32.xlu2 %v1198_v14, %s5803_s22  ;;  %1205 = vrot.lane.b32.xlu0 %v1200_v24, %s5803_s22  ;;  %v1404_v14 = vmul.f32 %v1402_v2, %v6334_v28  ;;  %v1441_v24 = vsel %vm931_vm0, %v1438_v10, %v1440_v62  ;;  %v1462_v0 = vmul.f32 %v1461_v36, %v6299_v16 }
  0xeb   : > { %v1463_v1 = vmul.f32 %v1461_v36, %v6334_v28  ;;  %v1464_v42 = vmul.f32 %v1461_v36, %v6292_v5 }
  0xec   : > { %v1470_v32 = vrot.slane %v1462_v0, 1 }
  0xed   : > { %v1471_v19 = vrot.slane %v1463_v1, 1  ;;  %v1473_v22 = vrot.slane %v1464_v42, 1 }
  0xef   : > { %v6444_v38 = vpop.permute.xlu2 %1109  ;;  %v1472_v43 = vsel %vm931_vm0, %v1470_v32, %v1471_v19 }
  0xf1   : > { %1269 = vrot.lane.b32.xlu1 %v1264_v60, %s5803_s22  ;;  %v1442_v60 = vrot.slane %v1432_v23, 1 }
  0xf2   : > { %1234 = vrot.lane.b32.xlu2 %v1229_v20, %s5803_s22  ;;  %1236 = vrot.lane.b32.xlu0 %v1231_v34, %s5803_s22 }
  0xf3   : > { %v1443_v25 = vsel %vm931_vm0, %v1440_v62, %v1442_v60 }
  0xf9   : > { %1300 = vrot.lane.b32.xlu1 %v1295_v37, %s5803_s22  ;;  %v1465_v37 = vmul.f32 %v1461_v36, %v6327_v49 }
  0xfa   : > { %1271 = vrot.lane.b32.xlu2 %v1266_v58, %s5803_s22  ;;  %1267 = vrot.lane.b32.xlu0 %v1262_v29, %s5803_s22 }
  0xfb   : > { %v1475_v33 = vrot.slane %v1465_v37, 1 }
 0x101   : > { %1337 = vrot.lane.b32.xlu1 %v1332_v45, %s5803_s22  ;;  %v1497_v45 = vmul.f32 %v1494_v30, %v6292_v5 }
 0x102   : > { %1302 = vrot.lane.b32.xlu2 %v1297_v31, %s5803_s22  ;;  %1304 = vrot.lane.b32.xlu0 %v1299_v46, %s5803_s22  ;;  %v1498_v31 = vmul.f32 %v1494_v30, %v6327_v49  ;;  %v1474_v46 = vsel %vm931_vm0, %v1471_v19, %v1473_v22 }
 0x103   : > { %v1506_v56 = vrot.slane %v1497_v45, 1 }
 0x104   : > { %v1508_v47 = vrot.slane %v1498_v31, 1 }
 0x106   : > { %v6458_v63 = vpop.permute.xlu1 %1087 }
 0x107   : > { %v6472_v17 = vpop.permute.xlu0 %1083 }
 0x109   : > { %1361 = vrot.lane.b32.xlu1 %v1352_v44, %s5804_s20  ;;  %v1504_v44 = vrot.slane %v1496_v51, 1 }
 0x10a   : > { %1333 = vrot.lane.b32.xlu2 %v1328_v41, %s5803_s22  ;;  %1335 = vrot.lane.b32.xlu0 %v1330_v59, %s5803_s22  ;;  %v1527_v59 = vstv %s5278_s18  ;;  %s6819_s18 = sld [smem:[#allocation12 + $0x2]] }
 0x10b   : > { %v1507_v36 = vsel %vm931_vm0, %v1504_v44, %v1506_v56 }
 0x111   : > { %1385 = vrot.lane.b32.xlu1 %v1377_v55, %s5804_s20 }
 0x112   : > { %1363 = vrot.lane.b32.xlu2 %v1353_v48, %s5804_s20  ;;  %1359 = vrot.lane.b32.xlu0 %v1351_v40, %s5804_s20  ;;  %v1509_v48 = vsel %vm931_vm0, %v1506_v56, %v1508_v47  ;;  %v1529_v40 = vmul.f32 %v1527_v59, %v6334_v28 }
 0x114   : > { %v6452_v54 = vpop.permute.xlu2 %1111  ;;  %v1537_v2 = vrot.slane %v1529_v40, 2 }
 0x119   : > { %1391 = vrot.lane.b32.xlu1 %v1380_v35, %s5804_s20  ;;  %v1530_v35 = vmul.f32 %v1527_v59, %v6292_v5 }
 0x11a   : > { %1387 = vrot.lane.b32.xlu2 %v1378_v57, %s5804_s20  ;;  %1365 = vrot.lane.b32.xlu0 %v1354_v3, %s5804_s20  ;;  %v1505_v57 = vsel %vm931_vm0, %v1503_v9, %v1504_v44  ;;  %v1476_v3 = vsel %vm931_vm0, %v1473_v22, %v1475_v33 }
 0x11b   : > { %v1539_v6 = vrot.slane %v1530_v35, 2 }
 0x11c   : > { %v6462_v4 = vpop.permute.xlu2 %1135 }
 0x11d   : > { %v1540_v13 = vsel %vm1007_vm1, %v1537_v2, %v1539_v6 }
 0x121   : > { %1415 = vrot.lane.b32.xlu1 %v1405_v52, %s5804_s20 }
 0x122   : > { %1411 = vrot.lane.b32.xlu2 %v1403_v12, %s5804_s20  ;;  %1389 = vrot.lane.b32.xlu0 %v1379_v39, %s5804_s20  ;;  %v1560_v12 = vstv %s5279_s9  ;;  %s5805_s9 = smov 2  }
 0x123   : > { %v6474_v7 = vpop.permute.xlu1 %1089  ;;  %v1561_v10 = vmul.f32 %v1560_v12, %v6299_v16  ;;  %v1562_v62 = vmul.f32 %v1560_v12, %v6334_v28 }
 0x124   : > { %10243 = vst [vmem:[#allocation25_spill] sm:$0xff] %v6474_v7  ;;  %v6476_v61 = vpop.permute.xlu2 %1141 }
 0x125   : > { %v1570_v0 = vrot.slane %v1562_v62, 2 }
 0x129   : > { %1446 = vrot.lane.b32.xlu1 %v1441_v24, %s5804_s20  ;;  %v1569_v24 = vrot.slane %v1561_v10, 2 }
 0x12a   : > { %1417 = vrot.lane.b32.xlu2 %v1406_v15, %s5804_s20  ;;  %1413 = vrot.lane.b32.xlu0 %v1404_v14, %s5804_s20  ;;  %v1531_v15 = vmul.f32 %v1527_v59, %v6327_v49  ;;  %v1528_v14 = vmul.f32 %v1527_v59, %v6299_v16 }
 0x12b   : > { %v6488_v50 = vpop.permute.xlu1 %1115 }
 0x12c   : > { %v6490_v20 = vpop.permute.xlu2 %1240  ;;  %v6492_v34 = vpop.permute.xlu0 %1085  ;;  %v1541_v1 = vrot.slane %v1531_v15, 2  ;;  %v1536_v23 = vrot.slane %v1528_v14, 2 }
 0x12e   : > { %v1542_v18 = vsel %vm1007_vm1, %v1539_v6, %v1541_v1 }
 0x131   : > { %1477 = vrot.lane.b32.xlu1 %v1472_v43, %s5804_s20  ;;  %v1538_v43 = vsel %vm1007_vm1, %v1536_v23, %v1537_v2 }
 0x132   : > { %1448 = vrot.lane.b32.xlu2 %v1443_v25, %s5804_s20  ;;  %1444 = vrot.lane.b32.xlu0 %v1439_v11, %s5804_s20  ;;  %v1563_v25 = vmul.f32 %v1560_v12, %v6292_v5  ;;  %v1564_v11 = vmul.f32 %v1560_v12, %v6327_v49 }
 0x133   : > { %v6502_v58 = vpop.permute.xlu1 %1139 }
 0x134   : > { %10244 = vst [vmem:[#allocation26_spill] sm:$0xff] %v6502_v58  ;;  %v6504_v29 = vpop.permute.xlu2 %1339  ;;  %v6506_v27 = vpop.permute.xlu0 %1113  ;;  %v1572_v42 = vrot.slane %v1563_v25, 2  ;;  %v1574_v45 = vrot.slane %v1564_v11, 2 }
 0x135   : > { %10245 = vst [vmem:[#allocation27_spill] sm:$0xff] %v6506_v27 }
 0x136   : > { %v1573_v21 = vsel %vm1007_vm1, %v1570_v0, %v1572_v42  ;;  %v1575_v2 = vsel %vm1007_vm1, %v1572_v42, %v1574_v45 }
 0x139   : > { %1483 = vrot.lane.b32.xlu1 %v1475_v33, %s5804_s20  ;;  %v1593_v33 = vstv %s5280_s19  ;;  %s5298_s19 = sld [smem:[#allocation14 + $0x7]] }
 0x13a   : > { %1479 = vrot.lane.b32.xlu2 %v1474_v46, %s5804_s20  ;;  %1450 = vrot.lane.b32.xlu0 %v1442_v60, %s5804_s20  ;;  %v1571_v60 = vsel %vm1007_vm1, %v1569_v24, %v1570_v0  ;;  %v1596_v31 = vmul.f32 %v1593_v33, %v6292_v5  ;;  %v1597_v46 = vmul.f32 %v1593_v33, %v6327_v49 }
 0x13b   : > { %v6516_v41 = vpop.permute.xlu1 %1207  ;;  %v1594_v51 = vmul.f32 %v1593_v33, %v6299_v16  ;;  %v1595_v56 = vmul.f32 %v1593_v33, %v6334_v28 }
 0x13c   : > { %10246 = vst [vmem:[#allocation28_spill] sm:$0xff] %v6516_v41  ;;  %v6518_v53 = vpop.permute.xlu2 %1172  ;;  %v6520_v55 = vpop.permute.xlu0 %1137  ;;  %v1607_v9 = vrot.slane %v1597_v46, 2 }
 0x13d   : > { %10247 = vst [vmem:[#allocation29_spill] sm:$0xff] %v6520_v55  ;;  %v1602_v44 = vrot.slane %v1594_v51, 2  ;;  %v1603_v59 = vrot.slane %v1595_v56, 2 }
 0x141   : > { %1514 = vrot.lane.b32.xlu1 %v1509_v48, %s5804_s20 }
 0x142   : > { %1510 = vrot.lane.b32.xlu2 %v1505_v57, %s5804_s20  ;;  %1481 = vrot.lane.b32.xlu0 %v1476_v3, %s5804_s20  ;;  %v1604_v3 = vsel %vm1007_vm1, %v1602_v44, %v1603_v59  ;;  %v6642_v44 = vstv %s5261_s15  ;;  %s5299_s15 = sld [smem:[#allocation14 + $0x10]] }
 0x143   : > { %v6530_v52 = vpop.permute.xlu1 %1306  ;;  %v1025_v58 = vmul.f32 %v6642_v44, %v6299_v16 }
 0x144   : > { %10248 = vst [vmem:[#allocation30_spill] sm:$0xff] %v6530_v52  ;;  %v6532_v39 = vpop.permute.xlu2 %1203  ;;  %v6534_v26 = vpop.permute.xlu0 %1174 }
 0x145   : > { %10249 = vst [vmem:[#allocation31_spill] sm:$0xff] %v6534_v26 }
 0x149   : > { %1545 = vrot.lane.b32.xlu1 %v1540_v13, %s5804_s20 }
 0x14a   : > { %1516 = vrot.lane.b32.xlu2 %v1508_v47, %s5804_s20  ;;  %1512 = vrot.lane.b32.xlu0 %v1507_v36, %s5804_s20  ;;  %v1605_v47 = vrot.slane %v1596_v31, 2 }
 0x14b   : > { %v6545_v8 = vpop.permute.xlu1 %1170 }
 0x14c   : > { %v6547_v32 = vpop.permute.xlu2 %1234  ;;  %v6549_v19 = vpop.permute.xlu0 %1273  ;;  %v1608_v57 = vsel %vm1007_vm1, %v1605_v47, %v1607_v9  ;;  %v1606_v10 = vsel %vm1007_vm1, %v1603_v59, %v1605_v47  ;;  %v6638_v47 = vstv %s5258_s14  ;;  %s5290_s14 = sld [smem:[#allocation14 + $0x5]] }
 0x14d   : > { %10250 = vst [vmem:[#allocation32_spill] sm:$0xff] %v6547_v32  ;;  %v6646_v59 = vmul.f32 %v6638_v47, %v6292_v5 }
 0x14e   : > { %10251 = vst [vmem:[#allocation33_spill] sm:$0xff] %v6549_v19 }
 0x14f   : > { %v10185_v55 = vrot.slane %v6646_v59, 1 }
 0x151   : > { %1576 = vrot.lane.b32.xlu1 %v1571_v60, %s5804_s20 }
 0x152   : > { %1547 = vrot.lane.b32.xlu2 %v1542_v18, %s5804_s20  ;;  %1543 = vrot.lane.b32.xlu0 %v1538_v43, %s5804_s20 }
 0x153   : > { %v6559_v37 = vpop.permute.xlu1 %1201 }
 0x154   : > { %10252 = vst [vmem:[#allocation34_spill] sm:$0xff] %v6559_v37  ;;  %v6561_v22 = vpop.permute.xlu2 %1271  ;;  %v6563_v30 = vpop.permute.xlu0 %1168 }
 0x159   : > { %1582 = vrot.lane.b32.xlu1 %v1574_v45, %s5804_s20 }
 0x15a   : > { %1578 = vrot.lane.b32.xlu2 %v1573_v21, %s5804_s20  ;;  %1549 = vrot.lane.b32.xlu0 %v1541_v1, %s5804_s20 }
 0x15b   : > { %v6573_v48 = vpop.permute.xlu1 %1238 }
 0x15c   : > { %10253 = vst [vmem:[#allocation35_spill] sm:$0xff] %v6573_v48  ;;  %v6575_v40 = vpop.permute.xlu2 %1302  ;;  %v6577_v35 = vpop.permute.xlu0 %1205 }
 0x15d   : > { %10254 = vst [vmem:[#allocation36_spill] sm:$0xff] %v6577_v35 }
 0x161   : > { %1613 = vrot.lane.b32.xlu1 %v1608_v57, %s5804_s20  ;;  %v922_v57 = vstv %s5257_s17  ;;  %s5294_s17 = sld [smem:[#allocation14 + $0x2]] }
 0x162   : > { %1609 = vrot.lane.b32.xlu2 %v1604_v3, %s5804_s20  ;;  %1580 = vrot.lane.b32.xlu0 %v1575_v2, %s5804_s20  ;;  %v1026_v3 = vmul.f32 %v6642_v44, %v6334_v28  ;;  %v949_v2 = vmul.f32 %v6638_v47, %v6299_v16  ;;  %v923_v32 = vmul.f32 %v922_v57, %v6299_v16 }
 0x163   : > { %v6585_v6 = vpop.permute.xlu1 %1269 }
 0x164   : > { %10255 = vst [vmem:[#allocation37_spill] sm:$0xff] %v6585_v6  ;;  %v6587_v12 = vpop.permute.xlu2 %1333  ;;  %v6589_v13 = vpop.permute.xlu0 %1236  ;;  %v1034_v48 = vrot.slane %v1026_v3, 2  ;;  %v6682_v3 = vstv %s6632_s1  ;;  %s5300_s1 = sld [smem:[#allocation14 + $0x19]] }
 0x165   : > { %10256 = vst [vmem:[#allocation38_spill] sm:$0xff] %v6587_v12 }
 0x166   : > { %10257 = vst [vmem:[#allocation39_spill] sm:$0xff] %v6589_v13  ;;  %v6664_v13 = vstv %s5255_s23  ;;  %s5286_s23 = sld [smem:[#allocation14 + $0x8]] }
 0x167   : > { %v903_v12 = vmul.f32 %v6664_v13, %v6299_v16 }
 0x16a   : > { %1615 = vrot.lane.b32.xlu2 %v1607_v9, %s5804_s20  ;;  %1611 = vrot.lane.b32.xlu0 %v1606_v10, %s5804_s20  ;;  %v950_v9 = vmul.f32 %v6638_v47, %v6334_v28  ;;  %v6654_v10 = vmul.f32 %v6642_v44, %v6292_v5 }
 0x16b   : > { %v6594_v62 = vpop.permute.xlu1 %1300 }
 0x16c   : > { %10258 = vst [vmem:[#allocation40_spill] sm:$0xff] %v6594_v62  ;;  %v6596_v36 = vpop.permute.xlu2 %1363  ;;  %v6598_v15 = vpop.permute.xlu0 %1267  ;;  %v10279_v37 = vrot.slane %v6654_v10, 2 }
 0x16d   : > { %10259 = vst [vmem:[#allocation41_spill] sm:$0xff] %v6598_v15 }
 0x16e   : > { %v1037_v27 = vsel %vm1007_vm1, %v1034_v48, %v10279_v37 }
 0x173   : > { %v6600_v14 = vpop.permute.xlu1 %1337 }
 0x174   : > { %10260 = vst [vmem:[#allocation42_spill] sm:$0xff] %v6600_v14  ;;  %v6602_v24 = vpop.permute.xlu2 %1387  ;;  %v6604_v0 = vpop.permute.xlu0 %1304  ;;  %v998_v14 = vstv %s5260_s8  ;;  %s1784_s8 = sld [smem:[#allocation15]] }
 0x175   : > { %10261 = vst [vmem:[#allocation43_spill] sm:$0xff] %v6604_v0  ;;  %v957_v0 = vrot.slane %v949_v2, 1  ;;  %v6686_v62 = vmul.f32 %v998_v14, %v6327_v49  ;;  %v6698_v2 = vstv %s5256_s13  ;;  %s5310_s13 = sld [smem:[#allocation14 + $0x6]] }
 0x17b   : > { %v6606_v1 = vpop.permute.xlu1 %1361 }
 0x17c   : > { %10262 = vst [vmem:[#allocation44_spill] sm:$0xff] %v6606_v1  ;;  %v6608_v23 = vpop.permute.xlu2 %1411  ;;  %v6610_v60 = vpop.permute.xlu0 %1335 }
 0x17d   : > { %10263 = vst [vmem:[#allocation45_spill] sm:$0xff] %v6608_v23  ;;  %v1033_v23 = vrot.slane %v1025_v58, 2 }
 0x17e   : > { %10264 = vst [vmem:[#allocation46_spill] sm:$0xff] %v6610_v60  ;;  %v6662_v60 = vmul.f32 %v922_v57, %v6292_v5 }
 0x17f   : > { %v1035_v1 = vsel %vm1007_vm1, %v1033_v23, %v1034_v48  ;;  %v1000_v48 = vmul.f32 %v998_v14, %v6334_v28 }
 0x183   : > { %v6612_v18 = vpop.permute.xlu1 %1385 }
 0x184   : > { %10265 = vst [vmem:[#allocation47_spill] sm:$0xff] %v6612_v18  ;;  %v6614_v43 = vpop.permute.xlu2 %1417  ;;  %v6616_v25 = vpop.permute.xlu0 %1359 }
 0x185   : > { %10266 = vst [vmem:[#allocation48_spill] sm:$0xff] %v6614_v43 }
 0x186   : > { %10267 = vst [vmem:[#allocation49_spill] sm:$0xff] %v6616_v25  ;;  %v1049_v25 = vstv %s6656_s16  ;;  %s5311_s16 = sld [smem:[#allocation14 + $0xf]] }
 0x187   : > { %v6731_v41 = vmul.f32 %v1049_v25, %v6327_v49 }
 0x18b   : > { %v6618_v11 = vpop.permute.xlu1 %1391 }
 0x18c   : > { %10268 = vst [vmem:[#allocation50_spill] sm:$0xff] %v6618_v11  ;;  %v6620_v42 = vpop.permute.xlu2 %1448  ;;  %v6622_v33 = vpop.permute.xlu0 %1365  ;;  %v935_v11 = vrot.slane %v6662_v60, 1  ;;  %v895_v60 = vmul.f32 %v6682_v3, %v6292_v5 }
 0x18d   : > { %10269 = vst [vmem:[#allocation51_spill] sm:$0xff] %v6622_v33  ;;  %v6690_v33 = vmul.f32 %v998_v14, %v6292_v5 }
 0x193   : > { %v6624_v45 = vpop.permute.xlu1 %1415 }
 0x194   : > { %10270 = vst [vmem:[#allocation52_spill] sm:$0xff] %v6624_v45  ;;  %v6626_v31 = vpop.permute.xlu2 %1479  ;;  %v6628_v46 = vpop.permute.xlu0 %1389  ;;  %v958_v45 = vrot.slane %v950_v9, 1 }
 0x195   : > { %10271 = vst [vmem:[#allocation53_spill] sm:$0xff] %v6626_v31 }
 0x196   : > { %10272 = vst [vmem:[#allocation54_spill] sm:$0xff] %v6628_v46  ;;  %v961_v9 = vsel %vm931_vm0, %v958_v45, %v10185_v55  ;;  %v959_v55 = vsel %vm931_vm0, %v957_v0, %v958_v45  ;;  %v1011_v45 = vrot.slane %v6690_v33, 2 }
 0x197   : > { %v968_v26 = vadd.f32 %v959_v55, %v903_v12  ;;  %v999_v12 = vmul.f32 %v998_v14, %v6299_v16 }
 0x19b   : > { %v6630_v21 = vpop.permute.xlu1 %1446 }
 0x19c   : > { %10273 = vst [vmem:[#allocation55_spill] sm:$0xff] %v6630_v21  ;;  %v6634_v51 = vpop.permute.xlu2 %1510  ;;  %v6636_v56 = vpop.permute.xlu0 %1413 }
 0x19d   : > { %10274 = vst [vmem:[#allocation56_spill] sm:$0xff] %v6634_v51  ;;  %v904_v51 = vmul.f32 %v6664_v13, %v6334_v28 }
 0x19e   : > { %10275 = vst [vmem:[#allocation57_spill] sm:$0xff] %v6636_v56  ;;  %v6659_v56 = vmul.f32 %v922_v57, %v6327_v49 }
 0x1a0   : > { %v10280_v58 = vrot.slane %v6659_v56, 1 }
 0x1a2   : > { %v938_v0 = vsel %vm931_vm0, %v935_v11, %v10280_v58 }
 0x1a3   : > { %v6667_v46 = vpop.permute.xlu1 %1477  ;;  %v945_v15 = vadd.f32 %v938_v0, %v895_v60  ;;  %v1050_v60 = vmul.f32 %v1049_v25, %v6299_v16 }
 0x1a4   : > { %10276 = vst [vmem:[#allocation58_spill] sm:$0xff] %v6667_v46  ;;  %v6673_v18 = vpop.permute.xlu2 %1516  ;;  %v6675_v35 = vpop.permute.xlu0 %1444  ;;  %v973_v46 = vstv %s5259_s29  ;;  %s5301_s29 = sld [smem:[#allocation14 + $0x22]] }
 0x1a5   : > { %10277 = vst [vmem:[#allocation59_spill] sm:$0xff] %v6673_v18  ;;  %v974_v21 = vmul.f32 %v973_v46, %v6299_v16  ;;  %v6704_v19 = vmul.f32 %v973_v46, %v6327_v49  ;;  %v6713_v37 = vmul.f32 %v973_v46, %v6334_v28  ;;  %v6723_v18 = vmul.f32 %v1049_v25, %v6334_v28 }
 0x1a6   : > { %10278 = vst [vmem:[#allocation60_spill] sm:$0xff] %v6675_v35  ;;  %v969_v35 = vadd.f32 %v961_v9, %v904_v51  ;;  %v916_v51 = vmul.f32 %v6698_v2, %v6327_v49  ;;  %v924_v9 = vmul.f32 %v922_v57, %v6334_v28 }
 0x1a7   : > { %10281 = vst [vmem:[#allocation61_spill] sm:$0xff] %v6713_v37  ;;  %v982_v31 = vrot.slane %v974_v21, 1  ;;  %v987_v6 = vrot.slane %v6704_v19, 1  ;;  %v10187_v23 = vrot.slane %v6713_v37, 1  ;;  %v932_v21 = vrot.slane %v923_v32, 1 }
 0x1a8   : > { %v1045_v57 = vadd.f32 %v1037_v27, %v969_v35  ;;  %v913_v19 = vmul.f32 %v6698_v2, %v6299_v16  ;;  %v952_v27 = vmul.f32 %v6638_v47, %v6327_v49  ;;  %v6745_v35 = vmul.f32 %v973_v46, %v6292_v5 }
 0x1a9   : > { %v996_v7 = vadd.f32 %v987_v6, %v916_v51  ;;  %v984_v14 = vsel %vm931_vm0, %v982_v31, %v10187_v23  ;;  %v1063_v32 = vrot.slane %v6731_v41, 2  ;;  %v1009_v51 = vrot.slane %v1000_v48, 2 }
 0x1aa   : > { %v894_v47 = vmul.f32 %v6682_v3, %v6334_v28  ;;  %v906_v37 = vmul.f32 %v6664_v13, %v6327_v49  ;;  %v1028_v41 = vmul.f32 %v6642_v44, %v6327_v49 }
 0x1ab   : > { %v6719_v52 = vpop.permute.xlu1 %1483  ;;  %v1072_v43 = vadd.f32 %v1063_v32, %v996_v7 }
 0x1ac   : > { %10282 = vst [vmem:[#allocation62_spill] sm:$0xff] %v6719_v52  ;;  %v6725_v58 = vpop.permute.xlu2 %1547  ;;  %v6727_v33 = vpop.permute.xlu0 %1450  ;;  %v10285_v52 = vrot.slane %v6686_v62, 2 }
 0x1ad   : > { %10283 = vst [vmem:[#allocation63_spill] sm:$0xff] %v6725_v58  ;;  %v1008_v58 = vrot.slane %v999_v12, 2  ;;  %v993_v12 = vadd.f32 %v984_v14, %v913_v19 }
 0x1ae   : > { %10284 = vst [vmem:[#allocation64_spill] sm:$0xff] %v6727_v33  ;;  %v1014_v55 = vsel %vm1007_vm1, %v1011_v45, %v10285_v52  ;;  %v933_v33 = vrot.slane %v924_v9, 1  ;;  %v893_v9 = vmul.f32 %v6682_v3, %v6299_v16  ;;  %v905_v16 = vmul.f32 %v6664_v13, %v6292_v5 }
 0x1af   : > { %v1021_v0 = vadd.f32 %v1014_v55, %v945_v15  ;;  %v962_v15 = vrot.slane %v952_v27, 1  ;;  %v6766_v55 = vmul.f32 %v1049_v25, %v6292_v5  ;;  %v1010_v23 = vsel %vm1007_vm1, %v1008_v58, %v1009_v51 }
 0x1b0   : > { %v934_v46 = vsel %vm931_vm0, %v932_v21, %v933_v33  ;;  %v936_v52 = vsel %vm931_vm0, %v933_v33, %v935_v11  ;;  %v1058_v11 = vrot.slane %v1050_v60, 2  ;;  %v896_v21 = vmul.f32 %v6682_v3, %v6327_v49 }
 0x1b1   : > { %v1097_v33 = vadd.f32 %v6458_v63, %v1021_v0  ;;  %v943_v27 = vadd.f32 %v934_v46, %v893_v9  ;;  %v944_v44 = vadd.f32 %v936_v52, %v894_v47  ;;  %v1150_v25 = vadd.f32 %v6476_v61, %v1072_v43 }
 0x1b2   : > { %v915_v63 = vmul.f32 %v6698_v2, %v6292_v5  ;;  %v971_v60 = vadd.f32 %v962_v15, %v906_v37  ;;  %v1038_v49 = vrot.slane %v1028_v41, 2  ;;  %v10289_v3 = vrot.slane %v6745_v35, 1  ;;  %v10308_v35 = vld [vmem:[#allocation44_spill] sm:$0xff] }
 0x1b3   : > { %v6760_v31 = vpop.permute.xlu1 %1514  ;;  %v1061_v52 = vrot.slane %v6766_v55, 2  ;;  %v1044_v13 = vadd.f32 %v1035_v1, %v968_v26  ;;  %v1122_v61 = vadd.f32 %v6452_v54, %v1045_v57  ;;  %v10290_v43 = vrot.slane %v6723_v18, 2  ;;  %v10325_v55 = vld [vmem:[#allocation56_spill] sm:$0xff] }
 0x1b4   : > { %10286 = vst [vmem:[#allocation65_spill] sm:$0xff] %v6760_v31  ;;  %v6768_v48 = vpop.permute.xlu2 %1578  ;;  %v6770_v7 = vpop.permute.xlu0 %1481  ;;  %v1012_v31 = vsel %vm1007_vm1, %v1009_v51, %v1011_v45  ;;  %v988_v58 = vsel %vm931_vm0, %v10289_v3, %v987_v6  ;;  %v1182_v45 = vadd.f32 %v6518_v53, %v1097_v33  ;;  %v1019_v14 = vadd.f32 %v1010_v23, %v943_v27  ;;  %v10295_v27 = vld [vmem:[#allocation63_spill] sm:$0xff] }
 0x1b5   : > { %10287 = vst [vmem:[#allocation66_spill] sm:$0xff] %v6770_v7  ;;  %v10288_v7 = vrot.slane %v6646_v59, 1  ;;  %v1060_v59 = vsel %vm1007_vm1, %v1058_v11, %v10290_v43  ;;  %v10291_v5 = vrot.slane %v6659_v56, 1  ;;  %v1020_v0 = vadd.f32 %v1012_v31, %v944_v44  ;;  %v10305_v43 = vld [vmem:[#allocation31_spill] sm:$0xff] }
 0x1b6   : > { %v1249_v6 = vadd.f32 %v6490_v20, %v1150_v25  ;;  %v10292_v26 = vrot.slane %v6654_v10, 2  ;;  %v995_v1 = vadd.f32 %v988_v58, %v915_v63  ;;  %v1281_v57 = vadd.f32 %v6561_v22, %v1182_v45  ;;  %v10304_v58 = vld [vmem:[#allocation59_spill] sm:$0xff]  ;;  %v10306_v45 = vld [vmem:[#allocation30_spill] sm:$0xff] }
 0x1b7   : > { %v963_v19 = vsel %vm931_vm0, %v10288_v7, %v962_v15  ;;  %v946_v37 = vadd.f32 %v10291_v5, %v896_v21  ;;  %v1069_v47 = vadd.f32 %v1060_v59, %v993_v12  ;;  %v1047_v53 = vadd.f32 %v1038_v49, %v971_v60  ;;  %v10307_v5 = vld [vmem:[#allocation32_spill] sm:$0xff] }
 0x1b8   : > { %v970_v51 = vadd.f32 %v963_v19, %v905_v16  ;;  %v1039_v54 = vsel %vm1007_vm1, %v10292_v26, %v1038_v49  ;;  %v1064_v56 = vsel %vm1007_vm1, %v1061_v52, %v1063_v32  ;;  %v1121_v20 = vadd.f32 %v6444_v38, %v1044_v13  ;;  %v10309_v26 = vld [vmem:[#allocation49_spill] sm:$0xff] }
 0x1b9   : > { %v1214_v10 = vadd.f32 %v6532_v39, %v1122_v61  ;;  %v1373_v31 = vadd.f32 %v6596_v36, %v1281_v57  ;;  %v1095_v22 = vadd.f32 %v6472_v17, %v1019_v14  ;;  %v10293_v15 = vrot.slane %v6686_v62, 2 }
 0x1ba   : > { %v1096_v16 = vadd.f32 %v6492_v34, %v1020_v0  ;;  %v1046_v32 = vadd.f32 %v1039_v54, %v970_v51  ;;  %v1348_v7 = vadd.f32 %v6504_v29, %v1249_v6  ;;  %v6822_v38 = vadd.f32 %v1064_v56, %v995_v1  ;;  %v10294_v29 = vld [vmem:[#allocation48_spill] sm:$0xff] }
 0x1bb   : > { %v1546_v9 = vpop.permute.xlu1 %1545  ;;  %v1022_v41 = vadd.f32 %v10293_v15, %v946_v37  ;;  %v1313_v39 = vadd.f32 %v6575_v40, %v1214_v10  ;;  %v1458_v36 = vadd.f32 %v6620_v42, %v1373_v31  ;;  %v1147_v12 = vadd.f32 %v6462_v4, %v1069_v47  ;;  %v10296_v40 = vld [vmem:[#allocation25_spill] sm:$0xff]  ;;  %v10297_v42 = vld [vmem:[#allocation28_spill] sm:$0xff]  ;;  %v10311_v10 = vld [vmem:[#allocation55_spill] sm:$0xff] }
 0x1bc   : > { %v6806_v23 = vpop.permute.xlu2 %1609  ;;  %v6808_v46 = vpop.permute.xlu0 %1512  ;;  %v1124_v17 = vadd.f32 %v6488_v50, %v1047_v53  ;;  %v914_v62 = vmul.f32 %v6698_v2, %v6334_v28  ;;  %v1181_v34 = vadd.f32 %v6545_v8, %v1096_v16  ;;  %v1180_v11 = vadd.f32 %v6563_v30, %v1095_v22  ;;  %v10298_v4 = vld [vmem:[#allocation37_spill] sm:$0xff] }
 0x1bd   : > { %v1398_v33 = vadd.f32 %v6602_v24, %v1313_v39  ;;  %v1426_v21 = vadd.f32 %v10294_v29, %v1348_v7  ;;  %v1557_v44 = vadd.f32 %v10295_v27, %v1458_v36  ;;  %v1098_v25 = vadd.f32 %v10296_v40, %v1022_v41  ;;  %v10300_v28 = vld [vmem:[#allocation61_spill] sm:$0xff]  ;;  %v10312_v41 = vld [vmem:[#allocation27_spill] sm:$0xff]  ;;  %v10313_v7 = vld [vmem:[#allocation34_spill] sm:$0xff] }
 0x1be   : > { %v1216_v19 = vadd.f32 %v10297_v42, %v1124_v17  ;;  %v1280_v63 = vadd.f32 %v10298_v4, %v1181_v34  ;;  %v1626_v50 = vstv %s6796_s0  ;;  %v10299_v60 = vmov %v10289_v3  ;;  %v10302_v30 = vld [vmem:[#allocation41_spill] sm:$0xff]  ;;  %v10314_v36 = vld [vmem:[#allocation60_spill] sm:$0xff]  ;;  %v10315_v34 = vld [vmem:[#allocation38_spill] sm:$0xff]  ;;  %s5302_s0 = sld [smem:[#allocation14 + $0x4]] }
 0x1bf   : > { %v10301_v2 = vrot.slane %v10300_v28, 1  ;;  %v1279_v49 = vadd.f32 %v10302_v30, %v1180_v11  ;;  %v10303_v24 = vld [vmem:[#allocation53_spill] sm:$0xff]  ;;  %v1525_v13 = vadd.f32 %v10304_v58, %v1426_v21  ;;  %v1183_v59 = vadd.f32 %v10305_v43, %v1098_v25  ;;  %v10317_v29 = vld [vmem:[#allocation50_spill] sm:$0xff]  ;;  %v10322_v30 = vld [vmem:[#allocation36_spill] sm:$0xff] }
 0x1c0   : > { %v1490_v3 = vadd.f32 %v10303_v24, %v1398_v33  ;;  %v1315_v14 = vadd.f32 %v10306_v45, %v1216_v19  ;;  %v1246_v37 = vadd.f32 %v10307_v5, %v1147_v12  ;;  %v1372_v0 = vadd.f32 %v10308_v35, %v1280_v63  ;;  %v10310_v53 = vld [vmem:[#allocation33_spill] sm:$0xff]  ;;  %v10319_v19 = vld [vmem:[#allocation40_spill] sm:$0xff]  ;;  %v10321_v28 = vld [vmem:[#allocation62_spill] sm:$0xff] }
 0x1c1   : > { %v986_v8 = vsel %vm931_vm0, %v10301_v2, %v10299_v60  ;;  %v1371_v54 = vadd.f32 %v10309_v26, %v1279_v49  ;;  %v6852_v1 = vadd.f32 %v1626_v50, %v1557_v44  ;;  %v1282_v56 = vadd.f32 %v10310_v53, %v1183_v59  ;;  %v10320_v63 = vld [vmem:[#allocation45_spill] sm:$0xff]  ;;  %v10323_v24 = vld [vmem:[#allocation64_spill] sm:$0xff]  ;;  %v10327_v35 = vld [vmem:[#allocation58_spill] sm:$0xff] }
 0x1c2   : > { %v1589_v57 = vadd.f32 %v6768_v48, %v1490_v3  ;;  %v1457_v31 = vadd.f32 %v10311_v10, %v1372_v0  ;;  %v6858_v22 = vstv %s6813_s21  ;;  %v6861_v15 = vstv %s6819_s18  ;;  %v10316_v48 = vld [vmem:[#allocation51_spill] sm:$0xff]  ;;  %s5303_s21 = sld [smem:[#allocation14 + $0xd]] }
 0x1c3   : > { %v1577_v61 = vpop.permute.xlu1 %1576  ;;  %v1123_v16 = vadd.f32 %v10312_v41, %v1046_v32  ;;  %v1213_v39 = vadd.f32 %v10313_v7, %v1121_v20  ;;  %v1456_v12 = vadd.f32 %v10314_v36, %v1371_v54  ;;  %v1345_v11 = vadd.f32 %v10315_v34, %v1246_v37  ;;  %v10328_v26 = vld [vmem:[#allocation43_spill] sm:$0xff]  ;;  %s5304_s18 = sld [smem:[#allocation14 + $0x16]] }
 0x1c4   : > { %v1616_v51 = vpop.permute.xlu2 %1615  ;;  %v1544_v6 = vpop.permute.xlu0 %1543  ;;  %v1374_v33 = vadd.f32 %v10316_v48, %v1282_v56  ;;  %v1400_v21 = vadd.f32 %v10317_v29, %v1315_v14  ;;  %v1556_v27 = vadd.f32 %v1546_v9, %v1457_v31  ;;  %v1633_v44 = vmul.f32 0.5, %v6852_v1  ;;  %v10329_v53 = vld [vmem:[#allocation35_spill] sm:$0xff] }
 0x1c5   : > { %v1624_v47 = vadd.f32 %v1616_v51, %v1525_v13  ;;  %v6872_v40 = vadd.f32 %v6858_v22, %v1589_v57  ;;  %v1555_v32 = vadd.f32 %v1544_v6, %v1456_v12  ;;  %v10318_v20 = vrot.slane %v6723_v18, 2  ;;  %v10324_v13 = vld [vmem:[#allocation47_spill] sm:$0xff]  ;;  %v10331_v12 = vld [vmem:[#allocation42_spill] sm:$0xff] }
 0x1c6   : > { %v1312_v4 = vadd.f32 %v10319_v19, %v1213_v39  ;;  %v1423_v60 = vadd.f32 %v10320_v63, %v1345_v11  ;;  %v1492_v2 = vadd.f32 %v10321_v28, %v1400_v21  ;;  %v994_v9 = vadd.f32 %v986_v8, %v914_v62  ;;  %v10326_v8 = vld [vmem:[#allocation26_spill] sm:$0xff]  ;;  %v10332_v11 = vld [vmem:[#allocation29_spill] sm:$0xff]  ;;  %v10334_v21 = vld [vmem:[#allocation52_spill] sm:$0xff] }
 0x1c7   : > { %v1682_v17 = vadd.f32 %v6861_v15, %v1624_v47  ;;  %v1062_v42 = vsel %vm1007_vm1, %v10318_v20, %v1061_v52  ;;  %v1215_v49 = vadd.f32 %v10322_v30, %v1123_v16  ;;  %v1459_v3 = vadd.f32 %v10323_v24, %v1374_v33  ;;  %v10330_v16 = vld [vmem:[#allocation54_spill] sm:$0xff]  ;;  %v10335_v20 = vld [vmem:[#allocation39_spill] sm:$0xff]  ;;  %v10336_v63 = vld [vmem:[#allocation65_spill] sm:$0xff] }
 0x1c8   : > { %v1397_v43 = vadd.f32 %v10324_v13, %v1312_v4  ;;  %v1522_v59 = vadd.f32 %v10325_v55, %v1423_v60  ;;  %v6886_v18 = vadd.f32 %v1626_v50, %v1556_v27  ;;  %v1658_v14 = vmul.f32 0.5, %v6872_v40  ;;  %v10333_v33 = vld [vmem:[#allocation66_spill] sm:$0xff] }
 0x1c9   : > { %v1686_v25 = vmul.f32 0.5, %v1682_v17  ;;  %v6889_v5 = vadd.f32 %v1626_v50, %v1555_v32  ;;  %v1149_v37 = vadd.f32 %v10326_v8, %v6822_v38  ;;  %v1070_v6 = vadd.f32 %v1062_v42, %v994_v9  ;;  %v10337_v30 = vld [vmem:[#allocation46_spill] sm:$0xff] }
 0x1ca   : > { %v1489_v0 = vadd.f32 %v10327_v35, %v1397_v43  ;;  %v1314_v54 = vadd.f32 %v10328_v26, %v1215_v49  ;;  %v1621_v57 = vadd.f32 %v6806_v23, %v1522_v59  ;;  %v1632_v10 = vmul.f32 0.5, %v6886_v18  ;;  %v10338_v59 = vld [vmem:[#allocation57_spill] sm:$0xff] }
 0x1cb   : > { %5528 = vtanh.f32 %v1686_v25  ;;  %v1583_v58 = vpop.permute.xlu1 %1582  ;;  %v1248_v56 = vadd.f32 %v10329_v53, %v1149_v37  ;;  %v1631_v39 = vmul.f32 0.5, %v6889_v5  ;;  %v1148_v48 = vadd.f32 %v10332_v11, %v1070_v6 }
 0x1cc   : > { %v1550_v52 = vpop.permute.xlu0 %1549  ;;  %v1591_v45 = vadd.f32 %v1583_v58, %v1492_v2  ;;  %5530 = vtanh.f32 %v1633_v44  ;;  %v1588_v31 = vadd.f32 %v1577_v61, %v1489_v0  ;;  %v1399_v7 = vadd.f32 %v10330_v16, %v1314_v54 }
 0x1cd   : > { %v1558_v62 = vadd.f32 %v1550_v52, %v1459_v3  ;;  %5532 = vtanh.f32 %v1658_v14  ;;  %v1347_v34 = vadd.f32 %v10331_v12, %v1248_v56  ;;  %v6911_v61 = vadd.f32 %v6861_v15, %v1621_v57 }
 0x1ce   : > { %v6895_v51 = vadd.f32 %v6858_v22, %v1591_v45  ;;  %v1491_v29 = vadd.f32 %v10333_v33, %v1399_v7  ;;  %v6915_v44 = vadd.f32 %v6858_v22, %v1588_v31  ;;  %v1247_v42 = vadd.f32 %v10335_v20, %v1148_v48 }
 0x1cf   : > { %v6899_v47 = vadd.f32 %v1626_v50, %v1558_v62  ;;  %v1425_v27 = vadd.f32 %v10334_v21, %v1347_v34  ;;  %v1683_v24 = vmul.f32 0.5, %v6911_v61  ;;  %v5806_v14 = vmov 0.0  }
 0x1d0   : > { %v1660_v41 = vmul.f32 0.5, %v6895_v51  ;;  %v1346_v49 = vadd.f32 %v10337_v30, %v1247_v42  ;;  %v1657_v13 = vmul.f32 0.5, %v6915_v44  ;;  %1718 = vst.msk [vmem:[#allocation2 + $0x68] sm:$0xff] %vm1703_vm2, %v5806_v14 }
 0x1d1   : > { %v5529_v38 = vpop.eup %5528  ;;  %v1634_v36 = vmul.f32 0.5, %v6899_v47  ;;  %v1524_v60 = vadd.f32 %v10336_v63, %v1425_v27  ;;  %1704 = vst.msk [vmem:[#allocation2] sm:$0xff] %vm1703_vm2, %v5806_v14 }
 0x1d2   : > { %5534 = vtanh.f32 %v1660_v41  ;;  %v1694_v23 = vadd.f32 1.0, %v5529_v38  ;;  %v5531_v50 = vpop.eup %5530  ;;  %1705 = vst.msk [vmem:[#allocation2 + $0x8] sm:$0xff] %vm1703_vm2, %v5806_v14 }
 0x1d3   : > { %5536 = vtanh.f32 %v1634_v36  ;;  %v1614_v4 = vpop.permute.xlu1 %1613  ;;  %v1641_v2 = vadd.f32 1.0, %v5531_v50  ;;  %v5533_v9 = vpop.eup %5532  ;;  %1706 = vst.msk [vmem:[#allocation2 + $0x10] sm:$0xff] %vm1703_vm2, %v5806_v14 }
 0x1d4   : > { %5538 = vtanh.f32 %v1632_v10  ;;  %v1581_v25 = vpop.permute.xlu0 %1580  ;;  %v1698_v32 = vmul.f32 0.5, %v1694_v23  ;;  %v1623_v43 = vadd.f32 %v1614_v4, %v1524_v60  ;;  %1707 = vst.msk [vmem:[#allocation2 + $0x18] sm:$0xff] %vm1703_vm2, %v5806_v14  ;;  %v1666_v31 = vadd.f32 1.0, %v5533_v9 }
 0x1d5   : > { %5540 = vtanh.f32 %v1631_v39  ;;  %v1590_v19 = vadd.f32 %v1581_v25, %v1491_v29  ;;  %v1645_v62 = vmul.f32 0.5, %v1641_v2  ;;  %1710 = vst.msk [vmem:[#allocation2 + $0x28] sm:$0xff] %vm1703_vm2, %v5806_v14 }
 0x1d6   : > { %v1702_v28 = vmul.f32 %v1698_v32, %v1682_v17  ;;  %v1424_v17 = vadd.f32 %v10338_v59, %v1346_v49  ;;  %5542 = vtanh.f32 %v1683_v24  ;;  %v1681_v6 = vadd.f32 %v6861_v15, %v1623_v43  ;;  %1711 = vst.msk [vmem:[#allocation2 + $0x30] sm:$0xff] %vm1703_vm2, %v5806_v14 }
 0x1d7   : > { %v6922_v3 = vadd.f32 %v6858_v22, %v1590_v19  ;;  %5544 = vtanh.f32 %v1657_v13  ;;  %1712 = vst.msk [vmem:[#allocation2 + $0x38] sm:$0xff] %vm1703_vm2, %v5806_v14  ;;  %v1670_v7 = vmul.f32 0.5, %v1666_v31 }
 0x1d8   : > { %v5535_v58 = vpop.eup %5534  ;;  %1773 = vrot.lane.b32.xlu2 %v1702_v28, %s5805_s9  ;;  %v1523_v35 = vadd.f32 %v6808_v46, %v1424_v17  ;;  %v1649_v46 = vmul.f32 %v1645_v62, %v6852_v1  ;;  %1713 = vst.msk [vmem:[#allocation2 + $0x40] sm:$0xff] %vm1703_vm2, %v5806_v14  ;;  %v2100_v62 = vstv %s5299_s15  ;;  %s5308_s15 = sld [smem:[#allocation14 + $0x13]] }
 0x1d9   : > { %v5537_v55 = vpop.eup %5536  ;;  %v1659_v52 = vmul.f32 0.5, %v6922_v3  ;;  %v1668_v45 = vadd.f32 1.0, %v5535_v58  ;;  %1715 = vst.msk [vmem:[#allocation2 + $0x50] sm:$0xff] %vm1703_vm2, %v5806_v14  ;;  %v1674_v23 = vmul.f32 %v1670_v7, %v6872_v40 }
 0x1da   : > { %v5539_v22 = vpop.eup %5538  ;;  %v1642_v8 = vadd.f32 1.0, %v5537_v55  ;;  %1716 = vst.msk [vmem:[#allocation2 + $0x58] sm:$0xff] %vm1703_vm2, %v5806_v14 }
 0x1db   : > { %v5541_v37 = vpop.eup %5540  ;;  %v1672_v0 = vmul.f32 0.5, %v1668_v45  ;;  %5546 = vtanh.f32 %v1659_v52  ;;  %v1640_v56 = vadd.f32 1.0, %v5539_v22  ;;  %1717 = vst.msk [vmem:[#allocation2 + $0x60] sm:$0xff] %vm1703_vm2, %v5806_v14 }
 0x1dc   : > { %v1612_v26 = vpop.permute.xlu0 %1611  ;;  %v1646_v54 = vmul.f32 0.5, %v1642_v8  ;;  %v1639_v41 = vadd.f32 1.0, %v5541_v37  ;;  %v5543_v1 = vpop.eup %5542  ;;  %1709 = vst.msk [vmem:[#allocation2 + $0x20] sm:$0x3] %vm1708_vm4, %v5806_v14 }
 0x1dd   : > { %v1622_v57 = vadd.f32 %v1612_v26, %v1523_v35  ;;  %v1676_v53 = vmul.f32 %v1672_v0, %v6895_v51  ;;  %v1685_v51 = vmul.f32 0.5, %v1681_v6  ;;  %v1644_v16 = vmul.f32 0.5, %v1640_v56  ;;  %1714 = vst.msk [vmem:[#allocation2 + $0x48] sm:$0x3] %vm1708_vm4, %v5806_v14 }
 0x1de   : > { %v1650_v10 = vmul.f32 %v1646_v54, %v6899_v47  ;;  %v1643_v39 = vmul.f32 0.5, %v1639_v41  ;;  %v1691_v11 = vadd.f32 1.0, %v5543_v1  ;;  %1719 = vst.msk [vmem:[#allocation2 + $0x70] sm:$0x3] %vm1708_vm4, %v5806_v14  ;;  %v7002_v14 = vstv %s5290_s14  ;;  %s5307_s14 = sld [smem:[#allocation14 + $0xa]] }
 0x1df   : > { %v1680_v38 = vadd.f32 %v6861_v15, %v1622_v57  ;;  %1752 = vrot.lane.b32.xlu1 %v1676_v53, %s5805_s9  ;;  %v5545_v15 = vpop.eup %5544  ;;  %5548 = vtanh.f32 %v1685_v51  ;;  %v1648_v12 = vmul.f32 %v1644_v16, %v6886_v18  ;;  %v7006_v35 = vstv %s5294_s17  ;;  %s5309_s17 = sld [smem:[#allocation14 + $0x1c]] }
 0x1e0   : > { %1728 = vrot.lane.b32.xlu2 %v1649_v46, %s5805_s9  ;;  %1730 = vrot.lane.b32.xlu0 %v1650_v10, %s5805_s9  ;;  %v1665_v34 = vadd.f32 1.0, %v5545_v15  ;;  %v1647_v50 = vmul.f32 %v1643_v39, %v6889_v5  ;;  %v1695_v21 = vmul.f32 0.5, %v1691_v11  ;;  %v7016_v54 = vstv %s5286_s23  ;;  %s5312_s23 = sld [smem:[#allocation14 + $0x18]] }
 0x1e1   : > { %v1684_v47 = vmul.f32 0.5, %v1680_v38  ;;  %v5547_v36 = vpop.eup %5546  ;;  %v7028_v46 = vstv %s1784_s8  ;;  %v2126_v51 = vstv %s5300_s1  ;;  %s5325_s8 = sld [smem:[#allocation14 + $0x29]] }
 0x1e2   : > { %v1667_v48 = vadd.f32 1.0, %v5547_v36  ;;  %v1669_v33 = vmul.f32 0.5, %v1665_v34  ;;  %v1699_v40 = vmul.f32 %v1695_v21, %v6911_v61  ;;  %s5329_s1 = sld [smem:[#allocation14 + $0x26]] }
 0x1e3   : > { %5550 = vtanh.f32 %v1684_v47 }
 0x1e4   : > { %v1671_v27 = vmul.f32 0.5, %v1667_v48  ;;  %v1673_v18 = vmul.f32 %v1669_v33, %v6915_v44 }
 0x1e5   : > { %v5549_v29 = vpop.eup %5548 }
 0x1e6   : > { %v1693_v32 = vadd.f32 1.0, %v5549_v29  ;;  %v1675_v5 = vmul.f32 %v1671_v27, %v6922_v3  ;;  %v2074_v3 = vstv %s5298_s19  ;;  %s5306_s19 = sld [smem:[#allocation14 + $0x1]] }
 0x1e7   : > { %1726 = vrot.lane.b32.xlu1 %v1648_v12, %s5805_s9 }
 0x1e8   : > { %1748 = vrot.lane.b32.xlu2 %v1674_v23, %s5805_s9  ;;  %1724 = vrot.lane.b32.xlu0 %v1647_v50, %s5805_s9  ;;  %v1697_v42 = vmul.f32 0.5, %v1693_v32 }
 0x1e9   : > { %v5551_v25 = vpop.eup %5550 }
 0x1ea   : > { %v1692_v20 = vadd.f32 1.0, %v5551_v25  ;;  %v1701_v4 = vmul.f32 %v1697_v42, %v1681_v6 }
 0x1ec   : > { %v1696_v19 = vmul.f32 0.5, %v1692_v20 }
 0x1ee   : > { %v1700_v63 = vmul.f32 %v1696_v19, %v1680_v38 }
 0x1ef   : > { %1746 = vrot.lane.b32.xlu1 %v1673_v18, %s5805_s9  ;;  %v2152_v18 = vstv %s5301_s29  ;;  %s5313_s29 = sld [smem:[#allocation14 + $0x21]] }
 0x1f0   : > { %1767 = vrot.lane.b32.xlu2 %v1699_v40, %s5805_s9  ;;  %1750 = vrot.lane.b32.xlu0 %v1675_v5, %s5805_s9 }
 0x1f7   : > { %1771 = vrot.lane.b32.xlu1 %v1701_v4, %s5805_s9 }
 0x1f8   : > { %1769 = vrot.lane.b32.xlu0 %v1700_v63, %s5805_s9  ;;  %v2474_v63 = vstv %s5310_s13  ;;  %s5305_s9 = sld [smem:[#allocation14 + $0x1f]] }
 0x1f9   : > { %s5314_s13 = sld [smem:[#allocation14 + $0x3]] }
 0x232   : > { %v1774_v44 = vpop.permute.xlu2 %1773 }
 0x233   : > { %1783 = vst.msk [vmem:[#allocation2 + $0x6a] sm:$0x3f] %vm1740_vm3, %v1774_v44 }
 0x23a   : > { %v1729_v61 = vpop.permute.xlu2 %1728 }
 0x23b   : > { %1739 = vst.msk [vmem:[#allocation2 + $0x12] sm:$0xff] %vm1736_vm5, %v1729_v61 }
 0x242   : > { %v1749_v60 = vpop.permute.xlu2 %1748 }
 0x243   : > { %1760 = vst.msk [vmem:[#allocation2 + $0x32] sm:$0xff] %vm1736_vm5, %v1749_v60 }
 0x24a   : > { %v1768_v28 = vpop.permute.xlu2 %1767 }
 0x24b   : > { %1780 = vst.msk [vmem:[#allocation2 + $0x52] sm:$0xff] %vm1736_vm5, %v1768_v28  ;;  %v7088_v28 = vstv %s5311_s16  ;;  %s5315_s16 = sld [smem:[#allocation14 + $0xc]] }
 0x251   : > { %v1753_v2 = vpop.permute.xlu1 %1752 }
 0x252   : > { %v1731_v9 = vpop.permute.xlu0 %1730  ;;  %1762 = vst.msk [vmem:[#allocation2 + $0x42] sm:$0x3f] %vm1740_vm3, %v1753_v2 }
 0x253   : > { %1741 = vst.msk [vmem:[#allocation2 + $0x1a] sm:$0x3f] %vm1740_vm3, %v1731_v9  ;;  %v2178_v9 = vstv %s5302_s0  ;;  %s5316_s0 = sld [smem:[#allocation14 + $0x15]] }
 0x259   : > { %v1727_v30 = vpop.permute.xlu1 %1726 }
 0x25a   : > { %v1725_v49 = vpop.permute.xlu0 %1724  ;;  %1738 = vst.msk [vmem:[#allocation2 + $0xa] sm:$0xff] %vm1736_vm5, %v1727_v30  ;;  %v7000_v45 = vld [vmem:[#allocation2 + $0x18] sm:$0xff] }
 0x25b   : > { %1737 = vst.msk [vmem:[#allocation2 + $0x2] sm:$0xff] %vm1736_vm5, %v1725_v49  ;;  %v2078_v0 = vmul.f32 %v2074_v3, %v7000_v45  ;;  %v7013_v26 = vmul.f32 %v7002_v14, %v7000_v45  ;;  %v7026_v56 = vmul.f32 %v7006_v35, %v7000_v45  ;;  %v2104_v36 = vmul.f32 %v2100_v62, %v7000_v45 }
 0x25c   : > { %v2130_v23 = vmul.f32 %v2126_v51, %v7000_v45  ;;  %v2156_v61 = vmul.f32 %v2152_v18, %v7000_v45 }
 0x25d   : > { %v10191_v38 = vrot.slane %v7013_v26, 1  ;;  %v10190_v16 = vrot.slane %v7026_v56, 2 }
 0x261   : > { %v6986_v24 = vld [vmem:[#allocation2 + $0x10] sm:$0xff]  ;;  %v1747_v58 = vpop.permute.xlu1 %1746 }
 0x262   : > { %v6988_v13 = vld [vmem:[#allocation2] sm:$0xff]  ;;  %v6990_v43 = vld [vmem:[#allocation2 + $0x8] sm:$0xff]  ;;  %v1751_v55 = vpop.permute.xlu0 %1750  ;;  %1759 = vst.msk [vmem:[#allocation2 + $0x2a] sm:$0xff] %vm1736_vm5, %v1747_v58  ;;  %v2077_v59 = vmul.f32 %v2074_v3, %v6986_v24  ;;  %v1805_v57 = vmul.f32 %v7016_v54, %v6986_v24  ;;  %v1845_v53 = vmul.f32 %v7002_v14, %v6986_v24  ;;  %v1961_v10 = vmul.f32 %v7006_v35, %v6986_v24 }
 0x263   : > { %1761 = vst.msk [vmem:[#allocation2 + $0x3a] sm:$0xff] %vm1736_vm5, %v1751_v55  ;;  %v2075_v17 = vmul.f32 %v2074_v3, %v6988_v13  ;;  %v2076_v52 = vmul.f32 %v2074_v3, %v6990_v43  ;;  %v2102_v37 = vmul.f32 %v2100_v62, %v6990_v43  ;;  %v2101_v6 = vmul.f32 %v2100_v62, %v6988_v13 }
 0x264   : > { %2087 = vrot.lane.b32.xlu2 %v2077_v59, %s5803_s22  ;;  %v1809_v31 = vadd.f32 %v1805_v57, %v7028_v46  ;;  %v1856_v41 = vrot.slane %v1845_v53, 1  ;;  %v1972_v47 = vrot.slane %v1961_v10, 2  ;;  %v2127_v15 = vmul.f32 %v2126_v51, %v6988_v13 }
 0x265   : > { %2083 = vrot.lane.b32.xlu0 %v2075_v17, %s5803_s22  ;;  %2085 = vrot.lane.b32.xlu1 %v2076_v52, %s5803_s22  ;;  %v2103_v39 = vmul.f32 %v2100_v62, %v6986_v24  ;;  %v2128_v50 = vmul.f32 %v2126_v51, %v6990_v43  ;;  %v2129_v11 = vmul.f32 %v2126_v51, %v6986_v24  ;;  %v7101_v52 = vld [vmem:[#allocation2 + $0x20] sm:$0x3]  ;;  %v2215_v62 = vstv %s5303_s21  ;;  %s5317_s21 = sld [smem:[#allocation14 + $0x1e]] }
 0x266   : > { %v1859_v1 = vsel %vm931_vm0, %v1856_v41, %v10191_v38  ;;  %v1975_v12 = vsel %vm1007_vm1, %v1972_v47, %v10190_v16  ;;  %v7055_v48 = vmul.f32 %v7002_v14, %v6990_v43  ;;  %v7061_v33 = vmul.f32 %v7006_v35, %v6990_v43 }
 0x267   : > { %v1868_v7 = vadd.f32 %v1859_v1, %v1809_v31  ;;  %v1804_v27 = vmul.f32 %v7016_v54, %v6990_v43  ;;  %v2155_v5 = vmul.f32 %v2152_v18, %v6986_v24  ;;  %v2153_v20 = vmul.f32 %v2152_v18, %v6988_v13 }
 0x268   : > { %v10193_v29 = vrot.slane %v7055_v48, 1  ;;  %v10192_v21 = vrot.slane %v7061_v33, 2  ;;  %v2154_v42 = vmul.f32 %v2152_v18, %v6990_v43  ;;  %v2477_v44 = vmul.f32 %v2474_v63, %v6986_v24 }
 0x269   : > { %v1772_v22 = vpop.permute.xlu1 %1771  ;;  %v7045_v34 = vadd.f32 %v1975_v12, %v1868_v7  ;;  %v1808_v32 = vadd.f32 %v1804_v27, %v7028_v46  ;;  %v2476_v60 = vmul.f32 %v2474_v63, %v6990_v43  ;;  %v2502_v2 = vmul.f32 %v7088_v28, %v6990_v43 }
 0x26a   : > { %v1770_v8 = vpop.permute.xlu0 %1769  ;;  %1782 = vst.msk [vmem:[#allocation2 + $0x62] sm:$0xff] %vm1736_vm5, %v1772_v22  ;;  %v1857_v25 = vsel %vm931_vm0, %v10193_v29, %v1856_v41  ;;  %v1973_v40 = vsel %vm1007_vm1, %v10192_v21, %v1972_v47  ;;  %v2475_v30 = vmul.f32 %v2474_v63, %v6988_v13  ;;  %v2501_v49 = vmul.f32 %v7088_v28, %v6988_v13 }
 0x26b   : > { %1781 = vst.msk [vmem:[#allocation2 + $0x5a] sm:$0xff] %vm1736_vm5, %v1770_v8  ;;  %v1867_v19 = vadd.f32 %v1857_v25, %v1808_v32  ;;  %v2180_v3 = vmul.f32 %v2178_v9, %v6990_v43  ;;  %v2181_v58 = vmul.f32 %v2178_v9, %v6986_v24  ;;  %v2179_v55 = vmul.f32 %v2178_v9, %v6988_v13 }
 0x26c   : > { %2111 = vrot.lane.b32.xlu2 %v2102_v37, %s5803_s22  ;;  %v2478_v8 = vmul.f32 %v2474_v63, %v7000_v45  ;;  %v2182_v57 = vmul.f32 %v2178_v9, %v7000_v45  ;;  %v2183_v53 = vmul.f32 %v2178_v9, %v7101_v52  ;;  %v2216_v10 = vmul.f32 %v2215_v62, %v6988_v13 }
 0x26d   : > { %2089 = vrot.lane.b32.xlu0 %v2078_v0, %s5803_s22  ;;  %2109 = vrot.lane.b32.xlu1 %v2101_v6, %s5803_s22  ;;  %v7080_v4 = vadd.f32 %v1973_v40, %v1867_v19  ;;  %v2190_v59 = vrot.slane %v2180_v3, 1  ;;  %v2192_v17 = vrot.slane %v2181_v58, 1  ;;  %v2189_v22 = vrot.slane %v2179_v55, 1 }
 0x26e   : > { %v2217_v0 = vmul.f32 %v2215_v62, %v6990_v43  ;;  %v2194_v41 = vrot.slane %v2182_v57, 1  ;;  %v2196_v51 = vrot.slane %v2183_v53, 1  ;;  %v2226_v1 = vrot.slane %v2216_v10, 1 }
 0x26f   : > { %v2193_v37 = vsel %vm931_vm0, %v2190_v59, %v2192_v17  ;;  %v2191_v6 = vsel %vm931_vm0, %v2189_v22, %v2190_v59  ;;  %v2220_v7 = vmul.f32 %v2215_v62, %v7101_v52  ;;  %v2218_v12 = vmul.f32 %v2215_v62, %v6986_v24 }
 0x270   : > { %v2227_v31 = vrot.slane %v2217_v0, 1  ;;  %v2252_v27 = vstv %s5304_s18  ;;  %v2615_v21 = vstv %s5315_s16  ;;  %s2725_s18 = sld [smem:[#allocation14]] }
 0x271   : > { %v2255_v18 = vmul.f32 %v2252_v27, %v6986_v24  ;;  %v2257_v58 = vmul.f32 %v2252_v27, %v7101_v52  ;;  %s5338_s16 = sld [smem:[#allocation14 + $0x31]] }
 0x272   : > { %v2228_v47 = vsel %vm931_vm0, %v2226_v1, %v2227_v31 }
 0x273   : > { %v2266_v19 = vrot.slane %v2255_v18, 1  ;;  %v2270_v22 = vrot.slane %v2257_v58, 1 }
 0x274   : > { %2135 = vrot.lane.b32.xlu2 %v2127_v15, %s5803_s22  ;;  %v2219_v15 = vmul.f32 %v2215_v62, %v7000_v45 }
 0x275   : > { %2113 = vrot.lane.b32.xlu0 %v2103_v39, %s5803_s22  ;;  %2115 = vrot.lane.b32.xlu1 %v2104_v36, %s5803_s22  ;;  %v2195_v39 = vsel %vm931_vm0, %v2192_v17, %v2194_v41  ;;  %v2197_v36 = vsel %vm931_vm0, %v2194_v41, %v2196_v51 }
 0x27c   : > { %2141 = vrot.lane.b32.xlu2 %v2130_v23, %s5803_s22  ;;  %v2231_v23 = vrot.slane %v2219_v15, 1 }
 0x27d   : > { %2137 = vrot.lane.b32.xlu0 %v2128_v50, %s5803_s22  ;;  %2139 = vrot.lane.b32.xlu1 %v2129_v11, %s5803_s22  ;;  %v2233_v50 = vrot.slane %v2220_v7, 1  ;;  %v2229_v11 = vrot.slane %v2218_v12, 1 }
 0x27f   : > { %v2234_v25 = vsel %vm931_vm0, %v2231_v23, %v2233_v50  ;;  %v2230_v32 = vsel %vm931_vm0, %v2227_v31, %v2229_v11  ;;  %v2232_v40 = vsel %vm931_vm0, %v2229_v11, %v2231_v23 }
 0x284   : > { %2165 = vrot.lane.b32.xlu2 %v2155_v5, %s5803_s22  ;;  %v2254_v5 = vmul.f32 %v2252_v27, %v6990_v43 }
 0x285   : > { %2161 = vrot.lane.b32.xlu0 %v2153_v20, %s5803_s22  ;;  %2163 = vrot.lane.b32.xlu1 %v2154_v42, %s5803_s22  ;;  %v2256_v20 = vmul.f32 %v2252_v27, %v7000_v45  ;;  %v2253_v42 = vmul.f32 %v2252_v27, %v6988_v13 }
 0x286   : > { %v2264_v63 = vrot.slane %v2254_v5, 1 }
 0x288   : > { %v2267_v3 = vsel %vm931_vm0, %v2264_v63, %v2266_v19 }
 0x28c   : > { %2487 = vrot.lane.b32.xlu2 %v2477_v44, %s5804_s20  ;;  %v2268_v44 = vrot.slane %v2256_v20, 1 }
 0x28d   : > { %2167 = vrot.lane.b32.xlu0 %v2156_v61, %s5803_s22  ;;  %2485 = vrot.lane.b32.xlu1 %v2476_v60, %s5804_s20  ;;  %v2263_v61 = vrot.slane %v2253_v42, 1  ;;  %v2289_v60 = vstv %s5305_s9  ;;  %s5318_s9 = sld [smem:[#allocation14 + $0x9]] }
 0x28e   : > { %v2291_v9 = vmul.f32 %v2289_v60, %v6990_v43  ;;  %v2290_v55 = vmul.f32 %v2289_v60, %v6988_v13  ;;  %v2293_v53 = vmul.f32 %v2289_v60, %v7000_v45  ;;  %v2294_v10 = vmul.f32 %v2289_v60, %v7101_v52 }
 0x290   : > { %v2301_v59 = vrot.slane %v2291_v9, 1  ;;  %v2300_v62 = vrot.slane %v2290_v55, 1  ;;  %v2305_v1 = vrot.slane %v2293_v53, 1 }
 0x292   : > { %v2302_v57 = vsel %vm931_vm0, %v2300_v62, %v2301_v59 }
 0x294   : > { %2511 = vrot.lane.b32.xlu2 %v2502_v2, %s5804_s20  ;;  %v2269_v2 = vsel %vm931_vm0, %v2266_v19, %v2268_v44 }
 0x295   : > { %2483 = vrot.lane.b32.xlu0 %v2475_v30, %s5804_s20  ;;  %2509 = vrot.lane.b32.xlu1 %v2501_v49, %s5804_s20  ;;  %v2292_v30 = vmul.f32 %v2289_v60, %v6986_v24  ;;  %v2265_v49 = vsel %vm931_vm0, %v2263_v61, %v2264_v63 }
 0x297   : > { %v2303_v17 = vrot.slane %v2292_v30, 1 }
 0x299   : > { %v2306_v12 = vsel %vm931_vm0, %v2303_v17, %v2305_v1 }
 0x29c   : > { %2200 = vrot.lane.b32.xlu2 %v2193_v37, %s5803_s22  ;;  %v2304_v37 = vsel %vm931_vm0, %v2301_v59, %v2303_v17 }
 0x29d   : > { %2489 = vrot.lane.b32.xlu0 %v2478_v8, %s5804_s20  ;;  %2198 = vrot.lane.b32.xlu1 %v2191_v6, %s5803_s22  ;;  %v2326_v8 = vstv %s5306_s19  ;;  %v2271_v6 = vsel %vm931_vm0, %v2268_v44, %v2270_v22  ;;  %s5319_s19 = sld [smem:[#allocation14 + $0x12]] }
 0x29e   : > { %v2328_v0 = vmul.f32 %v2326_v8, %v6990_v43  ;;  %v2327_v31 = vmul.f32 %v2326_v8, %v6988_v13  ;;  %v2329_v50 = vmul.f32 %v2326_v8, %v6986_v24 }
 0x2a0   : > { %v2338_v51 = vrot.slane %v2328_v0, 2  ;;  %v2337_v15 = vrot.slane %v2327_v31, 2  ;;  %v2340_v18 = vrot.slane %v2329_v50, 2  ;;  %v2437_v31 = vstv %s5309_s17  ;;  %s5334_s17 = sld [smem:[#allocation14 + $0x34]] }
 0x2a2   : > { %v2339_v7 = vsel %vm1007_vm1, %v2337_v15, %v2338_v51  ;;  %v2341_v20 = vsel %vm1007_vm1, %v2338_v51, %v2340_v18 }
 0x2a4   : > { %2235 = vrot.lane.b32.xlu2 %v2228_v47, %s5803_s22  ;;  %v2307_v47 = vrot.slane %v2294_v10, 1 }
 0x2a5   : > { %2202 = vrot.lane.b32.xlu0 %v2195_v39, %s5803_s22  ;;  %2204 = vrot.lane.b32.xlu1 %v2197_v36, %s5803_s22  ;;  %v2330_v39 = vmul.f32 %v2326_v8, %v7000_v45  ;;  %v2331_v36 = vmul.f32 %v2326_v8, %v7101_v52 }
 0x2a6   : > { %v2308_v23 = vsel %vm931_vm0, %v2305_v1, %v2307_v47  ;;  %v2439_v1 = vmul.f32 %v2437_v31, %v6990_v43 }
 0x2a7   : > { %v2342_v27 = vrot.slane %v2330_v39, 2 }
 0x2a9   : > { %v2343_v42 = vsel %vm1007_vm1, %v2340_v18, %v2342_v27 }
 0x2ac   : > { %2241 = vrot.lane.b32.xlu2 %v2234_v25, %s5803_s22  ;;  %v2344_v25 = vrot.slane %v2331_v36, 2  ;;  %v2438_v36 = vmul.f32 %v2437_v31, %v6988_v13 }
 0x2ad   : > { %2237 = vrot.lane.b32.xlu0 %v2230_v32, %s5803_s22  ;;  %2239 = vrot.lane.b32.xlu1 %v2232_v40, %s5803_s22  ;;  %v2363_v32 = vstv %s5307_s14  ;;  %s5320_s14 = sld [smem:[#allocation14 + $0x1b]] }
 0x2ae   : > { %v2345_v40 = vsel %vm1007_vm1, %v2342_v27, %v2344_v25  ;;  %v2366_v5 = vmul.f32 %v2363_v32, %v6986_v24  ;;  %v2365_v19 = vmul.f32 %v2363_v32, %v6990_v43  ;;  %v2367_v63 = vmul.f32 %v2363_v32, %v7000_v45 }
 0x2af   : > { %v2364_v44 = vmul.f32 %v2363_v32, %v6988_v13  ;;  %v2368_v22 = vmul.f32 %v2363_v32, %v7101_v52  ;;  %v2449_v27 = vrot.slane %v2439_v1, 2  ;;  %v2448_v32 = vrot.slane %v2438_v36, 2  ;;  %v7248_v1 = vld [vmem:[#allocation2 + $0x30] sm:$0xff] }
 0x2b0   : > { %v2377_v60 = vrot.slane %v2366_v5, 2  ;;  %v2379_v9 = vrot.slane %v2367_v63, 2  ;;  %v2441_v5 = vmul.f32 %v2437_v31, %v7000_v45  ;;  %v2440_v63 = vmul.f32 %v2437_v31, %v6986_v24 }
 0x2b1   : > { %v2374_v30 = vrot.slane %v2364_v44, 2  ;;  %v2381_v53 = vrot.slane %v2368_v22, 2 }
 0x2b3   : > { %v2382_v47 = vsel %vm1007_vm1, %v2379_v9, %v2381_v53  ;;  %v2503_v53 = vmul.f32 %v7088_v28, %v6986_v24 }
 0x2b4   : > { %2276 = vrot.lane.b32.xlu2 %v2269_v2, %s5803_s22  ;;  %v2375_v2 = vrot.slane %v2365_v19, 2 }
 0x2b5   : > { %2272 = vrot.lane.b32.xlu0 %v2265_v49, %s5803_s22  ;;  %2274 = vrot.lane.b32.xlu1 %v2267_v3, %s5803_s22  ;;  %v2400_v49 = vstv %s5308_s15  ;;  %v2380_v3 = vsel %vm1007_vm1, %v2377_v60, %v2379_v9  ;;  %v2453_v9 = vrot.slane %v2441_v5, 2  ;;  %s5333_s15 = sld [smem:[#allocation14 + $0x2b]] }
 0x2b6   : > { %v2402_v58 = vmul.f32 %v2400_v49, %v6990_v43  ;;  %v2403_v55 = vmul.f32 %v2400_v49, %v6986_v24  ;;  %v2376_v59 = vsel %vm1007_vm1, %v2374_v30, %v2375_v2  ;;  %v2378_v17 = vsel %vm1007_vm1, %v2375_v2, %v2377_v60 }
 0x2b7   : > { %v2401_v8 = vmul.f32 %v2400_v49, %v6988_v13  ;;  %v2405_v39 = vmul.f32 %v2400_v49, %v7101_v52 }
 0x2b9   : > { %v2411_v10 = vrot.slane %v2401_v8, 2  ;;  %v2418_v18 = vrot.slane %v2405_v39, 2  ;;  %v2526_v8 = vstv %s5312_s23  ;;  %s5335_s23 = sld [smem:[#allocation14 + $0x3d]] }
 0x2ba   : > { %v2529_v5 = vmul.f32 %v2526_v8, %v6986_v24 }
 0x2bc   : > { %2311 = vrot.lane.b32.xlu2 %v2304_v37, %s5803_s22 }
 0x2bd   : > { %2278 = vrot.lane.b32.xlu0 %v2271_v6, %s5803_s22  ;;  %2309 = vrot.lane.b32.xlu1 %v2302_v57, %s5803_s22  ;;  %v2412_v6 = vrot.slane %v2402_v58, 2  ;;  %v2414_v57 = vrot.slane %v2403_v55, 2 }
 0x2be   : > { %v7152_v41 = vpop.permute.xlu2 %2087 }
 0x2bf   : > { %v2415_v51 = vsel %vm1007_vm1, %v2412_v6, %v2414_v57  ;;  %v2413_v15 = vsel %vm1007_vm1, %v2411_v10, %v2412_v6  ;;  %v2527_v6 = vmul.f32 %v2526_v8, %v6988_v13  ;;  %v2504_v10 = vmul.f32 %v7088_v28, %v7000_v45 }
 0x2c4   : > { %2346 = vrot.lane.b32.xlu2 %v2339_v7, %s5803_s22  ;;  %v2404_v7 = vmul.f32 %v2400_v49, %v7000_v45  ;;  %v2451_v49 = vrot.slane %v2440_v63, 2 }
 0x2c5   : > { %2313 = vrot.lane.b32.xlu0 %v2306_v12, %s5803_s22  ;;  %2315 = vrot.lane.b32.xlu1 %v2308_v23, %s5803_s22 }
 0x2c6   : > { %v7163_v11 = vpop.permute.xlu2 %2111  ;;  %v2416_v25 = vrot.slane %v2404_v7, 2  ;;  %v2452_v58 = vsel %vm1007_vm1, %v2449_v27, %v2451_v49  ;;  %v2454_v55 = vsel %vm1007_vm1, %v2451_v49, %v2453_v9 }
 0x2c8   : > { %v2419_v19 = vsel %vm1007_vm1, %v2416_v25, %v2418_v18 }
 0x2cc   : > { %2352 = vrot.lane.b32.xlu2 %v2345_v40, %s5803_s22  ;;  %v2450_v40 = vsel %vm1007_vm1, %v2448_v32, %v2449_v27 }
 0x2cd   : > { %2348 = vrot.lane.b32.xlu0 %v2341_v20, %s5803_s22  ;;  %2350 = vrot.lane.b32.xlu1 %v2343_v42, %s5803_s22  ;;  %v2442_v20 = vmul.f32 %v2437_v31, %v7101_v52  ;;  %v2417_v42 = vsel %vm1007_vm1, %v2414_v57, %v2416_v25  ;;  %v7237_v57 = vld [vmem:[#allocation2 + $0x38] sm:$0xff]  ;;  %v7243_v31 = vstv %s5325_s8  ;;  %v2530_v25 = vmul.f32 %v2526_v8, %v7000_v45  ;;  %s5361_s8 = sld [smem:[#allocation14 + $0x4d]] }
 0x2ce   : > { %v7175_v61 = vpop.permute.xlu2 %2135  ;;  %10349 = vst [vmem:[#allocation30_spill] sm:$0xff] %v7243_v31  ;;  %v7268_v36 = vmul.f32 %v7243_v31, %v7248_v1 }
 0x2cf   : > { %v2455_v30 = vrot.slane %v2442_v20, 2 }
 0x2d0   : > { %10353 = vst [vmem:[#allocation33_spill] sm:$0xff] %v7268_v36  ;;  %v10189_v32 = vrot.slane %v7268_v36, 1  ;;  %v7948_v36 = vld [vmem:[#allocation2 + $0x20] sm:$0x3] }
 0x2d4   : > { %2387 = vrot.lane.b32.xlu2 %v2380_v3, %s5803_s22  ;;  %v2456_v3 = vsel %vm1007_vm1, %v2453_v9, %v2455_v30 }
 0x2d5   : > { %2383 = vrot.lane.b32.xlu0 %v2376_v59, %s5803_s22  ;;  %2385 = vrot.lane.b32.xlu1 %v2378_v17, %s5803_s22 }
 0x2d6   : > { %v7186_v62 = vpop.permute.xlu2 %2141 }
 0x2d7   : > { %10339 = vst [vmem:[#allocation48_spill] sm:$0xff] %v7186_v62  ;;  %v7189_v37 = vpop.permute.xlu0 %2083  ;;  %v7191_v0 = vpop.permute.xlu1 %2085 }
 0x2d8   : > { %10340 = vst [vmem:[#allocation63_spill] sm:$0xff] %v7189_v37 }
 0x2dc   : > { %2422 = vrot.lane.b32.xlu2 %v2415_v51, %s5803_s22  ;;  %v7246_v51 = vstv %s5329_s1  ;;  %s5365_s1 = sld [smem:[#allocation14 + $0x4a]] }
 0x2dd   : > { %2389 = vrot.lane.b32.xlu0 %v2382_v47, %s5803_s22  ;;  %2420 = vrot.lane.b32.xlu1 %v2413_v15, %s5803_s22  ;;  %10350 = vst [vmem:[#allocation32_spill] sm:$0xff] %v7246_v51  ;;  %v7256_v15 = vmul.f32 %v7243_v31, %v7237_v57  ;;  %v7264_v39 = vmul.f32 %v7246_v51, %v7237_v57 }
 0x2de   : > { %v7203_v12 = vpop.permute.xlu2 %2165  ;;  %v7272_v27 = vmul.f32 %v7246_v51, %v7248_v1 }
 0x2df   : > { %10341 = vst [vmem:[#allocation25_spill] sm:$0xff] %v7203_v12  ;;  %v7205_v23 = vpop.permute.xlu0 %2089  ;;  %v7207_v50 = vpop.permute.xlu1 %2109  ;;  %v10195_v18 = vrot.slane %v7256_v15, 1  ;;  %v10194_v20 = vrot.slane %v7264_v39, 2 }
 0x2e0   : > { %10342 = vst [vmem:[#allocation28_spill] sm:$0xff] %v7205_v23 }
 0x2e1   : > { %10343 = vst [vmem:[#allocation37_spill] sm:$0xff] %v7207_v50 }
 0x2e2   : > { %10354 = vst [vmem:[#allocation55_spill] sm:$0xff] %v7272_v27 }
 0x2e4   : > { %2457 = vrot.lane.b32.xlu2 %v2450_v40, %s5803_s22  ;;  %v2528_v40 = vmul.f32 %v2526_v8, %v6990_v43 }
 0x2e5   : > { %2424 = vrot.lane.b32.xlu0 %v2417_v42, %s5803_s22  ;;  %2426 = vrot.lane.b32.xlu1 %v2419_v19, %s5803_s22  ;;  %v10188_v42 = vrot.slane %v7272_v27, 2  ;;  %v7287_v19 = vsel %vm931_vm0, %v10189_v32, %v10195_v18  ;;  %v2837_v27 = vstv %s5320_s14  ;;  %s5343_s14 = sld [smem:[#allocation14 + $0x37]] }
 0x2e6   : > { %v7218_v44 = vpop.permute.xlu2 %2487 }
 0x2e7   : > { %v7220_v60 = vpop.permute.xlu0 %2113  ;;  %v7222_v2 = vpop.permute.xlu1 %2115  ;;  %v7296_v63 = vsel %vm1007_vm1, %v10188_v42, %v10194_v20 }
 0x2e8   : > { %10344 = vst [vmem:[#allocation61_spill] sm:$0xff] %v7220_v60 }
 0x2e9   : > { %10345 = vst [vmem:[#allocation41_spill] sm:$0xff] %v7222_v2 }
 0x2ec   : > { %2463 = vrot.lane.b32.xlu2 %v2456_v3, %s5803_s22  ;;  %v2552_v3 = vstv %s5313_s29  ;;  %s5336_s29 = sld [smem:[#allocation14 + $0x46]] }
 0x2ed   : > { %2459 = vrot.lane.b32.xlu0 %v2452_v58, %s5803_s22  ;;  %2461 = vrot.lane.b32.xlu1 %v2454_v55, %s5803_s22  ;;  %v2555_v58 = vmul.f32 %v2552_v3, %v6986_v24  ;;  %v2578_v55 = vstv %s5314_s13  ;;  %v2553_v8 = vmul.f32 %v2552_v3, %v6988_v13  ;;  %v2556_v29 = vmul.f32 %v2552_v3, %v7000_v45  ;;  %s5337_s13 = sld [smem:[#allocation14 + $0x28]] }
 0x2ee   : > { %v7230_v59 = vpop.permute.xlu2 %2511  ;;  %v2582_v20 = vmul.f32 %v2578_v55, %v7000_v45  ;;  %v2583_v18 = vmul.f32 %v2578_v55, %v7101_v52 }
 0x2ef   : > { %10346 = vst [vmem:[#allocation53_spill] sm:$0xff] %v7230_v59  ;;  %v7232_v17 = vpop.permute.xlu0 %2137  ;;  %v7234_v22 = vpop.permute.xlu1 %2139 }
 0x2f0   : > { %10347 = vst [vmem:[#allocation59_spill] sm:$0xff] %v7232_v17 }
 0x2f1   : > { %10348 = vst [vmem:[#allocation31_spill] sm:$0xff] %v7234_v22 }
 0x2f4   : > { %2535 = vrot.lane.b32.xlu2 %v2527_v6, %s5804_s20  ;;  %v2554_v6 = vmul.f32 %v2552_v3, %v6990_v43 }
 0x2f5   : > { %2513 = vrot.lane.b32.xlu0 %v2503_v53, %s5804_s20  ;;  %2515 = vrot.lane.b32.xlu1 %v2504_v10, %s5804_s20  ;;  %v2580_v53 = vmul.f32 %v2578_v55, %v6990_v43  ;;  %v2581_v10 = vmul.f32 %v2578_v55, %v6986_v24 }
 0x2f6   : > { %v7252_v47 = vpop.permute.xlu2 %2200 }
 0x2f7   : > { %v7258_v7 = vpop.permute.xlu0 %2161  ;;  %v7260_v28 = vpop.permute.xlu1 %2163  ;;  %v2590_v32 = vrot.slane %v2580_v53, 1  ;;  %v2592_v16 = vrot.slane %v2581_v10, 1  ;;  %v2616_v53 = vmul.f32 %v2615_v21, %v6988_v13 }
 0x2f8   : > { %10351 = vst [vmem:[#allocation44_spill] sm:$0xff] %v7258_v7 }
 0x2f9   : > { %10352 = vst [vmem:[#allocation49_spill] sm:$0xff] %v7260_v28 }
 0x2fc   : > { %2541 = vrot.lane.b32.xlu2 %v2530_v25, %s5804_s20 }
 0x2fd   : > { %2537 = vrot.lane.b32.xlu0 %v2528_v40, %s5804_s20  ;;  %2539 = vrot.lane.b32.xlu1 %v2529_v5, %s5804_s20  ;;  %v2579_v40 = vmul.f32 %v2578_v55, %v6988_v13  ;;  %v2619_v55 = vmul.f32 %v2615_v21, %v7000_v45 }
 0x2fe   : > { %v7298_v9 = vpop.permute.xlu2 %2235 }
 0x2ff   : > { %10355 = vst [vmem:[#allocation27_spill] sm:$0xff] %v7298_v9  ;;  %v7300_v30 = vpop.permute.xlu0 %2167  ;;  %v7302_v49 = vpop.permute.xlu1 %2485  ;;  %v2589_v38 = vrot.slane %v2579_v40, 1 }
 0x300   : > { %10356 = vst [vmem:[#allocation34_spill] sm:$0xff] %v7300_v30  ;;  %v2726_v30 = vstv %s2725_s18  ;;  %s5321_s18 = sld [smem:[#allocation14 + $0x2c]] }
 0x304   : > { %2565 = vrot.lane.b32.xlu2 %v2555_v58, %s5804_s20  ;;  %v2593_v58 = vsel %vm931_vm0, %v2590_v32, %v2592_v16 }
 0x305   : > { %2561 = vrot.lane.b32.xlu0 %v2553_v8, %s5804_s20  ;;  %2563 = vrot.lane.b32.xlu1 %v2554_v6, %s5804_s20  ;;  %v2617_v8 = vmul.f32 %v2615_v21, %v6990_v43  ;;  %v2591_v6 = vsel %vm931_vm0, %v2589_v38, %v2590_v32  ;;  %v2626_v38 = vrot.slane %v2616_v53, 1  ;;  %v2631_v53 = vrot.slane %v2619_v55, 1 }
 0x306   : > { %v7312_v25 = vpop.permute.xlu2 %2241 }
 0x307   : > { %10357 = vst [vmem:[#allocation60_spill] sm:$0xff] %v7312_v25  ;;  %v7315_v5 = vpop.permute.xlu0 %2483  ;;  %v7317_v42 = vpop.permute.xlu1 %2509  ;;  %v2627_v59 = vrot.slane %v2617_v8, 1 }
 0x308   : > { %10358 = vst [vmem:[#allocation38_spill] sm:$0xff] %v7315_v5 }
 0x309   : > { %10359 = vst [vmem:[#allocation51_spill] sm:$0xff] %v7317_v42  ;;  %v2596_v42 = vrot.slane %v2583_v18, 1  ;;  %v2628_v32 = vsel %vm931_vm0, %v2626_v38, %v2627_v59 }
 0x30c   : > { %2600 = vrot.lane.b32.xlu2 %v2593_v58, %s5804_s20  ;;  %v2594_v58 = vrot.slane %v2582_v20, 1 }
 0x30d   : > { %2567 = vrot.lane.b32.xlu0 %v2556_v29, %s5804_s20  ;;  %2598 = vrot.lane.b32.xlu1 %v2591_v6, %s5804_s20  ;;  %v2620_v29 = vmul.f32 %v2615_v21, %v7101_v52 }
 0x30e   : > { %v7329_v10 = vpop.permute.xlu2 %2276  ;;  %v2595_v6 = vsel %vm931_vm0, %v2592_v16, %v2594_v58  ;;  %v2597_v5 = vsel %vm931_vm0, %v2594_v58, %v2596_v42  ;;  %v2652_v16 = vstv %s5316_s0  ;;  %s5339_s0 = sld [smem:[#allocation14 + $0x3a]] }
 0x30f   : > { %10360 = vst [vmem:[#allocation50_spill] sm:$0xff] %v7329_v10  ;;  %v7331_v3 = vpop.permute.xlu0 %2489  ;;  %v7333_v40 = vpop.permute.xlu1 %2198  ;;  %v2633_v38 = vrot.slane %v2620_v29, 1  ;;  %v2655_v42 = vmul.f32 %v2652_v16, %v6986_v24  ;;  %v2654_v58 = vmul.f32 %v2652_v16, %v6990_v43  ;;  %v2653_v55 = vmul.f32 %v2652_v16, %v6988_v13 }
 0x310   : > { %10361 = vst [vmem:[#allocation40_spill] sm:$0xff] %v7331_v3  ;;  %v2618_v3 = vmul.f32 %v2615_v21, %v6986_v24 }
 0x311   : > { %10362 = vst [vmem:[#allocation45_spill] sm:$0xff] %v7333_v40 }
 0x312   : > { %v2629_v40 = vrot.slane %v2618_v3, 1  ;;  %v2656_v3 = vmul.f32 %v2652_v16, %v7000_v45 }
 0x314   : > { %2635 = vrot.lane.b32.xlu2 %v2628_v32, %s5804_s20  ;;  %v2634_v32 = vsel %vm931_vm0, %v2631_v53, %v2633_v38  ;;  %v2630_v21 = vsel %vm931_vm0, %v2627_v59, %v2629_v40  ;;  %v2666_v59 = vrot.slane %v2655_v42, 1 }
 0x315   : > { %2602 = vrot.lane.b32.xlu0 %v2595_v6, %s5804_s20  ;;  %2604 = vrot.lane.b32.xlu1 %v2597_v5, %s5804_s20  ;;  %v2632_v5 = vsel %vm931_vm0, %v2629_v40, %v2631_v53  ;;  %v2663_v40 = vrot.slane %v2653_v55, 1  ;;  %v2689_v53 = vstv %s5317_s21  ;;  %s5340_s21 = sld [smem:[#allocation14 + $0x43]] }
 0x316   : > { %v7344_v18 = vpop.permute.xlu2 %2311 }
 0x317   : > { %10363 = vst [vmem:[#allocation62_spill] sm:$0xff] %v7344_v18  ;;  %v7346_v20 = vpop.permute.xlu0 %2202  ;;  %v7348_v8 = vpop.permute.xlu1 %2204  ;;  %v2692_v18 = vmul.f32 %v2689_v53, %v6986_v24 }
 0x318   : > { %10364 = vst [vmem:[#allocation36_spill] sm:$0xff] %v7348_v8  ;;  %v2668_v8 = vrot.slane %v2656_v3, 1 }
 0x31c   : > { %2641 = vrot.lane.b32.xlu2 %v2634_v32, %s5804_s20  ;;  %v2664_v32 = vrot.slane %v2654_v58, 1  ;;  %v2690_v58 = vmul.f32 %v2689_v53, %v6988_v13 }
 0x31d   : > { %2637 = vrot.lane.b32.xlu0 %v2630_v21, %s5804_s20  ;;  %2639 = vrot.lane.b32.xlu1 %v2632_v5, %s5804_s20  ;;  %v2669_v21 = vsel %vm931_vm0, %v2666_v59, %v2668_v8  ;;  %v2691_v5 = vmul.f32 %v2689_v53, %v6990_v43 }
 0x31e   : > { %v7360_v29 = vpop.permute.xlu2 %2346  ;;  %v2665_v10 = vsel %vm931_vm0, %v2663_v40, %v2664_v32  ;;  %v2703_v40 = vrot.slane %v2692_v18, 1  ;;  %v2727_v18 = vmul.f32 %v2726_v30, %v6988_v13 }
 0x31f   : > { %10365 = vst [vmem:[#allocation64_spill] sm:$0xff] %v7360_v29  ;;  %v7362_v6 = vpop.permute.xlu0 %2237  ;;  %v7364_v38 = vpop.permute.xlu1 %2239  ;;  %v2667_v29 = vsel %vm931_vm0, %v2664_v32, %v2666_v59  ;;  %v2693_v32 = vmul.f32 %v2689_v53, %v7000_v45 }
 0x320   : > { %10366 = vst [vmem:[#allocation47_spill] sm:$0xff] %v7362_v6  ;;  %v2657_v6 = vmul.f32 %v2652_v16, %v7101_v52  ;;  %v2728_v16 = vmul.f32 %v2726_v30, %v6990_v43 }
 0x321   : > { %10367 = vst [vmem:[#allocation56_spill] sm:$0xff] %v7364_v38  ;;  %v2701_v38 = vrot.slane %v2691_v5, 1 }
 0x322   : > { %v2670_v25 = vrot.slane %v2657_v6, 1 }
 0x323   : > { %v2704_v59 = vsel %vm931_vm0, %v2701_v38, %v2703_v40 }
 0x324   : > { %2676 = vrot.lane.b32.xlu2 %v2669_v21, %s5804_s20  ;;  %v2700_v21 = vrot.slane %v2690_v58, 1 }
 0x325   : > { %2672 = vrot.lane.b32.xlu0 %v2665_v10, %s5804_s20  ;;  %2674 = vrot.lane.b32.xlu1 %v2667_v29, %s5804_s20  ;;  %v2671_v10 = vsel %vm931_vm0, %v2668_v8, %v2670_v25  ;;  %v2738_v25 = vrot.slane %v2728_v16, 2  ;;  %v2705_v8 = vrot.slane %v2693_v32, 1 }
 0x326   : > { %v7375_v42 = vpop.permute.xlu2 %2352  ;;  %v2702_v29 = vsel %vm931_vm0, %v2700_v21, %v2701_v38  ;;  %v2737_v38 = vrot.slane %v2727_v18, 2 }
 0x327   : > { %10368 = vst [vmem:[#allocation26_spill] sm:$0xff] %v7375_v42  ;;  %v7378_v3 = vpop.permute.xlu0 %2272  ;;  %v7380_v55 = vpop.permute.xlu1 %2274  ;;  %v2694_v42 = vmul.f32 %v2689_v53, %v7101_v52  ;;  %v2730_v53 = vmul.f32 %v2726_v30, %v7000_v45 }
 0x328   : > { %10369 = vst [vmem:[#allocation58_spill] sm:$0xff] %v7378_v3  ;;  %v2739_v21 = vsel %vm1007_vm1, %v2737_v38, %v2738_v25 }
 0x329   : > { %10370 = vst [vmem:[#allocation43_spill] sm:$0xff] %v7380_v55  ;;  %v2742_v18 = vrot.slane %v2730_v53, 2 }
 0x32c   : > { %2711 = vrot.lane.b32.xlu2 %v2704_v59, %s5804_s20  ;;  %v2707_v59 = vrot.slane %v2694_v42, 1 }
 0x32d   : > { %2678 = vrot.lane.b32.xlu0 %v2671_v10, %s5804_s20  ;;  %2709 = vrot.lane.b32.xlu1 %v2702_v29, %s5804_s20  ;;  %v2731_v10 = vmul.f32 %v2726_v30, %v7101_v52  ;;  %v2706_v29 = vsel %vm931_vm0, %v2703_v40, %v2705_v8  ;;  %v2763_v40 = vstv %s5318_s9  ;;  %s5341_s9 = sld [smem:[#allocation14 + $0x25]] }
 0x32e   : > { %v7392_v6 = vpop.permute.xlu2 %2387  ;;  %v2764_v53 = vmul.f32 %v2763_v40, %v6988_v13  ;;  %v2768_v55 = vmul.f32 %v2763_v40, %v7101_v52 }
 0x32f   : > { %10371 = vst [vmem:[#allocation35_spill] sm:$0xff] %v7392_v6  ;;  %v7394_v5 = vpop.permute.xlu0 %2278  ;;  %v7396_v58 = vpop.permute.xlu1 %2309  ;;  %v2708_v6 = vsel %vm931_vm0, %v2705_v8, %v2707_v59  ;;  %v2744_v38 = vrot.slane %v2731_v10, 2  ;;  %v2766_v8 = vmul.f32 %v2763_v40, %v6986_v24  ;;  %v2765_v59 = vmul.f32 %v2763_v40, %v6990_v43 }
 0x330   : > { %10372 = vst [vmem:[#allocation54_spill] sm:$0xff] %v7394_v5  ;;  %v2729_v5 = vmul.f32 %v2726_v30, %v6986_v24  ;;  %v2781_v9 = vrot.slane %v2768_v55, 2  ;;  %v2838_v55 = vmul.f32 %v2837_v27, %v6988_v13 }
 0x331   : > { %10373 = vst [vmem:[#allocation42_spill] sm:$0xff] %v7396_v58 }
 0x332   : > { %v2740_v58 = vrot.slane %v2729_v5, 2  ;;  %v2767_v5 = vmul.f32 %v2763_v40, %v7000_v45  ;;  %v2839_v40 = vmul.f32 %v2837_v27, %v6990_v43 }
 0x334   : > { %2746 = vrot.lane.b32.xlu2 %v2739_v21, %s5804_s20  ;;  %v2745_v21 = vsel %vm1007_vm1, %v2742_v18, %v2744_v38  ;;  %v2741_v30 = vsel %vm1007_vm1, %v2738_v25, %v2740_v58  ;;  %v2777_v25 = vrot.slane %v2766_v8, 2 }
 0x335   : > { %2713 = vrot.lane.b32.xlu0 %v2706_v29, %s5804_s20  ;;  %2715 = vrot.lane.b32.xlu1 %v2708_v6, %s5804_s20  ;;  %v2743_v6 = vsel %vm1007_vm1, %v2740_v58, %v2742_v18  ;;  %v2774_v58 = vrot.slane %v2764_v53, 2  ;;  %v2800_v18 = vstv %s5319_s19  ;;  %s5342_s19 = sld [smem:[#allocation14 + $0x2e]] }
 0x336   : > { %v7407_v42 = vpop.permute.xlu2 %2422 }
 0x337   : > { %10374 = vst [vmem:[#allocation29_spill] sm:$0xff] %v7407_v42  ;;  %v7409_v16 = vpop.permute.xlu0 %2313  ;;  %v7411_v32 = vpop.permute.xlu1 %2315  ;;  %v2803_v42 = vmul.f32 %v2800_v18, %v6986_v24 }
 0x338   : > { %10375 = vst [vmem:[#allocation66_spill] sm:$0xff] %v7409_v16 }
 0x339   : > { %10376 = vst [vmem:[#allocation52_spill] sm:$0xff] %v7411_v32  ;;  %v2779_v32 = vrot.slane %v2767_v5, 2 }
 0x33c   : > { %2752 = vrot.lane.b32.xlu2 %v2745_v21, %s5804_s20  ;;  %v2775_v21 = vrot.slane %v2765_v59, 2  ;;  %v2801_v59 = vmul.f32 %v2800_v18, %v6988_v13 }
 0x33d   : > { %2748 = vrot.lane.b32.xlu0 %v2741_v30, %s5804_s20  ;;  %2750 = vrot.lane.b32.xlu1 %v2743_v6, %s5804_s20  ;;  %v2780_v30 = vsel %vm1007_vm1, %v2777_v25, %v2779_v32  ;;  %v2802_v6 = vmul.f32 %v2800_v18, %v6990_v43 }
 0x33e   : > { %v7423_v10 = vpop.permute.xlu2 %2457  ;;  %v2776_v16 = vsel %vm1007_vm1, %v2774_v58, %v2775_v21  ;;  %v2814_v58 = vrot.slane %v2803_v42, 2 }
 0x33f   : > { %10377 = vst [vmem:[#allocation39_spill] sm:$0xff] %v7423_v10  ;;  %v7425_v29 = vpop.permute.xlu0 %2348  ;;  %v7427_v38 = vpop.permute.xlu1 %2350  ;;  %v2778_v10 = vsel %vm1007_vm1, %v2775_v21, %v2777_v25  ;;  %v2812_v3 = vrot.slane %v2802_v6, 2  ;;  %v2804_v21 = vmul.f32 %v2800_v18, %v7000_v45 }
 0x341   : > { %v2815_v25 = vsel %vm1007_vm1, %v2812_v3, %v2814_v58 }
 0x344   : > { %2787 = vrot.lane.b32.xlu2 %v2780_v30, %s5804_s20  ;;  %v2811_v30 = vrot.slane %v2801_v59, 2 }
 0x345   : > { %2783 = vrot.lane.b32.xlu0 %v2776_v16, %s5804_s20  ;;  %2785 = vrot.lane.b32.xlu1 %v2778_v10, %s5804_s20  ;;  %v2782_v16 = vsel %vm1007_vm1, %v2779_v32, %v2781_v9  ;;  %v2849_v9 = vrot.slane %v2839_v40, 2  ;;  %v2816_v32 = vrot.slane %v2804_v21, 2 }
 0x346   : > { %v7438_v8 = vpop.permute.xlu2 %2463  ;;  %v2813_v10 = vsel %vm1007_vm1, %v2811_v30, %v2812_v3  ;;  %v2848_v3 = vrot.slane %v2838_v55, 2 }
 0x347   : > { %10378 = vst [vmem:[#allocation65_spill] sm:$0xff] %v7438_v8  ;;  %v7441_v5 = vpop.permute.xlu0 %2383  ;;  %v7443_v53 = vpop.permute.xlu1 %2385 }
 0x348   : > { %10379 = vst [vmem:[#allocation46_spill] sm:$0xff] %v7441_v5  ;;  %v2805_v5 = vmul.f32 %v2800_v18, %v7101_v52  ;;  %v2850_v30 = vsel %vm1007_vm1, %v2848_v3, %v2849_v9  ;;  %v2841_v18 = vmul.f32 %v2837_v27, %v7000_v45  ;;  %v3151_v3 = vstv %s5333_s15  ;;  %s5344_s15 = sld [smem:[#allocation14 + $0x40]] }
 0x349   : > { %10380 = vst [vmem:[#allocation57_spill] sm:$0xff] %v7443_v53 }
 0x34a   : > { %v2818_v59 = vrot.slane %v2805_v5, 2  ;;  %v2853_v45 = vrot.slane %v2841_v18, 2  ;;  %v7488_v18 = vld [vmem:[#allocation2 + $0x28] sm:$0xff] }
 0x34c   : > { %2822 = vrot.lane.b32.xlu2 %v2815_v25, %s5804_s20  ;;  %v2842_v25 = vmul.f32 %v2837_v27, %v7101_v52  ;;  %v2819_v13 = vsel %vm1007_vm1, %v2816_v32, %v2818_v59 }
 0x34d   : > { %2789 = vrot.lane.b32.xlu0 %v2782_v16, %s5804_s20  ;;  %2820 = vrot.lane.b32.xlu1 %v2813_v10, %s5804_s20  ;;  %v2817_v16 = vsel %vm1007_vm1, %v2814_v58, %v2816_v32  ;;  %v2840_v10 = vmul.f32 %v2837_v27, %v6986_v24 }
 0x34e   : > { %v7455_v42 = vpop.permute.xlu2 %2535  ;;  %v2855_v52 = vrot.slane %v2842_v25, 2  ;;  %v3152_v25 = vmul.f32 %v3151_v3, %v7488_v18 }
 0x34f   : > { %10381 = vst [vmem:[#allocation67_spill] sm:$0xff] %v7455_v42  ;;  %v7457_v6 = vpop.permute.xlu0 %2389  ;;  %v7459_v43 = vpop.permute.xlu1 %2420  ;;  %v2851_v58 = vrot.slane %v2840_v10, 2 }
 0x350   : > { %10382 = vst [vmem:[#allocation68_spill] sm:$0xff] %v7457_v6  ;;  %v2856_v55 = vsel %vm1007_vm1, %v2853_v45, %v2855_v52  ;;  %v7502_v52 = vld [vmem:[#allocation2 + $0x40] sm:$0xff]  ;;  %v3203_v6 = vstv %s5335_s23  ;;  %s5346_s23 = sld [smem:[#allocation14 + $0x33]] }
 0x351   : > { %10383 = vst [vmem:[#allocation69_spill] sm:$0xff] %v7459_v43  ;;  %v2852_v32 = vsel %vm1007_vm1, %v2849_v9, %v2851_v58  ;;  %v2854_v24 = vsel %vm1007_vm1, %v2851_v58, %v2853_v45  ;;  %v3154_v9 = vmul.f32 %v3151_v3, %v7237_v57  ;;  %v3177_v58 = vstv %s5334_s17  ;;  %s5345_s17 = sld [smem:[#allocation14 + $0x2a]] }
 0x352   : > { %v7516_v43 = vstv %s5361_s8  ;;  %s5347_s8 = sld [smem:[#allocation14 + $0x3c]] }
 0x353   : > { %10395 = vst [vmem:[#allocation81_spill] sm:$0xff] %v7516_v43 }
 0x354   : > { %2857 = vrot.lane.b32.xlu2 %v2850_v30, %s5804_s20 }
 0x355   : > { %2824 = vrot.lane.b32.xlu0 %v2817_v16, %s5804_s20  ;;  %2826 = vrot.lane.b32.xlu1 %v2819_v13, %s5804_s20  ;;  %v3153_v16 = vmul.f32 %v3151_v3, %v7248_v1 }
 0x356   : > { %v7470_v5 = vpop.permute.xlu2 %2541 }
 0x357   : > { %10384 = vst [vmem:[#allocation70_spill] sm:$0xff] %v7470_v5  ;;  %v7472_v40 = vpop.permute.xlu0 %2424  ;;  %v7474_v21 = vpop.permute.xlu1 %2426 }
 0x358   : > { %10385 = vst [vmem:[#allocation71_spill] sm:$0xff] %v7472_v40 }
 0x359   : > { %10386 = vst [vmem:[#allocation72_spill] sm:$0xff] %v7474_v21 }
 0x35c   : > { %2863 = vrot.lane.b32.xlu2 %v2856_v55, %s5804_s20  ;;  %v3179_v55 = vmul.f32 %v3177_v58, %v7248_v1 }
 0x35d   : > { %2859 = vrot.lane.b32.xlu0 %v2852_v32, %s5804_s20  ;;  %2861 = vrot.lane.b32.xlu1 %v2854_v24, %s5804_s20  ;;  %v3155_v32 = vmul.f32 %v3151_v3, %v7502_v52  ;;  %v3178_v24 = vmul.f32 %v3177_v58, %v7488_v18  ;;  %v7518_v3 = vstv %s5365_s1  ;;  %s5291_s1 = sld [smem:[#allocation14 + $0xe]] }
 0x35e   : > { %v7482_v27 = vpop.permute.xlu2 %2565  ;;  %10396 = vst [vmem:[#allocation82_spill] sm:$0xff] %v7518_v3 }
 0x35f   : > { %10387 = vst [vmem:[#allocation73_spill] sm:$0xff] %v7482_v27  ;;  %v7484_v59 = vpop.permute.xlu0 %2459  ;;  %v7486_v30 = vpop.permute.xlu1 %2461  ;;  %v3204_v27 = vmul.f32 %v3203_v6, %v7488_v18 }
 0x360   : > { %10388 = vst [vmem:[#allocation74_spill] sm:$0xff] %v7484_v59 }
 0x361   : > { %10389 = vst [vmem:[#allocation75_spill] sm:$0xff] %v7486_v30 }
 0x364   : > { %3164 = vrot.lane.b32.xlu2 %v3154_v9, %s5803_s22 }
 0x365   : > { %3160 = vrot.lane.b32.xlu0 %v3152_v25, %s5803_s22  ;;  %3162 = vrot.lane.b32.xlu1 %v3153_v16, %s5803_s22  ;;  %v3952_v25 = vld [vmem:[#allocation2 + $0x60] sm:$0xff] }
 0x366   : > { %v7496_v13 = vpop.permute.xlu2 %2600 }
 0x367   : > { %v7498_v10 = vpop.permute.xlu0 %2513  ;;  %v7500_v45 = vpop.permute.xlu1 %2515 }
 0x368   : > { %10390 = vst [vmem:[#allocation76_spill] sm:$0xff] %v7498_v10 }
 0x369   : > { %10391 = vst [vmem:[#allocation77_spill] sm:$0xff] %v7500_v45  ;;  %v3951_v45 = vld [vmem:[#allocation2 + $0x58] sm:$0xff] }
 0x36a   : > { %v7531_v30 = vmul.f32 %v7516_v43, %v3951_v45  ;;  %v7534_v53 = vmul.f32 %v7518_v3, %v3951_v45 }
 0x36c   : > { %3188 = vrot.lane.b32.xlu2 %v3179_v55, %s5803_s22  ;;  %v7522_v55 = vmul.f32 %v7516_v43, %v3952_v25  ;;  %10399 = vst [vmem:[#allocation85_spill] sm:$0xff] %v7531_v30  ;;  %v10204_v45 = vrot.slane %v7534_v53, 2  ;;  %v3205_v43 = vmul.f32 %v3203_v6, %v7248_v1 }
 0x36d   : > { %3166 = vrot.lane.b32.xlu0 %v3155_v32, %s5803_s22  ;;  %3186 = vrot.lane.b32.xlu1 %v3178_v24, %s5803_s22  ;;  %v7525_v32 = vmul.f32 %v7518_v3, %v3952_v25  ;;  %v3180_v24 = vmul.f32 %v3177_v58, %v7237_v57  ;;  %10400 = vst [vmem:[#allocation86_spill] sm:$0xff] %v7534_v53 }
 0x36e   : > { %v7510_v9 = vpop.permute.xlu2 %2635  ;;  %10397 = vst [vmem:[#allocation83_spill] sm:$0xff] %v7522_v55  ;;  %v10203_v25 = vrot.slane %v7522_v55, 1  ;;  %v3207_v3 = vmul.f32 %v3203_v6, %v7502_v52 }
 0x36f   : > { %10392 = vst [vmem:[#allocation78_spill] sm:$0xff] %v7510_v9  ;;  %v7512_v16 = vpop.permute.xlu0 %2537  ;;  %v7514_v42 = vpop.permute.xlu1 %2539  ;;  %v3181_v9 = vmul.f32 %v3177_v58, %v7502_v52  ;;  %v10205_v10 = vrot.slane %v7525_v32, 2 }
 0x370   : > { %10393 = vst [vmem:[#allocation79_spill] sm:$0xff] %v7512_v16  ;;  %v7589_v16 = vld [vmem:[#allocation2 + $0x48] sm:$0x3] }
 0x371   : > { %10394 = vst [vmem:[#allocation80_spill] sm:$0xff] %v7514_v42 }
 0x372   : > { %10398 = vst [vmem:[#allocation84_spill] sm:$0xff] %v7525_v32 }
 0x374   : > { %3212 = vrot.lane.b32.xlu2 %v3204_v27, %s5803_s22  ;;  %v10202_v27 = vrot.slane %v7531_v30, 1 }
 0x375   : > { %3190 = vrot.lane.b32.xlu0 %v3180_v24, %s5803_s22  ;;  %3192 = vrot.lane.b32.xlu1 %v3181_v9, %s5803_s22  ;;  %v7561_v24 = vsel %vm1007_vm1, %v10204_v45, %v10205_v10  ;;  %v3255_v10 = vstv %s5337_s13  ;;  %s5287_s13 = sld [smem:[#allocation14 + $0x11]] }
 0x376   : > { %v7538_v5 = vpop.permute.xlu2 %2641  ;;  %v7554_v9 = vsel %vm931_vm0, %v10202_v27, %v10203_v25  ;;  %10405 = vst [vmem:[#allocation91_spill] sm:$0xff] %v7561_v24  ;;  %v3229_v25 = vstv %s5336_s29  ;;  %v3259_v59 = vmul.f32 %v3255_v10, %v7502_v52  ;;  %s7828_s29 = sld [smem:[#allocation15 + $0x1]] }
 0x377   : > { %10401 = vst [vmem:[#allocation87_spill] sm:$0xff] %v7538_v5  ;;  %v7542_v21 = vpop.permute.xlu0 %2561  ;;  %v7544_v58 = vpop.permute.xlu1 %2563  ;;  %v3206_v5 = vmul.f32 %v3203_v6, %v7237_v57  ;;  %v3232_v45 = vmul.f32 %v3229_v25, %v7237_v57  ;;  %v3230_v53 = vmul.f32 %v3229_v25, %v7488_v18  ;;  %v3231_v6 = vmul.f32 %v3229_v25, %v7248_v1 }
 0x378   : > { %10402 = vst [vmem:[#allocation88_spill] sm:$0xff] %v7542_v21  ;;  %v3271_v42 = vrot.slane %v3259_v59, 1 }
 0x379   : > { %10403 = vst [vmem:[#allocation89_spill] sm:$0xff] %v7544_v58 }
 0x37a   : > { %10404 = vst [vmem:[#allocation90_spill] sm:$0xff] %v7554_v9 }
 0x37c   : > { %3218 = vrot.lane.b32.xlu2 %v3207_v3, %s5803_s22  ;;  %v3257_v3 = vmul.f32 %v3255_v10, %v7248_v1 }
 0x37d   : > { %3214 = vrot.lane.b32.xlu0 %v3205_v43, %s5803_s22  ;;  %3216 = vrot.lane.b32.xlu1 %v3206_v5, %s5803_s22  ;;  %v3256_v43 = vmul.f32 %v3255_v10, %v7488_v18  ;;  %v3258_v5 = vmul.f32 %v3255_v10, %v7237_v57 }
 0x37e   : > { %v7568_v30 = vpop.permute.xlu2 %2676 }
 0x37f   : > { %10406 = vst [vmem:[#allocation92_spill] sm:$0xff] %v7568_v30  ;;  %v7570_v27 = vpop.permute.xlu0 %2567  ;;  %v7572_v9 = vpop.permute.xlu1 %2598  ;;  %v3266_v21 = vrot.slane %v3256_v43, 1  ;;  %v3269_v8 = vrot.slane %v3258_v5, 1 }
 0x380   : > { %10407 = vst [vmem:[#allocation93_spill] sm:$0xff] %v7570_v27  ;;  %v3267_v27 = vrot.slane %v3257_v3, 1  ;;  %v3260_v3 = vmul.f32 %v3255_v10, %v7589_v16 }
 0x381   : > { %10408 = vst [vmem:[#allocation94_spill] sm:$0xff] %v7572_v9  ;;  %v3233_v9 = vmul.f32 %v3229_v25, %v7502_v52 }
 0x384   : > { %3242 = vrot.lane.b32.xlu2 %v3232_v45, %s5803_s22  ;;  %v3292_v45 = vstv %s5338_s16  ;;  %s5295_s16 = sld [smem:[#allocation14 + $0xb]] }
 0x385   : > { %3238 = vrot.lane.b32.xlu0 %v3230_v53, %s5803_s22  ;;  %3240 = vrot.lane.b32.xlu1 %v3231_v6, %s5803_s22  ;;  %v3270_v53 = vsel %vm931_vm0, %v3267_v27, %v3269_v8  ;;  %v3294_v6 = vmul.f32 %v3292_v45, %v7248_v1  ;;  %v3293_v58 = vmul.f32 %v3292_v45, %v7488_v18 }
 0x386   : > { %v7583_v24 = vpop.permute.xlu2 %2711  ;;  %v3297_v10 = vmul.f32 %v3292_v45, %v7589_v16 }
 0x387   : > { %10409 = vst [vmem:[#allocation95_spill] sm:$0xff] %v7583_v24  ;;  %v7585_v32 = vpop.permute.xlu0 %2602  ;;  %v7587_v55 = vpop.permute.xlu1 %2604  ;;  %v3268_v24 = vsel %vm931_vm0, %v3266_v21, %v3267_v27  ;;  %v3303_v30 = vrot.slane %v3293_v58, 1  ;;  %v3273_v21 = vrot.slane %v3260_v3, 1 }
 0x388   : > { %10410 = vst [vmem:[#allocation96_spill] sm:$0xff] %v7587_v55  ;;  %v3304_v55 = vrot.slane %v3294_v6, 1  ;;  %v3310_v3 = vrot.slane %v3297_v10, 1 }
 0x38a   : > { %v3305_v27 = vsel %vm931_vm0, %v3303_v30, %v3304_v55 }
 0x38c   : > { %3277 = vrot.lane.b32.xlu2 %v3270_v53, %s5803_s22  ;;  %v3296_v53 = vmul.f32 %v3292_v45, %v7502_v52 }
 0x38d   : > { %3244 = vrot.lane.b32.xlu0 %v3233_v9, %s5803_s22  ;;  %3275 = vrot.lane.b32.xlu1 %v3268_v24, %s5803_s22  ;;  %v3272_v9 = vsel %vm931_vm0, %v3269_v8, %v3271_v42  ;;  %v3274_v24 = vsel %vm931_vm0, %v3271_v42, %v3273_v21  ;;  %v3329_v8 = vstv %s5339_s0  ;;  %s5292_s0 = sld [smem:[#allocation14 + $0x17]] }
 0x38e   : > { %v7601_v43 = vpop.permute.xlu2 %2746  ;;  %v3308_v6 = vrot.slane %v3296_v53, 1  ;;  %v3333_v21 = vmul.f32 %v3329_v8, %v7502_v52 }
 0x38f   : > { %10411 = vst [vmem:[#allocation97_spill] sm:$0xff] %v7601_v43  ;;  %v7603_v25 = vpop.permute.xlu0 %2637  ;;  %v7605_v5 = vpop.permute.xlu1 %2639  ;;  %v3295_v43 = vmul.f32 %v3292_v45, %v7237_v57  ;;  %v3332_v45 = vmul.f32 %v3329_v8, %v7237_v57 }
 0x390   : > { %10412 = vst [vmem:[#allocation98_spill] sm:$0xff] %v7603_v25  ;;  %v3311_v42 = vsel %vm931_vm0, %v3308_v6, %v3310_v3 }
 0x391   : > { %10413 = vst [vmem:[#allocation99_spill] sm:$0xff] %v7605_v5  ;;  %v3306_v25 = vrot.slane %v3295_v43, 1  ;;  %v3343_v3 = vrot.slane %v3332_v45, 1 }
 0x394   : > { %3312 = vrot.lane.b32.xlu2 %v3305_v27, %s5803_s22  ;;  %v3307_v27 = vsel %vm931_vm0, %v3304_v55, %v3306_v25  ;;  %v3345_v55 = vrot.slane %v3333_v21, 1 }
 0x395   : > { %3279 = vrot.lane.b32.xlu0 %v3272_v9, %s5803_s22  ;;  %3281 = vrot.lane.b32.xlu1 %v3274_v24, %s5803_s22  ;;  %v3309_v9 = vsel %vm931_vm0, %v3306_v25, %v3308_v6  ;;  %v3330_v24 = vmul.f32 %v3329_v8, %v7488_v18  ;;  %v3334_v6 = vmul.f32 %v3329_v8, %v7589_v16 }
 0x396   : > { %v7616_v59 = vpop.permute.xlu2 %2752 }
 0x397   : > { %10414 = vst [vmem:[#allocation100_spill] sm:$0xff] %v7616_v59  ;;  %v7618_v58 = vpop.permute.xlu0 %2672  ;;  %v7620_v30 = vpop.permute.xlu1 %2674  ;;  %v3340_v5 = vrot.slane %v3330_v24, 1  ;;  %v3347_v24 = vrot.slane %v3334_v6, 1 }
 0x398   : > { %10415 = vst [vmem:[#allocation101_spill] sm:$0xff] %v7618_v58  ;;  %v3331_v58 = vmul.f32 %v3329_v8, %v7248_v1 }
 0x399   : > { %10416 = vst [vmem:[#allocation102_spill] sm:$0xff] %v7620_v30  ;;  %v3366_v30 = vstv %s5340_s21  ;;  %s7836_s21 = sld [smem:[#allocation14 + $0x1a]] }
 0x39a   : > { %v3341_v25 = vrot.slane %v3331_v58, 1  ;;  %v3367_v58 = vmul.f32 %v3366_v30, %v7488_v18 }
 0x39c   : > { %3318 = vrot.lane.b32.xlu2 %v3311_v42, %s5803_s22  ;;  %v2097_v42 = vadd.f32 %v7152_v41, %v7045_v34  ;;  %v3342_v45 = vsel %vm931_vm0, %v3340_v5, %v3341_v25  ;;  %v3344_v21 = vsel %vm931_vm0, %v3341_v25, %v3343_v3  ;;  %v3369_v34 = vmul.f32 %v3366_v30, %v7237_v57 }
 0x39d   : > { %3314 = vrot.lane.b32.xlu0 %v3307_v27, %s5803_s22  ;;  %3316 = vrot.lane.b32.xlu1 %v3309_v9, %s5803_s22  ;;  %v3346_v27 = vsel %vm931_vm0, %v3343_v3, %v3345_v55  ;;  %v3368_v9 = vmul.f32 %v3366_v30, %v7248_v1 }
 0x39e   : > { %v7632_v43 = vpop.permute.xlu2 %2787  ;;  %v2212_v8 = vadd.f32 %v7346_v20, %v2097_v42  ;;  %v3370_v20 = vmul.f32 %v3366_v30, %v7502_v52 }
 0x39f   : > { %10417 = vst [vmem:[#allocation103_spill] sm:$0xff] %v7632_v43  ;;  %v7634_v53 = vpop.permute.xlu0 %2678  ;;  %v7636_v10 = vpop.permute.xlu1 %2709  ;;  %v3378_v3 = vrot.slane %v3368_v9, 1 }
 0x3a0   : > { %10418 = vst [vmem:[#allocation104_spill] sm:$0xff] %v7634_v53  ;;  %v2096_v53 = vadd.f32 %v7191_v0, %v7080_v4 }
 0x3a1   : > { %10419 = vst [vmem:[#allocation105_spill] sm:$0xff] %v7636_v10  ;;  %v7662_v10 = vstv %s5321_s18  ;;  %s5348_s18 = sld [smem:[#allocation14 + $0x45]] }
 0x3a2   : > { %v2211_v41 = vadd.f32 %v7252_v47, %v2096_v53  ;;  %v3348_v47 = vsel %vm931_vm0, %v3345_v55, %v3347_v24  ;;  %v3403_v53 = vstv %s5341_s9  ;;  %v3371_v55 = vmul.f32 %v3366_v30, %v7589_v16  ;;  %s5296_s9 = sld [smem:[#allocation14 + $0x14]] }
 0x3a3   : > { %v3405_v42 = vmul.f32 %v3403_v53, %v7248_v1  ;;  %v2882_v30 = vmul.f32 %v7662_v10, %v7237_v57  ;;  %v3408_v43 = vmul.f32 %v3403_v53, %v7589_v16 }
 0x3a4   : > { %3353 = vrot.lane.b32.xlu2 %v3346_v27, %s5803_s22  ;;  %v2359_v25 = vadd.f32 %v7425_v29, %v2211_v41  ;;  %v2360_v27 = vadd.f32 %v7427_v38, %v2212_v8  ;;  %v7671_v29 = vmul.f32 %v7243_v31, %v7502_v52 }
 0x3a5   : > { %3349 = vrot.lane.b32.xlu0 %v3342_v45, %s5803_s22  ;;  %3351 = vrot.lane.b32.xlu1 %v3344_v21, %s5803_s22  ;;  %v3377_v45 = vrot.slane %v3367_v58, 1  ;;  %v3380_v21 = vrot.slane %v3369_v34, 1  ;;  %v7682_v34 = vmul.f32 %v7246_v51, %v7502_v52 }
 0x3a6   : > { %v7654_v4 = vpop.permute.xlu2 %2822  ;;  %10423 = vst [vmem:[#allocation109_spill] sm:$0xff] %v7671_v29  ;;  %v2496_v38 = vadd.f32 %v7302_v49, %v2359_v25  ;;  %v2497_v9 = vadd.f32 %v7218_v44, %v2360_v27  ;;  %v2881_v44 = vmul.f32 %v7662_v10, %v7248_v1  ;;  %v3415_v25 = vrot.slane %v3405_v42, 2 }
 0x3a7   : > { %10420 = vst [vmem:[#allocation106_spill] sm:$0xff] %v7654_v4  ;;  %v7656_v0 = vpop.permute.xlu0 %2713  ;;  %v7658_v5 = vpop.permute.xlu1 %2715  ;;  %v3381_v6 = vsel %vm931_vm0, %v3378_v3, %v3380_v21  ;;  %v3379_v58 = vsel %vm931_vm0, %v3377_v45, %v3378_v3  ;;  %v10210_v45 = vrot.slane %v7671_v29, 1  ;;  %v7896_v4 = vstv %s7836_s21  ;;  %s8292_s21 = sld [smem:[#allocation14 + $0x35]] }
 0x3a8   : > { %10421 = vst [vmem:[#allocation107_spill] sm:$0xff] %v7656_v0  ;;  %v3404_v0 = vmul.f32 %v3403_v53, %v7488_v18  ;;  %v2611_v41 = vadd.f32 %v7496_v13, %v2496_v38  ;;  %v2612_v49 = vadd.f32 %v7585_v32, %v2497_v9  ;;  %v3384_v13 = vrot.slane %v3371_v55, 1 }
 0x3a9   : > { %10422 = vst [vmem:[#allocation108_spill] sm:$0xff] %v7658_v5  ;;  %v10209_v32 = vrot.slane %v7682_v34, 2 }
 0x3aa   : > { %10424 = vst [vmem:[#allocation110_spill] sm:$0xff] %v7682_v34  ;;  %v3414_v27 = vrot.slane %v3404_v0, 2  ;;  %v10426_v0 = vrot.slane %v7256_v15, 1 }
 0x3ac   : > { %3388 = vrot.lane.b32.xlu2 %v3381_v6, %s5803_s22  ;;  %v3382_v6 = vrot.slane %v3370_v20, 1  ;;  %v3416_v5 = vsel %vm1007_vm1, %v3414_v27, %v3415_v25  ;;  %v2936_v42 = vsel %vm931_vm0, %v10426_v0, %v10210_v45 }
 0x3ad   : > { %3355 = vrot.lane.b32.xlu0 %v3348_v47, %s5803_s22  ;;  %3386 = vrot.lane.b32.xlu1 %v3379_v58, %s5803_s22 }
 0x3ae   : > { %v7688_v8 = vpop.permute.xlu2 %2857  ;;  %v3383_v20 = vsel %vm931_vm0, %v3380_v21, %v3382_v6  ;;  %v3385_v55 = vsel %vm931_vm0, %v3382_v6, %v3384_v13 }
 0x3af   : > { %10425 = vst [vmem:[#allocation111_spill] sm:$0xff] %v7688_v8  ;;  %v2749_v24 = vpop.permute.xlu0 %2748  ;;  %v2751_v3 = vpop.permute.xlu1 %2750  ;;  %v3407_v8 = vmul.f32 %v3403_v53, %v7502_v52 }
 0x3b0   : > { %v2759_v47 = vadd.f32 %v2749_v24, %v2611_v41  ;;  %v2760_v58 = vadd.f32 %v2751_v3, %v2612_v49  ;;  %v3406_v41 = vmul.f32 %v3403_v53, %v7237_v57 }
 0x3b2   : > { %v2885_v38 = vadd.f32 %v2881_v44, %v2759_v47  ;;  %v2886_v9 = vadd.f32 %v2882_v30, %v2760_v58  ;;  %v10427_v44 = vrot.slane %v7264_v39, 2  ;;  %v3421_v30 = vrot.slane %v3408_v43, 2 }
 0x3b3   : > { %v3417_v27 = vrot.slane %v3406_v41, 2  ;;  %v3440_v47 = vstv %s5342_s19  ;;  %s7859_s19 = sld [smem:[#allocation14 + $0x27]] }
 0x3b4   : > { %3423 = vrot.lane.b32.xlu2 %v3416_v5, %s5803_s22  ;;  %v2945_v49 = vadd.f32 %v2936_v42, %v2886_v9  ;;  %v3052_v15 = vsel %vm1007_vm1, %v10427_v44, %v10209_v32  ;;  %v3419_v5 = vrot.slane %v3407_v8, 2  ;;  %v3443_v58 = vmul.f32 %v3440_v47, %v7237_v57  ;;  %v7778_v32 = vld [vmem:[#allocation2 + $0x38] sm:$0xff] }
 0x3b5   : > { %3390 = vrot.lane.b32.xlu0 %v3383_v20, %s5803_s22  ;;  %3392 = vrot.lane.b32.xlu1 %v3385_v55, %s5803_s22  ;;  %v3444_v39 = vmul.f32 %v3440_v47, %v7502_v52  ;;  %v3418_v13 = vsel %vm1007_vm1, %v3415_v25, %v3417_v27  ;;  %v3441_v0 = vmul.f32 %v3440_v47, %v7488_v18 }
 0x3b6   : > { %v7713_v24 = vpop.permute.xlu2 %2863  ;;  %v7715_v21 = vadd.f32 %v3052_v15, %v2945_v49  ;;  %v3422_v6 = vsel %vm1007_vm1, %v3419_v5, %v3421_v30  ;;  %v3420_v9 = vsel %vm1007_vm1, %v3417_v27, %v3419_v5  ;;  %v3442_v42 = vmul.f32 %v3440_v47, %v7248_v1 }
 0x3b7   : > { %10428 = vst [vmem:[#allocation112_spill] sm:$0xff] %v7713_v24  ;;  %v7717_v3 = vpop.permute.xlu0 %2783  ;;  %v7719_v53 = vpop.permute.xlu1 %2785  ;;  %v2944_v43 = vadd.f32 %v7287_v19, %v2885_v38  ;;  %v3454_v25 = vrot.slane %v3443_v58, 2  ;;  %v3456_v41 = vrot.slane %v3444_v39, 2  ;;  %v3451_v44 = vrot.slane %v3441_v0, 2 }
 0x3b8   : > { %10429 = vst [vmem:[#allocation113_spill] sm:$0xff] %v7715_v21  ;;  %v3452_v15 = vrot.slane %v3442_v42, 2  ;;  %v3477_v5 = vstv %s5343_s14  ;;  %s7884_s14 = sld [smem:[#allocation15 + $0x2]] }
 0x3b9   : > { %10430 = vst [vmem:[#allocation114_spill] sm:$0xff] %v7717_v3  ;;  %v7739_v49 = vadd.f32 %v7296_v63, %v2944_v43  ;;  %v3457_v30 = vsel %vm1007_vm1, %v3454_v25, %v3456_v41  ;;  %v3479_v27 = vmul.f32 %v3477_v5, %v7248_v1  ;;  %v3478_v58 = vmul.f32 %v3477_v5, %v7488_v18 }
 0x3ba   : > { %10431 = vst [vmem:[#allocation115_spill] sm:$0xff] %v7719_v53  ;;  %v3453_v19 = vsel %vm1007_vm1, %v3451_v44, %v3452_v15  ;;  %v3455_v38 = vsel %vm1007_vm1, %v3452_v15, %v3454_v25  ;;  %v3480_v63 = vmul.f32 %v3477_v5, %v7237_v57  ;;  %v3514_v25 = vstv %s5344_s15  ;;  %s7924_s15 = sld [smem:[#allocation14 + $0x30]] }
 0x3bb   : > { %10435 = vst [vmem:[#allocation119_spill] sm:$0xff] %v7739_v49  ;;  %v3489_v0 = vrot.slane %v3479_v27, 2  ;;  %v3488_v43 = vrot.slane %v3478_v58, 2  ;;  %v3516_v15 = vmul.f32 %v3514_v25, %v7248_v1  ;;  %v3482_v27 = vmul.f32 %v3477_v5, %v7589_v16 }
 0x3bc   : > { %3429 = vrot.lane.b32.xlu2 %v3422_v6, %s5803_s22  ;;  %v3445_v6 = vmul.f32 %v3440_v47, %v7589_v16  ;;  %v3491_v47 = vrot.slane %v3480_v63, 2  ;;  %v3517_v45 = vmul.f32 %v7778_v32, %v3514_v25  ;;  %v7863_v53 = vstv %s5287_s13  ;;  %s8114_s13 = sld [smem:[#allocation14 + $0x42]] }
 0x3bd   : > { %3425 = vrot.lane.b32.xlu0 %v3418_v13, %s5803_s22  ;;  %3427 = vrot.lane.b32.xlu1 %v3420_v9, %s5803_s22  ;;  %v3490_v57 = vsel %vm1007_vm1, %v3488_v43, %v3489_v0  ;;  %v3526_v63 = vrot.slane %v3516_v15, 2  ;;  %v7865_v3 = vstv %s5295_s16  ;;  %s8167_s16 = sld [smem:[#allocation14 + $0x24]] }
 0x3be   : > { %v7732_v8 = vpop.permute.xlu2 %3164  ;;  %v3458_v42 = vrot.slane %v3445_v6, 2  ;;  %v3492_v44 = vsel %vm1007_vm1, %v3489_v0, %v3491_v47  ;;  %v3495_v0 = vrot.slane %v3482_v27, 2  ;;  %v7944_v34 = vstv %s7884_s14  ;;  %s8344_s14 = sld [smem:[#allocation14 + $0x2f]] }
 0x3bf   : > { %10432 = vst [vmem:[#allocation116_spill] sm:$0xff] %v7732_v8  ;;  %v7734_v20 = vpop.permute.xlu0 %2789  ;;  %v7736_v55 = vpop.permute.xlu1 %2820 }
 0x3c0   : > { %10433 = vst [vmem:[#allocation117_spill] sm:$0xff] %v7734_v20 }
 0x3c1   : > { %10434 = vst [vmem:[#allocation118_spill] sm:$0xff] %v7736_v55  ;;  %v7844_v55 = vstv %s5291_s1  ;;  %s8021_s1 = sld [smem:[#allocation14 + $0x1d]] }
 0x3c4   : > { %3464 = vrot.lane.b32.xlu2 %v3457_v30, %s5803_s22  ;;  %v3515_v30 = vmul.f32 %v3514_v25, %v7488_v18 }
 0x3c5   : > { %3460 = vrot.lane.b32.xlu0 %v3453_v19, %s5803_s22  ;;  %3462 = vrot.lane.b32.xlu1 %v3455_v38, %s5803_s22  ;;  %v3459_v19 = vsel %vm1007_vm1, %v3456_v41, %v3458_v42  ;;  %v3481_v38 = vmul.f32 %v3477_v5, %v7502_v52  ;;  %v3519_v5 = vmul.f32 %v3514_v25, %v7589_v16 }
 0x3c6   : > { %v7751_v39 = vpop.permute.xlu2 %3188  ;;  %v3525_v41 = vrot.slane %v3515_v30, 2 }
 0x3c7   : > { %10436 = vst [vmem:[#allocation120_spill] sm:$0xff] %v7751_v39  ;;  %v7753_v13 = vpop.permute.xlu0 %2824  ;;  %v7755_v9 = vpop.permute.xlu1 %2826  ;;  %v3493_v42 = vrot.slane %v3481_v38, 2 }
 0x3c8   : > { %10437 = vst [vmem:[#allocation121_spill] sm:$0xff] %v7753_v13  ;;  %v3527_v43 = vsel %vm1007_vm1, %v3525_v41, %v3526_v63  ;;  %v3528_v41 = vrot.slane %v3517_v45, 2 }
 0x3c9   : > { %10438 = vst [vmem:[#allocation122_spill] sm:$0xff] %v7755_v9 }
 0x3cc   : > { %3499 = vrot.lane.b32.xlu2 %v3492_v44, %s5803_s22  ;;  %v3518_v44 = vmul.f32 %v3514_v25, %v7502_v52  ;;  %v3529_v25 = vsel %vm1007_vm1, %v3526_v63, %v3528_v41 }
 0x3cd   : > { %3466 = vrot.lane.b32.xlu0 %v3459_v19, %s5803_s22  ;;  %3497 = vrot.lane.b32.xlu1 %v3490_v57, %s5803_s22  ;;  %v3494_v19 = vsel %vm1007_vm1, %v3491_v47, %v3493_v42  ;;  %v3496_v57 = vsel %vm1007_vm1, %v3493_v42, %v3495_v0  ;;  %v3532_v47 = vrot.slane %v3519_v5, 2 }
 0x3ce   : > { %v7767_v6 = vpop.permute.xlu2 %3212  ;;  %v3530_v27 = vrot.slane %v3518_v44, 2  ;;  %v3551_v44 = vstv %s5345_s17  ;;  %s7989_s17 = sld [smem:[#allocation14 + $0x20]] }
 0x3cf   : > { %10439 = vst [vmem:[#allocation123_spill] sm:$0xff] %v7767_v6  ;;  %v7769_v58 = vpop.permute.xlu0 %2859  ;;  %v7771_v1 = vpop.permute.xlu1 %2861  ;;  %v3554_v45 = vmul.f32 %v7778_v32, %v3551_v44  ;;  %v3552_v63 = vmul.f32 %v3551_v44, %v7488_v18  ;;  %v3555_v6 = vmul.f32 %v3551_v44, %v7502_v52 }
 0x3d0   : > { %10440 = vst [vmem:[#allocation124_spill] sm:$0xff] %v7769_v58  ;;  %v3533_v42 = vsel %vm1007_vm1, %v3530_v27, %v3532_v47  ;;  %v3531_v0 = vsel %vm1007_vm1, %v3528_v41, %v3530_v27 }
 0x3d1   : > { %10441 = vst [vmem:[#allocation125_spill] sm:$0xff] %v7771_v1 }
 0x3d4   : > { %3534 = vrot.lane.b32.xlu2 %v3527_v43, %s5803_s22 }
 0x3d5   : > { %3501 = vrot.lane.b32.xlu0 %v3494_v19, %s5803_s22  ;;  %3503 = vrot.lane.b32.xlu1 %v3496_v57, %s5803_s22  ;;  %v7804_v57 = vld [vmem:[#allocation2 + $0x30] sm:$0xff] }
 0x3d6   : > { %v7784_v15 = vpop.permute.xlu2 %3218  ;;  %v3553_v27 = vmul.f32 %v7804_v57, %v3551_v44 }
 0x3d7   : > { %10442 = vst [vmem:[#allocation126_spill] sm:$0xff] %v7784_v15  ;;  %v7786_v30 = vpop.permute.xlu0 %3160  ;;  %v7788_v38 = vpop.permute.xlu1 %3162 }
 0x3d8   : > { %10443 = vst [vmem:[#allocation127_spill] sm:$0xff] %v7786_v30  ;;  %v7893_v30 = vstv %s7828_s29  ;;  %s8028_s29 = sld [smem:[#allocation14 + $0x39]] }
 0x3d9   : > { %10444 = vst [vmem:[#allocation128_spill] sm:$0xff] %v7788_v38 }
 0x3dc   : > { %3540 = vrot.lane.b32.xlu2 %v3533_v42, %s5803_s22 }
 0x3dd   : > { %3536 = vrot.lane.b32.xlu0 %v3529_v25, %s5803_s22  ;;  %3538 = vrot.lane.b32.xlu1 %v3531_v0, %s5803_s22  ;;  %v3577_v25 = vstv %s5346_s23  ;;  %s8002_s23 = sld [smem:[#allocation14 + $0x23]] }
 0x3de   : > { %v7796_v43 = vpop.permute.xlu2 %3242  ;;  %v3579_v0 = vmul.f32 %v7804_v57, %v3577_v25  ;;  %v3580_v39 = vmul.f32 %v7778_v32, %v3577_v25 }
 0x3df   : > { %10445 = vst [vmem:[#allocation129_spill] sm:$0xff] %v7796_v43  ;;  %v7798_v19 = vpop.permute.xlu0 %3166  ;;  %v7800_v5 = vpop.permute.xlu1 %3186 }
 0x3e0   : > { %10446 = vst [vmem:[#allocation130_spill] sm:$0xff] %v7798_v19  ;;  %v3629_v19 = vstv %s5348_s18  ;;  %s8301_s18 = sld [smem:[#allocation14 + $0x3e]] }
 0x3e1   : > { %10447 = vst [vmem:[#allocation131_spill] sm:$0xff] %v7800_v5  ;;  %v3578_v5 = vmul.f32 %v3577_v25, %v7488_v18  ;;  %v3632_v1 = vmul.f32 %v7778_v32, %v3629_v19  ;;  %v3630_v58 = vmul.f32 %v3629_v19, %v7488_v18  ;;  %v3631_v13 = vmul.f32 %v7804_v57, %v3629_v19 }
 0x3e4   : > { %3564 = vrot.lane.b32.xlu2 %v3554_v45, %s5804_s20 }
 0x3e5   : > { %3560 = vrot.lane.b32.xlu0 %v3552_v63, %s5804_s20  ;;  %3562 = vrot.lane.b32.xlu1 %v3553_v27, %s5804_s20 }
 0x3e6   : > { %v7810_v47 = vpop.permute.xlu2 %3277 }
 0x3e7   : > { %10448 = vst [vmem:[#allocation132_spill] sm:$0xff] %v7810_v47  ;;  %v7812_v41 = vpop.permute.xlu0 %3190  ;;  %v7814_v42 = vpop.permute.xlu1 %3192 }
 0x3e8   : > { %10449 = vst [vmem:[#allocation133_spill] sm:$0xff] %v7812_v41 }
 0x3e9   : > { %10450 = vst [vmem:[#allocation134_spill] sm:$0xff] %v7814_v42  ;;  %v3603_v42 = vstv %s5347_s8  ;;  %s8014_s8 = sld [smem:[#allocation15 + $0x3]] }
 0x3ea   : > { %v3604_v44 = vmul.f32 %v3603_v42, %v7488_v18  ;;  %v3605_v20 = vmul.f32 %v7804_v57, %v3603_v42  ;;  %v3606_v43 = vmul.f32 %v7778_v32, %v3603_v42 }
 0x3ec   : > { %3588 = vrot.lane.b32.xlu2 %v3579_v0, %s5804_s20  ;;  %v3581_v0 = vmul.f32 %v3577_v25, %v7502_v52  ;;  %v7846_v25 = vld [vmem:[#allocation2 + $0x10] sm:$0xff] }
 0x3ed   : > { %3566 = vrot.lane.b32.xlu0 %v3555_v6, %s5804_s20  ;;  %3586 = vrot.lane.b32.xlu1 %v3578_v5, %s5804_s20 }
 0x3ee   : > { %v7822_v45 = vpop.permute.xlu2 %3312 }
 0x3ef   : > { %10451 = vst [vmem:[#allocation135_spill] sm:$0xff] %v7822_v45  ;;  %v7824_v63 = vpop.permute.xlu0 %3214  ;;  %v7826_v27 = vpop.permute.xlu1 %3216 }
 0x3f0   : > { %10452 = vst [vmem:[#allocation136_spill] sm:$0xff] %v7824_v63 }
 0x3f1   : > { %10453 = vst [vmem:[#allocation137_spill] sm:$0xff] %v7826_v27 }
 0x3f4   : > { %3612 = vrot.lane.b32.xlu2 %v3604_v44, %s5804_s20  ;;  %v7850_v44 = vmul.f32 %v7846_v25, %v7844_v55 }
 0x3f5   : > { %3590 = vrot.lane.b32.xlu0 %v3580_v39, %s5804_s20  ;;  %3592 = vrot.lane.b32.xlu1 %v3581_v0, %s5804_s20  ;;  %v7852_v39 = vld [vmem:[#allocation2 + $0x8] sm:$0xff] }
 0x3f6   : > { %v7838_v6 = vpop.permute.xlu2 %3318  ;;  %v7856_v0 = vmul.f32 %v7852_v39, %v7844_v55  ;;  %v1814_v15 = vmul.f32 %v7852_v39, %v7863_v53  ;;  %v7876_v41 = vmul.f32 %v7852_v39, %v7865_v3  ;;  %v10460_v21 = vrot.slane %v7850_v44, 1 }
 0x3f7   : > { %10454 = vst [vmem:[#allocation138_spill] sm:$0xff] %v7838_v6  ;;  %v7840_v5 = vpop.permute.xlu0 %3238  ;;  %v7842_v45 = vpop.permute.xlu1 %3240  ;;  %v3607_v6 = vmul.f32 %v3603_v42, %v7502_v52  ;;  %v7878_v42 = vstv %s5292_s0  ;;  %s8273_s0 = sld [smem:[#allocation14 + $0x2d]] }
 0x3f8   : > { %10455 = vst [vmem:[#allocation139_spill] sm:$0xff] %v7840_v5  ;;  %v7870_v5 = vmul.f32 %v7846_v25, %v7865_v3  ;;  %v1818_v8 = vadd.f32 %v1814_v15, %v7893_v30  ;;  %v3655_v15 = vstv %s7859_s19  ;;  %s8331_s19 = sld [smem:[#allocation14 + $0x32]] }
 0x3f9   : > { %10456 = vst [vmem:[#allocation140_spill] sm:$0xff] %v7842_v45  ;;  %v10461_v45 = vrot.slane %v7856_v0, 1  ;;  %v3656_v40 = vmul.f32 %v3655_v15, %v7488_v18  ;;  %v7941_v49 = vmul.f32 %v7778_v32, %v3655_v15 }
 0x3fb   : > { %v1886_v59 = vsel %vm931_vm0, %v10461_v45, %v10460_v21  ;;  %v3657_v21 = vmul.f32 %v7804_v57, %v3655_v15  ;;  %v3666_v2 = vrot.slane %v3656_v40, 1  ;;  %v3633_v40 = vmul.f32 %v3629_v19, %v7502_v52 }
 0x3fc   : > { %3618 = vrot.lane.b32.xlu2 %v3607_v6, %s5804_s20  ;;  %v1896_v47 = vadd.f32 %v1886_v59, %v1818_v8 }
 0x3fd   : > { %3614 = vrot.lane.b32.xlu0 %v3605_v20, %s5804_s20  ;;  %3616 = vrot.lane.b32.xlu1 %v3606_v43, %s5804_s20  ;;  %v7898_v20 = vstv %s5296_s9  ;;  %v7900_v43 = vld [vmem:[#allocation2 + $0x18] sm:$0xff]  ;;  %v3667_v51 = vrot.slane %v3657_v21, 1  ;;  %v3669_v21 = vrot.slane %v7941_v49, 1  ;;  %s8310_s9 = sld [smem:[#allocation14 + $0x47]] }
 0x3fe   : > { %v7886_v24 = vpop.permute.xlu2 %3353  ;;  %v7904_v6 = vmul.f32 %v7900_v43, %v7878_v42  ;;  %v1826_v29 = vmul.f32 %v7900_v43, %v7896_v4  ;;  %v7998_v23 = vmul.f32 %v7900_v43, %v7898_v20 }
 0x3ff   : > { %10457 = vst [vmem:[#allocation141_spill] sm:$0xff] %v7886_v24  ;;  %v7888_v63 = vpop.permute.xlu0 %3244  ;;  %v7890_v9 = vpop.permute.xlu1 %3275  ;;  %v7920_v24 = vmul.f32 %v7852_v39, %v7898_v20  ;;  %v3668_v49 = vsel %vm931_vm0, %v3666_v2, %v3667_v51  ;;  %v10468_v2 = vrot.slane %v7055_v48, 1 }
 0x400   : > { %10458 = vst [vmem:[#allocation142_spill] sm:$0xff] %v7888_v63  ;;  %v7926_v63 = vld [vmem:[#allocation2] sm:$0xff] }
 0x401   : > { %10459 = vst [vmem:[#allocation143_spill] sm:$0xff] %v7890_v9  ;;  %v7911_v9 = vmul.f32 %v7852_v39, %v7878_v42  ;;  %v1901_v27 = vmul.f32 %v7926_v63, %v7878_v42  ;;  %v1823_v45 = vmul.f32 %v7926_v63, %v7896_v4  ;;  %v2017_v59 = vmul.f32 %v7926_v63, %v7898_v20 }
 0x403   : > { %v1911_v7 = vrot.slane %v1901_v27, 1  ;;  %v1827_v31 = vadd.f32 %v1823_v45, %v7944_v34  ;;  %v1959_v45 = vmul.f32 %v7926_v63, %v7006_v35  ;;  %v2027_v50 = vrot.slane %v2017_v59, 2 }
 0x404   : > { %3642 = vrot.lane.b32.xlu2 %v3632_v1, %s5804_s20  ;;  %v1905_v1 = vmul.f32 %v7948_v36, %v7878_v42  ;;  %v1806_v59 = vmul.f32 %v7900_v43, %v7016_v54 }
 0x405   : > { %3638 = vrot.lane.b32.xlu0 %v3630_v58, %s5804_s20  ;;  %3640 = vrot.lane.b32.xlu1 %v3631_v13, %s5804_s20  ;;  %v10463_v58 = vrot.slane %v7870_v5, 2  ;;  %v10464_v13 = vrot.slane %v7876_v41, 2 }
 0x406   : > { %v7953_v8 = vpop.permute.xlu2 %3388  ;;  %v1918_v28 = vrot.slane %v1905_v1, 1  ;;  %v3659_v1 = vmul.f32 %v3655_v15, %v7502_v52 }
 0x407   : > { %10462 = vst [vmem:[#allocation144_spill] sm:$0xff] %v7953_v8  ;;  %v2002_v38 = vsel %vm1007_vm1, %v10464_v13, %v10463_v58  ;;  %v7961_v22 = vpop.permute.xlu0 %3279  ;;  %v7963_v17 = vpop.permute.xlu1 %3281  ;;  %v1843_v8 = vmul.f32 %v7926_v63, %v7002_v14  ;;  %v10467_v58 = vrot.slane %v7911_v9, 1  ;;  %v1803_v13 = vmul.f32 %v7926_v63, %v7016_v54 }
 0x408   : > { %10465 = vst [vmem:[#allocation145_spill] sm:$0xff] %v7961_v22  ;;  %v7970_v60 = vadd.f32 %v2002_v38, %v1896_v47  ;;  %v3692_v22 = vstv %s7924_s15  ;;  %v3670_v38 = vsel %vm931_vm0, %v3667_v51, %v3669_v21  ;;  %v3671_v62 = vrot.slane %v3659_v1, 1  ;;  %s8358_s15 = sld [smem:[#allocation14 + $0x36]] }
 0x409   : > { %10466 = vst [vmem:[#allocation146_spill] sm:$0xff] %v7963_v17  ;;  %v1913_v27 = vsel %vm931_vm0, %v1911_v7, %v10467_v58  ;;  %v1847_v17 = vmul.f32 %v7948_v36, %v7002_v14  ;;  %v3693_v47 = vmul.f32 %v3692_v22, %v7488_v18  ;;  %v7987_v7 = vmul.f32 %v7804_v57, %v3692_v22 }
 0x40a   : > { %v1853_v58 = vrot.slane %v1843_v8, 1  ;;  %v3660_v14 = vmul.f32 %v3655_v15, %v7589_v16  ;;  %v1807_v19 = vadd.f32 %v1803_v13, %v7028_v46  ;;  %v2021_v8 = vmul.f32 %v7948_v36, %v7898_v20 }
 0x40b   : > { %v1830_v15 = vadd.f32 %v1826_v29, %v7944_v34  ;;  %v1963_v13 = vmul.f32 %v7948_v36, %v7006_v35  ;;  %v1860_v12 = vrot.slane %v1847_v17, 1  ;;  %v3704_v54 = vrot.slane %v7987_v7, 1 }
 0x40c   : > { %3677 = vrot.lane.b32.xlu2 %v3670_v38, %s5804_s20  ;;  %v1855_v51 = vsel %vm931_vm0, %v1853_v58, %v10468_v2  ;;  %v3703_v58 = vrot.slane %v3693_v47, 1  ;;  %v1924_v2 = vadd.f32 %v1913_v27, %v1827_v31  ;;  %v1969_v35 = vrot.slane %v1959_v45, 2 }
 0x40d   : > { %3644 = vrot.lane.b32.xlu0 %v3633_v40, %s5804_s20  ;;  %3675 = vrot.lane.b32.xlu1 %v3668_v49, %s5804_s20  ;;  %v10470_v40 = vrot.slane %v7904_v6, 1  ;;  %v3673_v37 = vrot.slane %v3660_v14, 1  ;;  %v1810_v31 = vadd.f32 %v1806_v59, %v7028_v46  ;;  %v1976_v27 = vrot.slane %v1963_v13, 2 }
 0x40e   : > { %v8016_v38 = vpop.permute.xlu2 %3423  ;;  %v10475_v45 = vrot.slane %v7013_v26, 1  ;;  %v3705_v14 = vsel %vm931_vm0, %v3703_v58, %v3704_v54  ;;  %v3695_v46 = vmul.f32 %v7778_v32, %v3692_v22 }
 0x40f   : > { %10469 = vst [vmem:[#allocation147_spill] sm:$0xff] %v8016_v38  ;;  %v1919_v49 = vsel %vm931_vm0, %v10470_v40, %v1918_v28  ;;  %v8023_v48 = vpop.permute.xlu0 %3314  ;;  %v8025_v29 = vpop.permute.xlu1 %3316  ;;  %v10473_v38 = vrot.slane %v7920_v24, 2  ;;  %v1866_v28 = vadd.f32 %v1855_v51, %v1807_v19  ;;  %v10218_v40 = vrot.slane %v7998_v23, 2 }
 0x410   : > { %10471 = vst [vmem:[#allocation148_spill] sm:$0xff] %v8023_v48  ;;  %v2034_v48 = vrot.slane %v2021_v8, 2  ;;  %v1927_v7 = vadd.f32 %v1919_v49, %v1830_v15  ;;  %v1861_v1 = vsel %vm931_vm0, %v10475_v45, %v1860_v12  ;;  %v3697_v19 = vmul.f32 %v3692_v22, %v7589_v16 }
 0x411   : > { %10472 = vst [vmem:[#allocation149_spill] sm:$0xff] %v8025_v29  ;;  %v2029_v17 = vsel %vm1007_vm1, %v2027_v50, %v10473_v38  ;;  %v10474_v29 = vrot.slane %v7061_v33, 2  ;;  %v3696_v50 = vmul.f32 %v3692_v22, %v7502_v52  ;;  %v8045_v51 = vstv %s7989_s17  ;;  %s8410_s17 = sld [smem:[#allocation14 + $0x3b]] }
 0x412   : > { %v3672_v33 = vsel %vm931_vm0, %v3669_v21, %v3671_v62  ;;  %v3674_v8 = vsel %vm931_vm0, %v3671_v62, %v3673_v37  ;;  %v8051_v26 = vadd.f32 %v2029_v17, %v1924_v2  ;;  %v2035_v15 = vsel %vm1007_vm1, %v10218_v40, %v2034_v48 }
 0x413   : > { %v1971_v47 = vsel %vm1007_vm1, %v1969_v35, %v10474_v29  ;;  %v8060_v62 = vadd.f32 %v2035_v15, %v1927_v7  ;;  %v8062_v37 = vadd.f32 %v1861_v1, %v1810_v31  ;;  %v10478_v22 = vrot.slane %v7026_v56, 2 }
 0x414   : > { %3712 = vrot.lane.b32.xlu2 %v3705_v14, %s5804_s20  ;;  %v8053_v12 = vadd.f32 %v1971_v47, %v1866_v28  ;;  %v8071_v59 = vmul.f32 %v7846_v25, %v8045_v51  ;;  %v8077_v38 = vmul.f32 %v7900_v43, %v8045_v51  ;;  %v8080_v49 = vstv %s8021_s1  ;;  %s8551_s1 = sld [smem:[#allocation14 + $0x44]] }
 0x415   : > { %3679 = vrot.lane.b32.xlu0 %v3672_v33, %s5804_s20  ;;  %3681 = vrot.lane.b32.xlu1 %v3674_v8, %s5804_s20  ;;  %10477 = vst [vmem:[#allocation151_spill] sm:$0xff] %v8060_v62  ;;  %v8067_v21 = vsel %vm1007_vm1, %v10478_v22, %v1976_v27  ;;  %v3708_v56 = vrot.slane %v3696_v50, 1  ;;  %v3710_v58 = vrot.slane %v3697_v19, 1  ;;  %v8087_v2 = vstv %s8014_s8  ;;  %s8451_s8 = sld [smem:[#allocation14 + $0x3f]] }
 0x416   : > { %10476 = vst [vmem:[#allocation150_spill] sm:$0xff] %v8053_v12  ;;  %v8073_v13 = vpop.permute.xlu2 %3429  ;;  %v8090_v35 = vstv %s8002_s23  ;;  %v3706_v17 = vrot.slane %v3695_v46, 1  ;;  %v3729_v28 = vstv %s8028_s29  ;;  %v1813_v7 = vmul.f32 %v7926_v63, %v7863_v53  ;;  %s8425_s23 = sld [smem:[#allocation14 + $0x38]] }
 0x417   : > { %10479 = vst [vmem:[#allocation152_spill] sm:$0xff] %v8073_v13  ;;  %v8082_v48 = vpop.permute.xlu0 %3349  ;;  %v8084_v29 = vpop.permute.xlu1 %3351  ;;  %v1835_v47 = vmul.f32 %v7846_v25, %v8090_v35  ;;  %v1872_v31 = vmul.f32 %v7926_v63, %v7844_v55  ;;  %v8101_v27 = vmul.f32 %v7900_v43, %v7844_v55  ;;  %v8106_v1 = vmul.f32 %v7846_v25, %v8080_v49  ;;  %s8563_s29 = sld [smem:[#allocation14 + $0x41]] }
 0x418   : > { %10480 = vst [vmem:[#allocation153_spill] sm:$0xff] %v8082_v48  ;;  %v8110_v14 = vmul.f32 %v7900_v43, %v8080_v49  ;;  %v1815_v50 = vmul.f32 %v7846_v25, %v7863_v53  ;;  %v3711_v33 = vsel %vm931_vm0, %v3708_v56, %v3710_v58  ;;  %v3732_v8 = vmul.f32 %v7778_v32, %v3729_v28 }
 0x419   : > { %10481 = vst [vmem:[#allocation154_spill] sm:$0xff] %v8084_v29  ;;  %v8120_v46 = vmul.f32 %v3729_v28, %v7502_v52  ;;  %v3707_v15 = vsel %vm931_vm0, %v3704_v54, %v3706_v17  ;;  %v3709_v22 = vsel %vm931_vm0, %v3706_v17, %v3708_v56  ;;  %v3730_v40 = vmul.f32 %v3729_v28, %v7488_v18 }
 0x41a   : > { %v3731_v45 = vmul.f32 %v7804_v57, %v3729_v28  ;;  %v1839_v48 = vadd.f32 %v1835_v47, %v8087_v2  ;;  %v1882_v19 = vrot.slane %v1872_v31, 1  ;;  %v1988_v58 = vmul.f32 %v7926_v63, %v7865_v3 }
 0x41b   : > { %v1887_v29 = vrot.slane %v8101_v27, 1  ;;  %v10482_v52 = vrot.slane %v8077_v38, 1  ;;  %v10483_v54 = vrot.slane %v8071_v59, 1  ;;  %v1817_v56 = vadd.f32 %v1813_v7, %v7893_v30 }
 0x41c   : > { %3718 = vrot.lane.b32.xlu2 %v3711_v33, %s5804_s20  ;;  %v1819_v17 = vadd.f32 %v1815_v50, %v7893_v30  ;;  %v8142_v47 = vmul.f32 %v7900_v43, %v7865_v3  ;;  %v10485_v27 = vrot.slane %v7856_v0, 1  ;;  %v3743_v50 = vrot.slane %v3732_v8, 1 }
 0x41d   : > { %3714 = vrot.lane.b32.xlu0 %v3707_v15, %s5804_s20  ;;  %3716 = vrot.lane.b32.xlu1 %v3709_v22, %s5804_s20  ;;  %v1946_v18 = vsel %vm931_vm0, %v10483_v54, %v10482_v52  ;;  %v10486_v15 = vrot.slane %v7850_v44, 1  ;;  %v3745_v54 = vrot.slane %v8120_v46, 1  ;;  %v10220_v13 = vrot.slane %v8106_v1, 2 }
 0x41e   : > { %v8144_v31 = vpop.permute.xlu2 %3464  ;;  %v1884_v33 = vsel %vm931_vm0, %v1882_v19, %v10485_v27  ;;  %v3740_v62 = vrot.slane %v3730_v40, 1  ;;  %v3741_v0 = vrot.slane %v3731_v45, 1  ;;  %v1955_v12 = vadd.f32 %v1946_v18, %v1839_v48 }
 0x41f   : > { %10484 = vst [vmem:[#allocation155_spill] sm:$0xff] %v8144_v31  ;;  %v1888_v22 = vsel %vm931_vm0, %v10486_v15, %v1887_v29  ;;  %v8152_v52 = vpop.permute.xlu0 %3355  ;;  %v8154_v7 = vpop.permute.xlu1 %3386  ;;  %v10219_v31 = vrot.slane %v8110_v14, 2  ;;  %v1998_v19 = vrot.slane %v1988_v58, 2  ;;  %v1876_v44 = vmul.f32 %v7948_v36, %v7844_v55 }
 0x420   : > { %10487 = vst [vmem:[#allocation156_spill] sm:$0xff] %v8152_v52  ;;  %v8163_v27 = vmul.f32 %v7846_v25, %v7878_v42  ;;  %v1895_v15 = vadd.f32 %v1884_v33, %v1817_v56  ;;  %v2003_v8 = vrot.slane %v8142_v47, 2  ;;  %v3766_v46 = vstv %s8114_s13  ;;  %v8179_v56 = vld [vmem:[#allocation2 + $0x28] sm:$0xff]  ;;  %s8673_s13 = sld [smem:[#allocation14 + $0x4f]] }
 0x421   : > { %10488 = vst [vmem:[#allocation157_spill] sm:$0xff] %v8154_v7  ;;  %v1897_v7 = vadd.f32 %v1888_v22, %v1819_v17  ;;  %v1816_v40 = vmul.f32 %v7900_v43, %v7863_v53  ;;  %v1824_v48 = vmul.f32 %v7852_v39, %v7896_v4  ;;  %v3746_v45 = vsel %vm931_vm0, %v3743_v50, %v3745_v54 }
 0x422   : > { %v3768_v55 = vmul.f32 %v7804_v57, %v3766_v46  ;;  %v3742_v42 = vsel %vm931_vm0, %v3740_v62, %v3741_v0  ;;  %v3744_v58 = vsel %vm931_vm0, %v3741_v0, %v3743_v50  ;;  %v3734_v18 = vmul.f32 %v3729_v28, %v7589_v16 }
 0x423   : > { %v3767_v17 = vmul.f32 %v8179_v56, %v3766_v46  ;;  %v2062_v53 = vsel %vm1007_vm1, %v10220_v13, %v10219_v31  ;;  %v1889_v33 = vrot.slane %v1876_v44, 1  ;;  %v1914_v22 = vrot.slane %v8163_v27, 1 }
 0x424   : > { %3753 = vrot.lane.b32.xlu2 %v3746_v45, %s5804_s20  ;;  %v8191_v62 = vmul.f32 %v7778_v32, %v3766_v46  ;;  %v8195_v28 = vadd.f32 %v8067_v21, %v8062_v37  ;;  %v8197_v50 = vadd.f32 %v2062_v53, %v1955_v12  ;;  %v10489_v0 = vrot.slane %v7876_v41, 2 }
 0x425   : > { %3749 = vrot.lane.b32.xlu0 %v3742_v42, %s5804_s20  ;;  %3751 = vrot.lane.b32.xlu1 %v3744_v58, %s5804_s20  ;;  %v10490_v44 = vrot.slane %v7870_v5, 2  ;;  %v1820_v12 = vadd.f32 %v1816_v40, %v7893_v30  ;;  %v3778_v21 = vrot.slane %v3768_v55, 1  ;;  %v1828_v5 = vadd.f32 %v1824_v48, %v7944_v34 }
 0x426   : > { %v2000_v45 = vsel %vm1007_vm1, %v1998_v19, %v10489_v0  ;;  %v8207_v42 = vpop.permute.xlu2 %3499  ;;  %v8220_v19 = vmul.f32 %v7948_v36, %v7865_v3  ;;  %v3747_v53 = vrot.slane %v3734_v18, 1  ;;  %v3777_v0 = vrot.slane %v3767_v17, 1 }
 0x427   : > { %v2004_v27 = vsel %vm1007_vm1, %v10490_v44, %v2003_v8  ;;  %10491 = vst [vmem:[#allocation158_spill] sm:$0xff] %v8207_v42  ;;  %v8209_v58 = vadd.f32 %v2000_v45, %v1895_v15  ;;  %v8214_v37 = vpop.permute.xlu0 %3390  ;;  %v8216_v41 = vpop.permute.xlu1 %3392  ;;  %v1890_v15 = vsel %vm931_vm0, %v1887_v29, %v1889_v33  ;;  %v8229_v30 = vmul.f32 %v7846_v25, %v7898_v20 }
 0x428   : > { %v8211_v31 = vadd.f32 %v2004_v27, %v1897_v7  ;;  %10492 = vst [vmem:[#allocation159_spill] sm:$0xff] %v8214_v37  ;;  %v10494_v7 = vrot.slane %v7911_v9, 1  ;;  %v3780_v40 = vrot.slane %v8191_v62, 1  ;;  %v1825_v3 = vmul.f32 %v7846_v25, %v7896_v4  ;;  %v8249_v25 = vld [vmem:[#allocation2 + $0x40] sm:$0xff] }
 0x429   : > { %10493 = vst [vmem:[#allocation160_spill] sm:$0xff] %v8216_v41  ;;  %v1930_v48 = vmul.f32 %v7926_v63, %v8045_v51  ;;  %v1931_v55 = vmul.f32 %v7852_v39, %v8045_v51  ;;  %v3803_v29 = vstv %s8167_s16  ;;  %v1934_v9 = vmul.f32 %v7948_v36, %v8045_v51  ;;  %s8760_s16 = sld [smem:[#allocation14 + $0x58]] }
 0x42a   : > { %v1915_v45 = vsel %vm931_vm0, %v10494_v7, %v1914_v22  ;;  %v3781_v18 = vsel %vm931_vm0, %v3778_v21, %v3780_v40  ;;  %v3804_v20 = vmul.f32 %v8179_v56, %v3803_v29  ;;  %v8244_v17 = vmul.f32 %v7804_v57, %v3803_v29 }
 0x42b   : > { %v3748_v33 = vsel %vm931_vm0, %v3745_v54, %v3747_v53  ;;  %v3779_v4 = vsel %vm931_vm0, %v3777_v0, %v3778_v21  ;;  %v3770_v62 = vmul.f32 %v8249_v25, %v3766_v46  ;;  %v3771_v44 = vmul.f32 %v3766_v46, %v7589_v16 }
 0x42c   : > { %3788 = vrot.lane.b32.xlu2 %v3781_v18, %s5804_s20  ;;  %v1898_v51 = vadd.f32 %v1890_v15, %v1820_v12  ;;  %v2005_v27 = vrot.slane %v8220_v19, 2  ;;  %v2030_v7 = vrot.slane %v8229_v30, 2  ;;  %v1833_v13 = vmul.f32 %v7926_v63, %v8090_v35 }
 0x42d   : > { %3755 = vrot.lane.b32.xlu0 %v3748_v33, %s5804_s20  ;;  %3786 = vrot.lane.b32.xlu1 %v3779_v4, %s5804_s20  ;;  %v1925_v54 = vadd.f32 %v1915_v45, %v1828_v5  ;;  %v1941_v21 = vrot.slane %v1931_v55, 1  ;;  %v1834_v53 = vmul.f32 %v7852_v39, %v8090_v35  ;;  %v1836_v16 = vmul.f32 %v7900_v43, %v8090_v35 }
 0x42e   : > { %v8263_v46 = vpop.permute.xlu2 %3534  ;;  %v1829_v12 = vadd.f32 %v1825_v3, %v7944_v34  ;;  %v1947_v19 = vrot.slane %v1934_v9, 1  ;;  %v3814_v30 = vrot.slane %v3804_v20, 2  ;;  %v3815_v18 = vrot.slane %v8244_v17, 2 }
 0x42f   : > { %10495 = vst [vmem:[#allocation161_spill] sm:$0xff] %v8263_v46  ;;  %v8266_v0 = vpop.permute.xlu0 %3425  ;;  %v8268_v15 = vpop.permute.xlu1 %3427  ;;  %v1940_v5 = vrot.slane %v1930_v48, 1  ;;  %v2047_v45 = vmul.f32 %v7852_v39, %v8080_v49  ;;  %v3782_v55 = vrot.slane %v3770_v62, 1  ;;  %v3784_v33 = vrot.slane %v3771_v44, 1 }
 0x430   : > { %10496 = vst [vmem:[#allocation162_spill] sm:$0xff] %v8268_v15  ;;  %v10497_v43 = vrot.slane %v7904_v6, 1  ;;  %v1837_v35 = vadd.f32 %v1833_v13, %v8087_v2  ;;  %v2046_v3 = vmul.f32 %v7926_v63, %v8080_v49  ;;  %v2050_v9 = vmul.f32 %v7948_v36, %v8080_v49  ;;  %v8298_v49 = vld [vmem:[#allocation2 + $0x48] sm:$0x3] }
 0x431   : > { %v1942_v48 = vsel %vm931_vm0, %v1940_v5, %v1941_v21  ;;  %v1838_v39 = vadd.f32 %v1834_v53, %v8087_v2  ;;  %v10498_v20 = vrot.slane %v8071_v59, 1  ;;  %v1840_v6 = vadd.f32 %v1836_v16, %v8087_v2 }
 0x432   : > { %v1917_v34 = vsel %vm931_vm0, %v1914_v22, %v10497_v43  ;;  %v10499_v22 = vrot.slane %v8077_v38, 1  ;;  %v3816_v36 = vsel %vm1007_vm1, %v3814_v30, %v3815_v18  ;;  %v3807_v63 = vmul.f32 %v8249_v25, %v3803_v29 }
 0x433   : > { %v1944_v4 = vsel %vm931_vm0, %v1941_v21, %v10498_v20  ;;  %v3808_v59 = vmul.f32 %v8298_v49, %v3803_v29  ;;  %v2057_v62 = vrot.slane %v2047_v45, 2  ;;  %v3783_v2 = vsel %vm931_vm0, %v3780_v40, %v3782_v55 }
 0x434   : > { %v1948_v13 = vsel %vm931_vm0, %v10499_v22, %v1947_v19  ;;  %v3785_v38 = vsel %vm931_vm0, %v3782_v55, %v3784_v33  ;;  %3823 = vrot.lane.b32.xlu2 %v3816_v36, %s5804_s20  ;;  %v3806_v44 = vmul.f32 %v7778_v32, %v3803_v29  ;;  %v2006_v21 = vsel %vm1007_vm1, %v2003_v8, %v2005_v27 }
 0x435   : > { %v1926_v53 = vadd.f32 %v1917_v34, %v1829_v12  ;;  %v1953_v16 = vadd.f32 %v1942_v48, %v1837_v35  ;;  %v2063_v19 = vrot.slane %v2050_v9, 2  ;;  %3790 = vrot.lane.b32.xlu0 %v3783_v2, %s5804_s20  ;;  %3792 = vrot.lane.b32.xlu1 %v3785_v38, %s5804_s20  ;;  %v10500_v40 = vrot.slane %v7920_v24, 2  ;;  %v10508_v2 = vld [vmem:[#allocation63_spill] sm:$0xff] }
 0x436   : > { %v2056_v5 = vrot.slane %v2046_v3, 2  ;;  %v1954_v29 = vadd.f32 %v1944_v4, %v1838_v39  ;;  %v1956_v45 = vadd.f32 %v1948_v13, %v1840_v6  ;;  %v8317_v47 = vpop.permute.xlu2 %3540  ;;  %v8319_v8 = vadd.f32 %v2006_v21, %v1898_v51  ;;  %v10510_v21 = vld [vmem:[#allocation48_spill] sm:$0xff] }
 0x437   : > { %v2031_v30 = vsel %vm1007_vm1, %v10500_v40, %v2030_v7  ;;  %10501 = vst [vmem:[#allocation163_spill] sm:$0xff] %v8317_v47  ;;  %v8323_v12 = vpop.permute.xlu0 %3460  ;;  %v8325_v55 = vpop.permute.xlu1 %3462  ;;  %v3819_v33 = vrot.slane %v3807_v63, 2  ;;  %v3821_v43 = vrot.slane %v3808_v59, 2  ;;  %v10504_v24 = vrot.slane %v7998_v23, 2 }
 0x438   : > { %v8321_v27 = vadd.f32 %v2031_v30, %v1925_v54  ;;  %10502 = vst [vmem:[#allocation164_spill] sm:$0xff] %v8323_v12  ;;  %v2058_v35 = vsel %vm1007_vm1, %v2056_v5, %v2057_v62  ;;  %v3817_v3 = vrot.slane %v3806_v44, 2  ;;  %v3840_v51 = vstv %s8273_s0  ;;  %v10509_v44 = vld [vmem:[#allocation151_spill] sm:$0xff]  ;;  %s8816_s0 = sld [smem:[#allocation14 + $0x61]] }
 0x439   : > { %10503 = vst [vmem:[#allocation165_spill] sm:$0xff] %v8325_v55  ;;  %v2033_v34 = vsel %vm1007_vm1, %v2030_v7, %v10504_v24  ;;  %v8336_v54 = vadd.f32 %v2058_v35, %v1953_v16  ;;  %v10505_v48 = vrot.slane %v8106_v1, 2  ;;  %v10506_v20 = vrot.slane %v8110_v14, 2 }
 0x43a   : > { %v8334_v9 = vadd.f32 %v2033_v34, %v1926_v53  ;;  %v8348_v7 = vadd.f32 %v7163_v11, %v7970_v60  ;;  %v8352_v4 = vadd.f32 %v7175_v61, %v8051_v26  ;;  %v2889_v14 = vstv %s8292_s21  ;;  %s8831_s21 = sld [smem:[#allocation14 + $0x6a]] }
 0x43b   : > { %v2060_v39 = vsel %vm1007_vm1, %v2057_v62, %v10505_v48  ;;  %v2064_v23 = vsel %vm1007_vm1, %v10506_v20, %v2063_v19  ;;  %v3822_v22 = vsel %vm1007_vm1, %v3819_v33, %v3821_v43  ;;  %v3843_v13 = vmul.f32 %v7778_v32, %v3840_v51  ;;  %v10518_v43 = vld [vmem:[#allocation25_spill] sm:$0xff]  ;;  %v10520_v48 = vld [vmem:[#allocation28_spill] sm:$0xff] }
 0x43c   : > { %v8354_v6 = vadd.f32 %v2060_v39, %v1954_v29  ;;  %v8356_v1 = vadd.f32 %v2064_v23, %v1956_v45  ;;  %v8364_v11 = vmul.f32 %v8249_v25, %v3840_v51  ;;  %v3818_v61 = vsel %vm1007_vm1, %v3815_v18, %v3817_v3  ;;  %3829 = vrot.lane.b32.xlu2 %v3822_v22, %s5804_s20  ;;  %v10507_v18 = vld [vmem:[#allocation150_spill] sm:$0xff]  ;;  %v10521_v20 = vld [vmem:[#allocation37_spill] sm:$0xff] }
 0x43d   : > { %v3820_v60 = vsel %vm1007_vm1, %v3817_v3, %v3819_v33  ;;  %v3841_v26 = vmul.f32 %v8179_v56, %v3840_v51  ;;  %v3842_v36 = vmul.f32 %v7804_v57, %v3840_v51  ;;  %v8375_v63 = vmul.f32 %v8179_v56, %v7662_v10  ;;  %3825 = vrot.lane.b32.xlu0 %v3818_v61, %s5804_s20 }
 0x43e   : > { %v8379_v59 = vmul.f32 %v8249_v25, %v7662_v10  ;;  %v2899_v62 = vstv %s8301_s18  ;;  %v8383_v17 = vstv %s8310_s9  ;;  %3827 = vrot.lane.b32.xlu1 %v3820_v60, %s5804_s20  ;;  %v8389_v38 = vadd.f32 %v10508_v2, %v10507_v18  ;;  %v8401_v19 = vpop.permute.xlu2 %3564  ;;  %s8839_s18 = sld [smem:[#allocation14 + $0x4c]] }
 0x43f   : > { %v8393_v53 = vadd.f32 %v10510_v21, %v10509_v44  ;;  %v8396_v16 = vmul.f32 %v7778_v32, %v2889_v14  ;;  %v8399_v10 = vmul.f32 %v7804_v57, %v2899_v62  ;;  %10513 = vst [vmem:[#allocation151_spill] sm:$0xff] %v8401_v19  ;;  %v8405_v40 = vmul.f32 %v8179_v56, %v8383_v17  ;;  %v8412_v5 = vpop.permute.xlu0 %3466  ;;  %v8414_v29 = vpop.permute.xlu1 %3497  ;;  %v10525_v21 = vld [vmem:[#allocation61_spill] sm:$0xff]  ;;  %s8847_s9 = sld [smem:[#allocation14 + $0x55]] }
 0x440   : > { %v8408_v30 = vmul.f32 %v8179_v56, %v2889_v14  ;;  %10516 = vst [vmem:[#allocation167_spill] sm:$0xff] %v8412_v5  ;;  %v3854_v45 = vrot.slane %v3843_v13, 2  ;;  %v3856_v33 = vrot.slane %v8364_v11, 2  ;;  %v8419_v24 = vadd.f32 %v10518_v43, %v8197_v50 }
 0x441   : > { %10511 = vst [vmem:[#allocation150_spill] sm:$0xff] %v8396_v16  ;;  %v8423_v34 = vmul.f32 %v8249_v25, %v8383_v17  ;;  %v3851_v35 = vrot.slane %v3841_v26, 2  ;;  %v3852_v3 = vrot.slane %v3842_v36, 2  ;;  %v8429_v39 = vadd.f32 %v10520_v48, %v8195_v28  ;;  %v10526_v48 = vld [vmem:[#allocation41_spill] sm:$0xff] }
 0x442   : > { %10512 = vst [vmem:[#allocation63_spill] sm:$0xff] %v8399_v10  ;;  %v8433_v23 = vadd.f32 %v10521_v20, %v8209_v58  ;;  %v8436_v22 = vmul.f32 %v7804_v57, %v2889_v14  ;;  %v8439_v50 = vmul.f32 %v8249_v25, %v2889_v14  ;;  %v8442_v13 = vmul.f32 %v8179_v56, %v2899_v62 }
 0x443   : > { %10514 = vst [vmem:[#allocation48_spill] sm:$0xff] %v8405_v40  ;;  %v8445_v11 = vstv %s8331_s19  ;;  %v8448_v61 = vstv %s8344_s14  ;;  %v3877_v60 = vstv %s8358_s15  ;;  %v3857_v14 = vsel %vm1007_vm1, %v3854_v45, %v3856_v33  ;;  %s8864_s19 = sld [smem:[#allocation14 + $0x50]] }
 0x444   : > { %10515 = vst [vmem:[#allocation166_spill] sm:$0xff] %v8408_v30  ;;  %v8455_v28 = vmul.f32 %v7804_v57, %v8445_v11  ;;  %v8459_v58 = vmul.f32 %v7804_v57, %v8448_v61  ;;  %v3879_v26 = vmul.f32 %v7804_v57, %v3877_v60  ;;  %v3853_v36 = vsel %vm1007_vm1, %v3851_v35, %v3852_v3  ;;  %v10532_v30 = vld [vmem:[#allocation59_spill] sm:$0xff]  ;;  %s8875_s14 = sld [smem:[#allocation14 + $0x5e]] }
 0x445   : > { %10517 = vst [vmem:[#allocation168_spill] sm:$0xff] %v8414_v29  ;;  %v3855_v18 = vsel %vm1007_vm1, %v3852_v3, %v3854_v45  ;;  %3864 = vrot.lane.b32.xlu2 %v3857_v14, %s5804_s20  ;;  %v3845_v2 = vmul.f32 %v8298_v49, %v3840_v51  ;;  %v3878_v44 = vmul.f32 %v8179_v56, %v3877_v60  ;;  %v8508_v29 = vstv %s8410_s17  ;;  %s8930_s15 = sld [smem:[#allocation14 + $0x59]] }
 0x446   : > { %10519 = vst [vmem:[#allocation25_spill] sm:$0xff] %v8423_v34  ;;  %v8470_v43 = vadd.f32 %v10525_v21, %v8211_v31  ;;  %v8474_v20 = vadd.f32 %v10526_v48, %v8319_v8  ;;  %3860 = vrot.lane.b32.xlu0 %v3853_v36, %s5804_s20  ;;  %3862 = vrot.lane.b32.xlu1 %v3855_v18, %s5804_s20  ;;  %v8495_v3 = vpop.permute.xlu2 %3588  ;;  %v3889_v48 = vrot.slane %v3879_v26, 2  ;;  %v8511_v5 = vstv %s8425_s23  ;;  %s8951_s17 = sld [smem:[#allocation14 + $0x62]] }
 0x447   : > { %10522 = vst [vmem:[#allocation28_spill] sm:$0xff] %v8436_v22  ;;  %v8479_v45 = vmul.f32 %v7778_v32, %v3877_v60  ;;  %v8482_v51 = vmul.f32 %v7778_v32, %v2899_v62  ;;  %v8485_v35 = vmul.f32 %v8249_v25, %v2899_v62  ;;  %v8489_v31 = vmul.f32 %v7778_v32, %v8445_v11  ;;  %v8503_v62 = vpop.permute.xlu0 %3501  ;;  %v8505_v21 = vpop.permute.xlu1 %3503  ;;  %s9095_s23 = sld [smem:[#allocation14 + $0x67]] }
 0x448   : > { %10523 = vst [vmem:[#allocation37_spill] sm:$0xff] %v8439_v50  ;;  %v8493_v8 = vmul.f32 %v7778_v32, %v8448_v61  ;;  %v8501_v18 = vmul.f32 %v7804_v57, %v8383_v17  ;;  %v3858_v55 = vrot.slane %v3845_v2, 2  ;;  %v2978_v14 = vmul.f32 %v8179_v56, %v8508_v29  ;;  %v10530_v50 = vld [vmem:[#allocation30_spill] sm:$0xff] }
 0x449   : > { %10524 = vst [vmem:[#allocation169_spill] sm:$0xff] %v8442_v13  ;;  %v8517_v36 = vmul.f32 %v7804_v57, %v8508_v29  ;;  %v3094_v12 = vmul.f32 %v8179_v56, %v8511_v5  ;;  %v3891_v13 = vrot.slane %v8479_v45, 2  ;;  %v8524_v26 = vmul.f32 %v7804_v57, %v8511_v5 }
 0x44a   : > { %10527 = vst [vmem:[#allocation61_spill] sm:$0xff] %v8485_v35  ;;  %v2920_v2 = vmul.f32 %v8179_v56, %v10530_v50  ;;  %v3914_v22 = vstv %s8451_s8  ;;  %v8533_v41 = vadd.f32 %v10532_v30, %v8321_v27  ;;  %v3859_v46 = vsel %vm1007_vm1, %v3856_v33, %v3858_v55  ;;  %v10533_v27 = vld [vmem:[#allocation31_spill] sm:$0xff]  ;;  %s9212_s8 = sld [smem:[#allocation14 + $0x49]] }
 0x44b   : > { %10528 = vst [vmem:[#allocation41_spill] sm:$0xff] %v8495_v3  ;;  %v3888_v3 = vrot.slane %v3878_v44, 2  ;;  %v10531_v44 = vld [vmem:[#allocation32_spill] sm:$0xff]  ;;  %v3892_v37 = vsel %vm1007_vm1, %v3889_v48, %v3891_v13  ;;  %v8538_v45 = vmul.f32 %v7804_v57, %v3914_v22  ;;  %v3881_v34 = vmul.f32 %v8249_v25, %v3877_v60 }
 0x44c   : > { %10529 = vst [vmem:[#allocation170_spill] sm:$0xff] %v8505_v21  ;;  %v3036_v47 = vmul.f32 %v8179_v56, %v10531_v44  ;;  %v3915_v21 = vmul.f32 %v8179_v56, %v3914_v22  ;;  %v3882_v42 = vmul.f32 %v8298_v49, %v3877_v60  ;;  %v8547_v30 = vadd.f32 %v10533_v27, %v8334_v9  ;;  %v10540_v9 = vld [vmem:[#allocation44_spill] sm:$0xff] }
 0x44d   : > { %v3890_v52 = vsel %vm1007_vm1, %v3888_v3, %v3889_v48  ;;  %3899 = vrot.lane.b32.xlu2 %v3892_v37, %s5804_s20  ;;  %v10221_v35 = vrot.slane %v8489_v31, 1  ;;  %v2988_v40 = vrot.slane %v2978_v14, 1  ;;  %v3104_v37 = vrot.slane %v3094_v12, 2 }
 0x44e   : > { %3866 = vrot.lane.b32.xlu0 %v3859_v46, %s5804_s20  ;;  %3897 = vrot.lane.b32.xlu1 %v3890_v52, %s5804_s20  ;;  %v2930_v33 = vrot.slane %v2920_v2, 1  ;;  %v3046_v60 = vrot.slane %v3036_v47, 2  ;;  %v8556_v3 = vpop.permute.xlu2 %3612  ;;  %v8561_v14 = vmul.f32 %v8249_v25, %v8508_v29  ;;  %v3925_v52 = vrot.slane %v3915_v21, 2  ;;  %v10541_v21 = vld [vmem:[#allocation49_spill] sm:$0xff] }
 0x44f   : > { %10534 = vst [vmem:[#allocation30_spill] sm:$0xff] %v8556_v3  ;;  %v8565_v48 = vpop.permute.xlu0 %3536  ;;  %v8567_v46 = vpop.permute.xlu1 %3538  ;;  %v3926_v12 = vrot.slane %v8538_v45, 2  ;;  %v10537_v47 = vrot.slane %v8455_v28, 1  ;;  %v8579_v27 = vmul.f32 %v7778_v32, %v8383_v17  ;;  %v3893_v55 = vrot.slane %v3881_v34, 2 }
 0x450   : > { %10535 = vst [vmem:[#allocation32_spill] sm:$0xff] %v8565_v48  ;;  %v3895_v57 = vrot.slane %v3882_v42, 2  ;;  %v8583_v3 = vadd.f32 %v10540_v9, %v8336_v54  ;;  %v8587_v45 = vadd.f32 %v10541_v21, %v8354_v6  ;;  %v10543_v16 = vrot.slane %v8459_v58, 2  ;;  %v10549_v9 = vld [vmem:[#allocation33_spill] sm:$0xff] }
 0x451   : > { %10536 = vst [vmem:[#allocation59_spill] sm:$0xff] %v8567_v46  ;;  %v8575_v2 = vsel %vm931_vm0, %v10537_v47, %v10221_v35  ;;  %v10542_v46 = vrot.slane %v8493_v8, 2  ;;  %v10545_v17 = vrot.slane %v8517_v36, 1  ;;  %v10547_v42 = vrot.slane %v8524_v26, 2  ;;  %v10551_v35 = vld [vmem:[#allocation55_spill] sm:$0xff] }
 0x452   : > { %10538 = vst [vmem:[#allocation31_spill] sm:$0xff] %v8575_v2  ;;  %v10550_v6 = vrot.slane %v10549_v9, 1  ;;  %v10552_v2 = vrot.slane %v10551_v35, 2  ;;  %v3894_v35 = vsel %vm1007_vm1, %v3891_v13, %v3893_v55  ;;  %v2924_v9 = vmul.f32 %v8298_v49, %v10530_v50  ;;  %v10553_v13 = vld [vmem:[#allocation27_spill] sm:$0xff] }
 0x453   : > { %10539 = vst [vmem:[#allocation171_spill] sm:$0xff] %v8579_v27  ;;  %v8594_v47 = vsel %vm1007_vm1, %v10543_v16, %v10542_v46  ;;  %v8599_v34 = vsel %vm931_vm0, %v2988_v40, %v10545_v17  ;;  %v8604_v54 = vsel %vm1007_vm1, %v3104_v37, %v10547_v42  ;;  %v2982_v40 = vmul.f32 %v8298_v49, %v8508_v29 }
 0x454   : > { %10544 = vst [vmem:[#allocation44_spill] sm:$0xff] %v8594_v47  ;;  %v8609_v21 = vsel %vm931_vm0, %v2930_v33, %v10550_v6  ;;  %v8614_v16 = vsel %vm1007_vm1, %v3046_v60, %v10552_v2  ;;  %v3927_v17 = vsel %vm1007_vm1, %v3925_v52, %v3926_v12  ;;  %v3918_v37 = vmul.f32 %v8249_v25, %v3914_v22  ;;  %v5562_v47 = vld [vmem:[#allocation2 + $0x38] sm:$0xff] }
 0x455   : > { %10546 = vst [vmem:[#allocation49_spill] sm:$0xff] %v8599_v34  ;;  %v3919_v42 = vmul.f32 %v8298_v49, %v3914_v22  ;;  %v8624_v33 = vmul.f32 %v8249_v25, %v8511_v5  ;;  %v3896_v60 = vsel %vm1007_vm1, %v3893_v55, %v3895_v57  ;;  %3934 = vrot.lane.b32.xlu2 %v3927_v17, %s5804_s20  ;;  %v8637_v46 = vstv %s8551_s1  ;;  %s9226_s1 = sld [smem:[#allocation14 + $0x52]] }
 0x456   : > { %10548 = vst [vmem:[#allocation172_spill] sm:$0xff] %v8604_v54  ;;  %v3917_v2 = vmul.f32 %v7778_v32, %v3914_v22  ;;  %v3098_v52 = vmul.f32 %v8298_v49, %v8511_v5  ;;  %v3040_v6 = vmul.f32 %v8298_v49, %v10531_v44  ;;  %3901 = vrot.lane.b32.xlu0 %v3894_v35, %s5804_s20  ;;  %v2995_v32 = vrot.slane %v2982_v40, 1  ;;  %v8649_v55 = vpop.permute.xlu2 %3618 }
 0x457   : > { %3903 = vrot.lane.b32.xlu1 %v3896_v60, %s5804_s20  ;;  %v8643_v57 = vadd.f32 %v10553_v13, %v8433_v23  ;;  %v2949_v22 = vmul.f32 %v8179_v56, %v8445_v11  ;;  %v3065_v50 = vmul.f32 %v8179_v56, %v8448_v61  ;;  %10555 = vst [vmem:[#allocation55_spill] sm:$0xff] %v8649_v55  ;;  %v8652_v44 = vstv %s8563_s29  ;;  %v8658_v35 = vpop.permute.xlu0 %3560  ;;  %v8660_v60 = vpop.permute.xlu1 %3562  ;;  %v10557_v13 = vld [vmem:[#allocation34_spill] sm:$0xff]  ;;  %s9262_s29 = sld [smem:[#allocation14 + $0x6b]] }
 0x458   : > { %v8656_v17 = vmul.f32 %v8249_v25, %v8445_v11  ;;  %10556 = vst [vmem:[#allocation27_spill] sm:$0xff] %v8658_v35  ;;  %v3930_v23 = vrot.slane %v3918_v37, 2  ;;  %v3932_v40 = vrot.slane %v3919_v42, 2  ;;  %v8664_v54 = vadd.f32 %v10557_v13, %v8356_v1 }
 0x459   : > { %10554 = vst [vmem:[#allocation33_spill] sm:$0xff] %v8643_v57  ;;  %v8668_v34 = vmul.f32 %v8249_v25, %v8637_v46  ;;  %v8671_v55 = vmul.f32 %v5562_v47, %v8637_v46  ;;  %v3928_v27 = vrot.slane %v3917_v2, 2  ;;  %v10222_v35 = vrot.slane %v8624_v33, 2 }
 0x45a   : > { %v3111_v19 = vrot.slane %v3098_v52, 2  ;;  %v2937_v37 = vrot.slane %v2924_v9, 1  ;;  %v3053_v42 = vrot.slane %v3040_v6, 2  ;;  %v10558_v10 = vrot.slane %v8561_v14, 1 }
 0x45b   : > { %v2959_v13 = vrot.slane %v2949_v22, 1  ;;  %v3075_v15 = vrot.slane %v3065_v50, 2  ;;  %v8683_v57 = vmul.f32 %v8249_v25, %v8652_v44  ;;  %v8686_v2 = vmul.f32 %v5562_v47, %v8652_v44 }
 0x45c   : > { %v8679_v1 = vsel %vm931_vm0, %v10558_v10, %v2995_v32  ;;  %v2964_v48 = vrot.slane %v8656_v17, 1  ;;  %v8691_v52 = vmul.f32 %v8249_v25, %v8448_v61  ;;  %v3933_v9 = vsel %vm1007_vm1, %v3930_v23, %v3932_v40  ;;  %v10561_v17 = vld [vmem:[#allocation109_spill] sm:$0xff]  ;;  %v10563_v40 = vld [vmem:[#allocation110_spill] sm:$0xff] }
 0x45d   : > { %10559 = vst [vmem:[#allocation34_spill] sm:$0xff] %v8679_v1  ;;  %v3929_v32 = vsel %vm1007_vm1, %v3926_v12, %v3928_v27  ;;  %v3931_v22 = vsel %vm1007_vm1, %v3928_v27, %v3930_v23  ;;  %3940 = vrot.lane.b32.xlu2 %v3933_v9, %s5804_s20  ;;  %v8702_v50 = vsel %vm1007_vm1, %v10222_v35, %v3111_v19  ;;  %v10562_v25 = vrot.slane %v10561_v17, 1  ;;  %v10565_v12 = vld [vmem:[#allocation60_spill] sm:$0xff] }
 0x45e   : > { %10560 = vst [vmem:[#allocation173_spill] sm:$0xff] %v8702_v50  ;;  %v10564_v10 = vrot.slane %v10563_v40, 2  ;;  %3936 = vrot.lane.b32.xlu0 %v3929_v32, %s5804_s20  ;;  %v8718_v27 = vadd.f32 %v10565_v12, %v8474_v20  ;;  %v10567_v19 = vrot.slane %v8455_v28, 1  ;;  %v8729_v9 = vpop.permute.xlu2 %3642  ;;  %v10571_v32 = vld [vmem:[#allocation128_spill] sm:$0xff]  ;;  %v10572_v17 = vrot.slane %v8459_v58, 2 }
 0x45f   : > { %v8707_v1 = vsel %vm931_vm0, %v10562_v25, %v2937_v37  ;;  %3938 = vrot.lane.b32.xlu1 %v3931_v22, %s5804_s20  ;;  %v2953_v37 = vmul.f32 %v8298_v49, %v8445_v11  ;;  %10569 = vst [vmem:[#allocation60_spill] sm:$0xff] %v8729_v9  ;;  %v8740_v25 = vpop.permute.xlu0 %3566  ;;  %v8742_v11 = vpop.permute.xlu1 %3586  ;;  %v8744_v40 = vld [vmem:[#allocation2 + $0x50] sm:$0xff]  ;;  %v10576_v12 = vrot.slane %v8671_v55, 1 }
 0x460   : > { %v8712_v6 = vsel %vm1007_vm1, %v10564_v10, %v3053_v42  ;;  %10566 = vst [vmem:[#allocation109_spill] sm:$0xff] %v8718_v27  ;;  %v8723_v23 = vsel %vm931_vm0, %v2959_v13, %v10567_v19  ;;  %v3069_v42 = vmul.f32 %v8298_v49, %v8448_v61  ;;  %v10570_v10 = vld [vmem:[#allocation119_spill] sm:$0xff]  ;;  %v8736_v20 = vsel %vm1007_vm1, %v3075_v15, %v10572_v17  ;;  %v10579_v17 = vld [vmem:[#allocation50_spill] sm:$0xff]  ;;  %v10580_v13 = vld [vmem:[#allocation132_spill] sm:$0xff] }
 0x461   : > { %10568 = vst [vmem:[#allocation110_spill] sm:$0xff] %v8723_v23  ;;  %v3173_v22 = vadd.f32 %v10571_v32, %v10570_v10  ;;  %v10575_v61 = vrot.slane %v8668_v34, 1  ;;  %v10578_v15 = vrot.slane %v8489_v31, 1  ;;  %v3080_v10 = vrot.slane %v8691_v52, 2  ;;  %v10581_v23 = vld [vmem:[#allocation71_spill] sm:$0xff] }
 0x462   : > { %10573 = vst [vmem:[#allocation119_spill] sm:$0xff] %v8736_v20  ;;  %v4228_v32 = vstv %s8673_s13  ;;  %v2286_v35 = vadd.f32 %v10579_v17, %v8547_v30  ;;  %v3082_v20 = vrot.slane %v3069_v42, 2  ;;  %v3007_v31 = vmul.f32 %v8179_v56, %v8637_v46  ;;  %v5565_v42 = vld [vmem:[#allocation2 + $0x30] sm:$0xff]  ;;  %s9291_s13 = sld [smem:[#allocation14 + $0x56]] }
 0x463   : > { %10574 = vst [vmem:[#allocation128_spill] sm:$0xff] %v8742_v11  ;;  %v8751_v19 = vsel %vm931_vm0, %v10576_v12, %v10575_v61  ;;  %v8756_v58 = vsel %vm931_vm0, %v10578_v15, %v2964_v48  ;;  %v3288_v28 = vadd.f32 %v10580_v13, %v3173_v22  ;;  %v2980_v11 = vmul.f32 %v5562_v47, %v8508_v29  ;;  %v8769_v15 = vld [vmem:[#allocation2 + $0x60] sm:$0xff]  ;;  %v8775_v22 = vld [vmem:[#allocation2 + $0x58] sm:$0xff] }
 0x464   : > { %10577 = vst [vmem:[#allocation174_spill] sm:$0xff] %v8751_v19  ;;  %v3096_v61 = vmul.f32 %v5562_v47, %v8511_v5  ;;  %v2966_v12 = vrot.slane %v2953_v37, 1  ;;  %v4231_v52 = vmul.f32 %v8769_v15, %v4228_v32  ;;  %v2434_v9 = vadd.f32 %v10581_v23, %v2286_v35  ;;  %v10585_v23 = vld [vmem:[#allocation80_spill] sm:$0xff] }
 0x465   : > { %v3436_v27 = vadd.f32 %v8266_v0, %v3288_v28  ;;  %v4229_v30 = vmul.f32 %v4228_v32, %v8744_v40  ;;  %v4230_v29 = vmul.f32 %v8775_v22, %v4228_v32  ;;  %v10582_v5 = vrot.slane %v8683_v57, 2 }
 0x466   : > { %v10583_v47 = vrot.slane %v8686_v2, 2  ;;  %v3008_v13 = vmul.f32 %v5565_v42, %v8637_v46  ;;  %v3123_v35 = vmul.f32 %v8179_v56, %v8652_v44  ;;  %v3124_v0 = vmul.f32 %v5565_v42, %v8652_v44  ;;  %4241 = vrot.lane.b32.xlu2 %v4231_v52, %s5803_s22  ;;  %v3678_v52 = vpop.permute.xlu2 %3677  ;;  %v10588_v42 = vld [vmem:[#allocation92_spill] sm:$0xff] }
 0x467   : > { %v2549_v28 = vadd.f32 %v10585_v23, %v2434_v9  ;;  %v10586_v17 = vrot.slane %v8493_v8, 2  ;;  %v2991_v50 = vrot.slane %v2980_v11, 1  ;;  %4237 = vrot.lane.b32.xlu0 %v4229_v30, %s5803_s22  ;;  %4239 = vrot.lane.b32.xlu1 %v4230_v29, %s5803_s22  ;;  %v8800_v56 = vsel %vm931_vm0, %v2964_v48, %v2966_v12  ;;  %v8810_v30 = vpop.permute.xlu0 %3590  ;;  %v8812_v29 = vpop.permute.xlu1 %3592  ;;  %v10593_v23 = vld [vmem:[#allocation45_spill] sm:$0xff] }
 0x468   : > { %v8783_v37 = vsel %vm1007_vm1, %v10583_v47, %v10582_v5  ;;  %v3573_v5 = vadd.f32 %v8660_v60, %v3436_v27  ;;  %10587 = vst [vmem:[#allocation132_spill] sm:$0xff] %v8800_v56  ;;  %v3107_v47 = vrot.slane %v3096_v61, 2  ;;  %v3011_v9 = vmul.f32 %v8298_v49, %v8637_v46  ;;  %v8818_v61 = vld [vmem:[#allocation2 + $0x68] sm:$0xff] }
 0x469   : > { %10584 = vst [vmem:[#allocation50_spill] sm:$0xff] %v8783_v37  ;;  %v8794_v19 = vsel %vm1007_vm1, %v10586_v17, %v3080_v10  ;;  %v3127_v8 = vmul.f32 %v8298_v49, %v8652_v44  ;;  %v2686_v11 = vadd.f32 %v10588_v42, %v2549_v28  ;;  %v8808_v60 = vsel %vm1007_vm1, %v3080_v10, %v3082_v20  ;;  %v10594_v20 = vld [vmem:[#allocation62_spill] sm:$0xff] }
 0x46a   : > { %10589 = vst [vmem:[#allocation71_spill] sm:$0xff] %v8808_v60  ;;  %v3017_v27 = vrot.slane %v3007_v31, 1  ;;  %v8814_v48 = vadd.f32 %v3678_v52, %v3573_v5  ;;  %v3018_v46 = vrot.slane %v3008_v13, 1  ;;  %v3133_v12 = vrot.slane %v3123_v35, 2  ;;  %v10595_v31 = vld [vmem:[#allocation121_spill] sm:$0xff] }
 0x46b   : > { %10590 = vst [vmem:[#allocation80_spill] sm:$0xff] %v8810_v30  ;;  %v3134_v49 = vrot.slane %v3124_v0, 2  ;;  %v4254_v44 = vstv %s8760_s16  ;;  %v2210_v28 = vadd.f32 %v10593_v23, %v8389_v38  ;;  %v2322_v10 = vadd.f32 %v10594_v20, %v8587_v45  ;;  %v10598_v45 = vld [vmem:[#allocation74_spill] sm:$0xff]  ;;  %s9308_s16 = sld [smem:[#allocation14 + $0x53]] }
 0x46c   : > { %10591 = vst [vmem:[#allocation92_spill] sm:$0xff] %v8812_v29  ;;  %v2834_v17 = vadd.f32 %v10595_v31, %v2686_v11  ;;  %v10596_v42 = vrot.slane %v8517_v36, 1  ;;  %v10597_v13 = vrot.slane %v8524_v26, 2  ;;  %v3024_v0 = vrot.slane %v3011_v9, 1 }
 0x46d   : > { %10592 = vst [vmem:[#allocation175_spill] sm:$0xff] %v8814_v48  ;;  %v3140_v52 = vrot.slane %v3127_v8, 2  ;;  %v4256_v38 = vmul.f32 %v8775_v22, %v4254_v44  ;;  %v2470_v11 = vadd.f32 %v10598_v45, %v2322_v10  ;;  %v10599_v36 = vrot.slane %v8561_v14, 1  ;;  %v10610_v45 = vld [vmem:[#allocation47_spill] sm:$0xff] }
 0x46e   : > { %v8829_v5 = vsel %vm931_vm0, %v10596_v42, %v2991_v50  ;;  %v8836_v35 = vsel %vm1007_vm1, %v10597_v13, %v3107_v47  ;;  %v4232_v20 = vmul.f32 %v4228_v32, %v8818_v61  ;;  %v4255_v31 = vmul.f32 %v4254_v44, %v8744_v40  ;;  %v10602_v32 = vld [vmem:[#allocation89_spill] sm:$0xff] }
 0x46f   : > { %v2994_v23 = vsel %vm931_vm0, %v2991_v50, %v10599_v36  ;;  %v10600_v26 = vrot.slane %v8624_v33, 2  ;;  %v8853_v8 = vsel %vm931_vm0, %v3017_v27, %v3018_v46  ;;  %v8856_v42 = vsel %vm1007_vm1, %v3133_v12, %v3134_v49  ;;  %4265 = vrot.lane.b32.xlu2 %v4256_v38, %s5803_s22  ;;  %v10605_v12 = vld [vmem:[#allocation56_spill] sm:$0xff] }
 0x470   : > { %v10601_v14 = vrot.slane %v8671_v55, 1  ;;  %v2574_v10 = vadd.f32 %v10602_v32, %v2470_v11  ;;  %v2906_v33 = vadd.f32 %v8482_v51, %v2834_v17  ;;  %4243 = vrot.lane.b32.xlu0 %v4232_v20, %s5803_s22  ;;  %4263 = vrot.lane.b32.xlu1 %v4255_v31, %s5803_s22  ;;  %v10604_v55 = vld [vmem:[#allocation36_spill] sm:$0xff]  ;;  %v2249_v13 = vadd.f32 %v10605_v12, %v8470_v43  ;;  %v8891_v17 = vpop.permute.xlu2 %3712  ;;  %v10612_v20 = vld [vmem:[#allocation95_spill] sm:$0xff]  ;;  %v10619_v12 = vld [vmem:[#allocation42_spill] sm:$0xff] }
 0x471   : > { %v3110_v9 = vsel %vm1007_vm1, %v3107_v47, %v10600_v26  ;;  %v10603_v47 = vrot.slane %v8686_v2, 2  ;;  %v10606_v38 = vrot.slane %v8668_v34, 1  ;;  %v10607_v2 = vrot.slane %v8683_v57, 2  ;;  %10609 = vst [vmem:[#allocation62_spill] sm:$0xff] %v8891_v17  ;;  %v8899_v34 = vpop.permute.xlu0 %3614  ;;  %v10613_v57 = vld [vmem:[#allocation58_spill] sm:$0xff]  ;;  %v10632_v17 = vld [vmem:[#allocation141_spill] sm:$0xff] }
 0x472   : > { %v8861_v50 = vsel %vm931_vm0, %v3018_v46, %v10601_v14  ;;  %v2213_v46 = vadd.f32 %v10604_v55, %v8429_v39  ;;  %v8895_v11 = vadd.f32 %v10610_v45, %v8348_v7  ;;  %v10611_v39 = vld [vmem:[#allocation64_spill] sm:$0xff]  ;;  %v2722_v43 = vadd.f32 %v10612_v20, %v2574_v10  ;;  %v10615_v26 = vld [vmem:[#allocation26_spill] sm:$0xff]  ;;  %v10616_v7 = vld [vmem:[#allocation43_spill] sm:$0xff] }
 0x473   : > { %v8871_v27 = vsel %vm1007_vm1, %v3134_v49, %v10603_v47  ;;  %v8884_v51 = vsel %vm931_vm0, %v10606_v38, %v3024_v0  ;;  %v8889_v49 = vsel %vm1007_vm1, %v10607_v2, %v3140_v52  ;;  %v2358_v36 = vadd.f32 %v10611_v39, %v2210_v28  ;;  %v8901_v0 = vpop.permute.xlu1 %3616  ;;  %v10617_v47 = vld [vmem:[#allocation35_spill] sm:$0xff]  ;;  %v10618_v10 = vld [vmem:[#allocation54_spill] sm:$0xff] }
 0x474   : > { %10608 = vst [vmem:[#allocation45_spill] sm:$0xff] %v8889_v49  ;;  %v4280_v31 = vstv %s8816_s0  ;;  %v8906_v52 = vadd.f32 %v10613_v57, %v8352_v4  ;;  %v2361_v14 = vadd.f32 %v10615_v26, %v2213_v46  ;;  %v2285_v32 = vadd.f32 %v10616_v7, %v8533_v41  ;;  %v10620_v4 = vld [vmem:[#allocation124_spill] sm:$0xff]  ;;  %v10621_v46 = vld [vmem:[#allocation66_spill] sm:$0xff]  ;;  %v10622_v41 = vld [vmem:[#allocation29_spill] sm:$0xff]  ;;  %s9315_s0 = sld [smem:[#allocation14 + $0x5b]] }
 0x475   : > { %v8912_v28 = vadd.f32 %v10617_v47, %v2249_v13  ;;  %v8916_v55 = vadd.f32 %v10618_v10, %v8393_v53  ;;  %v2321_v38 = vadd.f32 %v10619_v12, %v8583_v3  ;;  %v2870_v2 = vadd.f32 %v10620_v4, %v2722_v43  ;;  %v10623_v53 = vld [vmem:[#allocation38_spill] sm:$0xff]  ;;  %v10625_v4 = vld [vmem:[#allocation52_spill] sm:$0xff] }
 0x476   : > { %10614 = vst [vmem:[#allocation121_spill] sm:$0xff] %v8906_v52  ;;  %v3003_v45 = vadd.f32 %v2994_v23, %v2906_v33  ;;  %v8923_v39 = vadd.f32 %v10621_v46, %v8419_v24  ;;  %v2433_v20 = vadd.f32 %v10622_v41, %v2285_v32  ;;  %v4281_v13 = vmul.f32 %v4280_v31, %v8744_v40  ;;  %v10655_v52 = vld [vmem:[#allocation33_spill] sm:$0xff] }
 0x477   : > { %v8928_v57 = vstv %s8839_s18  ;;  %v2495_v26 = vadd.f32 %v10623_v53, %v2358_v36  ;;  %v4257_v3 = vmul.f32 %v8769_v15, %v4254_v44  ;;  %v4258_v43 = vmul.f32 %v4254_v44, %v8818_v61  ;;  %v10624_v36 = vld [vmem:[#allocation94_spill] sm:$0xff]  ;;  %s9463_s18 = sld [smem:[#allocation14 + $0x5c]] }
 0x478   : > { %v8936_v23 = vstv %s8847_s9  ;;  %4289 = vrot.lane.b32.xlu2 %v4281_v13, %s5803_s22  ;;  %v4306_v24 = vstv %s8831_s21  ;;  %v8942_v33 = vmul.f32 %v8775_v22, %v8928_v57  ;;  %v8945_v7 = vstv %s8864_s19  ;;  %v8963_v13 = vpop.permute.xlu2 %3718  ;;  %s9329_s21 = sld [smem:[#allocation14 + $0x5f]] }
 0x479   : > { %v8949_v32 = vmul.f32 %v8775_v22, %v8936_v23  ;;  %v2610_v47 = vadd.f32 %v10624_v36, %v2495_v26  ;;  %v2915_v44 = vadd.f32 %v8501_v18, %v2870_v2  ;;  %v3119_v10 = vadd.f32 %v3110_v9, %v3003_v45  ;;  %4267 = vrot.lane.b32.xlu0 %v4257_v3, %s5803_s22  ;;  %v10627_v9 = vld [vmem:[#allocation97_spill] sm:$0xff]  ;;  %v8971_v3 = vpop.permute.xlu0 %3638  ;;  %s9494_s9 = sld [smem:[#allocation14 + $0x64]] }
 0x47a   : > { %4269 = vrot.lane.b32.xlu1 %v4258_v43, %s5803_s22  ;;  %v8958_v12 = vstv %s8875_s14  ;;  %v2324_v46 = vadd.f32 %v10625_v4, %v8664_v54  ;;  %v4282_v41 = vmul.f32 %v8775_v22, %v4280_v31  ;;  %10626 = vst [vmem:[#allocation74_spill] sm:$0xff] %v8963_v13  ;;  %v4333_v53 = vmul.f32 %v8928_v57, %v8744_v40  ;;  %v10628_v45 = vld [vmem:[#allocation137_spill] sm:$0xff]  ;;  %s9557_s19 = sld [smem:[#allocation14 + $0x68]] }
 0x47b   : > { %v4370_v18 = vmul.f32 %v8936_v23, %v8744_v40  ;;  %v2758_v2 = vadd.f32 %v10627_v9, %v2610_v47  ;;  %v3226_v26 = vadd.f32 %v10628_v45, %v3119_v10  ;;  %10629 = vst [vmem:[#allocation89_spill] sm:$0xff] %v8971_v3  ;;  %v8973_v43 = vpop.permute.xlu1 %3640  ;;  %v8976_v54 = vmul.f32 %v4306_v24, %v8744_v40  ;;  %v10631_v9 = vld [vmem:[#allocation39_spill] sm:$0xff]  ;;  %v10634_v3 = vld [vmem:[#allocation40_spill] sm:$0xff]  ;;  %s9566_s14 = sld [smem:[#allocation14 + $0x65]] }
 0x47c   : > { %v8979_v36 = vmul.f32 %v8775_v22, %v4306_v24  ;;  %v8984_v13 = vmul.f32 %v8945_v7, %v8744_v40  ;;  %v8989_v10 = vmul.f32 %v8958_v12, %v8744_v40  ;;  %v8992_v45 = vadd.f32 %v10631_v9, %v2321_v38 }
 0x47d   : > { %v3031_v29 = vadd.f32 %v8861_v50, %v2915_v44  ;;  %v3363_v60 = vadd.f32 %v10632_v17, %v3226_v26  ;;  %v8998_v4 = vmul.f32 %v8775_v22, %v8958_v12  ;;  %v4343_v48 = vrot.slane %v4333_v53, 1 }
 0x47e   : > { %10630 = vst [vmem:[#allocation36_spill] sm:$0xff] %v8984_v13  ;;  %v4284_v13 = vmul.f32 %v4280_v31, %v8818_v61  ;;  %v4380_v47 = vrot.slane %v4370_v18, 1  ;;  %v9002_v56 = vstv %s8930_s15  ;;  %v2498_v49 = vadd.f32 %v10634_v3, %v2361_v14  ;;  %s9708_s15 = sld [smem:[#allocation14 + $0x4e]] }
 0x47f   : > { %10633 = vst [vmem:[#allocation56_spill] sm:$0xff] %v9002_v56  ;;  %v2884_v38 = vadd.f32 %v8375_v63, %v2758_v2  ;;  %v3511_v9 = vadd.f32 %v8503_v62, %v3363_v60  ;;  %v4283_v50 = vmul.f32 %v8769_v15, %v4280_v31  ;;  %v10635_v17 = vrot.slane %v8942_v33, 1  ;;  %v10638_v63 = vld [vmem:[#allocation96_spill] sm:$0xff]  ;;  %v10639_v2 = vld [vmem:[#allocation79_spill] sm:$0xff] }
 0x480   : > { %4295 = vrot.lane.b32.xlu2 %v4284_v13, %s5803_s22  ;;  %v10636_v53 = vrot.slane %v8949_v32, 1  ;;  %v9021_v26 = vstv %s8951_s17  ;;  %v2613_v62 = vadd.f32 %v10638_v63, %v2498_v49  ;;  %v3147_v60 = vadd.f32 %v8871_v27, %v3031_v29  ;;  %v10640_v27 = vld [vmem:[#allocation100_spill] sm:$0xff]  ;;  %s9788_s17 = sld [smem:[#allocation14 + $0x60]] }
 0x481   : > { %v9012_v44 = vsel %vm931_vm0, %v4343_v48, %v10635_v17  ;;  %10637 = vst [vmem:[#allocation47_spill] sm:$0xff] %v9021_v26  ;;  %v3626_v31 = vadd.f32 %v8901_v0, %v3511_v9  ;;  %4291 = vrot.lane.b32.xlu0 %v4282_v41, %s5803_s22  ;;  %v9028_v48 = vld [vmem:[#allocation2 + $0x70] sm:$0x3]  ;;  %v2548_v3 = vadd.f32 %v10639_v2, %v2433_v20  ;;  %v10644_v2 = vld [vmem:[#allocation102_spill] sm:$0xff] }
 0x482   : > { %v9017_v18 = vsel %vm931_vm0, %v4380_v47, %v10636_v53  ;;  %4293 = vrot.lane.b32.xlu1 %v4283_v50, %s5803_s22  ;;  %v3754_v47 = vpop.permute.xlu2 %3753  ;;  %v4309_v17 = vmul.f32 %v8769_v15, %v4306_v24  ;;  %v9034_v53 = vmul.f32 %v4306_v24, %v8818_v61  ;;  %v9038_v29 = vmul.f32 %v8769_v15, %v8928_v57  ;;  %v10641_v41 = vld [vmem:[#allocation140_spill] sm:$0xff]  ;;  %v9043_v50 = vpop.permute.xlu0 %3644  ;;  %v10645_v24 = vld [vmem:[#allocation113_spill] sm:$0xff] }
 0x483   : > { %v2761_v49 = vadd.f32 %v10640_v27, %v2613_v62  ;;  %v2943_v0 = vadd.f32 %v8609_v21, %v2884_v38  ;;  %v3251_v9 = vadd.f32 %v10641_v41, %v3147_v60  ;;  %10642 = vst [vmem:[#allocation64_spill] sm:$0xff] %v9043_v50  ;;  %v9045_v63 = vpop.permute.xlu1 %3675  ;;  %v9047_v20 = vadd.f32 %v3754_v47, %v3626_v31  ;;  %v10646_v13 = vld [vmem:[#allocation116_spill] sm:$0xff]  ;;  %v10647_v21 = vld [vmem:[#allocation65_spill] sm:$0xff]  ;;  %v10651_v47 = vld [vmem:[#allocation106_spill] sm:$0xff] }
 0x484   : > { %v2685_v14 = vadd.f32 %v10644_v2, %v2548_v3  ;;  %v3174_v26 = vadd.f32 %v10646_v13, %v10645_v24  ;;  %v4336_v37 = vmul.f32 %v8928_v57, %v8818_v61  ;;  %v4337_v62 = vmul.f32 %v8928_v57, %v9028_v48  ;;  %v10648_v60 = vld [vmem:[#allocation144_spill] sm:$0xff]  ;;  %v10652_v24 = vld [vmem:[#allocation145_spill] sm:$0xff] }
 0x485   : > { %10643 = vst [vmem:[#allocation95_spill] sm:$0xff] %v9047_v20  ;;  %v2472_v38 = vadd.f32 %v10647_v21, %v2324_v46  ;;  %v3399_v27 = vadd.f32 %v10648_v60, %v3251_v9  ;;  %v9060_v41 = vmul.f32 %v8769_v15, %v8936_v23  ;;  %v9064_v31 = vmul.f32 %v8945_v7, %v8818_v61  ;;  %v10650_v13 = vld [vmem:[#allocation72_spill] sm:$0xff] }
 0x486   : > { %v2435_v3 = vadd.f32 %v10650_v13, %v8916_v55  ;;  %v2833_v2 = vadd.f32 %v10651_v47, %v2685_v14  ;;  %v3289_v20 = vadd.f32 %v10652_v24, %v3174_v26  ;;  %v4346_v57 = vrot.slane %v9038_v29, 1  ;;  %v10653_v46 = vld [vmem:[#allocation76_spill] sm:$0xff]  ;;  %v10657_v55 = vld [vmem:[#allocation162_spill] sm:$0xff] }
 0x487   : > { %10649 = vst [vmem:[#allocation58_spill] sm:$0xff] %v9064_v31  ;;  %v2523_v9 = vadd.f32 %v10653_v46, %v8912_v28  ;;  %v2887_v21 = vadd.f32 %v8379_v59, %v2761_v49  ;;  %v3059_v60 = vadd.f32 %v8614_v16, %v2943_v0  ;;  %v10654_v50 = vld [vmem:[#allocation32_spill] sm:$0xff]  ;;  %v10656_v31 = vld [vmem:[#allocation46_spill] sm:$0xff]  ;;  %v9084_v14 = vmul.f32 %v8936_v23, %v8818_v61  ;;  %v10658_v59 = vld [vmem:[#allocation99_spill] sm:$0xff] }
 0x488   : > { %v3547_v56 = vadd.f32 %v10654_v50, %v3399_v27  ;;  %v9078_v30 = vadd.f32 %v10656_v31, %v10655_v52  ;;  %v3437_v13 = vadd.f32 %v10657_v55, %v3289_v20  ;;  %4319 = vrot.lane.b32.xlu2 %v4309_v17, %s5803_s22  ;;  %v4374_v28 = vmul.f32 %v8936_v23, %v9028_v48  ;;  %v10659_v16 = vld [vmem:[#allocation127_spill] sm:$0xff]  ;;  %v10660_v17 = vld [vmem:[#allocation88_spill] sm:$0xff]  ;;  %v10661_v50 = vld [vmem:[#allocation70_spill] sm:$0xff] }
 0x489   : > { %v2649_v26 = vadd.f32 %v10658_v59, %v2523_v9  ;;  %v3172_v29 = vadd.f32 %v10659_v16, %v3059_v60  ;;  %4315 = vrot.lane.b32.xlu0 %v8976_v54, %s5803_s22  ;;  %v4348_v52 = vrot.slane %v4336_v37, 1  ;;  %v2573_v0 = vadd.f32 %v10660_v17, %v8992_v45  ;;  %v10662_v20 = vld [vmem:[#allocation63_spill] sm:$0xff]  ;;  %v10666_v55 = vld [vmem:[#allocation104_spill] sm:$0xff]  ;;  %v10667_v59 = vld [vmem:[#allocation105_spill] sm:$0xff] }
 0x48a   : > { %v3651_v49 = vadd.f32 %v8973_v43, %v3547_v56  ;;  %4317 = vrot.lane.b32.xlu1 %v8979_v36, %s5803_s22  ;;  %v2550_v23 = vadd.f32 %v10661_v50, %v2435_v3  ;;  %v2905_v27 = vadd.f32 %v10662_v20, %v2833_v2  ;;  %v10663_v31 = vld [vmem:[#allocation151_spill] sm:$0xff]  ;;  %v3789_v24 = vpop.permute.xlu2 %3788  ;;  %v2946_v54 = vadd.f32 %v8707_v1, %v2887_v21  ;;  %v3680_v36 = vpop.permute.xlu0 %3679 }
 0x48b   : > { %v3574_v47 = vadd.f32 %v10663_v31, %v3437_v13  ;;  %v10664_v56 = vld [vmem:[#allocation103_spill] sm:$0xff]  ;;  %v9105_v37 = vpop.permute.xlu1 %3681  ;;  %v2721_v3 = vadd.f32 %v10667_v59, %v2573_v0  ;;  %v4350_v2 = vrot.slane %v4337_v62, 1  ;;  %v10668_v13 = vld [vmem:[#allocation57_spill] sm:$0xff]  ;;  %v10670_v21 = vrot.slane %v8942_v33, 1  ;;  %v10673_v31 = vld [vmem:[#allocation122_spill] sm:$0xff] }
 0x48c   : > { %v2797_v43 = vadd.f32 %v10664_v56, %v2649_v26  ;;  %v10665_v46 = vld [vmem:[#allocation143_spill] sm:$0xff]  ;;  %v9107_v60 = vadd.f32 %v3789_v24, %v3651_v49  ;;  %v2687_v45 = vadd.f32 %v10666_v55, %v2550_v23  ;;  %v9115_v17 = vadd.f32 %v10668_v13, %v8895_v11  ;;  %v10674_v11 = vld [vmem:[#allocation150_spill] sm:$0xff] }
 0x48d   : > { %v3287_v9 = vadd.f32 %v10665_v46, %v3172_v29  ;;  %v9111_v16 = vadd.f32 %v3680_v36, %v3574_v47  ;;  %v10669_v26 = vld [vmem:[#allocation147_spill] sm:$0xff]  ;;  %v4347_v29 = vsel %vm931_vm0, %v10670_v21, %v4346_v57  ;;  %v4383_v49 = vrot.slane %v9060_v41, 1  ;;  %v10684_v21 = vld [vmem:[#allocation146_spill] sm:$0xff] }
 0x48e   : > { %v10671_v50 = vld [vmem:[#allocation75_spill] sm:$0xff]  ;;  %v2835_v47 = vadd.f32 %v10673_v31, %v2687_v45  ;;  %v3002_v62 = vadd.f32 %v8829_v5, %v2905_v27  ;;  %v2896_v24 = vadd.f32 %v10674_v11, %v2797_v43  ;;  %v3062_v56 = vadd.f32 %v8712_v6, %v2946_v54  ;;  %v10678_v27 = vld [vmem:[#allocation93_spill] sm:$0xff]  ;;  %v10679_v43 = vld [vmem:[#allocation130_spill] sm:$0xff] }
 0x48f   : > { %v3435_v1 = vadd.f32 %v10669_v26, %v3287_v9  ;;  %v2471_v23 = vadd.f32 %v10671_v50, %v8923_v39  ;;  %v10672_v20 = vld [vmem:[#allocation111_spill] sm:$0xff]  ;;  %v4385_v9 = vrot.slane %v9084_v14, 1  ;;  %v4349_v41 = vsel %vm931_vm0, %v4346_v57, %v4348_v52  ;;  %v10683_v26 = vld [vmem:[#allocation108_spill] sm:$0xff] }
 0x490   : > { %v2869_v0 = vadd.f32 %v10672_v20, %v2721_v3  ;;  %v10675_v46 = vld [vmem:[#allocation27_spill] sm:$0xff]  ;;  %4354 = vrot.lane.b32.xlu2 %v4347_v29, %s5803_s22  ;;  %v4351_v39 = vsel %vm931_vm0, %v4348_v52, %v4350_v2  ;;  %v4387_v36 = vrot.slane %v4374_v28, 1  ;;  %v10676_v55 = vrot.slane %v8998_v4, 1  ;;  %v10680_v28 = vld [vmem:[#allocation73_spill] sm:$0xff]  ;;  %v10688_v11 = vld [vmem:[#allocation112_spill] sm:$0xff] }
 0x491   : > { %v3572_v33 = vadd.f32 %v10675_v46, %v3435_v1  ;;  %v10677_v45 = vrot.slane %v8989_v10, 1  ;;  %v2576_v6 = vadd.f32 %v10678_v27, %v2472_v38  ;;  %v3175_v54 = vadd.f32 %v10679_v43, %v3062_v56  ;;  %4321 = vrot.lane.b32.xlu0 %v9034_v53, %s5803_s22  ;;  %v10681_v10 = vld [vmem:[#allocation48_spill] sm:$0xff]  ;;  %v10682_v3 = vld [vmem:[#allocation61_spill] sm:$0xff]  ;;  %v10691_v27 = vld [vmem:[#allocation34_spill] sm:$0xff] }
 0x492   : > { %4352 = vrot.lane.b32.xlu1 %v9012_v44, %s5803_s22  ;;  %v9149_v57 = vstv %s9095_s23  ;;  %v2575_v52 = vadd.f32 %v10680_v28, %v2471_v23  ;;  %v2914_v59 = vadd.f32 %v10681_v10, %v2869_v0  ;;  %v2907_v2 = vadd.f32 %v10682_v3, %v2835_v47  ;;  %v3824_v13 = vpop.permute.xlu2 %3823  ;;  %v9158_v29 = vpop.permute.xlu0 %3714  ;;  %v10685_v23 = vld [vmem:[#allocation107_spill] sm:$0xff]  ;;  %v10686_v0 = vld [vmem:[#allocation136_spill] sm:$0xff]  ;;  %v10692_v43 = vld [vmem:[#allocation154_spill] sm:$0xff]  ;;  %s5384_s23 = sld [smem:[#allocation14 + $0x69]] }
 0x493   : > { %v9139_v5 = vsel %vm931_vm0, %v10677_v45, %v10676_v55  ;;  %v3687_v14 = vadd.f32 %v9045_v63, %v3572_v33  ;;  %v3118_v38 = vadd.f32 %v8836_v35, %v3002_v62  ;;  %v2724_v1 = vadd.f32 %v10683_v26, %v2576_v6  ;;  %v9160_v44 = vpop.permute.xlu1 %3716  ;;  %v10690_v55 = vld [vmem:[#allocation125_spill] sm:$0xff] }
 0x494   : > { %v2974_v63 = vadd.f32 %v8756_v58, %v2896_v24  ;;  %v3290_v53 = vadd.f32 %v10684_v21, %v3175_v54  ;;  %v2723_v20 = vadd.f32 %v10685_v23, %v2575_v52  ;;  %v10687_v47 = vrot.slane %v8949_v32, 1  ;;  %v10689_v24 = vld [vmem:[#allocation152_spill] sm:$0xff]  ;;  %v10694_v10 = vld [vmem:[#allocation25_spill] sm:$0xff] }
 0x495   : > { %v9162_v50 = vadd.f32 %v3824_v13, %v3687_v14  ;;  %v3225_v31 = vadd.f32 %v10686_v0, %v3118_v38  ;;  %v4388_v62 = vsel %vm931_vm0, %v4385_v9, %v4387_v36  ;;  %v2872_v58 = vadd.f32 %v10688_v11, %v2724_v1  ;;  %v10696_v38 = vld [vmem:[#allocation171_spill] sm:$0xff]  ;;  %v10697_v26 = vld [vmem:[#allocation173_spill] sm:$0xff] }
 0x496   : > { %v4384_v35 = vsel %vm931_vm0, %v10687_v47, %v4383_v49  ;;  %v3438_v56 = vadd.f32 %v10689_v24, %v3290_v53  ;;  %v4386_v46 = vsel %vm931_vm0, %v4383_v49, %v4385_v9  ;;  %v9175_v33 = vmul.f32 %v8769_v15, %v8958_v12  ;;  %v10693_v9 = vld [vmem:[#allocation158_spill] sm:$0xff]  ;;  %v10698_v23 = vld [vmem:[#allocation149_spill] sm:$0xff] }
 0x497   : > { %v2871_v45 = vadd.f32 %v10690_v55, %v2723_v20  ;;  %v3004_v6 = vadd.f32 %v10691_v27, %v2907_v2  ;;  %v3030_v32 = vadd.f32 %v8853_v8, %v2914_v59  ;;  %v3362_v54 = vadd.f32 %v10692_v43, %v3225_v31  ;;  %v10695_v59 = vld [vmem:[#allocation133_spill] sm:$0xff]  ;;  %v10699_v47 = vld [vmem:[#allocation126_spill] sm:$0xff] }
 0x498   : > { %v3090_v36 = vadd.f32 %v8794_v19, %v2974_v63  ;;  %v3575_v14 = vadd.f32 %v8740_v25, %v3438_v56  ;;  %v9185_v28 = vmul.f32 %v8958_v12, %v8818_v61  ;;  %v9189_v49 = vmul.f32 %v8958_v12, %v9028_v48  ;;  %4389 = vrot.lane.b32.xlu2 %v9017_v18, %s5803_s22  ;;  %v10701_v56 = vld [vmem:[#allocation155_spill] sm:$0xff] }
 0x499   : > { %v3510_v52 = vadd.f32 %v10693_v9, %v3362_v54  ;;  %v9196_v8 = vmul.f32 %v8775_v22, %v8945_v7  ;;  %v9200_v25 = vmul.f32 %v8775_v22, %v9149_v57  ;;  %v9204_v19 = vmul.f32 %v8769_v15, %v9149_v57  ;;  %4356 = vrot.lane.b32.xlu0 %v4349_v41, %s5803_s22 }
 0x49a   : > { %v2917_v12 = vadd.f32 %v10694_v10, %v2872_v58  ;;  %v3200_v3 = vadd.f32 %v10695_v59, %v3090_v36  ;;  %v3690_v2 = vadd.f32 %v9105_v37, %v3575_v14  ;;  %4358 = vrot.lane.b32.xlu1 %v4351_v39, %s5803_s22  ;;  %v4420_v18 = vrot.slane %v9175_v33, 1  ;;  %v3830_v53 = vpop.permute.xlu2 %3829  ;;  %v9219_v37 = vpop.permute.xlu0 %3749  ;;  %v10704_v36 = vld [vmem:[#allocation156_spill] sm:$0xff] }
 0x49b   : > { %v2916_v13 = vadd.f32 %v10696_v38, %v2871_v45  ;;  %v3120_v1 = vadd.f32 %v10697_v26, %v3004_v6  ;;  %v3146_v63 = vadd.f32 %v8856_v42, %v3030_v32  ;;  %v3625_v21 = vadd.f32 %v8899_v34, %v3510_v52  ;;  %v3752_v41 = vpop.permute.xlu1 %3751  ;;  %v10700_v42 = vld [vmem:[#allocation139_spill] sm:$0xff]  ;;  %v10703_v32 = vld [vmem:[#allocation174_spill] sm:$0xff]  ;;  %v10708_v59 = vld [vmem:[#allocation80_spill] sm:$0xff] }
 0x49c   : > { %v3326_v20 = vadd.f32 %v10698_v23, %v3200_v3  ;;  %v9221_v0 = vadd.f32 %v3830_v53, %v3690_v2  ;;  %v4422_v39 = vrot.slane %v9185_v28, 1  ;;  %v4444_v31 = vmul.f32 %v9149_v57, %v8744_v40  ;;  %v10705_v28 = vld [vmem:[#allocation157_spill] sm:$0xff]  ;;  %v10715_v23 = vld [vmem:[#allocation98_spill] sm:$0xff] }
 0x49d   : > { %v3227_v11 = vadd.f32 %v10699_v47, %v3120_v1  ;;  %v3250_v58 = vadd.f32 %v10700_v42, %v3146_v63  ;;  %v9230_v34 = vadd.f32 %v3752_v41, %v3625_v21  ;;  %v4424_v24 = vrot.slane %v9189_v49, 1  ;;  %v10706_v49 = vld [vmem:[#allocation51_spill] sm:$0xff]  ;;  %v10709_v2 = vld [vmem:[#allocation121_spill] sm:$0xff]  ;;  %v10713_v63 = vld [vmem:[#allocation56_spill] sm:$0xff] }
 0x49e   : > { %v3474_v33 = vadd.f32 %v10701_v56, %v3326_v20  ;;  %v10702_v55 = vrot.slane %v8998_v4, 1  ;;  %v4455_v27 = vrot.slane %v9200_v25, 1  ;;  %v4457_v6 = vrot.slane %v9204_v19, 1  ;;  %v10707_v4 = vld [vmem:[#allocation53_spill] sm:$0xff]  ;;  %v10718_v42 = vld [vmem:[#allocation55_spill] sm:$0xff] }
 0x49f   : > { %v3032_v43 = vadd.f32 %v10703_v32, %v2916_v13  ;;  %v3033_v54 = vadd.f32 %v8884_v51, %v2917_v12  ;;  %v3364_v14 = vadd.f32 %v10704_v36, %v3227_v11  ;;  %v3398_v9 = vadd.f32 %v10705_v28, %v3250_v58  ;;  %v10710_v38 = vld [vmem:[#allocation69_spill] sm:$0xff]  ;;  %v10712_v51 = vld [vmem:[#allocation170_spill] sm:$0xff]  ;;  %v10756_v19 = vld [vmem:[#allocation175_spill] sm:$0xff] }
 0x4a0   : > { %v4421_v45 = vsel %vm931_vm0, %v10702_v55, %v4420_v18  ;;  %v2521_v52 = vadd.f32 %v10706_v49, %v9078_v30  ;;  %v2522_v10 = vadd.f32 %v10707_v4, %v9115_v17  ;;  %v3600_v3 = vadd.f32 %v10708_v59, %v3474_v33  ;;  %v10711_v13 = vld [vmem:[#allocation161_spill] sm:$0xff]  ;;  %4395 = vrot.lane.b32.xlu2 %v4388_v62, %s5803_s22  ;;  %v10714_v30 = vld [vmem:[#allocation78_spill] sm:$0xff] }
 0x4a1   : > { %v4454_v25 = vrot.slane %v4444_v31, 1  ;;  %v2432_v26 = vadd.f32 %v10710_v38, %v10709_v2  ;;  %v3546_v1 = vadd.f32 %v10711_v13, %v3398_v9  ;;  %v3512_v12 = vadd.f32 %v10712_v51, %v3364_v14  ;;  %4391 = vrot.lane.b32.xlu0 %v4384_v35, %s5803_s22  ;;  %v10716_v62 = vld [vmem:[#allocation50_spill] sm:$0xff]  ;;  %v10717_v47 = vld [vmem:[#allocation45_spill] sm:$0xff]  ;;  %v10726_v51 = vld [vmem:[#allocation159_spill] sm:$0xff] }
 0x4a2   : > { %v9255_v21 = vmul.f32 %v10713_v63, %v8744_v40  ;;  %v2647_v53 = vadd.f32 %v10714_v30, %v2521_v52  ;;  %v2648_v17 = vadd.f32 %v10715_v23, %v2522_v10  ;;  %v3726_v20 = vadd.f32 %v9160_v44, %v3600_v3  ;;  %4393 = vrot.lane.b32.xlu1 %v4386_v46, %s5803_s22  ;;  %v10719_v56 = vld [vmem:[#allocation89_spill] sm:$0xff]  ;;  %v3865_v55 = vpop.permute.xlu2 %3864  ;;  %v10720_v32 = vld [vmem:[#allocation114_spill] sm:$0xff]  ;;  %v10721_v44 = vld [vmem:[#allocation115_spill] sm:$0xff]  ;;  %v3756_v35 = vpop.permute.xlu0 %3755 }
 0x4a3   : > { %v9265_v41 = vstv %s9212_s8  ;;  %v3148_v31 = vadd.f32 %v10716_v62, %v3032_v43  ;;  %v3149_v11 = vadd.f32 %v10717_v47, %v3033_v54  ;;  %v3627_v58 = vadd.f32 %v10718_v42, %v3512_v12  ;;  %v3787_v28 = vpop.permute.xlu1 %3786  ;;  %v10722_v49 = vld [vmem:[#allocation129_spill] sm:$0xff]  ;;  %v10723_v43 = vld [vmem:[#allocation142_spill] sm:$0xff]  ;;  %v10725_v3 = vld [vmem:[#allocation68_spill] sm:$0xff]  ;;  %s5385_s8 = sld [smem:[#allocation14 + $0x4b]] }
 0x4a4   : > { %v3650_v33 = vadd.f32 %v10719_v56, %v3546_v1  ;;  %v2795_v36 = vadd.f32 %v10720_v32, %v2647_v53  ;;  %v2796_v14 = vadd.f32 %v10721_v44, %v2648_v17  ;;  %v9273_v46 = vadd.f32 %v3865_v55, %v3726_v20  ;;  %v10724_v59 = vld [vmem:[#allocation109_spill] sm:$0xff]  ;;  %v10727_v30 = vld [vmem:[#allocation160_spill] sm:$0xff]  ;;  %v10730_v47 = vld [vmem:[#allocation166_spill] sm:$0xff] }
 0x4a5   : > { %v9276_v9 = vstv %s9226_s1  ;;  %v3252_v52 = vadd.f32 %v10722_v49, %v3148_v31  ;;  %v3253_v4 = vadd.f32 %v10723_v43, %v3149_v11  ;;  %v9280_v54 = vadd.f32 %v3756_v35, %v3627_v58  ;;  %v10728_v20 = vld [vmem:[#allocation77_spill] sm:$0xff]  ;;  %v10732_v42 = vld [vmem:[#allocation163_spill] sm:$0xff]  ;;  %v10736_v35 = vld [vmem:[#allocation60_spill] sm:$0xff]  ;;  %s5386_s1 = sld [smem:[#allocation14 + $0x54]] }
 0x4a6   : > { %v9282_v10 = vadd.f32 %v3787_v28, %v3650_v33  ;;  %v2398_v2 = vadd.f32 %v10725_v3, %v10724_v59  ;;  %v4423_v38 = vsel %vm931_vm0, %v4420_v18, %v4422_v39  ;;  %v4425_v13 = vsel %vm931_vm0, %v4422_v39, %v4424_v24  ;;  %v10729_v39 = vld [vmem:[#allocation67_spill] sm:$0xff]  ;;  %v10735_v32 = vld [vmem:[#allocation101_spill] sm:$0xff]  ;;  %v10737_v49 = vld [vmem:[#allocation64_spill] sm:$0xff] }
 0x4a7   : > { %v4458_v1 = vsel %vm931_vm0, %v4455_v27, %v4457_v6  ;;  %v3400_v12 = vadd.f32 %v10726_v51, %v3252_v52  ;;  %v3401_v53 = vadd.f32 %v10727_v30, %v3253_v4  ;;  %v4456_v23 = vsel %vm931_vm0, %v4454_v25, %v4455_v27  ;;  %v10731_v25 = vld [vmem:[#allocation28_spill] sm:$0xff]  ;;  %v10733_v56 = vld [vmem:[#allocation59_spill] sm:$0xff]  ;;  %v10739_v3 = vld [vmem:[#allocation118_spill] sm:$0xff] }
 0x4a8   : > { %v9298_v17 = vmul.f32 %v8775_v22, %v9265_v41  ;;  %v2524_v18 = vadd.f32 %v10728_v20, %v2398_v2  ;;  %v2547_v24 = vadd.f32 %v10729_v39, %v2432_v26  ;;  %v4481_v62 = vmul.f32 %v9265_v41, %v8744_v40  ;;  %4430 = vrot.lane.b32.xlu2 %v4423_v38, %s5803_s22  ;;  %v10734_v26 = vld [vmem:[#allocation87_spill] sm:$0xff] }
 0x4a9   : > { %v9306_v31 = vmul.f32 %v9276_v9, %v8744_v40  ;;  %v2894_v27 = vadd.f32 %v10730_v47, %v2795_v36  ;;  %v2895_v11 = vadd.f32 %v10731_v25, %v2796_v14  ;;  %v3549_v58 = vadd.f32 %v10732_v42, %v3401_v53  ;;  %4426 = vrot.lane.b32.xlu0 %v9139_v5, %s5803_s22  ;;  %v10741_v53 = vld [vmem:[#allocation31_spill] sm:$0xff] }
 0x4aa   : > { %v3548_v33 = vadd.f32 %v10733_v56, %v3400_v12  ;;  %v2650_v55 = vadd.f32 %v10734_v26, %v2524_v18  ;;  %v2684_v44 = vadd.f32 %v10735_v32, %v2547_v24  ;;  %4428 = vrot.lane.b32.xlu1 %v4421_v45, %s5803_s22  ;;  %v9323_v36 = vstv %s9262_s29  ;;  %v3900_v43 = vpop.permute.xlu2 %3899  ;;  %v10738_v45 = vld [vmem:[#allocation117_spill] sm:$0xff]  ;;  %v3791_v38 = vpop.permute.xlu0 %3790  ;;  %v10742_v18 = vld [vmem:[#allocation110_spill] sm:$0xff]  ;;  %s5387_s29 = sld [smem:[#allocation14 + $0x5d]] }
 0x4ab   : > { %v9327_v14 = vmul.f32 %v8775_v22, %v9276_v9  ;;  %v3653_v52 = vadd.f32 %v10737_v49, %v3549_v58  ;;  %v4447_v4 = vmul.f32 %v9149_v57, %v8818_v61  ;;  %v10225_v5 = vrot.slane %v9298_v17, 2  ;;  %v3793_v51 = vpop.permute.xlu1 %3792  ;;  %v10743_v56 = vld [vmem:[#allocation37_spill] sm:$0xff] }
 0x4ac   : > { %v3652_v28 = vadd.f32 %v10736_v35, %v3548_v33  ;;  %v2798_v59 = vadd.f32 %v10738_v45, %v2650_v55  ;;  %v2832_v2 = vadd.f32 %v10739_v3, %v2684_v44  ;;  %v9339_v12 = vadd.f32 %v3900_v43, %v9230_v34  ;;  %v10744_v26 = vld [vmem:[#allocation169_spill] sm:$0xff]  ;;  %v10748_v45 = vld [vmem:[#allocation82_spill] sm:$0xff] }
 0x4ad   : > { %v4491_v30 = vrot.slane %v4481_v62, 2  ;;  %v2973_v20 = vadd.f32 %v10741_v53, %v2895_v11  ;;  %v2972_v39 = vadd.f32 %v10742_v18, %v2894_v27  ;;  %v9345_v47 = vadd.f32 %v3793_v51, %v3653_v52  ;;  %v10745_v32 = vld [vmem:[#allocation81_spill] sm:$0xff]  ;;  %v10747_v52 = vld [vmem:[#allocation119_spill] sm:$0xff] }
 0x4ae   : > { %10740 = vst [vmem:[#allocation26_spill] sm:$0xff] %v9339_v12  ;;  %v9343_v24 = vadd.f32 %v3791_v38, %v3652_v28  ;;  %v3959_v25 = vmul.f32 %v8769_v15, %v8945_v7  ;;  %v9351_v42 = vmul.f32 %v8775_v22, %v10713_v63  ;;  %v9355_v62 = vstv %s9291_s13  ;;  %v10746_v28 = vld [vmem:[#allocation44_spill] sm:$0xff]  ;;  %v10751_v18 = vld [vmem:[#allocation49_spill] sm:$0xff]  ;;  %v10762_v12 = vld [vmem:[#allocation71_spill] sm:$0xff]  ;;  %s5388_s13 = sld [smem:[#allocation14 + $0x66]] }
 0x4af   : > { %v4459_v58 = vrot.slane %v4447_v4, 1  ;;  %v4493_v27 = vsel %vm1007_vm1, %v4491_v30, %v10225_v5  ;;  %v4448_v11 = vmul.f32 %v9149_v57, %v9028_v48  ;;  %v2897_v33 = vadd.f32 %v10743_v56, %v2798_v59  ;;  %v10749_v38 = vld [vmem:[#allocation120_spill] sm:$0xff]  ;;  %v10750_v30 = vld [vmem:[#allocation131_spill] sm:$0xff] }
 0x4b0   : > { %v2904_v55 = vadd.f32 %v10744_v26, %v2832_v2  ;;  %v9367_v44 = vmul.f32 %v10745_v32, %v8818_v61  ;;  %v9370_v35 = vstv %s9308_s16  ;;  %v3089_v49 = vadd.f32 %v10746_v28, %v2973_v20  ;;  %4465 = vrot.lane.b32.xlu2 %v4458_v1, %s5803_s22  ;;  %v10752_v56 = vld [vmem:[#allocation132_spill] sm:$0xff]  ;;  %s5389_s16 = sld [smem:[#allocation14 + $0x48]] }
 0x4b1   : > { %v3088_v43 = vadd.f32 %v10747_v52, %v2972_v39  ;;  %v9377_v57 = vmul.f32 %v8775_v22, %v9355_v62  ;;  %v9380_v4 = vstv %s9315_s0  ;;  %4432 = vrot.lane.b32.xlu0 %v4425_v13, %s5803_s22  ;;  %v9386_v59 = vmul.f32 %v10748_v45, %v8818_v61  ;;  %s5390_s0 = sld [smem:[#allocation14 + $0x51]] }
 0x4b2   : > { %4463 = vrot.lane.b32.xlu1 %v4456_v23, %s5803_s22  ;;  %v9390_v3 = vmul.f32 %v8775_v22, %v9370_v35  ;;  %v9394_v1 = vmul.f32 %v8775_v22, %v9380_v4  ;;  %v9397_v2 = vstv %s9329_s21  ;;  %v3199_v51 = vadd.f32 %v10749_v38, %v3089_v49  ;;  %v3935_v53 = vpop.permute.xlu2 %3934  ;;  %v3826_v28 = vpop.permute.xlu0 %3825  ;;  %v10754_v49 = vld [vmem:[#allocation135_spill] sm:$0xff]  ;;  %s5391_s21 = sld [smem:[#allocation14 + $0x5a]] }
 0x4b3   : > { %v3198_v13 = vadd.f32 %v10750_v30, %v3088_v43  ;;  %v4460_v23 = vsel %vm931_vm0, %v4457_v6, %v4459_v58  ;;  %v4461_v20 = vrot.slane %v4448_v11, 1  ;;  %v3001_v39 = vadd.f32 %v10751_v18, %v2904_v55  ;;  %v3828_v52 = vpop.permute.xlu1 %3827  ;;  %v10755_v43 = vld [vmem:[#allocation148_spill] sm:$0xff]  ;;  %v10758_v18 = vld [vmem:[#allocation165_spill] sm:$0xff] }
 0x4b4   : > { %v2975_v26 = vadd.f32 %v10752_v56, %v2897_v33  ;;  %v9407_v34 = vadd.f32 %v3935_v53, %v9282_v10  ;;  %v10229_v7 = vrot.slane %v9367_v44, 1  ;;  %v3325_v30 = vadd.f32 %v10755_v43, %v3199_v51  ;;  %v10757_v53 = vld [vmem:[#allocation164_spill] sm:$0xff] }
 0x4b5   : > { %v3324_v38 = vadd.f32 %v10754_v49, %v3198_v13  ;;  %v3836_v5 = vadd.f32 %v3826_v28, %v10756_v19  ;;  %v3837_v6 = vadd.f32 %v3828_v52, %v9111_v16  ;;  %v4483_v11 = vmul.f32 %v8769_v15, %v9265_v41  ;;  %v10759_v16 = vld [vmem:[#allocation172_spill] sm:$0xff]  ;;  %v10760_v19 = vld [vmem:[#allocation83_spill] sm:$0xff] }
 0x4b6   : > { %10753 = vst [vmem:[#allocation43_spill] sm:$0xff] %v9407_v34  ;;  %v4484_v33 = vmul.f32 %v9265_v41, %v8818_v61  ;;  %v9421_v10 = vmul.f32 %v9380_v4, %v8744_v40  ;;  %v3473_v51 = vadd.f32 %v10758_v18, %v3325_v30  ;;  %v3117_v52 = vadd.f32 %v10759_v16, %v3001_v39  ;;  %v10764_v18 = vld [vmem:[#allocation128_spill] sm:$0xff] }
 0x4b7   : > { %v3472_v13 = vadd.f32 %v10757_v53, %v3324_v38  ;;  %v3962_v56 = vadd.f32 %v9196_v8, %v3836_v5  ;;  %v3963_v28 = vadd.f32 %v3959_v25, %v3837_v6  ;;  %v4462_v49 = vsel %vm931_vm0, %v4459_v58, %v4461_v20  ;;  %v10763_v53 = vld [vmem:[#allocation41_spill] sm:$0xff]  ;;  %v10765_v25 = vld [vmem:[#allocation123_spill] sm:$0xff]  ;;  %v10767_v6 = vld [vmem:[#allocation84_spill] sm:$0xff] }
 0x4b8   : > { %v4485_v43 = vmul.f32 %v9265_v41, %v9028_v48  ;;  %v10761_v55 = vrot.slane %v10760_v19, 1  ;;  %v3091_v38 = vadd.f32 %v10762_v12, %v2975_v26  ;;  %v3599_v30 = vadd.f32 %v10763_v53, %v3473_v51  ;;  %4500 = vrot.lane.b32.xlu2 %v4493_v27, %s5803_s22  ;;  %v10769_v26 = vld [vmem:[#allocation134_spill] sm:$0xff] }
 0x4b9   : > { %v3598_v8 = vadd.f32 %v10764_v18, %v3472_v13  ;;  %v3224_v58 = vadd.f32 %v10765_v25, %v3117_v52  ;;  %4467 = vrot.lane.b32.xlu0 %v4460_v23, %s5803_s22  ;;  %v4494_v41 = vrot.slane %v4483_v11, 2  ;;  %v4496_v20 = vrot.slane %v4484_v33, 2  ;;  %v10770_v13 = vld [vmem:[#allocation62_spill] sm:$0xff]  ;;  %v10772_v18 = vld [vmem:[#allocation153_spill] sm:$0xff] }
 0x4ba   : > { %v4013_v34 = vsel %vm931_vm0, %v10761_v55, %v10229_v7  ;;  %4469 = vrot.lane.b32.xlu1 %v4462_v49, %s5803_s22  ;;  %v10766_v39 = vrot.slane %v9386_v59, 2  ;;  %v10768_v55 = vrot.slane %v10767_v6, 2  ;;  %v3201_v51 = vadd.f32 %v10769_v26, %v3091_v38  ;;  %v3941_v27 = vpop.permute.xlu2 %3940  ;;  %v3861_v52 = vpop.permute.xlu0 %3860  ;;  %v10771_v38 = vld [vmem:[#allocation138_spill] sm:$0xff] }
 0x4bb   : > { %v4022_v5 = vadd.f32 %v4013_v34, %v3963_v28  ;;  %v3724_v16 = vadd.f32 %v10770_v13, %v3598_v8  ;;  %v3725_v34 = vadd.f32 %v9158_v29, %v3599_v30  ;;  %v3863_v23 = vpop.permute.xlu1 %3862  ;;  %v9451_v49 = vadd.f32 %v3941_v27, %v9345_v47 }
 0x4bc   : > { %v4129_v12 = vsel %vm1007_vm1, %v10768_v55, %v10766_v39  ;;  %v4498_v11 = vrot.slane %v4485_v43, 2  ;;  %v4520_v33 = vmul.f32 %v8769_v15, %v9276_v9  ;;  %v9457_v19 = vmul.f32 %v8769_v15, %v9355_v62  ;;  %v10773_v39 = vld [vmem:[#allocation167_spill] sm:$0xff]  ;;  %v10774_v55 = vld [vmem:[#allocation168_spill] sm:$0xff] }
 0x4bd   : > { %v4138_v28 = vadd.f32 %v4129_v12, %v4022_v5  ;;  %v3327_v53 = vadd.f32 %v10771_v38, %v3201_v51  ;;  %v3361_v8 = vadd.f32 %v10772_v18, %v3224_v58  ;;  %v9461_v29 = vadd.f32 %v3861_v52, %v3724_v16  ;;  %v10777_v52 = vld [vmem:[#allocation92_spill] sm:$0xff]  ;;  %v10778_v18 = vld [vmem:[#allocation90_spill] sm:$0xff] }
 0x4be   : > { %v3873_v30 = vadd.f32 %v3863_v23, %v3725_v34  ;;  %v4521_v47 = vmul.f32 %v9276_v9, %v8818_v61  ;;  %v4522_v43 = vmul.f32 %v9276_v9, %v9028_v48  ;;  %v10233_v5 = vrot.slane %v9377_v57, 1  ;;  %v10776_v34 = vld [vmem:[#allocation30_spill] sm:$0xff] }
 0x4bf   : > { %v4566_v25 = vrot.slane %v9394_v1, 2  ;;  %v3475_v6 = vadd.f32 %v10773_v39, %v3327_v53  ;;  %v3509_v12 = vadd.f32 %v10774_v55, %v3361_v8  ;;  %v9475_v58 = vmul.f32 %v8769_v15, %v9370_v35  ;;  %v10779_v39 = vld [vmem:[#allocation74_spill] sm:$0xff] }
 0x4c0   : > { %v4565_v26 = vrot.slane %v9421_v10, 2  ;;  %v10775_v51 = vrot.slane %v9298_v17, 2  ;;  %v4499_v9 = vsel %vm1007_vm1, %v4496_v20, %v4498_v11  ;;  %v10227_v16 = vrot.slane %v9457_v19, 1 }
 0x4c1   : > { %v9485_v1 = vmul.f32 %v8769_v15, %v9380_v4  ;;  %v3624_v27 = vadd.f32 %v10776_v34, %v3509_v12  ;;  %v3601_v23 = vadd.f32 %v10777_v52, %v3475_v6  ;;  %4506 = vrot.lane.b32.xlu2 %v4499_v9, %s5803_s22  ;;  %v4497_v10 = vsel %vm1007_vm1, %v4494_v41, %v4496_v20 }
 0x4c2   : > { %v4495_v13 = vsel %vm1007_vm1, %v10775_v51, %v4494_v41  ;;  %v4531_v38 = vrot.slane %v4520_v33, 2  ;;  %v3972_v17 = vadd.f32 %v9351_v42, %v3873_v30  ;;  %4504 = vrot.lane.b32.xlu1 %v4497_v10, %s5803_s22  ;;  %v4533_v11 = vrot.slane %v4521_v47, 2  ;;  %v4242_v12 = vpop.permute.xlu2 %4241  ;;  %v3867_v42 = vpop.permute.xlu0 %3866 }
 0x4c3   : > { %4502 = vrot.lane.b32.xlu0 %v4495_v13, %s5803_s22  ;;  %v4535_v53 = vrot.slane %v4522_v43, 2  ;;  %v4021_v8 = vadd.f32 %v10778_v18, %v3962_v56  ;;  %v3727_v6 = vadd.f32 %v10779_v39, %v3601_v23  ;;  %v3761_v55 = vadd.f32 %v9219_v37, %v3624_v27  ;;  %v3898_v33 = vpop.permute.xlu1 %3897  ;;  %v10781_v37 = vld [vmem:[#allocation91_spill] sm:$0xff] }
 0x4c4   : > { %v10226_v41 = vrot.slane %v9475_v58, 2  ;;  %v9502_v20 = vmul.f32 %v9380_v4, %v8818_v61  ;;  %v9504_v30 = vadd.f32 %v4242_v12, %v4138_v28  ;;  %v4040_v56 = vsel %vm931_vm0, %v10233_v5, %v10227_v16 }
 0x4c5   : > { %v4568_v47 = vrot.slane %v9485_v1, 2  ;;  %v9513_v43 = vadd.f32 %v10781_v37, %v4021_v8  ;;  %v9515_v51 = vadd.f32 %v3867_v42, %v3727_v6  ;;  %v3909_v13 = vadd.f32 %v3898_v33, %v3761_v55  ;;  %v10784_v1 = vld [vmem:[#allocation47_spill] sm:$0xff] }
 0x4c6   : > { %10780 = vst [vmem:[#allocation35_spill] sm:$0xff] %v9504_v30  ;;  %v9518_v9 = vstv %s9463_s18  ;;  %v9522_v28 = vmul.f32 %v8775_v22, %v9397_v2  ;;  %v10782_v34 = vrot.slane %v9327_v14, 2  ;;  %v10783_v27 = vrot.slane %v9306_v31, 2  ;;  %s5392_s18 = sld [smem:[#allocation14 + $0x63]] }
 0x4c7   : > { %v3977_v23 = vmul.f32 %v10784_v1, %v8744_v40  ;;  %v4050_v10 = vadd.f32 %v4040_v56, %v3972_v17  ;;  %v10228_v18 = vrot.slane %v9390_v3, 2  ;;  %v3980_v8 = vmul.f32 %v10784_v1, %v8818_v61 }
 0x4c8   : > { %v4530_v52 = vsel %vm1007_vm1, %v10783_v27, %v10782_v34  ;;  %v4567_v39 = vsel %vm1007_vm1, %v4565_v26, %v4566_v25  ;;  %v4055_v6 = vmul.f32 %v9397_v2, %v8744_v40  ;;  %v9539_v55 = vmul.f32 %v8775_v22, %v9518_v9 }
 0x4c9   : > { %v4534_v31 = vsel %vm1007_vm1, %v4531_v38, %v4533_v11  ;;  %v10785_v12 = vmov %v10782_v34  ;;  %v4536_v42 = vsel %vm1007_vm1, %v4533_v11, %v4535_v53  ;;  %v4171_v33 = vmul.f32 %v9518_v9, %v8744_v40 }
 0x4ca   : > { %v4532_v17 = vsel %vm1007_vm1, %v10785_v12, %v4531_v38  ;;  %4541 = vrot.lane.b32.xlu2 %v4534_v31, %s5803_s22  ;;  %v4156_v26 = vsel %vm1007_vm1, %v10228_v18, %v10226_v41  ;;  %v4569_v56 = vsel %vm1007_vm1, %v4566_v25, %v4568_v47  ;;  %v10232_v37 = vrot.slane %v9502_v20, 2  ;;  %v4266_v25 = vpop.permute.xlu2 %4265  ;;  %v9590_v18 = vld [vmem:[#allocation2 + $0x50] sm:$0xff] }
 0x4cb   : > { %v10231_v14 = vrot.slane %v9522_v28, 1  ;;  %4537 = vrot.lane.b32.xlu0 %v4530_v52, %s5803_s22  ;;  %v3981_v38 = vadd.f32 %v3977_v23, %v3909_v13  ;;  %4539 = vrot.lane.b32.xlu1 %v4532_v17, %s5803_s22  ;;  %v4166_v11 = vadd.f32 %v4156_v26, %v4050_v10  ;;  %v3997_v53 = vmul.f32 %v10745_v32, %v8744_v40  ;;  %v3902_v52 = vpop.permute.xlu0 %3901  ;;  %v3904_v23 = vpop.permute.xlu1 %3903 }
 0x4cc   : > { %v9564_v34 = vstv %s9494_s9  ;;  %v9570_v27 = vmul.f32 %v8769_v15, %v9323_v36  ;;  %v4065_v31 = vrot.slane %v4055_v6, 1  ;;  %v10230_v12 = vrot.slane %v9539_v55, 2  ;;  %v10787_v15 = vld [vmem:[#allocation95_spill] sm:$0xff] }
 0x4cd   : > { %v4113_v13 = vmul.f32 %v10748_v45, %v8744_v40  ;;  %v9575_v10 = vadd.f32 %v4266_v25, %v4166_v11  ;;  %v4181_v17 = vrot.slane %v4171_v33, 2  ;;  %v9579_v26 = vmul.f32 %v9397_v2, %v8818_v61 }
 0x4ce   : > { %v4059_v41 = vmul.f32 %v9397_v2, %v9028_v48  ;;  %v9584_v16 = vadd.f32 %v3902_v52, %v10787_v15  ;;  %v3912_v6 = vadd.f32 %v3904_v23, %v9280_v54  ;;  %v4067_v40 = vsel %vm931_vm0, %v4065_v31, %v10231_v14 }
 0x4cf   : > { %10786 = vst [vmem:[#allocation54_spill] sm:$0xff] %v9575_v10  ;;  %v4592_v33 = vmul.f32 %v9590_v18, %v9564_v34  ;;  %v4571_v11 = vsel %vm1007_vm1, %v4568_v47, %v10232_v37  ;;  %v4078_v25 = vadd.f32 %v4067_v40, %v3981_v38  ;;  %v4007_v7 = vrot.slane %v3997_v53, 1  ;;  %v10790_v40 = vld [vmem:[#allocation86_spill] sm:$0xff] }
 0x4d0   : > { %v9599_v52 = vmul.f32 %v8775_v22, %v9564_v34  ;;  %v4183_v54 = vsel %vm1007_vm1, %v4181_v17, %v10230_v12  ;;  %v4123_v31 = vrot.slane %v4113_v13, 2  ;;  %v4559_v23 = vmul.f32 %v9380_v4, %v9028_v48  ;;  %v10788_v13 = vld [vmem:[#allocation85_spill] sm:$0xff] }
 0x4d1   : > { %v4026_v15 = vmul.f32 %v9590_v18, %v9355_v62  ;;  %v4072_v38 = vrot.slane %v4059_v41, 1  ;;  %v9611_v53 = vmul.f32 %v9518_v9, %v8818_v61  ;;  %v4175_v22 = vmul.f32 %v9518_v9, %v9028_v48 }
 0x4d2   : > { %4576 = vrot.lane.b32.xlu2 %v4569_v56, %s5803_s22  ;;  %v10789_v17 = vrot.slane %v10788_v13, 1  ;;  %v10791_v12 = vrot.slane %v10790_v40, 2  ;;  %v4602_v37 = vrot.slane %v4592_v33, 2  ;;  %v9623_v5 = vstv %s9557_s19  ;;  %v10792_v13 = vld [vmem:[#allocation36_spill] sm:$0xff] }
 0x4d3   : > { %4543 = vrot.lane.b32.xlu0 %v4536_v42, %s5803_s22  ;;  %v3984_v61 = vadd.f32 %v3980_v8, %v3912_v6  ;;  %4574 = vrot.lane.b32.xlu1 %v4567_v39, %s5803_s22  ;;  %v4194_v41 = vadd.f32 %v4183_v54, %v4078_v25  ;;  %v10234_v47 = vrot.slane %v9599_v52, 2  ;;  %v9629_v56 = vstv %s9566_s14  ;;  %v3937_v33 = vpop.permute.xlu0 %3936  ;;  %v3939_v42 = vpop.permute.xlu1 %3938  ;;  %s5807_s14 = smov 32  }
 0x4d4   : > { %v4009_v4 = vsel %vm931_vm0, %v4007_v7, %v10789_v17  ;;  %v4125_v14 = vsel %vm1007_vm1, %v4123_v31, %v10791_v12  ;;  %v3961_v7 = vadd.f32 %v10792_v13, %v9162_v50  ;;  %v4290_v17 = vpop.permute.xlu2 %4289  ;;  %v4572_v40 = vrot.slane %v4559_v23, 2  ;;  %v9647_v23 = vld [vmem:[#allocation2 + $0x60] sm:$0xff] }
 0x4d5   : > { %v4036_v10 = vrot.slane %v4026_v15, 1  ;;  %v9635_v12 = vmul.f32 %v9590_v18, %v9370_v35  ;;  %v9637_v8 = vadd.f32 %v4290_v17, %v4194_v41  ;;  %v10794_v39 = vrot.slane %v9579_v26, 1  ;;  %v9653_v41 = vld [vmem:[#allocation2 + $0x68] sm:$0xff] }
 0x4d6   : > { %v4188_v54 = vrot.slane %v4175_v22, 2  ;;  %v9644_v50 = vadd.f32 %v3937_v33, %v9107_v60  ;;  %v3948_v31 = vadd.f32 %v3939_v42, %v9343_v24  ;;  %v9651_v15 = vmul.f32 %v9647_v23, %v9623_v5 }
 0x4d7   : > { %10793 = vst [vmem:[#allocation42_spill] sm:$0xff] %v9637_v8  ;;  %v4073_v6 = vsel %vm931_vm0, %v10794_v39, %v4072_v38  ;;  %v9657_v13 = vmul.f32 %v9653_v41, %v9623_v5  ;;  %v4604_v38 = vsel %vm1007_vm1, %v4602_v37, %v10234_v47  ;;  %v4594_v60 = vmul.f32 %v9647_v23, %v9564_v34 }
 0x4d8   : > { %v4081_v24 = vadd.f32 %v4073_v6, %v3984_v61  ;;  %v4001_v22 = vmul.f32 %v10745_v32, %v9028_v48  ;;  %v4020_v17 = vadd.f32 %v4009_v4, %v3961_v7  ;;  %v4117_v33 = vmul.f32 %v10748_v45, %v9028_v48  ;;  %v10798_v6 = vld [vmem:[#allocation58_spill] sm:$0xff] }
 0x4d9   : > { %v4152_v42 = vrot.slane %v9635_v12, 2  ;;  %v10795_v39 = vrot.slane %v9377_v57, 1  ;;  %v10796_v8 = vrot.slane %v9502_v20, 2  ;;  %v4595_v61 = vmul.f32 %v9653_v41, %v9564_v34 }
 0x4da   : > { %v4596_v32 = vmul.f32 %v9564_v34, %v9028_v48  ;;  %v9681_v4 = vmul.f32 %v9647_v23, %v9629_v56  ;;  %4611 = vrot.lane.b32.xlu2 %v4604_v38, %s5803_s22  ;;  %v10797_v57 = vrot.slane %v9611_v53, 2  ;;  %v9691_v7 = vmul.f32 %v9653_v41, %v9629_v56 }
 0x4db   : > { %v4038_v25 = vsel %vm931_vm0, %v4036_v10, %v10795_v39  ;;  %v4573_v37 = vsel %vm1007_vm1, %v10796_v8, %v4572_v40  ;;  %4578 = vrot.lane.b32.xlu0 %v4571_v11, %s5803_s22  ;;  %v3993_v34 = vadd.f32 %v9570_v27, %v3948_v31  ;;  %v4605_v40 = vrot.slane %v4594_v60, 2  ;;  %v4238_v20 = vpop.permute.xlu0 %4237  ;;  %v4240_v11 = vpop.permute.xlu1 %4239 }
 0x4dc   : > { %v4189_v45 = vsel %vm1007_vm1, %v10797_v57, %v4188_v54  ;;  %4580 = vrot.lane.b32.xlu1 %v4573_v37, %s5803_s22  ;;  %v4014_v8 = vrot.slane %v4001_v22, 1  ;;  %v3964_v54 = vadd.f32 %v10798_v6, %v9221_v0  ;;  %v3971_v38 = vadd.f32 %v9255_v21, %v9461_v29  ;;  %v4296_v57 = vpop.permute.xlu2 %4295 }
 0x4dd   : > { %v4197_v12 = vadd.f32 %v4189_v45, %v4081_v24  ;;  %v4136_v39 = vadd.f32 %v4125_v14, %v4020_v17  ;;  %v4130_v47 = vrot.slane %v4117_v33, 2  ;;  %v4607_v30 = vrot.slane %v4595_v61, 2 }
 0x4de   : > { %v4609_v27 = vrot.slane %v4596_v32, 2  ;;  %v4213_v31 = vrot.slane %v9681_v4, 2  ;;  %v9706_v24 = vadd.f32 %v4240_v11, %v9513_v43  ;;  %v10799_v0 = vrot.slane %v9657_v13, 1 }
 0x4df   : > { %v9700_v10 = vadd.f32 %v4296_v57, %v4197_v12  ;;  %v9703_v60 = vadd.f32 %v4238_v20, %v4136_v39  ;;  %v10800_v21 = vrot.slane %v9651_v15, 1  ;;  %v4215_v14 = vrot.slane %v9691_v7, 2 }
 0x4e0   : > { %v10801_v22 = vrot.slane %v9367_v44, 1  ;;  %v4029_v37 = vmul.f32 %v9653_v41, %v9355_v62  ;;  %v4030_v43 = vmul.f32 %v9355_v62, %v9028_v48  ;;  %v3969_v61 = vmul.f32 %v9647_v23, %v10713_v63 }
 0x4e1   : > { %v4100_v29 = vsel %vm931_vm0, %v10800_v21, %v10799_v0  ;;  %v4049_v45 = vadd.f32 %v4038_v25, %v3971_v38  ;;  %v3970_v20 = vmul.f32 %v9653_v41, %v10713_v63  ;;  %v10802_v12 = vrot.slane %v9599_v52, 2 }
 0x4e2   : > { %v4015_v17 = vsel %vm931_vm0, %v10801_v22, %v4014_v8  ;;  %v4109_v33 = vadd.f32 %v4100_v29, %v3993_v34  ;;  %v4610_v34 = vsel %vm1007_vm1, %v4607_v30, %v4609_v27  ;;  %v10803_v8 = vrot.slane %v9390_v3, 2 }
 0x4e3   : > { %v4023_v32 = vadd.f32 %v4015_v17, %v3964_v54  ;;  %v4606_v44 = vsel %vm1007_vm1, %v10802_v12, %v4605_v40  ;;  %v10804_v62 = vrot.slane %v9386_v59, 2  ;;  %4617 = vrot.lane.b32.xlu2 %v4610_v34, %s5803_s22  ;;  %v4608_v25 = vsel %vm1007_vm1, %v4605_v40, %v4607_v30  ;;  %v4244_v11 = vpop.permute.xlu0 %4243  ;;  %v4264_v0 = vpop.permute.xlu1 %4263 }
 0x4e4   : > { %v4154_v6 = vsel %vm1007_vm1, %v4152_v42, %v10803_v8  ;;  %v4216_v63 = vsel %vm1007_vm1, %v4213_v31, %v4215_v14  ;;  %v4145_v52 = vmul.f32 %v9653_v41, %v9370_v35  ;;  %4613 = vrot.lane.b32.xlu0 %v4606_v44, %s5803_s22  ;;  %4615 = vrot.lane.b32.xlu1 %v4608_v25, %s5803_s22  ;;  %v4041_v3 = vrot.slane %v4029_v37, 1  ;;  %v4320_v38 = vpop.permute.xlu2 %4319  ;;  %s9757_s22 = sld [smem:[#allocation14 + $0x57]] }
 0x4e5   : > { %v4131_v39 = vsel %vm1007_vm1, %v10804_v62, %v4130_v47  ;;  %v4225_v59 = vadd.f32 %v4216_v63, %v4109_v33  ;;  %v4043_v47 = vrot.slane %v4030_v43, 1  ;;  %v4146_v30 = vmul.f32 %v9370_v35, %v9028_v48  ;;  %v10807_v62 = vld [vmem:[#allocation26_spill] sm:$0xff] }
 0x4e6   : > { %v3973_v42 = vadd.f32 %v3969_v61, %v9273_v46  ;;  %v3974_v40 = vadd.f32 %v3970_v20, %v9515_v51  ;;  %v4139_v54 = vadd.f32 %v4131_v39, %v4023_v32  ;;  %v4165_v57 = vadd.f32 %v4154_v6, %v4049_v45  ;;  %v9767_v45 = vld [vmem:[#allocation2 + $0x58] sm:$0xff] }
 0x4e7   : > { %v9752_v27 = vadd.f32 %v4320_v38, %v4225_v59  ;;  %v4628_v29 = vstv %s9708_s15  ;;  %v4157_v17 = vrot.slane %v4145_v52, 2  ;;  %v10805_v48 = vrot.slane %v9457_v19, 1  ;;  %s5808_s15 = smov 64  }
 0x4e8   : > { %v9754_v21 = vadd.f32 %v4244_v11, %v4139_v54  ;;  %v4275_v22 = vadd.f32 %v4264_v0, %v4165_v57  ;;  %v4044_v35 = vsel %vm931_vm0, %v4041_v3, %v4043_v47  ;;  %v4159_v51 = vrot.slane %v4146_v30, 2 }
 0x4e9   : > { %v4042_v46 = vsel %vm931_vm0, %v10805_v48, %v4041_v3  ;;  %v4057_v33 = vmul.f32 %v9647_v23, %v9397_v2  ;;  %v4631_v43 = vmul.f32 %v9647_v23, %v4628_v29  ;;  %v4052_v61 = vadd.f32 %v4044_v35, %v3974_v40 }
 0x4ea   : > { %v4051_v37 = vadd.f32 %v4042_v46, %v3973_v42  ;;  %v4629_v32 = vmul.f32 %v9590_v18, %v4628_v29  ;;  %v4630_v20 = vmul.f32 %v9767_v45, %v4628_v29  ;;  %v3978_v19 = vmul.f32 %v9767_v45, %v10784_v1 }
 0x4eb   : > { %v3979_v12 = vmul.f32 %v9647_v23, %v10784_v1  ;;  %4641 = vrot.lane.b32.xlu2 %v4631_v43, %s5804_s20  ;;  %v10806_v2 = vrot.slane %v9475_v58, 2  ;;  %v4160_v34 = vsel %vm1007_vm1, %v4157_v17, %v4159_v51  ;;  %v4068_v8 = vrot.slane %v4057_v33, 1  ;;  %v4268_v59 = vpop.permute.xlu0 %4267 }
 0x4ec   : > { %4637 = vrot.lane.b32.xlu0 %v4629_v32, %s5804_s20  ;;  %4639 = vrot.lane.b32.xlu1 %v4630_v20, %s5804_s20  ;;  %v4173_v6 = vmul.f32 %v9647_v23, %v9518_v9  ;;  %v3982_v39 = vadd.f32 %v3978_v19, %v10807_v62  ;;  %v4355_v63 = vpop.permute.xlu2 %4354  ;;  %v4168_v52 = vadd.f32 %v4160_v34, %v4052_v61  ;;  %v4270_v3 = vpop.permute.xlu1 %4269  ;;  %v4654_v42 = vstv %s9757_s22  ;;  %v10812_v61 = vld [vmem:[#allocation43_spill] sm:$0xff]  ;;  %s5809_s22 = smov 96  }
 0x4ed   : > { %v4158_v44 = vsel %vm1007_vm1, %v10806_v2, %v4157_v17  ;;  %v3983_v1 = vadd.f32 %v3979_v12, %v9584_v16  ;;  %v9786_v58 = vadd.f32 %v4355_v63, %v9706_v24  ;;  %v10808_v9 = vrot.slane %v9522_v28, 1 }
 0x4ee   : > { %v4167_v25 = vadd.f32 %v4158_v44, %v4051_v37  ;;  %v4278_v30 = vadd.f32 %v4270_v3, %v4168_v52  ;;  %v4184_v54 = vrot.slane %v4173_v6, 2  ;;  %v10809_v16 = vrot.slane %v9579_v26, 1  ;;  %v9834_v52 = vld [vmem:[#allocation2 + $0x70] sm:$0x3] }
 0x4ef   : > { %v4069_v40 = vsel %vm931_vm0, %v10808_v9, %v4068_v8  ;;  %v4085_v24 = vmul.f32 %v9767_v45, %v9623_v5  ;;  %v4656_v11 = vmul.f32 %v9767_v45, %v4654_v42  ;;  %v4632_v17 = vmul.f32 %v9653_v41, %v4628_v29 }
 0x4f0   : > { %v9790_v47 = vadd.f32 %v4268_v59, %v4167_v25  ;;  %v4071_v38 = vsel %vm931_vm0, %v4068_v8, %v10809_v16  ;;  %v4079_v57 = vadd.f32 %v4069_v40, %v3982_v39  ;;  %v4655_v48 = vmul.f32 %v9590_v18, %v4654_v42 }
 0x4f1   : > { %v4080_v0 = vadd.f32 %v4071_v38, %v3983_v1  ;;  %v4084_v28 = vmul.f32 %v9590_v18, %v9623_v5  ;;  %v3987_v46 = vmul.f32 %v9590_v18, %v9323_v36  ;;  %v3988_v26 = vmul.f32 %v9767_v45, %v9323_v36 }
 0x4f2   : > { %v10810_v35 = vrot.slane %v9539_v55, 2  ;;  %v10811_v51 = vrot.slane %v9611_v53, 2  ;;  %v4095_v37 = vrot.slane %v4085_v24, 1  ;;  %v4201_v43 = vmul.f32 %v9767_v45, %v9629_v56 }
 0x4f3   : > { %4665 = vrot.lane.b32.xlu2 %v4656_v11, %s5804_s20  ;;  %v3991_v32 = vadd.f32 %v3987_v46, %v10812_v61  ;;  %v3992_v20 = vadd.f32 %v3988_v26, %v9644_v50  ;;  %v4292_v2 = vpop.permute.xlu0 %4291  ;;  %v4094_v8 = vrot.slane %v4084_v28, 1  ;;  %v4200_v53 = vmul.f32 %v9590_v18, %v9629_v56 }
 0x4f4   : > { %4643 = vrot.lane.b32.xlu0 %v4632_v17, %s5804_s20  ;;  %v4185_v29 = vsel %vm1007_vm1, %v10810_v35, %v4184_v54  ;;  %4663 = vrot.lane.b32.xlu1 %v4655_v48, %s5804_s20  ;;  %v4187_v33 = vsel %vm1007_vm1, %v4184_v54, %v10811_v51  ;;  %v4390_v12 = vpop.permute.xlu2 %4389  ;;  %v4294_v34 = vpop.permute.xlu1 %4293  ;;  %v4680_v6 = vstv %s9788_s17  ;;  %v4211_v25 = vrot.slane %v4201_v43, 2  ;;  %s5398_s17 = sshll.u32 %s5873_s28, 5 }
 0x4f5   : > { %v4195_v19 = vadd.f32 %v4185_v29, %v4079_v57  ;;  %v4196_v55 = vadd.f32 %v4187_v33, %v4080_v0  ;;  %v9823_v44 = vadd.f32 %v4390_v12, %v4275_v22  ;;  %v4096_v1 = vsel %vm931_vm0, %v4094_v8, %v4095_v37 }
 0x4f6   : > { %v10813_v50 = vrot.slane %v9651_v15, 1  ;;  %v4088_v22 = vmul.f32 %v9834_v52, %v9623_v5  ;;  %v4107_v59 = vadd.f32 %v4096_v1, %v3991_v32  ;;  %v4681_v3 = vmul.f32 %v9590_v18, %v4680_v6 }
 0x4f7   : > { %v9828_v62 = vadd.f32 %v4292_v2, %v4195_v19  ;;  %v4303_v39 = vadd.f32 %v4294_v34, %v4196_v55  ;;  %v4657_v40 = vmul.f32 %v9647_v23, %v4654_v42  ;;  %v4210_v54 = vrot.slane %v4200_v53, 2 }
 0x4f8   : > { %v4098_v63 = vsel %vm931_vm0, %v4095_v37, %v10813_v50  ;;  %v4658_v16 = vmul.f32 %v9653_v41, %v4654_v42  ;;  %v3990_v38 = vmul.f32 %v9653_v41, %v9323_v36  ;;  %v4214_v5 = vsel %vm1007_vm1, %v4211_v25, %v4213_v31 }
 0x4f9   : > { %v4108_v9 = vadd.f32 %v4098_v63, %v3992_v20  ;;  %v4212_v15 = vsel %vm1007_vm1, %v4210_v54, %v4211_v25  ;;  %v4101_v24 = vrot.slane %v4088_v22, 1  ;;  %v4204_v57 = vmul.f32 %v9834_v52, %v9629_v56  ;;  %v10815_v25 = vld [vmem:[#allocation35_spill] sm:$0xff] }
 0x4fa   : > { %v3994_v42 = vadd.f32 %v3990_v38, %v9451_v49  ;;  %v4223_v11 = vadd.f32 %v4212_v15, %v4107_v59  ;;  %v10814_v4 = vrot.slane %v9657_v13, 1  ;;  %v4684_v56 = vmul.f32 %v9653_v41, %v4680_v6 }
 0x4fb   : > { %4689 = vrot.lane.b32.xlu2 %v4681_v3, %s5804_s20  ;;  %v4224_v0 = vadd.f32 %v4214_v5, %v4108_v9  ;;  %v4316_v17 = vpop.permute.xlu0 %4315  ;;  %v4217_v35 = vrot.slane %v4204_v57, 2  ;;  %v4682_v49 = vmul.f32 %v9767_v45, %v4680_v6  ;;  %v4683_v51 = vmul.f32 %v9647_v23, %v4680_v6 }
 0x4fc   : > { %4667 = vrot.lane.b32.xlu0 %v4657_v40, %s5804_s20  ;;  %4669 = vrot.lane.b32.xlu1 %v4658_v16, %s5804_s20  ;;  %v4396_v36 = vpop.permute.xlu2 %4395  ;;  %v4318_v28 = vpop.permute.xlu1 %4317  ;;  %v9855_v46 = vadd.f32 %v4316_v17, %v4223_v11  ;;  %v4102_v31 = vsel %vm931_vm0, %v10814_v4, %v4101_v24  ;;  %v4706_v20 = vstv %s5384_s23  ;;  %v4732_v55 = vstv %s5385_s8 }
 0x4fd   : > { %v9853_v48 = vadd.f32 %v4396_v36, %v4278_v30  ;;  %v4328_v26 = vadd.f32 %v4318_v28, %v4224_v0  ;;  %v4110_v29 = vadd.f32 %v4102_v31, %v3994_v42  ;;  %v4218_v30 = vsel %vm1007_vm1, %v4215_v14, %v4217_v35  ;;  %v10816_v36 = vld [vmem:[#allocation54_spill] sm:$0xff] }
 0x4fe   : > { %v4709_v12 = vmul.f32 %v9647_v23, %v4706_v20  ;;  %v4707_v7 = vmul.f32 %v9590_v18, %v4706_v20  ;;  %v4708_v14 = vmul.f32 %v9767_v45, %v4706_v20  ;;  %v4735_v2 = vmul.f32 %v9647_v23, %v4732_v55 }
 0x4ff   : > { %v4226_v13 = vadd.f32 %v4218_v30, %v4110_v29  ;;  %v4734_v34 = vmul.f32 %v9767_v45, %v4732_v55  ;;  %v4769_v3 = vstv %s5386_s1  ;;  %v4710_v9 = vmul.f32 %v9653_v41, %v4706_v20  ;;  %v10817_v20 = vld [vmem:[#allocation42_spill] sm:$0xff]  ;;  %s5107_s1 = scalar_lea.hbm %s10184_s7, %s5398_s17 }
 0x500   : > { %v4746_v1 = vrot.slane %v4735_v2, 1  ;;  %v4771_v54 = vmul.f32 %v9767_v45, %v4769_v3  ;;  %v4736_v38 = vmul.f32 %v9653_v41, %v4732_v55  ;;  %v4737_v15 = vmul.f32 %v9834_v52, %v4732_v55 }
 0x501   : > { %v4744_v22 = vrot.slane %v4734_v34, 1  ;;  %v4773_v35 = vmul.f32 %v9653_v41, %v4769_v3  ;;  %v4774_v29 = vmul.f32 %v9834_v52, %v4769_v3 }
 0x502   : > { %v4781_v11 = vrot.slane %v4771_v54, 1  ;;  %v4748_v17 = vrot.slane %v4736_v38, 1 }
 0x503   : > { %4695 = vrot.lane.b32.xlu2 %v4684_v56, %s5804_s20  ;;  %v4322_v37 = vpop.permute.xlu0 %4321  ;;  %v4747_v40 = vsel %vm931_vm0, %v4744_v22, %v4746_v1 }
 0x504   : > { %4691 = vrot.lane.b32.xlu0 %v4682_v49, %s5804_s20  ;;  %4693 = vrot.lane.b32.xlu1 %v4683_v51, %s5804_s20  ;;  %v4431_v33 = vpop.permute.xlu2 %4430  ;;  %v4353_v61 = vpop.permute.xlu1 %4352  ;;  %v9871_v32 = vadd.f32 %v4322_v37, %v4226_v13  ;;  %v4749_v56 = vsel %vm931_vm0, %v4746_v1, %v4748_v17  ;;  %v4772_v51 = vmul.f32 %v9647_v23, %v4769_v3  ;;  %v4785_v37 = vrot.slane %v4773_v35, 1 }
 0x505   : > { %v9869_v43 = vadd.f32 %v4431_v33, %v4303_v39  ;;  %v4364_v19 = vadd.f32 %v4353_v61, %v9703_v60  ;;  %v4733_v60 = vmul.f32 %v9590_v18, %v4732_v55  ;;  %v4787_v61 = vrot.slane %v4774_v29, 1 }
 0x507   : > { %v4743_v59 = vrot.slane %v4733_v60, 1 }
 0x509   : > { %v4745_v16 = vsel %vm931_vm0, %v4743_v59, %v4744_v22 }
 0x50b   : > { %4719 = vrot.lane.b32.xlu2 %v4709_v12, %s5804_s20  ;;  %v4357_v53 = vpop.permute.xlu0 %4356  ;;  %v4783_v12 = vrot.slane %v4772_v51, 1 }
 0x50c   : > { %4715 = vrot.lane.b32.xlu0 %v4707_v7, %s5804_s20  ;;  %4717 = vrot.lane.b32.xlu1 %v4708_v14, %s5804_s20  ;;  %v4466_v8 = vpop.permute.xlu2 %4465  ;;  %v4359_v39 = vpop.permute.xlu1 %4358  ;;  %v9886_v50 = vadd.f32 %v4357_v53, %v10815_v25  ;;  %v4806_v7 = vstv %s5387_s29  ;;  %v4788_v14 = vsel %vm931_vm0, %v4785_v37, %v4787_v61 }
 0x50d   : > { %v9883_v6 = vadd.f32 %v4466_v8, %v4328_v26  ;;  %v4367_v63 = vadd.f32 %v4359_v39, %v9754_v21  ;;  %v4770_v21 = vmul.f32 %v9590_v18, %v4769_v3  ;;  %v4750_v26 = vrot.slane %v4737_v15, 1 }
 0x50e   : > { %v4809_v2 = vmul.f32 %v9647_v23, %v4806_v7  ;;  %v4810_v34 = vmul.f32 %v9653_v41, %v4806_v7  ;;  %v4784_v8 = vsel %vm931_vm0, %v4781_v11, %v4783_v12  ;;  %v4786_v60 = vsel %vm931_vm0, %v4783_v12, %v4785_v37 }
 0x50f   : > { %v4780_v4 = vrot.slane %v4770_v21, 1  ;;  %v4751_v49 = vsel %vm931_vm0, %v4748_v17, %v4750_v26  ;;  %v4808_v53 = vmul.f32 %v9767_v45, %v4806_v7 }
 0x510   : > { %v4820_v22 = vrot.slane %v4809_v2, 1  ;;  %v4822_v59 = vrot.slane %v4810_v34, 1 }
 0x511   : > { %v4782_v31 = vsel %vm931_vm0, %v4780_v4, %v4781_v11 }
 0x512   : > { %v4823_v38 = vsel %vm931_vm0, %v4820_v22, %v4822_v59 }
 0x513   : > { %4754 = vrot.lane.b32.xlu2 %v4747_v40, %s5804_s20  ;;  %v4392_v24 = vpop.permute.xlu0 %4391 }
 0x514   : > { %4721 = vrot.lane.b32.xlu0 %v4710_v9, %s5804_s20  ;;  %4752 = vrot.lane.b32.xlu1 %v4745_v16, %s5804_s20  ;;  %v4501_v5 = vpop.permute.xlu2 %4500  ;;  %v4394_v42 = vpop.permute.xlu1 %4393  ;;  %v9902_v0 = vadd.f32 %v4392_v24, %v10816_v36  ;;  %v4818_v9 = vrot.slane %v4808_v53, 1  ;;  %v4843_v16 = vstv %s5388_s13  ;;  %v4811_v24 = vmul.f32 %v9834_v52, %v4806_v7  ;;  %s5110_s13 = sshll.u32 %s5107_s1, 4  ;;  %s5111_s13 = int_to_ptr.hbm [resolvable:$true] %s5110_s13 }
 0x515   : > { %v9899_v57 = vadd.f32 %v4501_v5, %v4364_v19  ;;  %v4403_v28 = vadd.f32 %v4394_v42, %v9790_v47  ;;  %v4846_v15 = vmul.f32 %v9647_v23, %v4843_v16  ;;  %v4844_v42 = vmul.f32 %v9590_v18, %v4843_v16 }
 0x516   : > { %v4821_v5 = vsel %vm931_vm0, %v4818_v9, %v4820_v22  ;;  %v4824_v4 = vrot.slane %v4811_v24, 1  ;;  %v4954_v24 = vstv %s5391_s21 }
 0x517   : > { %v4854_v29 = vrot.slane %v4844_v42, 1 }
 0x51b   : > { %4789 = vrot.lane.b32.xlu2 %v4782_v31, %s5804_s20  ;;  %v4427_v30 = vpop.permute.xlu0 %4426 }
 0x51c   : > { %4756 = vrot.lane.b32.xlu0 %v4749_v56, %s5804_s20  ;;  %4758 = vrot.lane.b32.xlu1 %v4751_v49, %s5804_s20  ;;  %v4507_v47 = vpop.permute.xlu2 %4506  ;;  %v4429_v33 = vpop.permute.xlu1 %4428  ;;  %v9917_v19 = vadd.f32 %v4427_v30, %v10817_v20  ;;  %v9952_v56 = vstv %s5389_s16  ;;  %v4847_v30 = vmul.f32 %v9653_v41, %v4843_v16  ;;  %s5720_s16 = sshra.s32 %s5111_s13, 4  ;;  %s5721_s16 = int_to_ptr.hbm [resolvable:$true] %s5720_s16 }
 0x51d   : > { %v9914_v13 = vadd.f32 %v4507_v47, %v4367_v63  ;;  %v4439_v55 = vadd.f32 %v4429_v33, %v9828_v62  ;;  %v4807_v62 = vmul.f32 %v9590_v18, %v4806_v7  ;;  %v9957_v51 = vmul.f32 %v9767_v45, %v9952_v56  ;;  %p5727_p2 = scmp.lt.s32.totalorder %s5721_s16, %s10184_s7 }
 0x51e   : > { %v4825_v47 = vsel %vm931_vm0, %v4822_v59, %v4824_v4  ;;  %v4881_v33 = vmul.f32 %v9590_v18, %v9952_v56 }
 0x51f   : > { %v4817_v54 = vrot.slane %v4807_v62, 1 }
 0x521   : > { %v4819_v21 = vsel %vm931_vm0, %v4817_v54, %v4818_v9 }
 0x523   : > { %4795 = vrot.lane.b32.xlu2 %v4788_v14, %s5804_s20  ;;  %v4433_v1 = vpop.permute.xlu0 %4432  ;;  %v4859_v14 = vrot.slane %v4847_v30, 1 }
 0x524   : > { %4791 = vrot.lane.b32.xlu0 %v4784_v8, %s5804_s20  ;;  %4793 = vrot.lane.b32.xlu1 %v4786_v60, %s5804_s20  ;;  %v4542_v39 = vpop.permute.xlu2 %4541  ;;  %v4464_v63 = vpop.permute.xlu1 %4463  ;;  %v9933_v3 = vadd.f32 %v4433_v1, %v9700_v10  ;;  %v4845_v10 = vmul.f32 %v9767_v45, %v4843_v16  ;;  %v4891_v8 = vrot.slane %v4881_v33, 2  ;;  %v4917_v60 = vstv %s5390_s0  ;;  %s5722_s0 = scalar_lea.hbm %s5721_s16, 32 }
 0x525   : > { %v9930_v25 = vadd.f32 %v4542_v39, %v4403_v28  ;;  %v4475_v40 = vadd.f32 %v4464_v63, %v9855_v46  ;;  %v4857_v28 = vrot.slane %v4846_v15, 1  ;;  %v4920_v62 = vmul.f32 %v9647_v23, %v4917_v60  ;;  %p5723_p13 = scmp.ne.s32.totalorder %s5721_s16, %s5722_s0 }
 0x526   : > { %v4855_v35 = vrot.slane %v4845_v10, 1  ;;  %v4921_v39 = vmul.f32 %v9653_v41, %v4917_v60  ;;  %v4918_v63 = vmul.f32 %v9590_v18, %v4917_v60  ;;  %v4991_v33 = vstv %s5392_s18 }
 0x527   : > { %v4860_v1 = vsel %vm931_vm0, %v4857_v28, %v4859_v14  ;;  %v4931_v54 = vrot.slane %v4920_v62, 2  ;;  %p5724_p0 = pnand %p5723_p13, %p5890_p5 }
 0x528   : > { %v4858_v49 = vsel %vm931_vm0, %v4855_v35, %v4857_v28  ;;  %v4955_v28 = vmul.f32 %v9590_v18, %v4954_v24 }
 0x529   : > { %p5725_p1 = pneg %p5724_p0 }
 0x52b   : > { %4830 = vrot.lane.b32.xlu2 %v4823_v38, %s5804_s20  ;;  %v4468_v11 = vpop.permute.xlu0 %4467 }
 0x52c   : > { %4826 = vrot.lane.b32.xlu0 %v4819_v21, %s5804_s20  ;;  %4828 = vrot.lane.b32.xlu1 %v4821_v5, %s5804_s20  ;;  %v4577_v46 = vpop.permute.xlu2 %4576  ;;  %v4470_v17 = vpop.permute.xlu1 %4469  ;;  %v9949_v26 = vadd.f32 %v4468_v11, %v9752_v27  ;;  %v4856_v27 = vsel %vm931_vm0, %v4854_v29, %v4855_v35  ;;  %v4928_v5 = vrot.slane %v4918_v63, 2 }
 0x52d   : > { %v9946_v36 = vadd.f32 %v4577_v46, %v4439_v55  ;;  %v4478_v31 = vadd.f32 %v4470_v17, %v9871_v32  ;;  %v4848_v32 = vmul.f32 %v9834_v52, %v4843_v16  ;;  %v4892_v55 = vrot.slane %v9957_v51, 2 }
 0x52e   : > { %v4933_v16 = vrot.slane %v4921_v39, 2  ;;  %v4957_v46 = vmul.f32 %v9647_v23, %v4954_v24  ;;  %v4922_v17 = vmul.f32 %v9834_v52, %v4917_v60 }
 0x52f   : > { %v4861_v34 = vrot.slane %v4848_v32, 1  ;;  %v4893_v53 = vsel %vm1007_vm1, %v4891_v8, %v4892_v55  ;;  %v4965_v32 = vrot.slane %v4955_v28, 2 }
 0x530   : > { %v4934_v10 = vsel %vm1007_vm1, %v4931_v54, %v4933_v16  ;;  %v4968_v29 = vrot.slane %v4957_v46, 2 }
 0x533   : > { %4865 = vrot.lane.b32.xlu2 %v4858_v49, %s5804_s20 }
 0x534   : > { %4832 = vrot.lane.b32.xlu0 %v4825_v47, %s5804_s20  ;;  %4863 = vrot.lane.b32.xlu1 %v4856_v27, %s5804_s20  ;;  %v4612_v37 = vpop.permute.xlu2 %4611  ;;  %v4505_v12 = vpop.permute.xlu1 %4504  ;;  %v4935_v47 = vrot.slane %v4922_v17, 2  ;;  %v4885_v17 = vmul.f32 %v9834_v52, %v9952_v56 }
 0x535   : > { %v4503_v61 = vpop.permute.xlu0 %4502  ;;  %v9968_v20 = vadd.f32 %v4612_v37, %v4475_v40  ;;  %v4514_v2 = vadd.f32 %v4505_v12, %v9886_v50  ;;  %v4919_v50 = vmul.f32 %v9767_v45, %v4917_v60 }
 0x536   : > { %v9972_v7 = vadd.f32 %v4503_v61, %v9786_v58  ;;  %v4862_v58 = vsel %vm931_vm0, %v4859_v14, %v4861_v34  ;;  %v4993_v61 = vmul.f32 %v9767_v45, %v4991_v33  ;;  %v4936_v12 = vsel %vm1007_vm1, %v4933_v16, %v4935_v47 }
 0x537   : > { %v4929_v15 = vrot.slane %v4919_v50, 2 }
 0x539   : > { %v4930_v42 = vsel %vm1007_vm1, %v4928_v5, %v4929_v15  ;;  %v4932_v11 = vsel %vm1007_vm1, %v4929_v15, %v4931_v54  ;;  %v4994_v54 = vmul.f32 %v9647_v23, %v4991_v33 }
 0x53b   : > { %4900 = vrot.lane.b32.xlu2 %v4893_v53, %s5804_s20  ;;  %v5003_v53 = vrot.slane %v4993_v61, 2 }
 0x53c   : > { %4867 = vrot.lane.b32.xlu0 %v4860_v1, %s5804_s20  ;;  %4869 = vrot.lane.b32.xlu1 %v4862_v58, %s5804_s20 }
 0x53d   : > { %v4618_v22 = vpop.permute.xlu2 %4617  ;;  %v4538_v59 = vpop.permute.xlu0 %4537 }
 0x53e   : > { %v9987_v9 = vadd.f32 %v4618_v22, %v4478_v31  ;;  %v4540_v40 = vpop.permute.xlu1 %4539  ;;  %v9990_v38 = vadd.f32 %v4538_v59, %v9823_v44  ;;  %v4956_v44 = vmul.f32 %v9767_v45, %v4954_v24  ;;  %v4995_v22 = vmul.f32 %v9653_v41, %v4991_v33 }
 0x53f   : > { %v4550_v21 = vadd.f32 %v4540_v40, %v9902_v0  ;;  %v4996_v59 = vmul.f32 %v9834_v52, %v4991_v33 }
 0x540   : > { %v4966_v30 = vrot.slane %v4956_v44, 2 }
 0x541   : > { %v5009_v5 = vrot.slane %v4996_v59, 2 }
 0x542   : > { %v4969_v37 = vsel %vm1007_vm1, %v4966_v30, %v4968_v29  ;;  %v4967_v14 = vsel %vm1007_vm1, %v4965_v32, %v4966_v30 }
 0x543   : > { %4941 = vrot.lane.b32.xlu2 %v4934_v10, %s5804_s20  ;;  %v5005_v10 = vrot.slane %v4994_v54, 2 }
 0x544   : > { %4937 = vrot.lane.b32.xlu0 %v4930_v42, %s5804_s20  ;;  %4939 = vrot.lane.b32.xlu1 %v4932_v11, %s5804_s20  ;;  %v4884_v11 = vmul.f32 %v9653_v41, %v9952_v56 }
 0x545   : > { %v4642_v0 = vpop.permute.xlu2 %4641  ;;  %v4544_v4 = vpop.permute.xlu0 %4543  ;;  %v5006_v44 = vsel %vm1007_vm1, %v5003_v53, %v5005_v10 }
 0x546   : > { %v10003_v31 = vadd.f32 %v4642_v0, %v4514_v2  ;;  %v4575_v35 = vpop.permute.xlu1 %4574  ;;  %v10006_v49 = vadd.f32 %v4544_v4, %v9853_v48  ;;  %v4958_v2 = vmul.f32 %v9653_v41, %v4954_v24  ;;  %v4959_v48 = vmul.f32 %v9834_v52, %v4954_v24 }
 0x547   : > { %v4586_v27 = vadd.f32 %v4575_v35, %v9917_v19  ;;  %v4992_v19 = vmul.f32 %v9590_v18, %v4991_v33  ;;  %v4896_v35 = vrot.slane %v4884_v11, 2  ;;  %v4898_v52 = vrot.slane %v4885_v17, 2 }
 0x548   : > { %v4970_v39 = vrot.slane %v4958_v2, 2  ;;  %v4972_v58 = vrot.slane %v4959_v48, 2 }
 0x549   : > { %v5002_v50 = vrot.slane %v4992_v19, 2 }
 0x54a   : > { %v4971_v18 = vsel %vm1007_vm1, %v4968_v29, %v4970_v39  ;;  %v4973_v40 = vsel %vm1007_vm1, %v4970_v39, %v4972_v58 }
 0x54b   : > { %4976 = vrot.lane.b32.xlu2 %v4969_v37, %s5804_s20  ;;  %v5004_v63 = vsel %vm1007_vm1, %v5002_v50, %v5003_v53 }
 0x54c   : > { %4943 = vrot.lane.b32.xlu0 %v4936_v12, %s5804_s20  ;;  %4974 = vrot.lane.b32.xlu1 %v4967_v14, %s5804_s20 }
 0x54d   : > { %v4666_v34 = vpop.permute.xlu2 %4665  ;;  %v4579_v8 = vpop.permute.xlu0 %4578 }
 0x54e   : > { %v10019_v60 = vadd.f32 %v4666_v34, %v4550_v21  ;;  %v4581_v45 = vpop.permute.xlu1 %4580  ;;  %v4588_v62 = vadd.f32 %v4579_v8, %v9869_v43  ;;  %v5007_v21 = vrot.slane %v4995_v22, 2 }
 0x54f   : > { %v4589_v1 = vadd.f32 %v4581_v45, %v9933_v3 }
 0x550   : > { %v5010_v42 = vsel %vm1007_vm1, %v5007_v21, %v5009_v5  ;;  %v5008_v0 = vsel %vm1007_vm1, %v5005_v10, %v5007_v21 }
 0x553   : > { %5011 = vrot.lane.b32.xlu2 %v5004_v63, %s5804_s20 }
 0x554   : > { %4978 = vrot.lane.b32.xlu0 %v4971_v18, %s5804_s20  ;;  %4980 = vrot.lane.b32.xlu1 %v4973_v40, %s5804_s20 }
 0x555   : > { %v4690_v43 = vpop.permute.xlu2 %4689 }
 0x556   : > { %v4614_v3 = vpop.permute.xlu0 %4613  ;;  %v10032_v16 = vadd.f32 %v4690_v43, %v4586_v27  ;;  %v4616_v15 = vpop.permute.xlu1 %4615  ;;  %v4899_v27 = vsel %vm1007_vm1, %v4896_v35, %v4898_v52 }
 0x557   : > { %v4624_v24 = vadd.f32 %v4614_v3, %v9883_v6  ;;  %v4625_v46 = vadd.f32 %v4616_v15, %v9949_v26  ;;  %v4883_v6 = vmul.f32 %v9647_v23, %v9952_v56 }
 0x559   : > { %v4894_v29 = vrot.slane %v4883_v6, 2 }
 0x55b   : > { %5017 = vrot.lane.b32.xlu2 %v5010_v42, %s5804_s20  ;;  %v4895_v23 = vsel %vm1007_vm1, %v4892_v55, %v4894_v29  ;;  %v4897_v56 = vsel %vm1007_vm1, %v4894_v29, %v4896_v35 }
 0x55c   : > { %5013 = vrot.lane.b32.xlu0 %v5006_v44, %s5804_s20  ;;  %5015 = vrot.lane.b32.xlu1 %v5008_v0, %s5804_s20 }
 0x55d   : > { %v4696_v26 = vpop.permute.xlu2 %4695 }
 0x55e   : > { %v4638_v28 = vpop.permute.xlu0 %4637  ;;  %v10048_v4 = vadd.f32 %v4696_v26, %v4589_v1  ;;  %v4640_v41 = vpop.permute.xlu1 %4639 }
 0x55f   : > { %v4650_v47 = vadd.f32 %v4640_v41, %v9972_v7 }
 0x563   : > { %4906 = vrot.lane.b32.xlu2 %v4899_v27, %s5804_s20 }
 0x564   : > { %4902 = vrot.lane.b32.xlu0 %v4895_v23, %s5804_s20  ;;  %4904 = vrot.lane.b32.xlu1 %v4897_v56, %s5804_s20  ;;  %s353_s20 = sand.u32 1, %s5784_s25  }
 0x565   : > { %v4720_v30 = vpop.permute.xlu2 %4719  ;;  %s5253_s9 = sshll.u32 %s353_s20, 5  ;;  %s5096_s28 = scalar_lea.sflag [#allocation5], %s353_s20 }
 0x566   : > { %v4644_v32 = vpop.permute.xlu0 %4643  ;;  %v10059_v33 = vadd.f32 %v4720_v30, %v4625_v46  ;;  %v4664_v37 = vpop.permute.xlu1 %4663  ;;  %s10085_s19 = scalar_lea.vmem [#allocation17], %s5253_s9  ;;  %s5726_s9 = scalar_lea.hbm %s10184_s7, 64 }
 0x567   : > { %v10062_v7 = vadd.f32 %v4644_v32, %v9914_v13  ;;  %v4675_v51 = vadd.f32 %v4664_v37, %v9990_v38  ;;  %s5108_s29 = sshll.u32 %s10085_s19, 4  ;;  %p5728_p3 = scmp.lt.s32.totalorder %s5726_s9, %s5722_s0  ;;  %s5109_s29 = int_to_ptr.vmem [resolvable:$true] %s5108_s29 }
 0x569   : > { %p5729_p4 = por %p5728_p3, %p5727_p2 }
 0x56b   : > { %p5730_p7 = pnand %p5729_p4, %p5725_p1 }
 0x56d   : > { %v4755_v61 = vpop.permute.xlu2 %4754 }
 0x56e   : > { %v4668_v55 = vpop.permute.xlu0 %4667  ;;  %v10065_v12 = vadd.f32 %v4755_v61, %v4650_v47  ;;  %v4670_v14 = vpop.permute.xlu1 %4669 }
 0x56f   : > { %v10068_v2 = vadd.f32 %v4670_v14, %v10006_v49  ;;  %v4677_v3 = vadd.f32 %v4668_v55, %v9930_v25 }
 0x575   : > { %v4790_v48 = vpop.permute.xlu2 %4789 }
 0x576   : > { %v4692_v19 = vpop.permute.xlu0 %4691  ;;  %v4694_v34 = vpop.permute.xlu1 %4693  ;;  %v4801_v35 = vadd.f32 %v4790_v48, %v4675_v51 }
 0x577   : > { %v10070_v8 = vadd.f32 %v4694_v34, %v4588_v62  ;;  %v4649_v62 = vadd.f32 %v4638_v28, %v9899_v57 }
 0x57d   : > { %v4796_v45 = vpop.permute.xlu2 %4795 }
 0x57e   : > { %v4716_v13 = vpop.permute.xlu0 %4715  ;;  %v4718_v53 = vpop.permute.xlu1 %4717 }
 0x57f   : > { %v10072_v39 = vadd.f32 %v4718_v53, %v4624_v24  ;;  %v4702_v24 = vadd.f32 %v4692_v19, %v9946_v36  ;;  %v4727_v25 = vadd.f32 %v4716_v13, %v9968_v20 }
 0x585   : > { %v10074_v38 = vpop.permute.xlu2 %4830 }
 0x586   : > { %v4722_v1 = vpop.permute.xlu0 %4721  ;;  %v4753_v58 = vpop.permute.xlu1 %4752  ;;  %v4840_v48 = vadd.f32 %v10074_v38, %v10070_v8 }
 0x587   : > { %v4764_v59 = vadd.f32 %v4753_v58, %v4649_v62  ;;  %v4730_v36 = vadd.f32 %v4722_v1, %v9987_v9  ;;  %v4804_v9 = vadd.f32 %v4796_v45, %v10068_v2 }
 0x58d   : > { %v10076_v50 = vpop.permute.xlu2 %4865 }
 0x58e   : > { %v4757_v49 = vpop.permute.xlu0 %4756  ;;  %v4759_v63 = vpop.permute.xlu1 %4758  ;;  %v4876_v45 = vadd.f32 %v10076_v50, %v10072_v39 }
 0x58f   : > { %v10079_v22 = vadd.f32 %v4757_v49, %v10003_v31  ;;  %v4767_v30 = vadd.f32 %v4759_v63, %v10062_v7 }
 0x595   : > { %v4901_v18 = vpop.permute.xlu2 %4900 }
 0x596   : > { %v4792_v40 = vpop.permute.xlu0 %4791  ;;  %v4912_v54 = vadd.f32 %v4901_v18, %v4764_v59  ;;  %v4794_v43 = vpop.permute.xlu1 %4793 }
 0x597   : > { %v4803_v31 = vadd.f32 %v4794_v43, %v4677_v3  ;;  %v4802_v52 = vadd.f32 %v4792_v40, %v10019_v60 }
 0x598   : > { %5028 = vst.msk [vmem:[%s10085_s19] sm:$0xff] %vm5027_vm6, %v4912_v54 }
 0x59d   : > { %v4942_v15 = vpop.permute.xlu2 %4941 }
 0x59e   : > { %v4827_v21 = vpop.permute.xlu0 %4826  ;;  %v4951_v5 = vadd.f32 %v4942_v15, %v4803_v31  ;;  %v4829_v57 = vpop.permute.xlu1 %4828 }
 0x59f   : > { %v4839_v10 = vadd.f32 %v4829_v57, %v4702_v24  ;;  %v4838_v32 = vadd.f32 %v4827_v21, %v10032_v16 }
 0x5a0   : > { %5040 = vrot.lane.b32.xlu2 %v4951_v5, %s5807_s14 }
 0x5a5   : > { %v4977_v46 = vpop.permute.xlu2 %4976 }
 0x5a6   : > { %v4833_v42 = vpop.permute.xlu0 %4832  ;;  %v4987_v11 = vadd.f32 %v4977_v46, %v4839_v10  ;;  %v4864_v17 = vpop.permute.xlu1 %4863 }
 0x5a7   : > { %v4875_v44 = vadd.f32 %v4864_v17, %v4727_v25  ;;  %v4841_v7 = vadd.f32 %v4833_v42, %v10048_v4 }
 0x5a8   : > { %5059 = vrot.lane.b32.xlu2 %v4987_v11, %s5808_s15 }
 0x5ad   : > { %v5012_v0 = vpop.permute.xlu2 %5011 }
 0x5ae   : > { %v4868_v6 = vpop.permute.xlu0 %4867  ;;  %v5023_v26 = vadd.f32 %v5012_v0, %v4875_v44  ;;  %v4870_v28 = vpop.permute.xlu1 %4869 }
 0x5af   : > { %v4878_v41 = vadd.f32 %v4870_v28, %v4730_v36  ;;  %v4877_v13 = vadd.f32 %v4868_v6, %v10059_v33 }
 0x5b0   : > { %5078 = vrot.lane.b32.xlu2 %v5023_v26, %s5809_s22 }
 0x5b5   : > { %v5018_v29 = vpop.permute.xlu2 %5017 }
 0x5b6   : > { %v4938_v47 = vpop.permute.xlu0 %4937  ;;  %v5026_v27 = vadd.f32 %v5018_v29, %v4878_v41  ;;  %v4940_v23 = vpop.permute.xlu1 %4939 }
 0x5b7   : > { %v4949_v20 = vadd.f32 %v4938_v47, %v4801_v35  ;;  %v4950_v56 = vadd.f32 %v4940_v23, %v4802_v52 }
 0x5b8   : > { %5084 = vrot.lane.b32.xlu2 %v5026_v27, %s5809_s22 }
 0x5b9   : > { %5036 = vrot.lane.b32.xlu0 %v4949_v20, %s5807_s14  ;;  %5038 = vrot.lane.b32.xlu1 %v4950_v56, %s5807_s14 }
 0x5bd   : > { %v4907_v60 = vpop.permute.xlu2 %4906 }
 0x5be   : > { %v4944_v37 = vpop.permute.xlu0 %4943  ;;  %v4915_v51 = vadd.f32 %v4907_v60, %v4767_v30  ;;  %v4975_v61 = vpop.permute.xlu1 %4974 }
 0x5bf   : > { %v4952_v55 = vadd.f32 %v4944_v37, %v4804_v9  ;;  %v4986_v14 = vadd.f32 %v4975_v61, %v4838_v32 }
 0x5c0   : > { %5031 = vst.msk [vmem:[%s10085_s19 + $0x18] sm:$0xff] %vm5027_vm6, %v4915_v51 }
 0x5c1   : > { %5042 = vrot.lane.b32.xlu0 %v4952_v55, %s5807_s14  ;;  %5057 = vrot.lane.b32.xlu1 %v4986_v14, %s5808_s15 }
 0x5c6   : > { %v4979_v2 = vpop.permute.xlu0 %4978  ;;  %v4981_v19 = vpop.permute.xlu1 %4980 }
 0x5c7   : > { %v4988_v16 = vadd.f32 %v4979_v2, %v4840_v48  ;;  %v4989_v34 = vadd.f32 %v4981_v19, %v4841_v7 }
 0x5c9   : > { %5061 = vrot.lane.b32.xlu0 %v4988_v16, %s5808_s15  ;;  %5063 = vrot.lane.b32.xlu1 %v4989_v34, %s5808_s15 }
 0x5ce   : > { %v5014_v53 = vpop.permute.xlu0 %5013  ;;  %v5016_v8 = vpop.permute.xlu1 %5015 }
 0x5cf   : > { %v5024_v38 = vadd.f32 %v5014_v53, %v4876_v45  ;;  %v5025_v4 = vadd.f32 %v5016_v8, %v4877_v13 }
 0x5d1   : > { %5080 = vrot.lane.b32.xlu0 %v5024_v38, %s5809_s22  ;;  %5082 = vrot.lane.b32.xlu1 %v5025_v4, %s5809_s22 }
 0x5d6   : > { %v4903_v1 = vpop.permute.xlu0 %4902  ;;  %v4905_v58 = vpop.permute.xlu1 %4904 }
 0x5d7   : > { %v4913_v49 = vadd.f32 %v4903_v1, %v10065_v12  ;;  %v4914_v39 = vadd.f32 %v4905_v58, %v10079_v22 }
 0x5d9   : > { %5029 = vst.msk [vmem:[%s10085_s19 + $0x8] sm:$0xff] %vm5027_vm6, %v4913_v49 }
 0x5da   : > { %5030 = vst.msk [vmem:[%s10085_s19 + $0x10] sm:$0xff] %vm5027_vm6, %v4914_v39 }
 0x5fa   : > { %v5041_v33 = vpop.permute.xlu2 %5040 }
 0x5fb   : > { %5051 = vst.msk [vmem:[%s10085_s19 + $0x10] sm:$0xff] %vm5048_vm7, %v5041_v33 }
 0x602   : > { %v5060_v50 = vpop.permute.xlu2 %5059 }
 0x60a   : > { %v5079_v12 = vpop.permute.xlu2 %5078 }
 0x612   : > { %v5085_v54 = vpop.permute.xlu2 %5084 }
 0x62b   : > { %v5037_v63 = vpop.permute.xlu0 %5036  ;;  %v5039_v62 = vpop.permute.xlu1 %5038 }
 0x62c   : > { %5049 = vst.msk [vmem:[%s10085_s19] sm:$0xff] %vm5048_vm7, %v5037_v63 }
 0x62d   : > { %5050 = vst.msk [vmem:[%s10085_s19 + $0x8] sm:$0xff] %vm5048_vm7, %v5039_v62 }
 0x62e   : > { %5071 = vst.msk [vmem:[%s10085_s19 + $0x8] sm:$0xff] %vm5069_vm8, %v5060_v50 }
 0x633   : > { %v5043_v22 = vpop.permute.xlu0 %5042  ;;  %v5058_v59 = vpop.permute.xlu1 %5057 }
 0x634   : > { %5052 = vst.msk [vmem:[%s10085_s19 + $0x18] sm:$0xff] %vm5048_vm7, %v5043_v22 }
 0x635   : > { %5070 = vst.msk [vmem:[%s10085_s19] sm:$0xff] %vm5069_vm8, %v5058_v59 }
 0x636   : > { %5091 = vst.msk [vmem:[%s10085_s19] sm:$0xff] %vm5090_vm9, %v5079_v12 }
 0x63b   : > { %v5062_v18 = vpop.permute.xlu0 %5061  ;;  %v5064_v40 = vpop.permute.xlu1 %5063 }
 0x63c   : > { %5072 = vst.msk [vmem:[%s10085_s19 + $0x10] sm:$0xff] %vm5069_vm8, %v5062_v18 }
 0x63d   : > { %5073 = vst.msk [vmem:[%s10085_s19 + $0x18] sm:$0xff] %vm5069_vm8, %v5064_v40 }
 0x63e   : > { %5094 = vst.msk [vmem:[%s10085_s19 + $0x18] sm:$0xff] %vm5090_vm9, %v5085_v54 }
 0x643   : > { %v5081_v43 = vpop.permute.xlu0 %5080  ;;  %v5083_v3 = vpop.permute.xlu1 %5082 }
 0x644   : > { %5092 = vst.msk [vmem:[%s10085_s19 + $0x8] sm:$0xff] %vm5090_vm9, %v5081_v43 }
 0x645   : > { %5093 = vst.msk [vmem:[%s10085_s19 + $0x10] sm:$0xff] %vm5090_vm9, %v5083_v3 }
 0x646   : > { %5733 = shalt.err (!%p5730_p7)
}
 0x647   : > { %s5810_s20 = smov 128   ;;  %s5811_s19 = smov 8  }
 0x648   : > { %5427 = dma.vmem_to_hbm [thread:$0]  (%p5890_p5), %s5109_s29, 512, %s5111_s13, %s5096_s28, %s5810_s20, %s5810_s20, %s5811_s19  }
 0x649 PF: > { %p5469_p8 = scmp.ge.s32.totalorder %s5792_s27, 2  ;;  %s5125_s22 = sand.u32 1, %s5780_s24  }
 0x64a   : > { %s5126_s17 = scalar_lea.sflag [#allocation5], %s5125_s22 }
 0x64b   : > { %p5452_p9 = pnand %p5469_p8, %p5894_p6 }
 0x64d   : > { %p5453_p10 = pneg %p5452_p9 }
 0x64f   : > { %5775 = dma.done.wait (%p5453_p10), %s5126_s17, 512  }
 0x650   : > { %5777 = vsyncadd (%p5453_p10), %s5126_s17, 4294966784  ;;  %p23_p11 = scmp.ge.s32.totalorder %s5877_s30, 4   ;;  %s10818_s24 = smov %s5784_s25 }
 0x651   : > { %s10819_s25 = smov %s5788_s26  ;;  %s10820_s26 = smov %s5888_s10 }
 0x652   : > { %s10821_s27 = smov %s5877_s30  ;;  %25 = sbr.rel (!%p23_p11) target bundleno = 12 (0xc), region = 144 }
 0x657   :  { %5132 = vsyncpa [#allocation4], 1 }
 0x658   :  { %5134 = vsyncpa [#allocation4 + $0x1], 1 }
 0x659   :  { %5135 = vsyncpa [#allocation10], 1 }
 0x65a   :  { %5136 = vsyncpa [#allocation5], 1 }
 0x65b   :  { %5138 = vsyncpa [#allocation5 + $0x1], 1 }
 0x65c   :  { %5139 = vsyncpa [#allocation6], 1 }
 0x65d   :  { %5141 = vsyncpa [#allocation6 + $0x1], 1 }
 0x65e   :  { %5142 = vsyncpa [#allocation7], 1 }
 0x65f   :  { %5144 = vsyncpa [#allocation7 + $0x1], 1 }
 0x660   :  { %5145 = vsyncpa [#allocation13], 1 }
 0x661   :  { %5146 = vsyncpa [#allocation16], 1 }

</bundles_post_ra>
